<compile_context>
chip_gen: v7x
topology: tpu7x:2x2x1
jax: 0.10.0
libtpu: 0.0.40
codegen_flags: <defaults>
</compile_context>

<pallas_src>
import functools

import numpy as np
import jax
import jax.numpy as jnp
from jax import lax
from jax.experimental import pallas as pl
from jax.experimental.pallas import tpu as pltpu

# Layer geometry (CIFAR-10: 32x32x3 input, three stride-2 valid 3x3 convs).
S0, C0 = 32, 3      # input
S1, C1 = 15, 32     # after conv1
S2, C2 = 7, 64      # after conv2
S3, C3 = 3, 128     # after conv3
FC1 = 1024
KPAD = 128          # fc2 logits padded to a full 128-lane store
BT = 8              # images per grid step (batch tile; keeps all M mult. of 8)


# ---------------------------------------------------------------------------
# Fused forward kernel (one grid step == BT images).
# ---------------------------------------------------------------------------
def _cnn_kernel(x_ref,
                s1_ref, t1_ref, b1_ref,
                s2_ref, t2_ref, b2_ref,
                s3_ref, t3_ref, b3_ref,
                sf_ref, w1_ref, bf1_ref,
                w2_ref, bf2_ref,
                o_ref):
    bf16 = jnp.bfloat16

    def conv(x_b, s_ref, t_ref, b_ref):
        """Stride-2 3x3 valid conv over BT row-stacked images, + bias, ReLU."""
        acc = None
        for di in range(3):
            # batched row gather (input rows 2*a+di per image) via 0/1 matmul
            rows = jnp.dot(s_ref[di], x_b,
                           preferred_element_type=jnp.float32).astype(bf16)
            part = jnp.dot(rows, t_ref[di],
                           preferred_element_type=jnp.float32)
            acc = part if acc is None else acc + part
        return jnp.maximum(acc + b_ref[...], 0.0).astype(bf16)

    x = x_ref[...]                                    # (BT*32, 96) bf16
    a1 = conv(x,  s1_ref, t1_ref, b1_ref)             # (BT*15, 480)
    a2 = conv(a1, s2_ref, t2_ref, b2_ref)             # (BT*7,  448)
    a3 = conv(a2, s3_ref, t3_ref, b3_ref)             # (BT*3,  384)

    # dropout(p=0.5) -> identity (eval semantics; see TODO at top).
    # fc1: the NCHW flatten permutation is folded into w1_ref (3, W*C, 1024).
    h = None
    for hh in range(S3):
        row = jnp.dot(sf_ref[hh], a3,
                      preferred_element_type=jnp.float32).astype(bf16)  # (BT, 384)
        term = jnp.dot(row, w1_ref[hh], preferred_element_type=jnp.float32)
        h = term if h is None else h + term
    h = jnp.maximum(h + bf1_ref[...], 0.0).astype(bf16)   # (BT, 1024)

    # dropout(p=0.2) -> identity (eval semantics; see TODO at top).
    logits = jnp.dot(h, w2_ref[...],
                     preferred_element_type=jnp.float32) + bf2_ref[...]
    o_ref[...] = logits.astype(o_ref.dtype)           # (BT, 128) lane-dense store


# ---------------------------------------------------------------------------
# One-time parameter repack (outside the forward path).
# ---------------------------------------------------------------------------
def _conv_toeplitz(w_oihw, w_in, stride=2):
    """Fold kernel-width/stride structure along W into (kh, W*Cin, Wout*Cout)."""
    cout, cin, kh, kw = w_oihw.shape
    w_out = (w_in - kw) // stride + 1
    sel = np.zeros((kw, w_in, w_out), np.float32)
    for dj in range(kw):
        for wo in range(w_out):
            sel[dj, stride * wo + dj, wo] = 1.0
    wt = jnp.transpose(w_oihw, (2, 3, 1, 0))              # (kh, kw, cin, cout)
    t = jnp.einsum("jwo,ijcq->iwcoq", jnp.asarray(sel), wt)
    return t.reshape(kh, w_in * cin, w_out * cout)


def _row_select_mats(bt, s_out, s_in, stride, taps):
    """sel[t, b*s_out + a, b*s_in + stride*a + t] = 1 (block-diag over images)."""
    sel = np.zeros((taps, bt * s_out, bt * s_in), np.float32)
    for t in range(taps):
        for b in range(bt):
            for a in range(s_out):
                sel[t, b * s_out + a, b * s_in + stride * a + t] = 1.0
    return jnp.asarray(sel, jnp.bfloat16)


def prepare_params(p):
    """Repack PyTorch-layout params into fused-kernel operands (run once)."""
    def tiled_bias(b, w_out):
        return jnp.tile(b, (w_out,)).reshape(1, -1).astype(jnp.float32)

    # fc1 weight (1024, 1152) with column index c*9 + h*3 + w (NCHW flatten)
    # -> (h, w*C3 + c, out) to match the kernel's (H, W*C) activation layout.
    w1 = (p["fc1_w"].reshape(FC1, C3, S3, S3)             # [o, c, h, w]
          .transpose(2, 3, 1, 0)                          # [h, w, c, o]
          .reshape(S3, S3 * C3, FC1))
    k = p["fc2_w"].shape[0]
    w2 = jnp.zeros((FC1, KPAD), jnp.float32).at[:, :k].set(p["fc2_w"].T)
    bf2 = jnp.zeros((1, KPAD), jnp.float32).at[0, :k].set(p["fc2_b"])
    bf16 = jnp.bfloat16
    return {
        # batched 0/1 row-selection matrices (resident constants)
        "s1": _row_select_mats(BT, S1, S0, 2, 3),              # (3, 120, 256)
        "s2": _row_select_mats(BT, S2, S1, 2, 3),              # (3,  56, 120)
        "s3": _row_select_mats(BT, S3, S2, 2, 3),              # (3,  24,  56)
        "sf": _row_select_mats(BT, 1, S3, 1, 3),               # (3,   8,  24)
        # block-Toeplitz conv weights + tiled biases
        "t1": _conv_toeplitz(p["conv1_w"], S0).astype(bf16),   # (3, 96, 480)
        "b1": tiled_bias(p["conv1_b"], S1),                    # (1, 480)
        "t2": _conv_toeplitz(p["conv2_w"], S1).astype(bf16),   # (3, 480, 448)
        "b2": tiled_bias(p["conv2_b"], S2),                    # (1, 448)
        "t3": _conv_toeplitz(p["conv3_w"], S2).astype(bf16),   # (3, 448, 384)
        "b3": tiled_bias(p["conv3_b"], S3),                    # (1, 384)
        "w1": w1.astype(bf16),                                 # (3, 384, 1024)
        "bf1": p["fc1_b"].reshape(1, FC1).astype(jnp.float32),
        "w2": w2.astype(bf16),                                 # (1024, 128)
        "bf2": bf2,                                            # (1, 128)
    }


# ---------------------------------------------------------------------------
# Forward pass: pad/transpose the input + ONE pallas_call.
# ---------------------------------------------------------------------------
@functools.partial(jax.jit, static_argnums=(2,))
def cnn_forward(prep, x_nchw, num_classes):
    n = x_nchw.shape[0]
    n_pad = ((n + BT - 1) // BT) * BT
    x = x_nchw.astype(jnp.float32)
    if n_pad != n:
        x = jnp.pad(x, ((0, n_pad - n), (0, 0), (0, 0), (0, 0)))
    # NCHW -> NHWC -> image-major row stacking (N*H, W*C); bf16 matmul operand.
    x2 = jnp.transpose(x, (0, 2, 3, 1)).reshape(n_pad * S0, S0 * C0)
    x2 = x2.astype(jnp.bfloat16)

    full = lambda nd: (lambda i: (0,) * nd)
    operands = (x2,
                prep["s1"], prep["t1"], prep["b1"],
                prep["s2"], prep["t2"], prep["b2"],
                prep["s3"], prep["t3"], prep["b3"],
                prep["sf"], prep["w1"], prep["bf1"],
                prep["w2"], prep["bf2"])
    in_specs = [pl.BlockSpec((BT * S0, S0 * C0), lambda i: (i, 0))]
    in_specs += [pl.BlockSpec(op.shape, full(op.ndim)) for op in operands[1:]]

    out = pl.pallas_call(
        _cnn_kernel,
        out_shape=jax.ShapeDtypeStruct((n_pad, KPAD), jnp.float32),
        grid=(n_pad // BT,),
        in_specs=in_specs,
        out_specs=pl.BlockSpec((BT, KPAD), lambda i: (i, 0)),
        compiler_params=pltpu.CompilerParams(
            dimension_semantics=("parallel",),
            vmem_limit_bytes=32 * 1024 * 1024,
        ),
    )(*operands)
    return out[:n, :num_classes]


# ---------------------------------------------------------------------------
# Deterministic parameter init (PyTorch layouts) + plain-XLA reference.
# ---------------------------------------------------------------------------
def init_params(key, num_classes):
    def nrm(k, shape, fan_in):
        return jax.random.normal(k, shape, jnp.float32) / float(np.sqrt(fan_in))

    ks = jax.random.split(key, 10)
    return {
        "conv1_w": nrm(ks[0], (C1, C0, 3, 3), C0 * 9),
        "conv1_b": 0.01 * jax.random.normal(ks[1], (C1,), jnp.float32),
        "conv2_w": nrm(ks[2], (C2, C1, 3, 3), C1 * 9),
        "conv2_b": 0.01 * jax.random.normal(ks[3], (C2,), jnp.float32),
        "conv3_w": nrm(ks[4], (C3, C2, 3, 3), C2 * 9),
        "conv3_b": 0.01 * jax.random.normal(ks[5], (C3,), jnp.float32),
        "fc1_w": nrm(ks[6], (FC1, C3 * S3 * S3), C3 * S3 * S3),
        "fc1_b": 0.01 * jax.random.normal(ks[7], (FC1,), jnp.float32),
        "fc2_w": nrm(ks[8], (num_classes, FC1), FC1),
        "fc2_b": 0.01 * jax.random.normal(ks[9], (num_classes,), jnp.float32),
    }


def reference_forward(params, x_nchw):
    x = x_nchw.astype(jnp.float32)

    def conv(y, w, b):
        y = lax.conv_general_dilated(
            y, w, window_strides=(2, 2), padding="VALID",
            dimension_numbers=("NCHW", "OIHW", "NCHW"))
        return jax.nn.relu(y + b.reshape(1, -1, 1, 1))

    x = conv(x, params["conv1_w"], params["conv1_b"])
    x = conv(x, params["conv2_w"], params["conv2_b"])
    x = conv(x, params["conv3_w"], params["conv3_b"])
    x = x.reshape(x.shape[0], -1)                     # NCHW flatten, as in PyTorch
    x = jax.nn.relu(x @ params["fc1_w"].T + params["fc1_b"])
    return x @ params["fc2_w"].T + params["fc2_b"]


if __name__ == "__main__":
    num_classes = 10  # CIFAR-10 classes
    key = jax.random.PRNGKey(0)
    k_param, k_x = jax.random.split(key)

    params = init_params(k_param, num_classes)
    prep = prepare_params(params)      # one-time weight repack, not in the fwd path
    # CIFAR input: batch=2, channels=3, spatial=32 (required for 128*3*3 flatten)
    x = jax.random.normal(k_x, (2, C0, S0, S0), jnp.float32)

    out = cnn_forward(prep, x, num_classes)
    out = jax.block_until_ready(out)
    assert out.shape == (2, num_classes), out.shape
    assert bool(jnp.all(jnp.isfinite(out)))

    # Numerical sanity check vs. plain-XLA reference (bf16 weights in the
    # kernel -> generous tolerance).
    ref = reference_forward(params, x)
    err = float(jnp.max(jnp.abs(out - ref)))
    scale = float(jnp.max(jnp.abs(ref)))
    assert err <= 0.1 + 0.05 * scale, (err, scale)

    print("KERNEL_OK")
</pallas_src>

<mosaic_0001>
module attributes {stable_mosaic.version = 11 : i64} {
  func.func @_cnn_kernel(%arg0: i32, %arg1: memref<256x96xbf16, #tpu.memory_space<vmem>>, %arg2: memref<3x120x256xbf16, #tpu.memory_space<vmem>>, %arg3: memref<3x96x480xbf16, #tpu.memory_space<vmem>>, %arg4: memref<1x480xf32, #tpu.memory_space<vmem>>, %arg5: memref<3x56x120xbf16, #tpu.memory_space<vmem>>, %arg6: memref<3x480x448xbf16, #tpu.memory_space<vmem>>, %arg7: memref<1x448xf32, #tpu.memory_space<vmem>>, %arg8: memref<3x24x56xbf16, #tpu.memory_space<vmem>>, %arg9: memref<3x448x384xbf16, #tpu.memory_space<vmem>>, %arg10: memref<1x384xf32, #tpu.memory_space<vmem>>, %arg11: memref<3x8x24xbf16, #tpu.memory_space<vmem>>, %arg12: memref<3x384x1024xbf16, #tpu.memory_space<vmem>>, %arg13: memref<1x1024xf32, #tpu.memory_space<vmem>>, %arg14: memref<1024x128xbf16, #tpu.memory_space<vmem>>, %arg15: memref<1x128xf32, #tpu.memory_space<vmem>>, %arg16: memref<8x128xf32, #tpu.memory_space<vmem>>) attributes {dimension_semantics = [#tpu.dimension_semantics<parallel>], iteration_bounds = array<i64: 1>, scalar_prefetch = 0 : i64, scratch_operands = 0 : i64, tpu.core_type = #tpu.core_type<tc>, window_params = [{transform_indices = @transform_0, window_bounds = array<i64: 256, 96>}, {pipeline_mode = #tpu.pipeline_mode<synchronous>, transform_indices = @transform_1, window_bounds = array<i64: 3, 120, 256>}, {pipeline_mode = #tpu.pipeline_mode<synchronous>, transform_indices = @transform_2, window_bounds = array<i64: 3, 96, 480>}, {pipeline_mode = #tpu.pipeline_mode<synchronous>, transform_indices = @transform_3, window_bounds = array<i64: 1, 480>}, {pipeline_mode = #tpu.pipeline_mode<synchronous>, transform_indices = @transform_4, window_bounds = array<i64: 3, 56, 120>}, {pipeline_mode = #tpu.pipeline_mode<synchronous>, transform_indices = @transform_5, window_bounds = array<i64: 3, 480, 448>}, {pipeline_mode = #tpu.pipeline_mode<synchronous>, transform_indices = @transform_6, window_bounds = array<i64: 1, 448>}, {pipeline_mode = #tpu.pipeline_mode<synchronous>, transform_indices = @transform_7, window_bounds = array<i64: 3, 24, 56>}, {pipeline_mode = #tpu.pipeline_mode<synchronous>, transform_indices = @transform_8, window_bounds = array<i64: 3, 448, 384>}, {pipeline_mode = #tpu.pipeline_mode<synchronous>, transform_indices = @transform_9, window_bounds = array<i64: 1, 384>}, {pipeline_mode = #tpu.pipeline_mode<synchronous>, transform_indices = @transform_10, window_bounds = array<i64: 3, 8, 24>}, {pipeline_mode = #tpu.pipeline_mode<synchronous>, transform_indices = @transform_11, window_bounds = array<i64: 3, 384, 1024>}, {pipeline_mode = #tpu.pipeline_mode<synchronous>, transform_indices = @transform_12, window_bounds = array<i64: 1, 1024>}, {pipeline_mode = #tpu.pipeline_mode<synchronous>, transform_indices = @transform_13, window_bounds = array<i64: 1024, 128>}, {pipeline_mode = #tpu.pipeline_mode<synchronous>, transform_indices = @transform_14, window_bounds = array<i64: 1, 128>}, {transform_indices = @transform_15, window_bounds = array<i64: 8, 128>}]} {
    %c0 = arith.constant 0 : index
    %c0_0 = arith.constant 0 : index
    %0 = vector.load %arg1[%c0, %c0_0] : memref<256x96xbf16, #tpu.memory_space<vmem>>, vector<256x96xbf16>
    %c0_1 = arith.constant 0 : index
    %c0_2 = arith.constant 0 : index
    %c0_3 = arith.constant 0 : index
    %1 = vector.load %arg2[%c0_1, %c0_2, %c0_3] : memref<3x120x256xbf16, #tpu.memory_space<vmem>>, vector<1x120x256xbf16>
    %2 = vector.shape_cast %1 : vector<1x120x256xbf16> to vector<120x256xbf16>
    %cst = arith.constant dense<0.000000e+00> : vector<120x96xf32>
    %3 = tpu.matmul %2, %0, %cst {dimension_numbers = #tpu.dot_dimension_numbers<[1], [0], [0], [1], [0, 0, 1, 1], [], []>} : vector<120x256xbf16>, vector<256x96xbf16>, vector<120x96xf32> -> vector<120x96xf32>
    %4 = arith.truncf %3 : vector<120x96xf32> to vector<120x96xbf16>
    %c0_4 = arith.constant 0 : index
    %c0_5 = arith.constant 0 : index
    %c0_6 = arith.constant 0 : index
    %5 = vector.load %arg3[%c0_4, %c0_5, %c0_6] : memref<3x96x480xbf16, #tpu.memory_space<vmem>>, vector<1x96x480xbf16>
    %6 = vector.shape_cast %5 : vector<1x96x480xbf16> to vector<96x480xbf16>
    %cst_7 = arith.constant dense<0.000000e+00> : vector<120x480xf32>
    %7 = tpu.matmul %4, %6, %cst_7 {dimension_numbers = #tpu.dot_dimension_numbers<[1], [0], [0], [1], [0, 0, 1, 1], [], []>} : vector<120x96xbf16>, vector<96x480xbf16>, vector<120x480xf32> -> vector<120x480xf32>
    %c1 = arith.constant 1 : index
    %c0_8 = arith.constant 0 : index
    %c0_9 = arith.constant 0 : index
    %8 = vector.load %arg2[%c1, %c0_8, %c0_9] : memref<3x120x256xbf16, #tpu.memory_space<vmem>>, vector<1x120x256xbf16>
    %9 = vector.shape_cast %8 : vector<1x120x256xbf16> to vector<120x256xbf16>
    %cst_10 = arith.constant dense<0.000000e+00> : vector<120x96xf32>
    %10 = tpu.matmul %9, %0, %cst_10 {dimension_numbers = #tpu.dot_dimension_numbers<[1], [0], [0], [1], [0, 0, 1, 1], [], []>} : vector<120x256xbf16>, vector<256x96xbf16>, vector<120x96xf32> -> vector<120x96xf32>
    %11 = arith.truncf %10 : vector<120x96xf32> to vector<120x96xbf16>
    %c1_11 = arith.constant 1 : index
    %c0_12 = arith.constant 0 : index
    %c0_13 = arith.constant 0 : index
    %12 = vector.load %arg3[%c1_11, %c0_12, %c0_13] : memref<3x96x480xbf16, #tpu.memory_space<vmem>>, vector<1x96x480xbf16>
    %13 = vector.shape_cast %12 : vector<1x96x480xbf16> to vector<96x480xbf16>
    %cst_14 = arith.constant dense<0.000000e+00> : vector<120x480xf32>
    %14 = tpu.matmul %11, %13, %cst_14 {dimension_numbers = #tpu.dot_dimension_numbers<[1], [0], [0], [1], [0, 0, 1, 1], [], []>} : vector<120x96xbf16>, vector<96x480xbf16>, vector<120x480xf32> -> vector<120x480xf32>
    %15 = arith.addf %7, %14 : vector<120x480xf32>
    %c2 = arith.constant 2 : index
    %c0_15 = arith.constant 0 : index
    %c0_16 = arith.constant 0 : index
    %16 = vector.load %arg2[%c2, %c0_15, %c0_16] : memref<3x120x256xbf16, #tpu.memory_space<vmem>>, vector<1x120x256xbf16>
    %17 = vector.shape_cast %16 : vector<1x120x256xbf16> to vector<120x256xbf16>
    %cst_17 = arith.constant dense<0.000000e+00> : vector<120x96xf32>
    %18 = tpu.matmul %17, %0, %cst_17 {dimension_numbers = #tpu.dot_dimension_numbers<[1], [0], [0], [1], [0, 0, 1, 1], [], []>} : vector<120x256xbf16>, vector<256x96xbf16>, vector<120x96xf32> -> vector<120x96xf32>
    %19 = arith.truncf %18 : vector<120x96xf32> to vector<120x96xbf16>
    %c2_18 = arith.constant 2 : index
    %c0_19 = arith.constant 0 : index
    %c0_20 = arith.constant 0 : index
    %20 = vector.load %arg3[%c2_18, %c0_19, %c0_20] : memref<3x96x480xbf16, #tpu.memory_space<vmem>>, vector<1x96x480xbf16>
    %21 = vector.shape_cast %20 : vector<1x96x480xbf16> to vector<96x480xbf16>
    %cst_21 = arith.constant dense<0.000000e+00> : vector<120x480xf32>
    %22 = tpu.matmul %19, %21, %cst_21 {dimension_numbers = #tpu.dot_dimension_numbers<[1], [0], [0], [1], [0, 0, 1, 1], [], []>} : vector<120x96xbf16>, vector<96x480xbf16>, vector<120x480xf32> -> vector<120x480xf32>
    %23 = arith.addf %15, %22 : vector<120x480xf32>
    %c0_22 = arith.constant 0 : index
    %c0_23 = arith.constant 0 : index
    %24 = vector.load %arg4[%c0_22, %c0_23] : memref<1x480xf32, #tpu.memory_space<vmem>>, vector<1x480xf32>
    %25 = vector.broadcast %24 : vector<1x480xf32> to vector<120x480xf32>
    %26 = arith.addf %23, %25 : vector<120x480xf32>
    %cst_24 = arith.constant 0.000000e+00 : f32
    %27 = vector.broadcast %cst_24 : f32 to vector<120x480xf32>
    %28 = arith.maximumf %26, %27 : vector<120x480xf32>
    %29 = arith.truncf %28 : vector<120x480xf32> to vector<120x480xbf16>
    %c0_25 = arith.constant 0 : index
    %c0_26 = arith.constant 0 : index
    %c0_27 = arith.constant 0 : index
    %30 = vector.load %arg5[%c0_25, %c0_26, %c0_27] : memref<3x56x120xbf16, #tpu.memory_space<vmem>>, vector<1x56x120xbf16>
    %31 = vector.shape_cast %30 : vector<1x56x120xbf16> to vector<56x120xbf16>
    %cst_28 = arith.constant dense<0.000000e+00> : vector<56x480xf32>
    %32 = tpu.matmul %31, %29, %cst_28 {dimension_numbers = #tpu.dot_dimension_numbers<[1], [0], [0], [1], [0, 0, 1, 1], [], []>} : vector<56x120xbf16>, vector<120x480xbf16>, vector<56x480xf32> -> vector<56x480xf32>
    %33 = arith.truncf %32 : vector<56x480xf32> to vector<56x480xbf16>
    %c0_29 = arith.constant 0 : index
    %c0_30 = arith.constant 0 : index
    %c0_31 = arith.constant 0 : index
    %34 = vector.load %arg6[%c0_29, %c0_30, %c0_31] : memref<3x480x448xbf16, #tpu.memory_space<vmem>>, vector<1x480x448xbf16>
    %35 = vector.shape_cast %34 : vector<1x480x448xbf16> to vector<480x448xbf16>
    %cst_32 = arith.constant dense<0.000000e+00> : vector<56x448xf32>
    %36 = tpu.matmul %33, %35, %cst_32 {dimension_numbers = #tpu.dot_dimension_numbers<[1], [0], [0], [1], [0, 0, 1, 1], [], []>} : vector<56x480xbf16>, vector<480x448xbf16>, vector<56x448xf32> -> vector<56x448xf32>
    %c1_33 = arith.constant 1 : index
    %c0_34 = arith.constant 0 : index
    %c0_35 = arith.constant 0 : index
    %37 = vector.load %arg5[%c1_33, %c0_34, %c0_35] : memref<3x56x120xbf16, #tpu.memory_space<vmem>>, vector<1x56x120xbf16>
    %38 = vector.shape_cast %37 : vector<1x56x120xbf16> to vector<56x120xbf16>
    %cst_36 = arith.constant dense<0.000000e+00> : vector<56x480xf32>
    %39 = tpu.matmul %38, %29, %cst_36 {dimension_numbers = #tpu.dot_dimension_numbers<[1], [0], [0], [1], [0, 0, 1, 1], [], []>} : vector<56x120xbf16>, vector<120x480xbf16>, vector<56x480xf32> -> vector<56x480xf32>
    %40 = arith.truncf %39 : vector<56x480xf32> to vector<56x480xbf16>
    %c1_37 = arith.constant 1 : index
    %c0_38 = arith.constant 0 : index
    %c0_39 = arith.constant 0 : index
    %41 = vector.load %arg6[%c1_37, %c0_38, %c0_39] : memref<3x480x448xbf16, #tpu.memory_space<vmem>>, vector<1x480x448xbf16>
    %42 = vector.shape_cast %41 : vector<1x480x448xbf16> to vector<480x448xbf16>
    %cst_40 = arith.constant dense<0.000000e+00> : vector<56x448xf32>
    %43 = tpu.matmul %40, %42, %cst_40 {dimension_numbers = #tpu.dot_dimension_numbers<[1], [0], [0], [1], [0, 0, 1, 1], [], []>} : vector<56x480xbf16>, vector<480x448xbf16>, vector<56x448xf32> -> vector<56x448xf32>
    %44 = arith.addf %36, %43 : vector<56x448xf32>
    %c2_41 = arith.constant 2 : index
    %c0_42 = arith.constant 0 : index
    %c0_43 = arith.constant 0 : index
    %45 = vector.load %arg5[%c2_41, %c0_42, %c0_43] : memref<3x56x120xbf16, #tpu.memory_space<vmem>>, vector<1x56x120xbf16>
    %46 = vector.shape_cast %45 : vector<1x56x120xbf16> to vector<56x120xbf16>
    %cst_44 = arith.constant dense<0.000000e+00> : vector<56x480xf32>
    %47 = tpu.matmul %46, %29, %cst_44 {dimension_numbers = #tpu.dot_dimension_numbers<[1], [0], [0], [1], [0, 0, 1, 1], [], []>} : vector<56x120xbf16>, vector<120x480xbf16>, vector<56x480xf32> -> vector<56x480xf32>
    %48 = arith.truncf %47 : vector<56x480xf32> to vector<56x480xbf16>
    %c2_45 = arith.constant 2 : index
    %c0_46 = arith.constant 0 : index
    %c0_47 = arith.constant 0 : index
    %49 = vector.load %arg6[%c2_45, %c0_46, %c0_47] : memref<3x480x448xbf16, #tpu.memory_space<vmem>>, vector<1x480x448xbf16>
    %50 = vector.shape_cast %49 : vector<1x480x448xbf16> to vector<480x448xbf16>
    %cst_48 = arith.constant dense<0.000000e+00> : vector<56x448xf32>
    %51 = tpu.matmul %48, %50, %cst_48 {dimension_numbers = #tpu.dot_dimension_numbers<[1], [0], [0], [1], [0, 0, 1, 1], [], []>} : vector<56x480xbf16>, vector<480x448xbf16>, vector<56x448xf32> -> vector<56x448xf32>
    %52 = arith.addf %44, %51 : vector<56x448xf32>
    %c0_49 = arith.constant 0 : index
    %c0_50 = arith.constant 0 : index
    %53 = vector.load %arg7[%c0_49, %c0_50] : memref<1x448xf32, #tpu.memory_space<vmem>>, vector<1x448xf32>
    %54 = vector.broadcast %53 : vector<1x448xf32> to vector<56x448xf32>
    %55 = arith.addf %52, %54 : vector<56x448xf32>
    %cst_51 = arith.constant 0.000000e+00 : f32
    %56 = vector.broadcast %cst_51 : f32 to vector<56x448xf32>
    %57 = arith.maximumf %55, %56 : vector<56x448xf32>
    %58 = arith.truncf %57 : vector<56x448xf32> to vector<56x448xbf16>
    %c0_52 = arith.constant 0 : index
    %c0_53 = arith.constant 0 : index
    %c0_54 = arith.constant 0 : index
    %59 = vector.load %arg8[%c0_52, %c0_53, %c0_54] : memref<3x24x56xbf16, #tpu.memory_space<vmem>>, vector<1x24x56xbf16>
    %60 = vector.shape_cast %59 : vector<1x24x56xbf16> to vector<24x56xbf16>
    %cst_55 = arith.constant dense<0.000000e+00> : vector<24x448xf32>
    %61 = tpu.matmul %60, %58, %cst_55 {dimension_numbers = #tpu.dot_dimension_numbers<[1], [0], [0], [1], [0, 0, 1, 1], [], []>} : vector<24x56xbf16>, vector<56x448xbf16>, vector<24x448xf32> -> vector<24x448xf32>
    %62 = arith.truncf %61 : vector<24x448xf32> to vector<24x448xbf16>
    %c0_56 = arith.constant 0 : index
    %c0_57 = arith.constant 0 : index
    %c0_58 = arith.constant 0 : index
    %63 = vector.load %arg9[%c0_56, %c0_57, %c0_58] : memref<3x448x384xbf16, #tpu.memory_space<vmem>>, vector<1x448x384xbf16>
    %64 = vector.shape_cast %63 : vector<1x448x384xbf16> to vector<448x384xbf16>
    %cst_59 = arith.constant dense<0.000000e+00> : vector<24x384xf32>
    %65 = tpu.matmul %62, %64, %cst_59 {dimension_numbers = #tpu.dot_dimension_numbers<[1], [0], [0], [1], [0, 0, 1, 1], [], []>} : vector<24x448xbf16>, vector<448x384xbf16>, vector<24x384xf32> -> vector<24x384xf32>
    %c1_60 = arith.constant 1 : index
    %c0_61 = arith.constant 0 : index
    %c0_62 = arith.constant 0 : index
    %66 = vector.load %arg8[%c1_60, %c0_61, %c0_62] : memref<3x24x56xbf16, #tpu.memory_space<vmem>>, vector<1x24x56xbf16>
    %67 = vector.shape_cast %66 : vector<1x24x56xbf16> to vector<24x56xbf16>
    %cst_63 = arith.constant dense<0.000000e+00> : vector<24x448xf32>
    %68 = tpu.matmul %67, %58, %cst_63 {dimension_numbers = #tpu.dot_dimension_numbers<[1], [0], [0], [1], [0, 0, 1, 1], [], []>} : vector<24x56xbf16>, vector<56x448xbf16>, vector<24x448xf32> -> vector<24x448xf32>
    %69 = arith.truncf %68 : vector<24x448xf32> to vector<24x448xbf16>
    %c1_64 = arith.constant 1 : index
    %c0_65 = arith.constant 0 : index
    %c0_66 = arith.constant 0 : index
    %70 = vector.load %arg9[%c1_64, %c0_65, %c0_66] : memref<3x448x384xbf16, #tpu.memory_space<vmem>>, vector<1x448x384xbf16>
    %71 = vector.shape_cast %70 : vector<1x448x384xbf16> to vector<448x384xbf16>
    %cst_67 = arith.constant dense<0.000000e+00> : vector<24x384xf32>
    %72 = tpu.matmul %69, %71, %cst_67 {dimension_numbers = #tpu.dot_dimension_numbers<[1], [0], [0], [1], [0, 0, 1, 1], [], []>} : vector<24x448xbf16>, vector<448x384xbf16>, vector<24x384xf32> -> vector<24x384xf32>
    %73 = arith.addf %65, %72 : vector<24x384xf32>
    %c2_68 = arith.constant 2 : index
    %c0_69 = arith.constant 0 : index
    %c0_70 = arith.constant 0 : index
    %74 = vector.load %arg8[%c2_68, %c0_69, %c0_70] : memref<3x24x56xbf16, #tpu.memory_space<vmem>>, vector<1x24x56xbf16>
    %75 = vector.shape_cast %74 : vector<1x24x56xbf16> to vector<24x56xbf16>
    %cst_71 = arith.constant dense<0.000000e+00> : vector<24x448xf32>
    %76 = tpu.matmul %75, %58, %cst_71 {dimension_numbers = #tpu.dot_dimension_numbers<[1], [0], [0], [1], [0, 0, 1, 1], [], []>} : vector<24x56xbf16>, vector<56x448xbf16>, vector<24x448xf32> -> vector<24x448xf32>
    %77 = arith.truncf %76 : vector<24x448xf32> to vector<24x448xbf16>
    %c2_72 = arith.constant 2 : index
    %c0_73 = arith.constant 0 : index
    %c0_74 = arith.constant 0 : index
    %78 = vector.load %arg9[%c2_72, %c0_73, %c0_74] : memref<3x448x384xbf16, #tpu.memory_space<vmem>>, vector<1x448x384xbf16>
    %79 = vector.shape_cast %78 : vector<1x448x384xbf16> to vector<448x384xbf16>
    %cst_75 = arith.constant dense<0.000000e+00> : vector<24x384xf32>
    %80 = tpu.matmul %77, %79, %cst_75 {dimension_numbers = #tpu.dot_dimension_numbers<[1], [0], [0], [1], [0, 0, 1, 1], [], []>} : vector<24x448xbf16>, vector<448x384xbf16>, vector<24x384xf32> -> vector<24x384xf32>
    %81 = arith.addf %73, %80 : vector<24x384xf32>
    %c0_76 = arith.constant 0 : index
    %c0_77 = arith.constant 0 : index
    %82 = vector.load %arg10[%c0_76, %c0_77] : memref<1x384xf32, #tpu.memory_space<vmem>>, vector<1x384xf32>
    %83 = vector.broadcast %82 : vector<1x384xf32> to vector<24x384xf32>
    %84 = arith.addf %81, %83 : vector<24x384xf32>
    %cst_78 = arith.constant 0.000000e+00 : f32
    %85 = vector.broadcast %cst_78 : f32 to vector<24x384xf32>
    %86 = arith.maximumf %84, %85 : vector<24x384xf32>
    %87 = arith.truncf %86 : vector<24x384xf32> to vector<24x384xbf16>
    %c0_79 = arith.constant 0 : index
    %c0_80 = arith.constant 0 : index
    %c0_81 = arith.constant 0 : index
    %88 = vector.load %arg11[%c0_79, %c0_80, %c0_81] : memref<3x8x24xbf16, #tpu.memory_space<vmem>>, vector<1x8x24xbf16>
    %89 = vector.shape_cast %88 : vector<1x8x24xbf16> to vector<8x24xbf16>
    %cst_82 = arith.constant dense<0.000000e+00> : vector<8x384xf32>
    %90 = tpu.matmul %89, %87, %cst_82 {dimension_numbers = #tpu.dot_dimension_numbers<[1], [0], [0], [1], [0, 0, 1, 1], [], []>} : vector<8x24xbf16>, vector<24x384xbf16>, vector<8x384xf32> -> vector<8x384xf32>
    %91 = arith.truncf %90 : vector<8x384xf32> to vector<8x384xbf16>
    %c0_83 = arith.constant 0 : index
    %c0_84 = arith.constant 0 : index
    %c0_85 = arith.constant 0 : index
    %92 = vector.load %arg12[%c0_83, %c0_84, %c0_85] : memref<3x384x1024xbf16, #tpu.memory_space<vmem>>, vector<1x384x1024xbf16>
    %93 = vector.shape_cast %92 : vector<1x384x1024xbf16> to vector<384x1024xbf16>
    %cst_86 = arith.constant dense<0.000000e+00> : vector<8x1024xf32>
    %94 = tpu.matmul %91, %93, %cst_86 {dimension_numbers = #tpu.dot_dimension_numbers<[1], [0], [0], [1], [0, 0, 1, 1], [], []>} : vector<8x384xbf16>, vector<384x1024xbf16>, vector<8x1024xf32> -> vector<8x1024xf32>
    %c1_87 = arith.constant 1 : index
    %c0_88 = arith.constant 0 : index
    %c0_89 = arith.constant 0 : index
    %95 = vector.load %arg11[%c1_87, %c0_88, %c0_89] : memref<3x8x24xbf16, #tpu.memory_space<vmem>>, vector<1x8x24xbf16>
    %96 = vector.shape_cast %95 : vector<1x8x24xbf16> to vector<8x24xbf16>
    %cst_90 = arith.constant dense<0.000000e+00> : vector<8x384xf32>
    %97 = tpu.matmul %96, %87, %cst_90 {dimension_numbers = #tpu.dot_dimension_numbers<[1], [0], [0], [1], [0, 0, 1, 1], [], []>} : vector<8x24xbf16>, vector<24x384xbf16>, vector<8x384xf32> -> vector<8x384xf32>
    %98 = arith.truncf %97 : vector<8x384xf32> to vector<8x384xbf16>
    %c1_91 = arith.constant 1 : index
    %c0_92 = arith.constant 0 : index
    %c0_93 = arith.constant 0 : index
    %99 = vector.load %arg12[%c1_91, %c0_92, %c0_93] : memref<3x384x1024xbf16, #tpu.memory_space<vmem>>, vector<1x384x1024xbf16>
    %100 = vector.shape_cast %99 : vector<1x384x1024xbf16> to vector<384x1024xbf16>
    %cst_94 = arith.constant dense<0.000000e+00> : vector<8x1024xf32>
    %101 = tpu.matmul %98, %100, %cst_94 {dimension_numbers = #tpu.dot_dimension_numbers<[1], [0], [0], [1], [0, 0, 1, 1], [], []>} : vector<8x384xbf16>, vector<384x1024xbf16>, vector<8x1024xf32> -> vector<8x1024xf32>
    %102 = arith.addf %94, %101 : vector<8x1024xf32>
    %c2_95 = arith.constant 2 : index
    %c0_96 = arith.constant 0 : index
    %c0_97 = arith.constant 0 : index
    %103 = vector.load %arg11[%c2_95, %c0_96, %c0_97] : memref<3x8x24xbf16, #tpu.memory_space<vmem>>, vector<1x8x24xbf16>
    %104 = vector.shape_cast %103 : vector<1x8x24xbf16> to vector<8x24xbf16>
    %cst_98 = arith.constant dense<0.000000e+00> : vector<8x384xf32>
    %105 = tpu.matmul %104, %87, %cst_98 {dimension_numbers = #tpu.dot_dimension_numbers<[1], [0], [0], [1], [0, 0, 1, 1], [], []>} : vector<8x24xbf16>, vector<24x384xbf16>, vector<8x384xf32> -> vector<8x384xf32>
    %106 = arith.truncf %105 : vector<8x384xf32> to vector<8x384xbf16>
    %c2_99 = arith.constant 2 : index
    %c0_100 = arith.constant 0 : index
    %c0_101 = arith.constant 0 : index
    %107 = vector.load %arg12[%c2_99, %c0_100, %c0_101] : memref<3x384x1024xbf16, #tpu.memory_space<vmem>>, vector<1x384x1024xbf16>
    %108 = vector.shape_cast %107 : vector<1x384x1024xbf16> to vector<384x1024xbf16>
    %cst_102 = arith.constant dense<0.000000e+00> : vector<8x1024xf32>
    %109 = tpu.matmul %106, %108, %cst_102 {dimension_numbers = #tpu.dot_dimension_numbers<[1], [0], [0], [1], [0, 0, 1, 1], [], []>} : vector<8x384xbf16>, vector<384x1024xbf16>, vector<8x1024xf32> -> vector<8x1024xf32>
    %110 = arith.addf %102, %109 : vector<8x1024xf32>
    %c0_103 = arith.constant 0 : index
    %c0_104 = arith.constant 0 : index
    %111 = vector.load %arg13[%c0_103, %c0_104] : memref<1x1024xf32, #tpu.memory_space<vmem>>, vector<1x1024xf32>
    %112 = vector.broadcast %111 : vector<1x1024xf32> to vector<8x1024xf32>
    %113 = arith.addf %110, %112 : vector<8x1024xf32>
    %cst_105 = arith.constant 0.000000e+00 : f32
    %114 = vector.broadcast %cst_105 : f32 to vector<8x1024xf32>
    %115 = arith.maximumf %113, %114 : vector<8x1024xf32>
    %116 = arith.truncf %115 : vector<8x1024xf32> to vector<8x1024xbf16>
    %c0_106 = arith.constant 0 : index
    %c0_107 = arith.constant 0 : index
    %117 = vector.load %arg14[%c0_106, %c0_107] : memref<1024x128xbf16, #tpu.memory_space<vmem>>, vector<1024x128xbf16>
    %cst_108 = arith.constant dense<0.000000e+00> : vector<8x128xf32>
    %118 = tpu.matmul %116, %117, %cst_108 {dimension_numbers = #tpu.dot_dimension_numbers<[1], [0], [0], [1], [0, 0, 1, 1], [], []>} : vector<8x1024xbf16>, vector<1024x128xbf16>, vector<8x128xf32> -> vector<8x128xf32>
    %c0_109 = arith.constant 0 : index
    %c0_110 = arith.constant 0 : index
    %119 = vector.load %arg15[%c0_109, %c0_110] : memref<1x128xf32, #tpu.memory_space<vmem>>, vector<1x128xf32>
    %120 = vector.broadcast %119 : vector<1x128xf32> to vector<8x128xf32>
    %121 = arith.addf %118, %120 : vector<8x128xf32>
    %c0_111 = arith.constant 0 : index
    %c0_112 = arith.constant 0 : index
    %122 = vector.load %arg16[%c0_111, %c0_112] : memref<8x128xf32, #tpu.memory_space<vmem>>, vector<8x128xf32>
    tpu.vector_store %arg16[%c0_111, %c0_112], %121 {strides = array<i32>} : memref<8x128xf32, #tpu.memory_space<vmem>>, vector<8x128xf32>,
    return
  }
  func.func @transform_0(%arg0: i32) -> (i32, i32) {
    %c0_i32 = arith.constant 0 : i32
    %c0_i32_0 = arith.constant 0 : i32
    return %arg0, %c0_i32 : i32, i32
  }
  func.func @transform_1(%arg0: i32) -> (i32, i32, i32) {
    %c0_i32 = arith.constant 0 : i32
    %c0_i32_0 = arith.constant 0 : i32
    %c0_i32_1 = arith.constant 0 : i32
    %c0_i32_2 = arith.constant 0 : i32
    return %c0_i32, %c0_i32_0, %c0_i32_1 : i32, i32, i32
  }
  func.func @transform_2(%arg0: i32) -> (i32, i32, i32) {
    %c0_i32 = arith.constant 0 : i32
    %c0_i32_0 = arith.constant 0 : i32
    %c0_i32_1 = arith.constant 0 : i32
    %c0_i32_2 = arith.constant 0 : i32
    return %c0_i32, %c0_i32_0, %c0_i32_1 : i32, i32, i32
  }
  func.func @transform_3(%arg0: i32) -> (i32, i32) {
    %c0_i32 = arith.constant 0 : i32
    %c0_i32_0 = arith.constant 0 : i32
    %c0_i32_1 = arith.constant 0 : i32
    return %c0_i32, %c0_i32_0 : i32, i32
  }
  func.func @transform_4(%arg0: i32) -> (i32, i32, i32) {
    %c0_i32 = arith.constant 0 : i32
    %c0_i32_0 = arith.constant 0 : i32
    %c0_i32_1 = arith.constant 0 : i32
    %c0_i32_2 = arith.constant 0 : i32
    return %c0_i32, %c0_i32_0, %c0_i32_1 : i32, i32, i32
  }
  func.func @transform_5(%arg0: i32) -> (i32, i32, i32) {
    %c0_i32 = arith.constant 0 : i32
    %c0_i32_0 = arith.constant 0 : i32
    %c0_i32_1 = arith.constant 0 : i32
    %c0_i32_2 = arith.constant 0 : i32
    return %c0_i32, %c0_i32_0, %c0_i32_1 : i32, i32, i32
  }
  func.func @transform_6(%arg0: i32) -> (i32, i32) {
    %c0_i32 = arith.constant 0 : i32
    %c0_i32_0 = arith.constant 0 : i32
    %c0_i32_1 = arith.constant 0 : i32
    return %c0_i32, %c0_i32_0 : i32, i32
  }
  func.func @transform_7(%arg0: i32) -> (i32, i32, i32) {
    %c0_i32 = arith.constant 0 : i32
    %c0_i32_0 = arith.constant 0 : i32
    %c0_i32_1 = arith.constant 0 : i32
    %c0_i32_2 = arith.constant 0 : i32
    return %c0_i32, %c0_i32_0, %c0_i32_1 : i32, i32, i32
  }
  func.func @transform_8(%arg0: i32) -> (i32, i32, i32) {
    %c0_i32 = arith.constant 0 : i32
    %c0_i32_0 = arith.constant 0 : i32
    %c0_i32_1 = arith.constant 0 : i32
    %c0_i32_2 = arith.constant 0 : i32
    return %c0_i32, %c0_i32_0, %c0_i32_1 : i32, i32, i32
  }
  func.func @transform_9(%arg0: i32) -> (i32, i32) {
    %c0_i32 = arith.constant 0 : i32
    %c0_i32_0 = arith.constant 0 : i32
    %c0_i32_1 = arith.constant 0 : i32
    return %c0_i32, %c0_i32_0 : i32, i32
  }
  func.func @transform_10(%arg0: i32) -> (i32, i32, i32) {
    %c0_i32 = arith.constant 0 : i32
    %c0_i32_0 = arith.constant 0 : i32
    %c0_i32_1 = arith.constant 0 : i32
    %c0_i32_2 = arith.constant 0 : i32
    return %c0_i32, %c0_i32_0, %c0_i32_1 : i32, i32, i32
  }
  func.func @transform_11(%arg0: i32) -> (i32, i32, i32) {
    %c0_i32 = arith.constant 0 : i32
    %c0_i32_0 = arith.constant 0 : i32
    %c0_i32_1 = arith.constant 0 : i32
    %c0_i32_2 = arith.constant 0 : i32
    return %c0_i32, %c0_i32_0, %c0_i32_1 : i32, i32, i32
  }
  func.func @transform_12(%arg0: i32) -> (i32, i32) {
    %c0_i32 = arith.constant 0 : i32
    %c0_i32_0 = arith.constant 0 : i32
    %c0_i32_1 = arith.constant 0 : i32
    return %c0_i32, %c0_i32_0 : i32, i32
  }
  func.func @transform_13(%arg0: i32) -> (i32, i32) {
    %c0_i32 = arith.constant 0 : i32
    %c0_i32_0 = arith.constant 0 : i32
    %c0_i32_1 = arith.constant 0 : i32
    return %c0_i32, %c0_i32_0 : i32, i32
  }
  func.func @transform_14(%arg0: i32) -> (i32, i32) {
    %c0_i32 = arith.constant 0 : i32
    %c0_i32_0 = arith.constant 0 : i32
    %c0_i32_1 = arith.constant 0 : i32
    return %c0_i32, %c0_i32_0 : i32, i32
  }
  func.func @transform_15(%arg0: i32) -> (i32, i32) {
    %c0_i32 = arith.constant 0 : i32
    %c0_i32_0 = arith.constant 0 : i32
    return %arg0, %c0_i32 : i32, i32
  }
}

</mosaic_0001>

<bundles_post_ra>
// kernel: cnn_forward.1
= control target key start
LH: loop header
LB: loop body
LE: loop exit
PB: predicated region body
PF: predicated region fallthrough
CT: control target
= control target key end

     0   :  { %20 = vsyncpa [#allocation3], 0  ;;  %s24149_s0 = inlined_call_operand.vmem [shape: bf16[256,96], index: 0, kind: input, shape index: {}]   ;;  %s24150_s1 = inlined_call_operand.hbm [shape: bf16[3,120,256], index: 1, kind: input, shape index: {}]   ;;  %s24151_s2 = inlined_call_operand.vmem [shape: bf16[3,96,480], index: 2, kind: input, shape index: {}]   ;;  %s24152_s3 = inlined_call_operand.hbm [shape: f32[1,480], index: 3, kind: input, shape index: {}]   ;;  %s24153_s4 = inlined_call_operand.vmem [shape: bf16[3,56,120], index: 4, kind: input, shape index: {}]   ;;  %s24154_s5 = inlined_call_operand.vmem [shape: bf16[3,480,448], index: 5, kind: input, shape index: {}]   ;;  %s24155_s6 = inlined_call_operand.hbm [shape: f32[1,448], index: 6, kind: input, shape index: {}]   ;;  %s24156_s7 = inlined_call_operand.hbm [shape: bf16[3,24,56], index: 7, kind: input, shape index: {}]   ;;  %s24157_s8 = inlined_call_operand.vmem [shape: bf16[3,448,384], index: 8, kind: input, shape index: {}]   ;;  %s24158_s9 = inlined_call_operand.hbm [shape: f32[1,384], index: 9, kind: input, shape index: {}]   ;;  %s24159_s10 = inlined_call_operand.vmem [shape: bf16[3,8,24], index: 10, kind: input, shape index: {}]   ;;  %s24160_s11 = inlined_call_operand.vmem [shape: bf16[3,384,1024], index: 11, kind: input, shape index: {}]   ;;  %s24161_s12 = inlined_call_operand.hbm [shape: f32[1,1024], index: 12, kind: input, shape index: {}]   ;;  %s24162_s13 = inlined_call_operand.vmem [shape: bf16[1024,128], index: 13, kind: input, shape index: {}]   ;;  %s24163_s14 = inlined_call_operand.hbm [shape: f32[1,128], index: 14, kind: input, shape index: {}]   ;;  %s24164_s15 = inlined_call_operand.vmem [shape: f32[8,128], index: 15, kind: output, shape index: {}]  }
   0x1   :  { %21 = vsyncpa [#allocation5], 0 }
   0x2   :  { %22 = vsyncpa [#allocation8], 0 }
   0x3   :  { %23 = vsyncpa [#allocation11], 0  ;;  %s18707_s18 = smov [#allocation4]   ;;  %s18708_s20 = smov [#allocation7]  }
   0x4   :  { %s46_s19 = sshll.u32 %s18707_s18, 4  ;;  %s69_s21 = sshll.u32 %s18708_s20, 4  ;;  %s47_s19 = int_to_ptr.vmem [resolvable:$true] %s46_s19  ;;  %s18801_s21 = int_to_ptr.vmem [resolvable:$true] %s69_s21 }
   0x5   :  { %s18545_s24 = scalar_lea.hbm %s24152_s3, 64 }
   0x6   :  { %p18546_p0 = scmp.ne.s32.totalorder %s24152_s3, %s18545_s24  ;;  %p18549_p1 = scmp.lt.u32.totalorder %s18545_s24, %s24152_s3 }
   0x8   :  { %p18551_p2 = pnand %p18549_p1, %p18546_p0 }
   0xa   :  { %18554 = shalt.err (!%p18551_p2)
}
   0xb   :  { %s18555_s29 = scalar_lea.vmem %s47_s19, 64  ;;  %p18560_p4 = scmp.lt.s32.totalorder %s47_s19, %s47_s19 }
   0xc   :  { %p18556_p3 = scmp.ne.s32.totalorder %s47_s19, %s18555_s29  ;;  %p18561_p5 = scmp.lt.s32.totalorder %s18555_s29, %s18555_s29 }
   0xe   :  { %p18562_p6 = por %p18561_p5, %p18560_p4 }
  0x10   :  { %p18563_p7 = pnand %p18562_p6, %p18556_p3 }
  0x12   :  { %18566 = shalt.err (!%p18563_p7)
}
  0x13   :  { %49 = dma.hbm_to_vmem [thread:$0]  %s24152_s3, 64, %s47_s19, [#allocation5]  }
  0x14   :  { %s18567_s20 = scalar_lea.hbm %s24156_s7, 576 }
  0x15   :  { %p18568_p8 = scmp.ne.s32.totalorder %s24156_s7, %s18567_s20  ;;  %p18571_p9 = scmp.lt.u32.totalorder %s18567_s20, %s24156_s7 }
  0x17   :  { %p18573_p10 = pnand %p18571_p9, %p18568_p8 }
  0x19   :  { %18576 = shalt.err (!%p18573_p10)
}
  0x1a   :  { %s18577_s26 = scalar_lea.vmem %s18801_s21, 576  ;;  %p18582_p12 = scmp.lt.s32.totalorder %s18801_s21, %s18801_s21 }
  0x1b   :  { %p18578_p11 = scmp.ne.s32.totalorder %s18801_s21, %s18577_s26  ;;  %p18583_p13 = scmp.lt.s32.totalorder %s18577_s26, %s18577_s26 }
  0x1d   :  { %p18584_p0 = por %p18583_p13, %p18582_p12 }
  0x1f   :  { %p18585_p1 = pnand %p18584_p0, %p18578_p11 }
  0x21   :  { %18588 = shalt.err (!%p18585_p1)
}
  0x22   :  { %s18709_s3 = smov 64   ;;  %s18710_s19 = smov 4  }
  0x23   :  { %75 = dma.hbm_to_vmem [thread:$0]  %s24156_s7, 576, %s18801_s21, [#allocation8], %s18709_s3, %s18709_s3, %s18710_s19  }
  0x24   :  { %s18711_s29 = smov [#allocation10]   ;;  %s18712_s16 = smov [#allocation2]  }
  0x25   :  { %s98_s30 = sshll.u32 %s18711_s29, 4  ;;  %s31_s17 = sshll.u32 %s18712_s16, 4  ;;  %s99_s30 = int_to_ptr.vmem [resolvable:$true] %s98_s30  ;;  %s18832_s17 = int_to_ptr.vmem [resolvable:$true] %s31_s17 }
  0x26   :  { %s18589_s22 = scalar_lea.hbm %s24161_s12, 128 }
  0x27   :  { %p18590_p2 = scmp.ne.s32.totalorder %s24161_s12, %s18589_s22  ;;  %p18593_p3 = scmp.lt.u32.totalorder %s18589_s22, %s24161_s12 }
  0x29   :  { %p18595_p4 = pnand %p18593_p3, %p18590_p2 }
  0x2b   :  { %18598 = shalt.err (!%p18595_p4)
}
  0x2c   :  { %s18599_s7 = scalar_lea.vmem %s99_s30, 128  ;;  %p18604_p6 = scmp.lt.s32.totalorder %s99_s30, %s99_s30 }
  0x2d   :  { %p18600_p5 = scmp.ne.s32.totalorder %s99_s30, %s18599_s7  ;;  %p18605_p7 = scmp.lt.s32.totalorder %s18599_s7, %s18599_s7 }
  0x2f   :  { %p18606_p8 = por %p18605_p7, %p18604_p6 }
  0x31   :  { %p18607_p9 = pnand %p18606_p8, %p18600_p5 }
  0x33   :  { %18610 = shalt.err (!%p18607_p9)
}
  0x34   :  { %101 = dma.hbm_to_vmem [thread:$0]  %s24161_s12, 128, %s99_s30, [#allocation11]  }
  0x35   :  { %s18611_s28 = scalar_lea.hbm %s24150_s1, 5760 }
  0x36   :  { %p18612_p10 = scmp.ne.s32.totalorder %s24150_s1, %s18611_s28  ;;  %p18615_p11 = scmp.lt.u32.totalorder %s18611_s28, %s24150_s1 }
  0x38   :  { %p18617_p12 = pnand %p18615_p11, %p18612_p10 }
  0x3a   :  { %18620 = shalt.err (!%p18617_p12)
}
  0x3b   :  { %s18621_s22 = scalar_lea.vmem %s18832_s17, 5760  ;;  %p18626_p0 = scmp.lt.s32.totalorder %s18832_s17, %s18832_s17 }
  0x3c   :  { %p18622_p13 = scmp.ne.s32.totalorder %s18832_s17, %s18621_s22  ;;  %p18627_p1 = scmp.lt.s32.totalorder %s18621_s22, %s18621_s22 }
  0x3e   :  { %p18628_p2 = por %p18627_p1, %p18626_p0 }
  0x40   :  { %p18629_p3 = pnand %p18628_p2, %p18622_p13 }
  0x42   :  { %18632 = shalt.err (!%p18629_p3)
}
  0x43   :  { %s18713_s12 = smov 128   ;;  %s18714_s30 = smov 8  }
  0x44   :  { %37 = dma.hbm_to_vmem [thread:$0]  %s24150_s1, 5760, %s18832_s17, [#allocation3], %s18713_s12, %s18713_s12, %s18714_s30  }
  0x45   :  { %s18715_s25 = smov [#allocation6]   ;;  %s18716_s7 = smov [#allocation9]  }
  0x46   :  { %s60_s26 = sshll.u32 %s18715_s25, 4  ;;  %s84_s21 = sshll.u32 %s18716_s7, 4  ;;  %s61_s26 = int_to_ptr.vmem [resolvable:$true] %s60_s26  ;;  %s85_s21 = int_to_ptr.vmem [resolvable:$true] %s84_s21 }
  0x47   :  { %s18633_s27 = scalar_lea.hbm %s24155_s6, 64 }
  0x48   :  { %p18634_p4 = scmp.ne.s32.totalorder %s24155_s6, %s18633_s27  ;;  %p18637_p5 = scmp.lt.u32.totalorder %s18633_s27, %s24155_s6 }
  0x4a   :  { %p18639_p6 = pnand %p18637_p5, %p18634_p4 }
  0x4c   :  { %18642 = shalt.err (!%p18639_p6)
}
  0x4d   :  { %s18643_s1 = scalar_lea.vmem %s61_s26, 64  ;;  %p18648_p8 = scmp.lt.s32.totalorder %s61_s26, %s61_s26 }
  0x4e   :  { %p18644_p7 = scmp.ne.s32.totalorder %s61_s26, %s18643_s1  ;;  %p18649_p9 = scmp.lt.s32.totalorder %s18643_s1, %s18643_s1 }
  0x50   :  { %p18650_p10 = por %p18649_p9, %p18648_p8 }
  0x52   :  { %p18651_p11 = pnand %p18650_p10, %p18644_p7 }
  0x54   :  { %18654 = shalt.err (!%p18651_p11)
}
  0x55   :  { %63 = dma.hbm_to_vmem [thread:$0]  %s24155_s6, 64, %s61_s26, [#allocation5]  }
  0x56   :  { %s18655_s30 = scalar_lea.hbm %s24158_s9, 48 }
  0x57   :  { %p18656_p12 = scmp.ne.s32.totalorder %s24158_s9, %s18655_s30  ;;  %p18659_p13 = scmp.lt.u32.totalorder %s18655_s30, %s24158_s9 }
  0x59   :  { %p18661_p0 = pnand %p18659_p13, %p18656_p12 }
  0x5b   :  { %18664 = shalt.err (!%p18661_p0)
}
  0x5c   :  { %s18665_s3 = scalar_lea.vmem %s85_s21, 48  ;;  %s18669_s19 = scalar_lea.vmem %s85_s21, 64 }
  0x5d   :  { %p18666_p1 = scmp.ne.s32.totalorder %s85_s21, %s18665_s3  ;;  %p18670_p2 = scmp.lt.s32.totalorder %s85_s21, %s85_s21 }
  0x5e   :  { %p18671_p3 = scmp.lt.s32.totalorder %s18669_s19, %s18665_s3 }
  0x60   :  { %p18672_p4 = por %p18671_p3, %p18670_p2 }
  0x62   :  { %p18673_p5 = pnand %p18672_p4, %p18666_p1 }
  0x64   :  { %18676 = shalt.err (!%p18673_p5)
}
  0x65   :  { %87 = dma.hbm_to_vmem [thread:$0]  %s24158_s9, 48, %s85_s21, [#allocation8]  }
  0x66   :  { %s18717_s27 = smov [#allocation12]   ;;  %s18677_s18 = scalar_lea.hbm %s24163_s14, 16 }
  0x67   :  { %s110_s28 = sshll.u32 %s18717_s27, 4  ;;  %p18678_p6 = scmp.ne.s32.totalorder %s24163_s14, %s18677_s18  ;;  %s111_s28 = int_to_ptr.vmem [resolvable:$true] %s110_s28 }
  0x68   :  { %p18681_p7 = scmp.lt.u32.totalorder %s18677_s18, %s24163_s14 }
  0x6a   :  { %p18683_p8 = pnand %p18681_p7, %p18678_p6 }
  0x6c   :  { %18686 = shalt.err (!%p18683_p8)
}
  0x6d   :  { %s18687_s12 = scalar_lea.vmem %s111_s28, 16  ;;  %s18691_s9 = scalar_lea.vmem %s111_s28, 32 }
  0x6e   :  { %p18688_p9 = scmp.ne.s32.totalorder %s111_s28, %s18687_s12  ;;  %p18692_p10 = scmp.lt.s32.totalorder %s111_s28, %s111_s28 }
  0x6f   :  { %p18693_p11 = scmp.lt.s32.totalorder %s18691_s9, %s18687_s12 }
  0x71   :  { %p18694_p12 = por %p18693_p11, %p18692_p10 }
  0x73   :  { %p18695_p13 = pnand %p18694_p12, %p18688_p9 }
  0x75   :  { %18698 = shalt.err (!%p18695_p13)
}
  0x76   :  { %113 = dma.hbm_to_vmem [thread:$0]  %s24163_s14, 16, %s111_s28, [#allocation11]  }
  0x77   :  { %18699 = dma.done.wait [#allocation3], 5760  }
  0x78   :  { %18700 = vsyncadd [#allocation3], 4294961536 }
  0x79   :  { %18701 = dma.done.wait [#allocation5], 128  }
  0x7a   :  { %18702 = vsyncadd [#allocation5], 4294967168 }
  0x7b   :  { %18703 = dma.done.wait [#allocation8], 624  }
  0x7c   :  { %18704 = vsyncadd [#allocation8], 4294966672 }
  0x7d   :  { %18705 = dma.done.wait [#allocation11], 144  }
  0x7e   :  { %18706 = vsyncadd [#allocation11], 4294967152  ;;  %v17378_v0 = vld [vmem:[%s24149_s0 + $0x40] sm:$0xff]   ;;  %v17380_v2 = vld [vmem:[%s24149_s0 + $0x48] sm:$0xff]   ;;  %vm826_vm0 = vcmask 785408   ;;  %vm2299_vm1 = vcmask 1043456  }
  0x7f   :  { %v17379_v1 = vld [vmem:[%s24149_s0] sm:$0xff]   ;;  %16779 = vmatprep.subr.bf16.mxu1 %v17378_v0  ;;  %16715 = vmatprep.subr.bf16.mxu0 %v17378_v0  ;;  %v17381_v3 = vld [vmem:[%s24149_s0 + $0x8] sm:$0xff]   ;;  %v17382_v4 = vld [vmem:[%s24149_s0 + $0x50] sm:$0xff]   ;;  %vm2286_vm2 = vcmask 982016   ;;  %vm6045_vm3 = vcmask 457728   ;;  %vm6975_vm4 = vcmask 523264  }
  0x80   :  { %16780 = vmatpush3.bf16.msra.mxu1 %v17379_v1  ;;  %16716 = vmatpush3.bf16.msra.mxu0 %v17379_v1  ;;  %v17383_v5 = vld [vmem:[%s24149_s0 + $0x10] sm:$0xff]   ;;  %v17384_v6 = vld [vmem:[%s24149_s0 + $0x58] sm:$0xff]   ;;  %v17386_v8 = vld [vmem:[%s24149_s0 + $0x60] sm:$0xff]   ;;  %vm8776_vm5 = vcmask 195584   ;;  %vm18720_vm6 = vmmov 0  }
  0x81   :  { %16781 = vmatprep.subr.bf16.mxu1 %v17380_v2  ;;  %16717 = vmatprep.subr.bf16.mxu0 %v17380_v2  ;;  %v17385_v7 = vld [vmem:[%s24149_s0 + $0x18] sm:$0xff]   ;;  %v17387_v9 = vld [vmem:[%s24149_s0 + $0x20] sm:$0xff]   ;;  %v17388_v10 = vld [vmem:[%s24149_s0 + $0x68] sm:$0xff]  }
  0x82   :  { %v17396_v11 = vld [vmem:[#allocation2 + $0x7c] ss:$8 sps:$4 sm:$0xff]   ;;  %v17389_v12 = vld [vmem:[%s24149_s0 + $0x28] sm:$0xff]   ;;  %v17390_v13 = vld [vmem:[%s24149_s0 + $0x70] sm:$0xff]  }
  0x83   :  { %609 = vmatprep.mubr.bf16.mxu1 %v17396_v11  ;;  %v17391_v14 = vld [vmem:[%s24149_s0 + $0x30] sm:$0xff]   ;;  %v17392_v15 = vld [vmem:[%s24149_s0 + $0x78] sm:$0xff]   ;;  %v17419_v16 = vld [vmem:[#allocation2 + $0x4] ss:$8 sps:$4 sm:$0xff]  }
  0x84   :  { %16782 = vmatpush3.bf16.msra.mxu1 %v17381_v3  ;;  %16718 = vmatpush3.bf16.msra.mxu0 %v17381_v3  ;;  %v17393_v17 = vld [vmem:[%s24149_s0 + $0x38] sm:$0xff]   ;;  %v17397_v19 = vld [vmem:[#allocation2 + $0x8c] ss:$8 sps:$4 sm:$0xff]   ;;  %v17417_v20 = vld [vmem:[#allocation2] ss:$8 sps:$4 sm:$0xff]  }
  0x85   :  { %16783 = vmatprep.subr.bf16.mxu1 %v17382_v4  ;;  %16719 = vmatprep.subr.bf16.mxu0 %v17382_v4  ;;  %v17394_v18 = vld [vmem:[#allocation2 + $0x78] ss:$8 sps:$4 sm:$0xff]   ;;  %v17420_v21 = vld [vmem:[#allocation2 + $0x14] ss:$8 sps:$4 sm:$0xff]   ;;  %v17399_v24 = vld [vmem:[#allocation2 + $0x88] ss:$8 sps:$4 sm:$0xff]  }
  0x86   :  { %388 = vmatprep.mubr.bf16.mxu0 %v17419_v16  ;;  %v17440_v22 = vld [vmem:[%s24151_s2 + $0xc0] ss:$16 sps:$4 sm:$0xff]   ;;  %v17442_v23 = vld [vmem:[%s24151_s2 + $0xc4] ss:$16 sps:$4 sm:$0xff]   ;;  %v17454_v31 = vld [vmem:[%s24151_s2 + $0xcc] ss:$16 sps:$4 sm:$0xff]  }
  0x87   :  { %v17445_v25 = vld [vmem:[%s24151_s2 + $0xe4] ss:$16 sps:$4 sm:$0xff]   ;;  %v17422_v27 = vld [vmem:[#allocation2 + $0x10] ss:$8 sps:$4 sm:$0xff]   ;;  %v17457_v33 = vld [vmem:[%s24151_s2 + $0xec] ss:$16 sps:$4 sm:$0xff]  }
  0x88   :  { %16784 = vmatpush3.bf16.msra.mxu1 %v17383_v5  ;;  %16720 = vmatpush3.bf16.msra.mxu0 %v17383_v5  ;;  %v17400_v26 = vld [vmem:[#allocation2 + $0x9c] ss:$8 sps:$4 sm:$0xff]   ;;  %v17443_v29 = vld [vmem:[%s24151_s2 + $0xe0] ss:$16 sps:$4 sm:$0xff]   ;;  %v17452_v32 = vld [vmem:[%s24151_s2 + $0xc8] ss:$16 sps:$4 sm:$0xff]  }
  0x89   :  { %16785 = vmatprep.subr.bf16.mxu1 %v17384_v6  ;;  %16721 = vmatprep.subr.bf16.mxu0 %v17384_v6  ;;  %v17423_v28 = vld [vmem:[#allocation2 + $0x24] ss:$8 sps:$4 sm:$0xff]   ;;  %v17402_v34 = vld [vmem:[#allocation2 + $0x98] ss:$8 sps:$4 sm:$0xff]   ;;  %v17426_v39 = vld [vmem:[#allocation2 + $0x34] ss:$8 sps:$4 sm:$0xff]  }
  0x8a   :  { %v17448_v30 = vld [vmem:[%s24151_s2 + $0x104] ss:$16 sps:$4 sm:$0xff]   ;;  %v17446_v35 = vld [vmem:[%s24151_s2 + $0x100] ss:$16 sps:$4 sm:$0xff]   ;;  %v17455_v41 = vld [vmem:[%s24151_s2 + $0xe8] ss:$16 sps:$4 sm:$0xff]  }
  0x8b   :  { %v17403_v36 = vld [vmem:[#allocation2 + $0xac] ss:$8 sps:$4 sm:$0xff]   ;;  %v17425_v37 = vld [vmem:[#allocation2 + $0x20] ss:$8 sps:$4 sm:$0xff]   ;;  %v17406_v48 = vld [vmem:[#allocation2 + $0xbc] ss:$8 sps:$4 sm:$0xff]  }
  0x8c   :  { %16786 = vmatpush3.bf16.msra.mxu1 %v17385_v7  ;;  %16722 = vmatpush3.bf16.msra.mxu0 %v17385_v7  ;;  %v17451_v38 = vld [vmem:[%s24151_s2 + $0x124] ss:$16 sps:$4 sm:$0xff]   ;;  %v17449_v40 = vld [vmem:[%s24151_s2 + $0x120] ss:$16 sps:$4 sm:$0xff]   ;;  %v17463_v43 = vld [vmem:[%s24151_s2 + $0x10c] ss:$16 sps:$4 sm:$0xff]  }
  0x8d   :  { %16787 = vmatprep.subr.bf16.mxu1 %v17386_v8  ;;  %16723 = vmatprep.subr.bf16.mxu0 %v17386_v8  ;;  %v17460_v42 = vld [vmem:[%s24151_s2 + $0x144] ss:$16 sps:$4 sm:$0xff]   ;;  %v17458_v44 = vld [vmem:[%s24151_s2 + $0x140] ss:$16 sps:$4 sm:$0xff]   ;;  %v17461_v45 = vld [vmem:[%s24151_s2 + $0x108] ss:$16 sps:$4 sm:$0xff]  }
  0x8e   :  { %v17405_v46 = vld [vmem:[#allocation2 + $0xa8] ss:$8 sps:$4 sm:$0xff]   ;;  %v17466_v47 = vld [vmem:[%s24151_s2 + $0x12c] ss:$16 sps:$4 sm:$0xff]   ;;  %v17408_v52 = vld [vmem:[#allocation2 + $0xb8] ss:$8 sps:$4 sm:$0xff]  }
  0x8f   :  { %v17428_v49 = vld [vmem:[#allocation2 + $0x30] ss:$8 sps:$4 sm:$0xff]   ;;  %v17429_v50 = vld [vmem:[#allocation2 + $0x44] ss:$8 sps:$4 sm:$0xff]   ;;  %v17431_v54 = vld [vmem:[#allocation2 + $0x40] ss:$8 sps:$4 sm:$0xff]  }
  0x90   :  { %16788 = vmatpush3.bf16.msra.mxu1 %v17387_v9  ;;  %16724 = vmatpush3.bf16.msra.mxu0 %v17387_v9  ;;  %v17464_v51 = vld [vmem:[%s24151_s2 + $0x128] ss:$16 sps:$4 sm:$0xff]   ;;  %v17409_v53 = vld [vmem:[#allocation2 + $0xcc] ss:$8 sps:$4 sm:$0xff]   ;;  %v17412_v57 = vld [vmem:[#allocation2 + $0xdc] ss:$8 sps:$4 sm:$0xff]  }
  0x91   :  { %16789 = vmatprep.subr.bf16.mxu1 %v17388_v10  ;;  %16725 = vmatprep.subr.bf16.mxu0 %v17388_v10  ;;  %v17432_v55 = vld [vmem:[#allocation2 + $0x54] ss:$8 sps:$4 sm:$0xff]   ;;  %v17411_v56 = vld [vmem:[#allocation2 + $0xc8] ss:$8 sps:$4 sm:$0xff]   ;;  %v17435_v59 = vld [vmem:[#allocation2 + $0x64] ss:$8 sps:$4 sm:$0xff]  }
  0x92   :  { %v17434_v58 = vld [vmem:[#allocation2 + $0x50] ss:$8 sps:$4 sm:$0xff]   ;;  %v499_v60 = vld [vmem:[#allocation2 + $0xe8] sm:$0xff]  ;;  %v17472_v7 = vld [vmem:[%s24151_s2 + $0x164] ss:$16 sps:$4 sm:$0xff]   ;;  %v24165_v10 = vmov 0  }
  0x93   :  { %v182_v61 = vld [vmem:[#allocation2 + $0x70] sm:$0xff]  ;;  %v17414_v62 = vld [vmem:[#allocation2 + $0xd8] ss:$8 sps:$4 sm:$0xff]   ;;  %v14302_v0 = vcombine.high %v499_v60, %v499_v60  ;;  %v14301_v2 = vcombine.low %v499_v60, %v499_v60  ;;  %v17469_v4 = vld [vmem:[%s24151_s2 + $0x14c] ss:$16 sps:$4 sm:$0xff]  }
  0x94   :  { %16790 = vmatpush3.bf16.msra.mxu1 %v17389_v12  ;;  %16726 = vmatpush3.bf16.msra.mxu0 %v17389_v12  ;;  %v17437_v63 = vld [vmem:[#allocation2 + $0x60] ss:$8 sps:$4 sm:$0xff]   ;;  %v14270_v1 = vcombine.high %v182_v61, %v182_v61  ;;  %v14269_v3 = vcombine.low %v182_v61, %v182_v61  ;;  %v17475_v8 = vld [vmem:[%s24151_s2 + $0x16c] ss:$16 sps:$4 sm:$0xff]   ;;  %v17478_v11 = vld [vmem:[%s24151_s2 + $0x4] ss:$16 sps:$4 sm:$0xff]  }
  0x95   :  { %16791 = vmatprep.subr.bf16.mxu1 %v17390_v13  ;;  %16727 = vmatprep.subr.bf16.mxu0 %v17390_v13  ;;  %v17467_v5 = vld [vmem:[%s24151_s2 + $0x148] ss:$16 sps:$4 sm:$0xff]   ;;  %v17470_v6 = vld [vmem:[%s24151_s2 + $0x160] ss:$16 sps:$4 sm:$0xff]   ;;  %v17490_v12 = vld [vmem:[%s24151_s2 + $0xc] ss:$16 sps:$4 sm:$0xff]  }
  0x96   :  { %v17473_v9 = vld [vmem:[%s24151_s2 + $0x168] ss:$16 sps:$4 sm:$0xff]  }
  0x98   :  { %16792 = vmatpush3.bf16.msra.mxu1 %v17391_v14  ;;  %16728 = vmatpush3.bf16.msra.mxu0 %v17391_v14 }
  0x99   :  { %16793 = vmatprep.subr.bf16.mxu1 %v17392_v15  ;;  %16729 = vmatprep.subr.bf16.mxu0 %v17392_v15 }
  0x9c   :  { %16794 = vmatpush3.bf16.msra.mxu1 %v17393_v17  ;;  %16730 = vmatpush3.bf16.msra.mxu0 %v17393_v17 }
  0x9d   :  { %851 = vmatprep.subr.bf16.mxu0 %v17442_v23  ;;  %962 = vmatprep.subr.bf16.mxu1 %v17454_v31 }
  0x9f   :  { %610 = vmatmul.mubr.bf16.vlgmr.msra.gmra.mrb[0].mxu1 %v17394_v18  ;;  %389 = vmatmul.mubr.bf16.vlgmr.msra.gmra.mrb[0].mxu0 %v17417_v20  ;;  %v17476_v20 = vld [vmem:[%s24151_s2] ss:$16 sps:$4 sm:$0xff]  }
  0xa0   :  { %617 = vmatprep.mubr.bf16.mxu1 %v17397_v19  ;;  %396 = vmatprep.mubr.bf16.mxu0 %v17420_v21 }
  0xa1   :  { %852 = vmatpush1.bf16.msra.mxu0 %v17440_v22  ;;  %963 = vmatpush1.bf16.msra.mxu1 %v17452_v32  ;;  %v17484_v32 = vld [vmem:[%s24151_s2 + $0x44] ss:$16 sps:$4 sm:$0xff]  }
  0xa2   :  { %853 = vmatprep.subr.bf16.mxu0 %v17445_v25  ;;  %964 = vmatprep.subr.bf16.mxu1 %v17457_v33  ;;  %v17493_v33 = vld [vmem:[%s24151_s2 + $0x2c] ss:$16 sps:$4 sm:$0xff]  }
  0xa5   :  { %854 = vmatpush1.bf16.msra.mxu0 %v17443_v29  ;;  %965 = vmatpush1.bf16.msra.mxu1 %v17455_v41  ;;  %v17479_v29 = vld [vmem:[%s24151_s2 + $0x20] ss:$16 sps:$4 sm:$0xff]  }
  0xa6   :  { %855 = vmatprep.subr.bf16.mxu0 %v17448_v30  ;;  %966 = vmatprep.subr.bf16.mxu1 %v17463_v43 }
  0xa7   :  { %618 = vmatmul.mubr.bf16.gmra.mrb[4].mxu1 %v17399_v24  ;;  %397 = vmatmul.mubr.bf16.gmra.mrb[4].mxu0 %v17422_v27  ;;  %v17481_v24 = vld [vmem:[%s24151_s2 + $0x24] ss:$16 sps:$4 sm:$0xff]  }
  0xa8   :  { %625 = vmatprep.mubr.bf16.mxu1 %v17400_v26  ;;  %404 = vmatprep.mubr.bf16.mxu0 %v17423_v28  ;;  %v17488_v26 = vld [vmem:[%s24151_s2 + $0x8] ss:$16 sps:$4 sm:$0xff]  }
  0xa9   :  { %856 = vmatpush1.bf16.msra.mxu0 %v17446_v35  ;;  %967 = vmatpush1.bf16.msra.mxu1 %v17461_v45  ;;  %v17491_v35 = vld [vmem:[%s24151_s2 + $0x28] ss:$16 sps:$4 sm:$0xff]   ;;  %v17499_v45 = vld [vmem:[%s24151_s2 + $0x4c] ss:$16 sps:$4 sm:$0xff]  }
  0xaa   :  { %857 = vmatprep.subr.bf16.mxu0 %v17451_v38  ;;  %968 = vmatprep.subr.bf16.mxu1 %v17466_v47  ;;  %v17487_v47 = vld [vmem:[%s24151_s2 + $0x64] ss:$16 sps:$4 sm:$0xff]  }
  0xad   :  { %858 = vmatpush1.bf16.msra.mxu0 %v17449_v40  ;;  %969 = vmatpush1.bf16.msra.mxu1 %v17464_v51 }
  0xae   :  { %859 = vmatprep.subr.bf16.mxu0 %v17460_v42  ;;  %970 = vmatprep.subr.bf16.mxu1 %v17469_v4 }
  0xaf   :  { %626 = vmatmul.mubr.bf16.gmra.mrb[8].mxu1 %v17402_v34  ;;  %405 = vmatmul.mubr.bf16.gmra.mrb[8].mxu0 %v17425_v37 }
  0xb0   :  { %633 = vmatprep.mubr.bf16.mxu1 %v17403_v36  ;;  %412 = vmatprep.mubr.bf16.mxu0 %v17426_v39 }
  0xb1   :  { %860 = vmatpush1.bf16.msra.mxu0 %v17458_v44  ;;  %971 = vmatpush1.bf16.msra.mxu1 %v17467_v5  ;;  %v17482_v44 = vld [vmem:[%s24151_s2 + $0x40] ss:$16 sps:$4 sm:$0xff]   ;;  %v17503_v5 = vld [vmem:[%s24151_s2 + $0x88] ss:$16 sps:$4 sm:$0xff]  }
  0xb2   :  { %861 = vmatprep.subr.bf16.mxu0 %v17472_v7  ;;  %972 = vmatprep.subr.bf16.mxu1 %v17475_v8 }
  0xb5   :  { %862 = vmatpush1.bf16.msra.mxu0 %v17470_v6  ;;  %973 = vmatpush1.bf16.msra.mxu1 %v17473_v9  ;;  %v17508_v6 = vld [vmem:[%s24151_s2 + $0xa4] ss:$16 sps:$4 sm:$0xff]  }
  0xb6   :  { %1217 = vmatprep.subr.bf16.mxu0 %v17478_v11  ;;  %1328 = vmatprep.subr.bf16.mxu1 %v17490_v12  ;;  %v17506_v12 = vld [vmem:[%s24151_s2 + $0xa0] ss:$16 sps:$4 sm:$0xff]  }
  0xb7   :  { %634 = vmatmul.mubr.bf16.gmra.mrb[12].mxu1 %v17405_v46  ;;  %413 = vmatmul.mubr.bf16.gmra.mrb[12].mxu0 %v17428_v49 }
  0xb8   :  { %641 = vmatprep.mubr.bf16.mxu1 %v17406_v48  ;;  %420 = vmatprep.mubr.bf16.mxu0 %v17429_v50  ;;  %v17497_v48 = vld [vmem:[%s24151_s2 + $0x48] ss:$16 sps:$4 sm:$0xff]  }
  0xbf   :  { %642 = vmatmul.mubr.bf16.gmra.mrb[16].mxu1 %v17408_v52  ;;  %421 = vmatmul.mubr.bf16.gmra.mrb[16].mxu0 %v17431_v54  ;;  %v17502_v54 = vld [vmem:[%s24151_s2 + $0x6c] ss:$16 sps:$4 sm:$0xff]  }
  0xc0   :  { %649 = vmatprep.mubr.bf16.mxu1 %v17409_v53  ;;  %428 = vmatprep.mubr.bf16.mxu0 %v17432_v55  ;;  %v17485_v53 = vld [vmem:[%s24151_s2 + $0x60] ss:$16 sps:$4 sm:$0xff]  }
  0xc7   :  { %650 = vmatmul.mubr.bf16.gmra.mrb[20].mxu1 %v17411_v56  ;;  %429 = vmatmul.mubr.bf16.gmra.mrb[20].mxu0 %v17434_v58  ;;  %v17496_v56 = vld [vmem:[%s24151_s2 + $0x84] ss:$16 sps:$4 sm:$0xff]  }
  0xc8   :  { %657 = vmatprep.mubr.bf16.mxu1 %v17412_v57  ;;  %436 = vmatprep.mubr.bf16.mxu0 %v17435_v59  ;;  %v17500_v57 = vld [vmem:[%s24151_s2 + $0x68] ss:$16 sps:$4 sm:$0xff]  }
  0xcf   :  { %658 = vmatmul.mubr.bf16.gmra.mrb[24].mxu1 %v17414_v62  ;;  %437 = vmatmul.mubr.bf16.gmra.mrb[24].mxu0 %v17437_v63 }
  0xd0   :  { %665 = vmatprep.mubr.bf16.mxu1 %v14302_v0  ;;  %444 = vmatprep.mubr.bf16.mxu0 %v14270_v1 }
  0xd7   :  { %666 = vmatmul.mubr.bf16.gmra.mrb[28].mxu1 %v14301_v2  ;;  %445 = vmatmul.mubr.bf16.gmra.mrb[28].mxu0 %v14269_v3  ;;  %v17494_v2 = vld [vmem:[%s24151_s2 + $0x80] ss:$16 sps:$4 sm:$0xff]   ;;  %v17505_v3 = vld [vmem:[%s24151_s2 + $0x8c] ss:$16 sps:$4 sm:$0xff]  }
  0xd8   :  { %883 = vmatprep.mubr.bf16.mxu0 %v24165_v10  ;;  %994 = vmatprep.mubr.bf16.mxu1 %v24165_v10 }
 0x172   :  { %v16795_v13 = vpop.f32.mrb[0].mxu1  ;;  %v16731_v15 = vpop.f32.mrb[0].mxu0 }
 0x173   :  { %v16796_v14 = vpop.f32.mrb[1].mxu1  ;;  %v16732_v18 = vpop.f32.mrb[1].mxu0 }
 0x174   :  { %v16797_v16 = vadd.f32 %v16796_v14, %v16795_v13  ;;  %v16798_v17 = vpop.f32.mrb[2].mxu1  ;;  %v16733_v21 = vadd.f32 %v16732_v18, %v16731_v15  ;;  %v16734_v22 = vpop.f32.mrb[2].mxu0  ;;  %v17511_v13 = vld [vmem:[%s24151_s2 + $0xac] ss:$16 sps:$4 sm:$0xff]   ;;  %v17509_v15 = vld [vmem:[%s24151_s2 + $0xa8] ss:$16 sps:$4 sm:$0xff]  }
 0x175   :  { %v16799_v19 = vpop.f32.mrb[3].mxu1  ;;  %v16735_v25 = vpop.f32.mrb[3].mxu0 }
 0x176   :  { %v16800_v23 = vadd.f32 %v16799_v19, %v16798_v17  ;;  %v16736_v27 = vadd.f32 %v16735_v25, %v16734_v22 }
 0x178   :  { %v673_v28 = vpack.c.bf16 %v16800_v23, %v16797_v16  ;;  %v19039_v30 = vpack.c.bf16 %v16736_v27, %v16733_v21  ;;  %v18529_v27 = vld [vmem:[%s24149_s0 + $0x40] sm:$0xff]  }
 0x17a   :  { %v16801_v31 = vpop.f32.mrb[4].mxu1  ;;  %14351 = vmatmul.mubr.msk.bf16.vlgmr.msra.gmra.mrb[32].mxu0 %vm826_vm0, %v673_v28  ;;  %14359 = vmatmul.mubr.msk.bf16.vlgmr.msra.gmra.mrb[32].mxu1 %vm826_vm0, %v673_v28  ;;  %v16737_v36 = vpop.f32.mrb[4].mxu0 }
 0x17b   :  { %v16802_v34 = vpop.f32.mrb[5].mxu1  ;;  %1218 = vmatpush1.bf16.msra.mxu0 %v17476_v20  ;;  %893 = vmatprep.mubr.bf16.mxu0 %v24165_v10  ;;  %v16738_v39 = vpop.f32.mrb[5].mxu0 }
 0x17c   :  { %v16803_v37 = vadd.f32 %v16802_v34, %v16801_v31  ;;  %v16804_v38 = vpop.f32.mrb[6].mxu1  ;;  %1004 = vmatprep.mubr.bf16.mxu1 %v24165_v10  ;;  %1219 = vmatprep.subr.bf16.mxu0 %v17481_v24  ;;  %v16739_v41 = vadd.f32 %v16738_v39, %v16737_v36  ;;  %v16740_v42 = vpop.f32.mrb[6].mxu0 }
 0x17d   :  { %v16805_v40 = vpop.f32.mrb[7].mxu1  ;;  %1329 = vmatpush1.bf16.msra.mxu1 %v17488_v26  ;;  %v16741_v46 = vpop.f32.mrb[7].mxu0 }
 0x17e   :  { %v16806_v43 = vadd.f32 %v16805_v40, %v16804_v38  ;;  %1330 = vmatprep.subr.bf16.mxu1 %v17493_v33  ;;  %v16742_v49 = vadd.f32 %v16741_v46, %v16740_v42 }
 0x17f   :  { %1220 = vmatpush1.bf16.msra.mxu0 %v17479_v29 }
 0x180   :  { %v674_v50 = vpack.c.bf16 %v16806_v43, %v16803_v37  ;;  %1221 = vmatprep.subr.bf16.mxu0 %v17484_v32  ;;  %v19066_v51 = vpack.c.bf16 %v16742_v49, %v16739_v41 }
 0x181   :  { %1331 = vmatpush1.bf16.msra.mxu1 %v17491_v35 }
 0x182   :  { %v16807_v52 = vpop.f32.mrb[8].mxu1  ;;  %14352 = vmatmul.mubr.msk.bf16.gmra.mrb[36].mxu0 %vm826_vm0, %v674_v50  ;;  %14360 = vmatmul.mubr.msk.bf16.gmra.mrb[36].mxu1 %vm826_vm0, %v674_v50  ;;  %v16743_v58 = vpop.f32.mrb[8].mxu0 }
 0x183   :  { %v16808_v55 = vpop.f32.mrb[9].mxu1  ;;  %903 = vmatprep.mubr.bf16.mxu0 %v24165_v10  ;;  %1014 = vmatprep.mubr.bf16.mxu1 %v24165_v10  ;;  %v16744_v61 = vpop.f32.mrb[9].mxu0 }
 0x184   :  { %v16809_v59 = vadd.f32 %v16808_v55, %v16807_v52  ;;  %v16810_v60 = vpop.f32.mrb[10].mxu1  ;;  %1222 = vmatpush1.bf16.msra.mxu0 %v17482_v44  ;;  %1332 = vmatprep.subr.bf16.mxu1 %v17499_v45  ;;  %v16745_v63 = vadd.f32 %v16744_v61, %v16743_v58  ;;  %v16746_v0 = vpop.f32.mrb[10].mxu0 }
 0x185   :  { %v16811_v62 = vpop.f32.mrb[11].mxu1  ;;  %1223 = vmatprep.subr.bf16.mxu0 %v17487_v47  ;;  %1333 = vmatpush1.bf16.msra.mxu1 %v17497_v48  ;;  %v16747_v4 = vpop.f32.mrb[11].mxu0 }
 0x186   :  { %v16812_v1 = vadd.f32 %v16811_v62, %v16810_v60  ;;  %1334 = vmatprep.subr.bf16.mxu1 %v17502_v54  ;;  %v16748_v7 = vadd.f32 %v16747_v4, %v16746_v0 }
 0x188   :  { %v675_v8 = vpack.c.bf16 %v16812_v1, %v16809_v59  ;;  %1224 = vmatpush1.bf16.msra.mxu0 %v17485_v53  ;;  %v19096_v9 = vpack.c.bf16 %v16748_v7, %v16745_v63 }
 0x189   :  { %1225 = vmatprep.subr.bf16.mxu0 %v17496_v56  ;;  %1335 = vmatpush1.bf16.msra.mxu1 %v17500_v57 }
 0x18a   :  { %v16813_v11 = vpop.f32.mrb[12].mxu1  ;;  %14353 = vmatmul.mubr.msk.bf16.gmra.mrb[40].mxu0 %vm826_vm0, %v675_v8  ;;  %14361 = vmatmul.mubr.msk.bf16.gmra.mrb[40].mxu1 %vm826_vm0, %v675_v8  ;;  %v16749_v16 = vpop.f32.mrb[12].mxu0 }
 0x18b   :  { %v16814_v14 = vpop.f32.mrb[13].mxu1  ;;  %913 = vmatprep.mubr.bf16.mxu0 %v24165_v10  ;;  %1024 = vmatprep.mubr.bf16.mxu1 %v24165_v10  ;;  %v16750_v19 = vpop.f32.mrb[13].mxu0 }
 0x18c   :  { %v16815_v17 = vadd.f32 %v16814_v14, %v16813_v11  ;;  %v16816_v18 = vpop.f32.mrb[14].mxu1  ;;  %1226 = vmatpush1.bf16.msra.mxu0 %v17494_v2  ;;  %1336 = vmatprep.subr.bf16.mxu1 %v17505_v3  ;;  %v16751_v21 = vadd.f32 %v16750_v19, %v16749_v16  ;;  %v16752_v22 = vpop.f32.mrb[14].mxu0 }
 0x18d   :  { %v16817_v20 = vpop.f32.mrb[15].mxu1  ;;  %1337 = vmatpush1.bf16.msra.mxu1 %v17503_v5  ;;  %1227 = vmatprep.subr.bf16.mxu0 %v17508_v6  ;;  %v16753_v24 = vpop.f32.mrb[15].mxu0 }
 0x18e   :  { %v16818_v23 = vadd.f32 %v16817_v20, %v16816_v18  ;;  %1338 = vmatprep.subr.bf16.mxu1 %v17511_v13  ;;  %v16754_v25 = vadd.f32 %v16753_v24, %v16752_v22  ;;  %v18530_v22 = vld [vmem:[%s24149_s0] sm:$0xff]   ;;  %v18532_v24 = vld [vmem:[%s24149_s0 + $0x8] sm:$0xff]  }
 0x190   :  { %v676_v26 = vpack.c.bf16 %v16818_v23, %v16815_v17  ;;  %1228 = vmatpush1.bf16.msra.mxu0 %v17506_v12  ;;  %v19114_v28 = vpack.c.bf16 %v16754_v25, %v16751_v21  ;;  %v18531_v23 = vld [vmem:[%s24149_s0 + $0x48] sm:$0xff]   ;;  %v18534_v25 = vld [vmem:[%s24149_s0 + $0x10] sm:$0xff]  }
 0x191   :  { %1339 = vmatpush1.bf16.msra.mxu1 %v17509_v15  ;;  %16843 = vmatprep.subr.bf16.mxu0 %v18529_v27  ;;  %v18536_v27 = vld [vmem:[%s24149_s0 + $0x18] sm:$0xff]  }
 0x192   :  { %v16819_v29 = vpop.f32.mrb[16].mxu1  ;;  %14354 = vmatmul.mubr.msk.bf16.gmra.mrb[44].mxu0 %vm826_vm0, %v676_v26  ;;  %14362 = vmatmul.mubr.msk.bf16.gmra.mrb[44].mxu1 %vm826_vm0, %v676_v26  ;;  %v16755_v32 = vpop.f32.mrb[16].mxu0  ;;  %v18535_v26 = vld [vmem:[%s24149_s0 + $0x58] sm:$0xff]  }
 0x193   :  { %v16820_v31 = vpop.f32.mrb[17].mxu1  ;;  %923 = vmatprep.mubr.bf16.mxu0 %v24165_v10  ;;  %1034 = vmatprep.mubr.bf16.mxu1 %v24165_v10  ;;  %v16756_v35 = vpop.f32.mrb[17].mxu0 }
 0x194   :  { %v16821_v33 = vadd.f32 %v16820_v31, %v16819_v29  ;;  %v16822_v34 = vpop.f32.mrb[18].mxu1  ;;  %v16757_v37 = vadd.f32 %v16756_v35, %v16755_v32  ;;  %v16758_v38 = vpop.f32.mrb[18].mxu0  ;;  %v18538_v29 = vld [vmem:[%s24149_s0 + $0x20] sm:$0xff]   ;;  %v18539_v31 = vld [vmem:[%s24149_s0 + $0x68] sm:$0xff]   ;;  %v18544_v35 = vld [vmem:[%s24149_s0 + $0x38] sm:$0xff]  }
 0x195   :  { %v16823_v36 = vpop.f32.mrb[19].mxu1  ;;  %v16759_v40 = vpop.f32.mrb[19].mxu0  ;;  %v18540_v32 = vld [vmem:[%s24149_s0 + $0x28] sm:$0xff]  }
 0x196   :  { %v16824_v39 = vadd.f32 %v16823_v36, %v16822_v34  ;;  %v16760_v41 = vadd.f32 %v16759_v40, %v16758_v38  ;;  %v18543_v34 = vld [vmem:[%s24149_s0 + $0x78] sm:$0xff]   ;;  %v17515_v38 = vld [vmem:[#allocation2 + $0x104] ss:$8 sps:$4 sm:$0xff]  }
 0x197   :  { %v17518_v40 = vld [vmem:[#allocation2 + $0x114] ss:$8 sps:$4 sm:$0xff]  }
 0x198   :  { %v677_v42 = vpack.c.bf16 %v16824_v39, %v16821_v33  ;;  %v19120_v43 = vpack.c.bf16 %v16760_v41, %v16757_v37  ;;  %v18542_v33 = vld [vmem:[%s24149_s0 + $0x30] sm:$0xff]   ;;  %v17517_v39 = vld [vmem:[#allocation2 + $0x100] ss:$8 sps:$4 sm:$0xff]  }
 0x199   :  { %v17512_v37 = vld [vmem:[#allocation2 + $0xf0] ss:$8 sps:$4 sm:$0xff]  }
 0x19a   :  { %v16825_v44 = vpop.f32.mrb[20].mxu1  ;;  %14355 = vmatmul.mubr.msk.bf16.gmra.mrb[48].mxu0 %vm826_vm0, %v677_v42  ;;  %14363 = vmatmul.mubr.msk.bf16.gmra.mrb[48].mxu1 %vm826_vm0, %v677_v42  ;;  %v16761_v46 = vpop.f32.mrb[20].mxu0  ;;  %v17520_v41 = vld [vmem:[#allocation2 + $0x110] ss:$8 sps:$4 sm:$0xff]   ;;  %v17521_v42 = vld [vmem:[#allocation2 + $0x124] ss:$8 sps:$4 sm:$0xff]  }
 0x19b   :  { %v16826_v45 = vpop.f32.mrb[21].mxu1  ;;  %933 = vmatprep.mubr.bf16.mxu0 %v24165_v10  ;;  %1044 = vmatprep.mubr.bf16.mxu1 %v24165_v10  ;;  %v16762_v49 = vpop.f32.mrb[21].mxu0 }
 0x19c   :  { %v16827_v47 = vadd.f32 %v16826_v45, %v16825_v44  ;;  %v16828_v48 = vpop.f32.mrb[22].mxu1  ;;  %v16763_v52 = vadd.f32 %v16762_v49, %v16761_v46  ;;  %v16764_v53 = vpop.f32.mrb[22].mxu0  ;;  %v17537_v44 = vld [vmem:[%s24151_s2 + $0x184] ss:$16 sps:$4 sm:$0xff]   ;;  %v17547_v46 = vld [vmem:[%s24151_s2 + $0x188] ss:$16 sps:$4 sm:$0xff]  }
 0x19d   :  { %v16829_v50 = vpop.f32.mrb[23].mxu1  ;;  %v16765_v55 = vpop.f32.mrb[23].mxu0  ;;  %v17540_v45 = vld [vmem:[%s24151_s2 + $0x1a4] ss:$16 sps:$4 sm:$0xff]   ;;  %v17552_v49 = vld [vmem:[%s24151_s2 + $0x1ac] ss:$16 sps:$4 sm:$0xff]  }
 0x19e   :  { %v16830_v54 = vadd.f32 %v16829_v50, %v16828_v48  ;;  %v16766_v56 = vadd.f32 %v16765_v55, %v16764_v53  ;;  %v17549_v48 = vld [vmem:[%s24151_s2 + $0x18c] ss:$16 sps:$4 sm:$0xff]   ;;  %v17543_v50 = vld [vmem:[%s24151_s2 + $0x1c4] ss:$16 sps:$4 sm:$0xff]   ;;  %v17550_v53 = vld [vmem:[%s24151_s2 + $0x1a8] ss:$16 sps:$4 sm:$0xff]  }
 0x19f   :  { %1916 = vmatprep.subr.bf16.mxu1 %v17549_v48  ;;  %v17541_v55 = vld [vmem:[%s24151_s2 + $0x1c0] ss:$16 sps:$4 sm:$0xff]  }
 0x1a0   :  { %v678_v57 = vpack.c.bf16 %v16830_v54, %v16827_v47  ;;  %v19126_v58 = vpack.c.bf16 %v16766_v56, %v16763_v52  ;;  %v17538_v47 = vld [vmem:[%s24151_s2 + $0x1a0] ss:$16 sps:$4 sm:$0xff]   ;;  %v17524_v54 = vld [vmem:[#allocation2 + $0x134] ss:$8 sps:$4 sm:$0xff]  }
 0x1a1   :  { %v17523_v52 = vld [vmem:[#allocation2 + $0x120] ss:$8 sps:$4 sm:$0xff]   ;;  %v17546_v56 = vld [vmem:[%s24151_s2 + $0x1e4] ss:$16 sps:$4 sm:$0xff]  }
 0x1a2   :  { %v16831_v59 = vpop.f32.mrb[24].mxu1  ;;  %14356 = vmatmul.mubr.msk.bf16.gmra.mrb[52].mxu0 %vm826_vm0, %v678_v57  ;;  %14364 = vmatmul.mubr.msk.bf16.gmra.mrb[52].mxu1 %vm826_vm0, %v678_v57  ;;  %v16767_v61 = vpop.f32.mrb[24].mxu0  ;;  %v17544_v57 = vld [vmem:[%s24151_s2 + $0x1e0] ss:$16 sps:$4 sm:$0xff]  }
 0x1a3   :  { %v16832_v60 = vpop.f32.mrb[25].mxu1  ;;  %943 = vmatprep.mubr.bf16.mxu0 %v24165_v10  ;;  %1054 = vmatprep.mubr.bf16.mxu1 %v24165_v10  ;;  %v16768_v0 = vpop.f32.mrb[25].mxu0 }
 0x1a4   :  { %v16833_v62 = vadd.f32 %v16832_v60, %v16831_v59  ;;  %v16834_v63 = vpop.f32.mrb[26].mxu1  ;;  %v16769_v2 = vadd.f32 %v16768_v0, %v16767_v61  ;;  %v16770_v3 = vpop.f32.mrb[26].mxu0  ;;  %v17526_v59 = vld [vmem:[#allocation2 + $0x130] ss:$8 sps:$4 sm:$0xff]   ;;  %v17527_v60 = vld [vmem:[#allocation2 + $0x144] ss:$8 sps:$4 sm:$0xff]  }
 0x1a5   :  { %v16835_v1 = vpop.f32.mrb[27].mxu1  ;;  %v16771_v5 = vpop.f32.mrb[27].mxu0  ;;  %v17553_v61 = vld [vmem:[%s24151_s2 + $0x200] ss:$16 sps:$4 sm:$0xff]  }
 0x1a6   :  { %v16836_v4 = vadd.f32 %v16835_v1, %v16834_v63  ;;  %v16772_v6 = vadd.f32 %v16771_v5, %v16770_v3  ;;  %v17530_v63 = vld [vmem:[#allocation2 + $0x154] ss:$8 sps:$4 sm:$0xff]   ;;  %v1454_v0 = vld [vmem:[#allocation2 + $0x160] sm:$0xff]  ;;  %v17532_v1 = vld [vmem:[#allocation2 + $0x150] ss:$8 sps:$4 sm:$0xff]  }
 0x1a7   :  { %v14421_v3 = vcombine.low %v1454_v0, %v1454_v0  ;;  %v17556_v5 = vld [vmem:[%s24151_s2 + $0x1c8] ss:$16 sps:$4 sm:$0xff]  }
 0x1a8   :  { %v679_v7 = vpack.c.bf16 %v16836_v4, %v16833_v62  ;;  %v19132_v8 = vpack.c.bf16 %v16772_v6, %v16769_v2  ;;  %v17529_v62 = vld [vmem:[#allocation2 + $0x140] ss:$8 sps:$4 sm:$0xff]   ;;  %v14422_v2 = vcombine.high %v1454_v0, %v1454_v0  ;;  %v17558_v4 = vld [vmem:[%s24151_s2 + $0x1cc] ss:$16 sps:$4 sm:$0xff]  }
 0x1a9   :  { %v17561_v6 = vld [vmem:[%s24151_s2 + $0x1ec] ss:$16 sps:$4 sm:$0xff]  }
 0x1aa   :  { %v16837_v11 = vpop.f32.mrb[28].mxu1  ;;  %14357 = vmatmul.mubr.msk.bf16.gmra.mrb[56].mxu0 %vm826_vm0, %v679_v7  ;;  %14365 = vmatmul.mubr.msk.bf16.gmra.mrb[56].mxu1 %vm826_vm0, %v679_v7  ;;  %v16773_v13 = vpop.f32.mrb[28].mxu0  ;;  %v17559_v7 = vld [vmem:[%s24151_s2 + $0x1e8] ss:$16 sps:$4 sm:$0xff]  }
 0x1ab   :  { %v16838_v12 = vpop.f32.mrb[29].mxu1  ;;  %953 = vmatprep.mubr.bf16.mxu0 %v24165_v10  ;;  %1064 = vmatprep.mubr.bf16.mxu1 %v24165_v10  ;;  %v16774_v16 = vpop.f32.mrb[29].mxu0 }
 0x1ac   :  { %v16839_v14 = vadd.f32 %v16838_v12, %v16837_v11  ;;  %v16840_v15 = vpop.f32.mrb[30].mxu1  ;;  %v19138_v18 = vadd.f32 %v16774_v16, %v16773_v13  ;;  %v16776_v19 = vpop.f32.mrb[30].mxu0  ;;  %v17562_v11 = vld [vmem:[%s24151_s2 + $0x208] ss:$16 sps:$4 sm:$0xff]   ;;  %v17565_v12 = vld [vmem:[%s24151_s2 + $0x220] ss:$16 sps:$4 sm:$0xff]  }
 0x1ad   :  { %v16841_v17 = vpop.f32.mrb[31].mxu1  ;;  %v16777_v21 = vpop.f32.mrb[31].mxu0  ;;  %v17567_v13 = vld [vmem:[%s24151_s2 + $0x224] ss:$16 sps:$4 sm:$0xff]   ;;  %v17568_v15 = vld [vmem:[%s24151_s2 + $0x228] ss:$16 sps:$4 sm:$0xff]  }
 0x1ae   :  { %v680_v20 = vpack.c.bf16 %v16839_v14, %v16839_v14  ;;  %v459_v36 = vpack.c.bf16 %v19138_v18, %v19138_v18  ;;  %v17570_v14 = vld [vmem:[%s24151_s2 + $0x22c] ss:$16 sps:$4 sm:$0xff]  }
 0x1b2   :  { %14358 = vmatmul.mubr.msk.bf16.gmra.mrb[60].mxu0 %vm826_vm0, %v680_v20  ;;  %14366 = vmatmul.mubr.msk.bf16.gmra.mrb[60].mxu1 %vm826_vm0, %v680_v20 }
 0x1b3   :  { %1249 = vmatprep.mubr.bf16.mxu0 %v24165_v10  ;;  %1360 = vmatprep.mubr.bf16.mxu1 %v24165_v10 }
 0x1ba   :  { %14391 = vmatmul.mubr.msk.bf16.vlgmr.msra.gmra.mrb[32].mxu0 %vm826_vm0, %v19039_v30  ;;  %14399 = vmatmul.mubr.msk.bf16.vlgmr.msra.gmra.mrb[32].mxu1 %vm826_vm0, %v19039_v30  ;;  %v18533_v30 = vld [vmem:[%s24149_s0 + $0x50] sm:$0xff]  }
 0x1bb   :  { %16844 = vmatpush3.bf16.msra.mxu0 %v18530_v22  ;;  %1259 = vmatprep.mubr.bf16.mxu0 %v24165_v10 }
 0x1bc   :  { %1370 = vmatprep.mubr.bf16.mxu1 %v24165_v10  ;;  %16845 = vmatprep.subr.bf16.mxu0 %v18531_v23 }
 0x1bd   :  { %1917 = vmatpush1.bf16.msra.mxu1 %v17547_v46 }
 0x1be   :  { %1918 = vmatprep.subr.bf16.mxu1 %v17552_v49 }
 0x1bf   :  { %16846 = vmatpush3.bf16.msra.mxu0 %v18532_v24 }
 0x1c0   :  { %16847 = vmatprep.subr.bf16.mxu0 %v18533_v30 }
 0x1c1   :  { %1919 = vmatpush1.bf16.msra.mxu1 %v17550_v53 }
 0x1c2   :  { %14392 = vmatmul.mubr.msk.bf16.gmra.mrb[36].mxu0 %vm826_vm0, %v19066_v51  ;;  %14400 = vmatmul.mubr.msk.bf16.gmra.mrb[36].mxu1 %vm826_vm0, %v19066_v51  ;;  %v18537_v51 = vld [vmem:[%s24149_s0 + $0x60] sm:$0xff]  }
 0x1c3   :  { %1269 = vmatprep.mubr.bf16.mxu0 %v24165_v10  ;;  %1380 = vmatprep.mubr.bf16.mxu1 %v24165_v10 }
 0x1c4   :  { %16848 = vmatpush3.bf16.msra.mxu0 %v18534_v25  ;;  %1920 = vmatprep.subr.bf16.mxu1 %v17558_v4 }
 0x1c5   :  { %16849 = vmatprep.subr.bf16.mxu0 %v18535_v26  ;;  %1921 = vmatpush1.bf16.msra.mxu1 %v17556_v5 }
 0x1c6   :  { %1922 = vmatprep.subr.bf16.mxu1 %v17561_v6 }
 0x1c8   :  { %16850 = vmatpush3.bf16.msra.mxu0 %v18536_v27 }
 0x1c9   :  { %16851 = vmatprep.subr.bf16.mxu0 %v18537_v51  ;;  %1923 = vmatpush1.bf16.msra.mxu1 %v17559_v7 }
 0x1ca   :  { %14393 = vmatmul.mubr.msk.bf16.gmra.mrb[40].mxu0 %vm826_vm0, %v19096_v9  ;;  %14401 = vmatmul.mubr.msk.bf16.gmra.mrb[40].mxu1 %vm826_vm0, %v19096_v9  ;;  %v18541_v9 = vld [vmem:[%s24149_s0 + $0x70] sm:$0xff]  }
 0x1cb   :  { %1279 = vmatprep.mubr.bf16.mxu0 %v24165_v10  ;;  %1390 = vmatprep.mubr.bf16.mxu1 %v24165_v10 }
 0x1cc   :  { %16852 = vmatpush3.bf16.msra.mxu0 %v18538_v29 }
 0x1cd   :  { %16853 = vmatprep.subr.bf16.mxu0 %v18539_v31 }
 0x1d0   :  { %16854 = vmatpush3.bf16.msra.mxu0 %v18540_v32 }
 0x1d1   :  { %16855 = vmatprep.subr.bf16.mxu0 %v18541_v9 }
 0x1d2   :  { %14394 = vmatmul.mubr.msk.bf16.gmra.mrb[44].mxu0 %vm826_vm0, %v19114_v28  ;;  %14402 = vmatmul.mubr.msk.bf16.gmra.mrb[44].mxu1 %vm826_vm0, %v19114_v28  ;;  %v17514_v28 = vld [vmem:[#allocation2 + $0xf4] ss:$8 sps:$4 sm:$0xff]  }
 0x1d3   :  { %1289 = vmatprep.mubr.bf16.mxu0 %v24165_v10  ;;  %1400 = vmatprep.mubr.bf16.mxu1 %v24165_v10 }
 0x1d4   :  { %16856 = vmatpush3.bf16.msra.mxu0 %v18542_v33 }
 0x1d5   :  { %16857 = vmatprep.subr.bf16.mxu0 %v18543_v34 }
 0x1d8   :  { %16858 = vmatpush3.bf16.msra.mxu0 %v18544_v35 }
 0x1d9   :  { %1805 = vmatprep.subr.bf16.mxu0 %v17537_v44 }
 0x1da   :  { %14395 = vmatmul.mubr.msk.bf16.gmra.mrb[48].mxu0 %vm826_vm0, %v19120_v43  ;;  %14403 = vmatmul.mubr.msk.bf16.gmra.mrb[48].mxu1 %vm826_vm0, %v19120_v43  ;;  %v17535_v43 = vld [vmem:[%s24151_s2 + $0x180] ss:$16 sps:$4 sm:$0xff]  }
 0x1db   :  { %1299 = vmatprep.mubr.bf16.mxu0 %v24165_v10  ;;  %1410 = vmatprep.mubr.bf16.mxu1 %v24165_v10 }
 0x1e2   :  { %14396 = vmatmul.mubr.msk.bf16.gmra.mrb[52].mxu0 %vm826_vm0, %v19126_v58  ;;  %14404 = vmatmul.mubr.msk.bf16.gmra.mrb[52].mxu1 %vm826_vm0, %v19126_v58  ;;  %v17555_v58 = vld [vmem:[%s24151_s2 + $0x204] ss:$16 sps:$4 sm:$0xff]  }
 0x1e3   :  { %1309 = vmatprep.mubr.bf16.mxu0 %v24165_v10  ;;  %1420 = vmatprep.mubr.bf16.mxu1 %v24165_v10 }
 0x1ea   :  { %14397 = vmatmul.mubr.msk.bf16.gmra.mrb[56].mxu0 %vm826_vm0, %v19132_v8  ;;  %14405 = vmatmul.mubr.msk.bf16.gmra.mrb[56].mxu1 %vm826_vm0, %v19132_v8  ;;  %v17564_v8 = vld [vmem:[%s24151_s2 + $0x20c] ss:$16 sps:$4 sm:$0xff]  }
 0x1eb   :  { %1319 = vmatprep.mubr.bf16.mxu0 %v24165_v10  ;;  %1430 = vmatprep.mubr.bf16.mxu1 %v24165_v10 }
 0x1ec   :  { %1924 = vmatprep.subr.bf16.mxu1 %v17564_v8 }
 0x1ed   :  { %1925 = vmatpush1.bf16.msra.mxu1 %v17562_v11 }
 0x1ee   :  { %1926 = vmatprep.subr.bf16.mxu1 %v17570_v14 }
 0x1f1   :  { %1927 = vmatpush1.bf16.msra.mxu1 %v17568_v15 }
 0x1f2   :  { %14398 = vmatmul.mubr.msk.bf16.gmra.mrb[64].mxu0 %vm826_vm0, %v459_v36  ;;  %14406 = vmatmul.mubr.msk.bf16.gmra.mrb[64].mxu1 %vm826_vm0, %v459_v36 }
 0x1f3   :  { %1564 = vmatprep.mubr.bf16.mxu0 %v17514_v28  ;;  %1948 = vmatprep.mubr.bf16.mxu1 %v24165_v10 }
 0x1fa   :  { %1565 = vmatmul.mubr.bf16.vlgmr.msra.gmra.mrb[68].mxu0 %v17512_v37 }
 0x1fb   :  { %1572 = vmatprep.mubr.bf16.mxu0 %v17515_v38  ;;  %1806 = vmatpush1.bf16.msra.mxu0 %v17535_v43 }
 0x1fc   :  { %1807 = vmatprep.subr.bf16.mxu0 %v17540_v45 }
 0x1ff   :  { %1808 = vmatpush1.bf16.msra.mxu0 %v17538_v47 }
 0x200   :  { %1809 = vmatprep.subr.bf16.mxu0 %v17543_v50 }
 0x202   :  { %1573 = vmatmul.mubr.bf16.gmra.mrb[72].mxu0 %v17517_v39 }
 0x203   :  { %1580 = vmatprep.mubr.bf16.mxu0 %v17518_v40  ;;  %1810 = vmatpush1.bf16.msra.mxu0 %v17541_v55 }
 0x204   :  { %1811 = vmatprep.subr.bf16.mxu0 %v17546_v56 }
 0x207   :  { %1812 = vmatpush1.bf16.msra.mxu0 %v17544_v57 }
 0x208   :  { %1813 = vmatprep.subr.bf16.mxu0 %v17555_v58 }
 0x20a   :  { %1581 = vmatmul.mubr.bf16.gmra.mrb[76].mxu0 %v17520_v41 }
 0x20b   :  { %1588 = vmatprep.mubr.bf16.mxu0 %v17521_v42  ;;  %1814 = vmatpush1.bf16.msra.mxu0 %v17553_v61 }
 0x20c   :  { %1815 = vmatprep.subr.bf16.mxu0 %v17567_v13 }
 0x20f   :  { %1816 = vmatpush1.bf16.msra.mxu0 %v17565_v12 }
 0x212   :  { %1589 = vmatmul.mubr.bf16.gmra.mrb[80].mxu0 %v17523_v52 }
 0x213   :  { %1596 = vmatprep.mubr.bf16.mxu0 %v17524_v54 }
 0x21a   :  { %1597 = vmatmul.mubr.bf16.gmra.mrb[84].mxu0 %v17526_v59 }
 0x21b   :  { %1604 = vmatprep.mubr.bf16.mxu0 %v17527_v60 }
 0x222   :  { %1605 = vmatmul.mubr.bf16.gmra.mrb[88].mxu0 %v17529_v62 }
 0x223   :  { %1612 = vmatprep.mubr.bf16.mxu0 %v17530_v63 }
 0x22a   :  { %1613 = vmatmul.mubr.bf16.gmra.mrb[92].mxu0 %v17532_v1 }
 0x22b   :  { %1620 = vmatprep.mubr.bf16.mxu0 %v14422_v2 }
 0x232   :  { %1621 = vmatmul.mubr.bf16.gmra.mrb[96].mxu0 %v14421_v3 }
 0x233   :  { %1837 = vmatprep.mubr.bf16.mxu0 %v24165_v10 }
 0x285   :  { %v955_v16 = vpop.f32.mrb[60].mxu0  ;;  %v1066_v17 = vpop.f32.mrb[60].mxu1 }
 0x286   :  { %v957_v18 = vpop.f32.mrb[61].mxu0  ;;  %v1068_v19 = vpop.f32.mrb[61].mxu1 }
 0x287   :  { %v959_v20 = vpop.f32.mrb[62].mxu0  ;;  %v1070_v21 = vpop.f32.mrb[62].mxu1 }
 0x288   :  { %v960_v22 = vpop.f32.mrb[63].mxu0  ;;  %v1071_v23 = vpop.f32.mrb[63].mxu1 }
 0x2c5   :  { %v1321_v24 = vpop.f32.mrb[64].mxu0  ;;  %v1432_v30 = vpop.f32.mrb[64].mxu1 }
 0x2c6   :  { %v19309_v25 = vadd.f32 %v1321_v24, %v955_v16  ;;  %v19311_v26 = vadd.f32 %v1432_v30, %v1066_v17  ;;  %v1323_v27 = vpop.f32.mrb[65].mxu0  ;;  %v1434_v51 = vpop.f32.mrb[65].mxu1 }
 0x2c7   :  { %v19313_v29 = vadd.f32 %v1323_v27, %v957_v18  ;;  %v19315_v31 = vadd.f32 %v1434_v51, %v1068_v19  ;;  %v1325_v32 = vpop.f32.mrb[66].mxu0  ;;  %v1436_v9 = vpop.f32.mrb[66].mxu1 }
 0x2c8   :  { %v1326_v33 = vpop.f32.mrb[67].mxu0  ;;  %v1437_v34 = vpop.f32.mrb[67].mxu1  ;;  %v2089_v32 = vlaneseq }
 0x2ca   :  { %v19349_v9 = vshrl.u32 %v2089_v32, 7 }
 0x2cc   :  { %24173 = vst [vmem:[#allocation17_spill] sm:$0xff] %v19349_v9  ;;  %v19352_v33 = vsub.s32 0, %v19349_v9  ;;  %v19355_v34 = vsub.s32 2, %v19349_v9 }
 0x2cd   :  { %v16859_v35 = vpop.f32.mrb[68].mxu0 }
 0x2ce   :  { %v16860_v28 = vpop.f32.mrb[69].mxu0 }
 0x2cf   :  { %v16861_v36 = vadd.f32 %v16860_v28, %v16859_v35  ;;  %v16862_v37 = vpop.f32.mrb[70].mxu0  ;;  %v2087_v35 = vld [vmem:[#allocation4] sm:$0xf]  ;;  %v19358_v28 = vsub.s32 1, %v19349_v9 }
 0x2d0   :  { %v16863_v38 = vpop.f32.mrb[71].mxu0 }
 0x2d1   :  { %v16864_v39 = vadd.f32 %v16863_v38, %v16862_v37  ;;  %24174 = vst [vmem:[#allocation18_spill] sm:$0xff] %v19358_v28  ;;  %v19364_v37 = vrot.slane %v2087_v35, %v19352_v33  ;;  %v19367_v38 = vrot.slane %v2087_v35, %v19355_v34 }
 0x2d3   :  { %v1628_v40 = vpack.c.bf16 %v16864_v39, %v16861_v36  ;;  %v19361_v36 = vsub.s32 3, %v19349_v9  ;;  %v19370_v39 = vrot.slane %v2087_v35, %v19358_v28  ;;  %v17762_v28 = vld [vmem:[%s24154_s5 + $0x8] ss:$16 sps:$4 sm:$0xff]  }
 0x2d5   :  { %v16865_v41 = vpop.f32.mrb[72].mxu0  ;;  %14471 = vmatmul.mubr.msk.bf16.vlgmr.msra.gmra.mrb[32].mxu0 %vm826_vm0, %v1628_v40  ;;  %14479 = vmatmul.mubr.msk.bf16.vlgmr.msra.gmra.mrb[32].mxu1 %vm826_vm0, %v1628_v40  ;;  %24175 = vst [vmem:[#allocation19_spill] sm:$0xff] %v19361_v36  ;;  %v19373_v40 = vrot.slane %v2087_v35, %v19361_v36  ;;  %v17759_v36 = vld [vmem:[%s24154_s5] ss:$16 sps:$4 sm:$0xff]  }
 0x2d6   :  { %v16866_v42 = vpop.f32.mrb[73].mxu0  ;;  %1847 = vmatprep.mubr.bf16.mxu0 %v24165_v10  ;;  %1958 = vmatprep.mubr.bf16.mxu1 %v24165_v10 }
 0x2d7   :  { %v16867_v43 = vadd.f32 %v16866_v42, %v16865_v41  ;;  %v16868_v44 = vpop.f32.mrb[74].mxu0 }
 0x2d8   :  { %v16869_v45 = vpop.f32.mrb[75].mxu0 }
 0x2d9   :  { %v16870_v46 = vadd.f32 %v16869_v45, %v16868_v44 }
 0x2db   :  { %v1629_v47 = vpack.c.bf16 %v16870_v46, %v16867_v43 }
 0x2dd   :  { %v16871_v48 = vpop.f32.mrb[76].mxu0  ;;  %14472 = vmatmul.mubr.msk.bf16.gmra.mrb[36].mxu0 %vm826_vm0, %v1629_v47  ;;  %14480 = vmatmul.mubr.msk.bf16.gmra.mrb[36].mxu1 %vm826_vm0, %v1629_v47 }
 0x2de   :  { %v16872_v49 = vpop.f32.mrb[77].mxu0  ;;  %1857 = vmatprep.mubr.bf16.mxu0 %v24165_v10  ;;  %1968 = vmatprep.mubr.bf16.mxu1 %v24165_v10 }
 0x2df   :  { %v16873_v50 = vadd.f32 %v16872_v49, %v16871_v48  ;;  %v16874_v52 = vpop.f32.mrb[78].mxu0 }
 0x2e0   :  { %v16875_v53 = vpop.f32.mrb[79].mxu0 }
 0x2e1   :  { %v16876_v54 = vadd.f32 %v16875_v53, %v16874_v52 }
 0x2e3   :  { %v1630_v55 = vpack.c.bf16 %v16876_v54, %v16873_v50 }
 0x2e5   :  { %v16877_v56 = vpop.f32.mrb[80].mxu0  ;;  %14473 = vmatmul.mubr.msk.bf16.gmra.mrb[40].mxu0 %vm826_vm0, %v1630_v55  ;;  %14481 = vmatmul.mubr.msk.bf16.gmra.mrb[40].mxu1 %vm826_vm0, %v1630_v55 }
 0x2e6   :  { %v16878_v57 = vpop.f32.mrb[81].mxu0  ;;  %1867 = vmatprep.mubr.bf16.mxu0 %v24165_v10  ;;  %1978 = vmatprep.mubr.bf16.mxu1 %v24165_v10 }
 0x2e7   :  { %v16879_v58 = vadd.f32 %v16878_v57, %v16877_v56  ;;  %v16880_v59 = vpop.f32.mrb[82].mxu0 }
 0x2e8   :  { %v16881_v60 = vpop.f32.mrb[83].mxu0 }
 0x2e9   :  { %v16882_v61 = vadd.f32 %v16881_v60, %v16880_v59 }
 0x2eb   :  { %v1631_v62 = vpack.c.bf16 %v16882_v61, %v16879_v58 }
 0x2ed   :  { %v16883_v63 = vpop.f32.mrb[84].mxu0  ;;  %14474 = vmatmul.mubr.msk.bf16.gmra.mrb[44].mxu0 %vm826_vm0, %v1631_v62  ;;  %14482 = vmatmul.mubr.msk.bf16.gmra.mrb[44].mxu1 %vm826_vm0, %v1631_v62 }
 0x2ee   :  { %v16884_v0 = vpop.f32.mrb[85].mxu0  ;;  %1877 = vmatprep.mubr.bf16.mxu0 %v24165_v10  ;;  %1988 = vmatprep.mubr.bf16.mxu1 %v24165_v10 }
 0x2ef   :  { %v16885_v1 = vadd.f32 %v16884_v0, %v16883_v63  ;;  %v16886_v2 = vpop.f32.mrb[86].mxu0 }
 0x2f0   :  { %v16887_v3 = vpop.f32.mrb[87].mxu0 }
 0x2f1   :  { %v16888_v4 = vadd.f32 %v16887_v3, %v16886_v2 }
 0x2f3   :  { %v1632_v5 = vpack.c.bf16 %v16888_v4, %v16885_v1 }
 0x2f5   :  { %v16889_v6 = vpop.f32.mrb[88].mxu0  ;;  %14475 = vmatmul.mubr.msk.bf16.gmra.mrb[48].mxu0 %vm826_vm0, %v1632_v5  ;;  %14483 = vmatmul.mubr.msk.bf16.gmra.mrb[48].mxu1 %vm826_vm0, %v1632_v5 }
 0x2f6   :  { %v16890_v7 = vpop.f32.mrb[89].mxu0  ;;  %1887 = vmatprep.mubr.bf16.mxu0 %v24165_v10  ;;  %1998 = vmatprep.mubr.bf16.mxu1 %v24165_v10 }
 0x2f7   :  { %v16891_v8 = vadd.f32 %v16890_v7, %v16889_v6  ;;  %v16892_v11 = vpop.f32.mrb[90].mxu0 }
 0x2f8   :  { %v16893_v12 = vpop.f32.mrb[91].mxu0 }
 0x2f9   :  { %v16894_v13 = vadd.f32 %v16893_v12, %v16892_v11 }
 0x2fb   :  { %v1633_v14 = vpack.c.bf16 %v16894_v13, %v16891_v8 }
 0x2fd   :  { %v16895_v15 = vpop.f32.mrb[92].mxu0  ;;  %14476 = vmatmul.mubr.msk.bf16.gmra.mrb[52].mxu0 %vm826_vm0, %v1633_v14  ;;  %14484 = vmatmul.mubr.msk.bf16.gmra.mrb[52].mxu1 %vm826_vm0, %v1633_v14 }
 0x2fe   :  { %v16896_v16 = vpop.f32.mrb[93].mxu0  ;;  %1897 = vmatprep.mubr.bf16.mxu0 %v24165_v10  ;;  %2008 = vmatprep.mubr.bf16.mxu1 %v24165_v10 }
 0x2ff   :  { %v16897_v17 = vadd.f32 %v16896_v16, %v16895_v15  ;;  %v16898_v18 = vpop.f32.mrb[94].mxu0 }
 0x300   :  { %v16899_v19 = vpop.f32.mrb[95].mxu0 }
 0x301   :  { %v16900_v20 = vadd.f32 %v16899_v19, %v16898_v18 }
 0x303   :  { %v1634_v21 = vpack.c.bf16 %v16900_v20, %v16897_v17 }
 0x305   :  { %v16901_v22 = vpop.f32.mrb[96].mxu0  ;;  %14477 = vmatmul.mubr.msk.bf16.gmra.mrb[56].mxu0 %vm826_vm0, %v1634_v21  ;;  %14485 = vmatmul.mubr.msk.bf16.gmra.mrb[56].mxu1 %vm826_vm0, %v1634_v21 }
 0x306   :  { %v16902_v23 = vpop.f32.mrb[97].mxu0  ;;  %1907 = vmatprep.mubr.bf16.mxu0 %v24165_v10  ;;  %2018 = vmatprep.mubr.bf16.mxu1 %v24165_v10 }
 0x307   :  { %v16903_v24 = vadd.f32 %v16902_v23, %v16901_v22  ;;  %v16904_v30 = vpop.f32.mrb[98].mxu0 }
 0x308   :  { %v16905_v27 = vpop.f32.mrb[99].mxu0 }
 0x309   :  { %v1635_v51 = vpack.c.bf16 %v16903_v24, %v16903_v24 }
 0x30d   :  { %14478 = vmatmul.mubr.msk.bf16.gmra.mrb[100].mxu0 %vm826_vm0, %v1635_v51  ;;  %14486 = vmatmul.mubr.msk.bf16.gmra.mrb[68].mxu1 %vm826_vm0, %v1635_v51 }
 0x30e   :  { %2344 = vmatprep.mubr.bf16.mxu1 %v24165_v10  ;;  %2660 = vmatprep.mubr.bf16.mxu0 %v24165_v10 }
 0x3a8   :  { %v1839_v41 = vpop.f32.mrb[32].mxu0  ;;  %v1950_v42 = vpop.f32.mrb[32].mxu1 }
 0x3a9   :  { %v2109_v43 = vadd.f32 %v19364_v37, %v1839_v41  ;;  %v2111_v44 = vadd.f32 %v19367_v38, %v1950_v42  ;;  %v1841_v45 = vpop.f32.mrb[33].mxu0  ;;  %v1952_v46 = vpop.f32.mrb[33].mxu1 }
 0x3aa   :  { %v2110_v47 = vadd.f32 %v19370_v39, %v1841_v45  ;;  %v2112_v48 = vadd.f32 %v19373_v40, %v1952_v46  ;;  %v1843_v49 = vpop.f32.mrb[34].mxu0  ;;  %v1954_v50 = vpop.f32.mrb[34].mxu1 }
 0x3ab   :  { %v2113_v52 = vadd.f32 %v19364_v37, %v1843_v49  ;;  %v2115_v53 = vadd.f32 %v19367_v38, %v1954_v50  ;;  %v1845_v54 = vpop.f32.mrb[35].mxu0  ;;  %v1956_v55 = vpop.f32.mrb[35].mxu1  ;;  %v2169_v58 = vmax.f32 %v2109_v43, 0.0  ;;  %v2171_v59 = vmax.f32 %v2111_v44, 0.0 }
 0x3ac   :  { %v2114_v56 = vadd.f32 %v19370_v39, %v1845_v54  ;;  %v2116_v57 = vadd.f32 %v19373_v40, %v1956_v55  ;;  %v2170_v62 = vmax.f32 %v2110_v47, 0.0  ;;  %v2172_v63 = vmax.f32 %v2112_v48, 0.0 }
 0x3ad   :  { %v2173_v60 = vmax.f32 %v2113_v52, 0.0  ;;  %v2175_v61 = vmax.f32 %v2115_v53, 0.0 }
 0x3ae   :  { %v2174_v0 = vmax.f32 %v2114_v56, 0.0  ;;  %v2176_v1 = vmax.f32 %v2116_v57, 0.0 }
 0x3af   :  { %v19383_v2 = vpack.c.bf16 %v2173_v60, %v2169_v58  ;;  %v19385_v3 = vpack.c.bf16 %v2175_v61, %v2171_v59 }
 0x3b0   :  { %v19387_v4 = vpack.c.bf16 %v2174_v0, %v2170_v62  ;;  %v1849_v5 = vpop.f32.mrb[36].mxu0  ;;  %v1960_v6 = vpop.f32.mrb[36].mxu1  ;;  %v19389_v7 = vpack.c.bf16 %v2176_v1, %v2172_v63 }
 0x3b1   :  { %v2117_v8 = vadd.f32 %v19364_v37, %v1849_v5  ;;  %v2119_v11 = vadd.f32 %v19367_v38, %v1960_v6  ;;  %v1851_v12 = vpop.f32.mrb[37].mxu0  ;;  %v1962_v13 = vpop.f32.mrb[37].mxu1 }
 0x3b2   :  { %v2118_v14 = vadd.f32 %v19370_v39, %v1851_v12  ;;  %v2120_v15 = vadd.f32 %v19373_v40, %v1962_v13  ;;  %v1853_v16 = vpop.f32.mrb[38].mxu0  ;;  %v1964_v17 = vpop.f32.mrb[38].mxu1  ;;  %2312 = vmatprep.subr.bf16.mxu1 %v19387_v4  ;;  %2628 = vmatprep.subr.bf16.mxu0 %v19387_v4 }
 0x3b3   :  { %v2121_v18 = vadd.f32 %v19364_v37, %v1853_v16  ;;  %v2123_v19 = vadd.f32 %v19367_v38, %v1964_v17  ;;  %v1855_v20 = vpop.f32.mrb[39].mxu0  ;;  %v1966_v21 = vpop.f32.mrb[39].mxu1  ;;  %2313 = vmatpush1.bf16.msra.mxu1 %v19383_v2  ;;  %2629 = vmatpush1.bf16.msra.mxu0 %v19383_v2  ;;  %v2177_v24 = vmax.f32 %v2117_v8, 0.0  ;;  %v2179_v30 = vmax.f32 %v2119_v11, 0.0 }
 0x3b4   :  { %v2122_v22 = vadd.f32 %v19370_v39, %v1855_v20  ;;  %v2124_v23 = vadd.f32 %v19373_v40, %v1966_v21  ;;  %v2178_v32 = vmax.f32 %v2118_v14, 0.0  ;;  %v2180_v35 = vmax.f32 %v2120_v15, 0.0 }
 0x3b5   :  { %v2181_v27 = vmax.f32 %v2121_v18, 0.0  ;;  %v2183_v51 = vmax.f32 %v2123_v19, 0.0 }
 0x3b6   :  { %v2182_v41 = vmax.f32 %v2122_v22, 0.0  ;;  %v2184_v42 = vmax.f32 %v2124_v23, 0.0 }
 0x3b7   :  { %v19403_v43 = vpack.c.bf16 %v2181_v27, %v2177_v24  ;;  %v19405_v44 = vpack.c.bf16 %v2183_v51, %v2179_v30 }
 0x3b8   :  { %v19407_v45 = vpack.c.bf16 %v2182_v41, %v2178_v32  ;;  %v1859_v46 = vpop.f32.mrb[40].mxu0  ;;  %v1970_v47 = vpop.f32.mrb[40].mxu1  ;;  %v19409_v48 = vpack.c.bf16 %v2184_v42, %v2180_v35 }
 0x3b9   :  { %v2125_v49 = vadd.f32 %v19364_v37, %v1859_v46  ;;  %v2127_v50 = vadd.f32 %v19367_v38, %v1970_v47  ;;  %v1861_v52 = vpop.f32.mrb[41].mxu0  ;;  %v1972_v53 = vpop.f32.mrb[41].mxu1 }
 0x3ba   :  { %v2126_v54 = vadd.f32 %v19370_v39, %v1861_v52  ;;  %v2128_v55 = vadd.f32 %v19373_v40, %v1972_v53  ;;  %v1863_v56 = vpop.f32.mrb[42].mxu0  ;;  %v1974_v57 = vpop.f32.mrb[42].mxu1  ;;  %2314 = vmatprep.subr.bf16.mxu1 %v19407_v45  ;;  %2630 = vmatprep.subr.bf16.mxu0 %v19407_v45 }
 0x3bb   :  { %v2129_v58 = vadd.f32 %v19364_v37, %v1863_v56  ;;  %v2131_v59 = vadd.f32 %v19367_v38, %v1974_v57  ;;  %v1865_v60 = vpop.f32.mrb[43].mxu0  ;;  %v1976_v61 = vpop.f32.mrb[43].mxu1  ;;  %2315 = vmatpush1.bf16.msra.mxu1 %v19403_v43  ;;  %2631 = vmatpush1.bf16.msra.mxu0 %v19403_v43  ;;  %v2185_v0 = vmax.f32 %v2125_v49, 0.0  ;;  %v2187_v1 = vmax.f32 %v2127_v50, 0.0 }
 0x3bc   :  { %v2130_v62 = vadd.f32 %v19370_v39, %v1865_v60  ;;  %v2132_v63 = vadd.f32 %v19373_v40, %v1976_v61  ;;  %v2186_v8 = vmax.f32 %v2126_v54, 0.0  ;;  %v2188_v11 = vmax.f32 %v2128_v55, 0.0 }
 0x3bd   :  { %v2189_v5 = vmax.f32 %v2129_v58, 0.0  ;;  %v2191_v6 = vmax.f32 %v2131_v59, 0.0 }
 0x3be   :  { %v2190_v12 = vmax.f32 %v2130_v62, 0.0  ;;  %v2192_v13 = vmax.f32 %v2132_v63, 0.0 }
 0x3bf   :  { %v19423_v14 = vpack.c.bf16 %v2189_v5, %v2185_v0  ;;  %v19425_v15 = vpack.c.bf16 %v2191_v6, %v2187_v1 }
 0x3c0   :  { %v19427_v16 = vpack.c.bf16 %v2190_v12, %v2186_v8  ;;  %v1869_v17 = vpop.f32.mrb[44].mxu0  ;;  %v1980_v18 = vpop.f32.mrb[44].mxu1  ;;  %v19429_v19 = vpack.c.bf16 %v2192_v13, %v2188_v11 }
 0x3c1   :  { %v2133_v20 = vadd.f32 %v19364_v37, %v1869_v17  ;;  %v2135_v21 = vadd.f32 %v19367_v38, %v1980_v18  ;;  %v1871_v22 = vpop.f32.mrb[45].mxu0  ;;  %v1982_v23 = vpop.f32.mrb[45].mxu1 }
 0x3c2   :  { %v2134_v24 = vadd.f32 %v19370_v39, %v1871_v22  ;;  %v2136_v30 = vadd.f32 %v19373_v40, %v1982_v23  ;;  %v1873_v27 = vpop.f32.mrb[46].mxu0  ;;  %v1984_v51 = vpop.f32.mrb[46].mxu1  ;;  %2316 = vmatprep.subr.bf16.mxu1 %v19427_v16  ;;  %2632 = vmatprep.subr.bf16.mxu0 %v19427_v16 }
 0x3c3   :  { %v2137_v32 = vadd.f32 %v19364_v37, %v1873_v27  ;;  %v2139_v35 = vadd.f32 %v19367_v38, %v1984_v51  ;;  %v1875_v41 = vpop.f32.mrb[47].mxu0  ;;  %v1986_v42 = vpop.f32.mrb[47].mxu1  ;;  %2317 = vmatpush1.bf16.msra.mxu1 %v19423_v14  ;;  %2633 = vmatpush1.bf16.msra.mxu0 %v19423_v14  ;;  %v2193_v49 = vmax.f32 %v2133_v20, 0.0  ;;  %v2195_v50 = vmax.f32 %v2135_v21, 0.0 }
 0x3c4   :  { %v2138_v46 = vadd.f32 %v19370_v39, %v1875_v41  ;;  %v2140_v47 = vadd.f32 %v19373_v40, %v1986_v42  ;;  %v2194_v54 = vmax.f32 %v2134_v24, 0.0  ;;  %v2196_v55 = vmax.f32 %v2136_v30, 0.0 }
 0x3c5   :  { %v2197_v52 = vmax.f32 %v2137_v32, 0.0  ;;  %v2199_v53 = vmax.f32 %v2139_v35, 0.0 }
 0x3c6   :  { %v2198_v56 = vmax.f32 %v2138_v46, 0.0  ;;  %v2200_v57 = vmax.f32 %v2140_v47, 0.0 }
 0x3c7   :  { %v19443_v58 = vpack.c.bf16 %v2197_v52, %v2193_v49  ;;  %v19445_v59 = vpack.c.bf16 %v2199_v53, %v2195_v50 }
 0x3c8   :  { %v19447_v60 = vpack.c.bf16 %v2198_v56, %v2194_v54  ;;  %v1879_v61 = vpop.f32.mrb[48].mxu0  ;;  %v1990_v62 = vpop.f32.mrb[48].mxu1  ;;  %v19449_v63 = vpack.c.bf16 %v2200_v57, %v2196_v55 }
 0x3c9   :  { %v2141_v0 = vadd.f32 %v19364_v37, %v1879_v61  ;;  %v2143_v1 = vadd.f32 %v19367_v38, %v1990_v62  ;;  %v1881_v5 = vpop.f32.mrb[49].mxu0  ;;  %v1992_v6 = vpop.f32.mrb[49].mxu1 }
 0x3ca   :  { %v2142_v8 = vadd.f32 %v19370_v39, %v1881_v5  ;;  %v2144_v11 = vadd.f32 %v19373_v40, %v1992_v6  ;;  %v1883_v12 = vpop.f32.mrb[50].mxu0  ;;  %v1994_v13 = vpop.f32.mrb[50].mxu1  ;;  %2318 = vmatprep.subr.bf16.mxu1 %v19447_v60  ;;  %2634 = vmatprep.subr.bf16.mxu0 %v19447_v60 }
 0x3cb   :  { %v2145_v17 = vadd.f32 %v19364_v37, %v1883_v12  ;;  %v2147_v18 = vadd.f32 %v19367_v38, %v1994_v13  ;;  %v1885_v20 = vpop.f32.mrb[51].mxu0  ;;  %v1996_v21 = vpop.f32.mrb[51].mxu1  ;;  %2319 = vmatpush1.bf16.msra.mxu1 %v19443_v58  ;;  %2635 = vmatpush1.bf16.msra.mxu0 %v19443_v58  ;;  %v2201_v24 = vmax.f32 %v2141_v0, 0.0  ;;  %v2203_v30 = vmax.f32 %v2143_v1, 0.0 }
 0x3cc   :  { %v2146_v22 = vadd.f32 %v19370_v39, %v1885_v20  ;;  %v2148_v23 = vadd.f32 %v19373_v40, %v1996_v21  ;;  %v2202_v32 = vmax.f32 %v2142_v8, 0.0  ;;  %v2204_v35 = vmax.f32 %v2144_v11, 0.0 }
 0x3cd   :  { %v2205_v27 = vmax.f32 %v2145_v17, 0.0  ;;  %v2207_v51 = vmax.f32 %v2147_v18, 0.0 }
 0x3ce   :  { %v2206_v41 = vmax.f32 %v2146_v22, 0.0  ;;  %v2208_v42 = vmax.f32 %v2148_v23, 0.0 }
 0x3cf   :  { %v19463_v46 = vpack.c.bf16 %v2205_v27, %v2201_v24  ;;  %v19465_v47 = vpack.c.bf16 %v2207_v51, %v2203_v30 }
 0x3d0   :  { %v19467_v49 = vpack.c.bf16 %v2206_v41, %v2202_v32  ;;  %v1889_v50 = vpop.f32.mrb[52].mxu0  ;;  %v2000_v52 = vpop.f32.mrb[52].mxu1  ;;  %v19469_v53 = vpack.c.bf16 %v2208_v42, %v2204_v35 }
 0x3d1   :  { %v2149_v54 = vadd.f32 %v19364_v37, %v1889_v50  ;;  %v2151_v55 = vadd.f32 %v19367_v38, %v2000_v52  ;;  %v1891_v56 = vpop.f32.mrb[53].mxu0  ;;  %v2002_v57 = vpop.f32.mrb[53].mxu1 }
 0x3d2   :  { %v2150_v61 = vadd.f32 %v19370_v39, %v1891_v56  ;;  %v2152_v62 = vadd.f32 %v19373_v40, %v2002_v57  ;;  %v1893_v0 = vpop.f32.mrb[54].mxu0  ;;  %v2004_v1 = vpop.f32.mrb[54].mxu1  ;;  %2320 = vmatprep.subr.bf16.mxu1 %v19467_v49  ;;  %2636 = vmatprep.subr.bf16.mxu0 %v19467_v49 }
 0x3d3   :  { %v2153_v5 = vadd.f32 %v19364_v37, %v1893_v0  ;;  %v2155_v6 = vadd.f32 %v19367_v38, %v2004_v1  ;;  %v1895_v8 = vpop.f32.mrb[55].mxu0  ;;  %v2006_v11 = vpop.f32.mrb[55].mxu1  ;;  %2321 = vmatpush1.bf16.msra.mxu1 %v19463_v46  ;;  %2637 = vmatpush1.bf16.msra.mxu0 %v19463_v46  ;;  %v2209_v17 = vmax.f32 %v2149_v54, 0.0  ;;  %v2211_v18 = vmax.f32 %v2151_v55, 0.0 }
 0x3d4   :  { %v2154_v12 = vadd.f32 %v19370_v39, %v1895_v8  ;;  %v2156_v13 = vadd.f32 %v19373_v40, %v2006_v11  ;;  %v2210_v22 = vmax.f32 %v2150_v61, 0.0  ;;  %v2212_v23 = vmax.f32 %v2152_v62, 0.0 }
 0x3d5   :  { %v2213_v20 = vmax.f32 %v2153_v5, 0.0  ;;  %v2215_v21 = vmax.f32 %v2155_v6, 0.0 }
 0x3d6   :  { %v2214_v24 = vmax.f32 %v2154_v12, 0.0  ;;  %v2216_v30 = vmax.f32 %v2156_v13, 0.0 }
 0x3d7   :  { %v19483_v27 = vpack.c.bf16 %v2213_v20, %v2209_v17  ;;  %v19485_v51 = vpack.c.bf16 %v2215_v21, %v2211_v18 }
 0x3d8   :  { %v19487_v32 = vpack.c.bf16 %v2214_v24, %v2210_v22  ;;  %v1899_v35 = vpop.f32.mrb[56].mxu0  ;;  %v2010_v41 = vpop.f32.mrb[56].mxu1  ;;  %v19489_v42 = vpack.c.bf16 %v2216_v30, %v2212_v23 }
 0x3d9   :  { %v2157_v50 = vadd.f32 %v19364_v37, %v1899_v35  ;;  %v2159_v52 = vadd.f32 %v19367_v38, %v2010_v41  ;;  %v1901_v54 = vpop.f32.mrb[57].mxu0  ;;  %v2012_v55 = vpop.f32.mrb[57].mxu1 }
 0x3da   :  { %v2158_v56 = vadd.f32 %v19370_v39, %v1901_v54  ;;  %v2160_v57 = vadd.f32 %v19373_v40, %v2012_v55  ;;  %v1903_v61 = vpop.f32.mrb[58].mxu0  ;;  %v2014_v62 = vpop.f32.mrb[58].mxu1  ;;  %2322 = vmatprep.subr.bf16.mxu1 %v19487_v32  ;;  %2638 = vmatprep.subr.bf16.mxu0 %v19487_v32 }
 0x3db   :  { %v2161_v0 = vadd.f32 %v19364_v37, %v1903_v61  ;;  %v2163_v1 = vadd.f32 %v19367_v38, %v2014_v62  ;;  %v1905_v5 = vpop.f32.mrb[59].mxu0  ;;  %v2016_v6 = vpop.f32.mrb[59].mxu1  ;;  %2323 = vmatpush1.bf16.msra.mxu1 %v19483_v27  ;;  %2639 = vmatpush1.bf16.msra.mxu0 %v19483_v27  ;;  %v2217_v12 = vmax.f32 %v2157_v50, 0.0  ;;  %v2219_v13 = vmax.f32 %v2159_v52, 0.0 }
 0x3dc   :  { %v2162_v8 = vadd.f32 %v19370_v39, %v1905_v5  ;;  %v2164_v11 = vadd.f32 %v19373_v40, %v2016_v6  ;;  %v2218_v20 = vmax.f32 %v2158_v56, 0.0  ;;  %v2220_v21 = vmax.f32 %v2160_v57, 0.0 }
 0x3dd   :  { %v2221_v17 = vmax.f32 %v2161_v0, 0.0  ;;  %v2223_v18 = vmax.f32 %v2163_v1, 0.0 }
 0x3de   :  { %v2222_v22 = vmax.f32 %v2162_v8, 0.0  ;;  %v2224_v23 = vmax.f32 %v2164_v11, 0.0 }
 0x3df   :  { %v19503_v24 = vpack.c.bf16 %v2221_v17, %v2217_v12  ;;  %v19505_v30 = vpack.c.bf16 %v2223_v18, %v2219_v13  ;;  %v17581_v12 = vld [vmem:[%s24154_s5 + $0x3c4] ss:$16 sps:$4 sm:$0xff]   ;;  %v19543_v13 = vld [vmem:[%s24153_s4 + $0x1c] sm:$0xff]  }
 0x3e0   :  { %v19507_v35 = vpack.c.bf16 %v2222_v22, %v2218_v20  ;;  %v1909_v41 = vpop.f32.mrb[100].mxu0  ;;  %v2020_v54 = vpop.f32.mrb[68].mxu1  ;;  %v19509_v55 = vpack.c.bf16 %v2224_v23, %v2220_v21  ;;  %v17579_v17 = vld [vmem:[%s24154_s5 + $0x3c0] ss:$16 sps:$4 sm:$0xff]   ;;  %v17587_v18 = vld [vmem:[%s24154_s5 + $0x3e4] ss:$16 sps:$4 sm:$0xff]  }
 0x3e1   :  { %v2083_v61 = vadd.f32 %v1909_v41, %v19309_v25  ;;  %v19513_v50 = vadd.f32 %v2020_v54, %v19311_v26  ;;  %v1911_v52 = vpop.f32.mrb[101].mxu0  ;;  %v2022_v56 = vpop.f32.mrb[69].mxu1  ;;  %v17585_v20 = vld [vmem:[%s24154_s5 + $0x3e0] ss:$16 sps:$4 sm:$0xff]   ;;  %v19568_v21 = vld [vmem:[%s24153_s4 + $0x8] sm:$0xff]  }
 0x3e2   :  { %v2084_v57 = vadd.f32 %v1911_v52, %v19313_v29  ;;  %v2086_v62 = vadd.f32 %v2022_v56, %v19315_v31  ;;  %v1913_v0 = vpop.f32.mrb[102].mxu0  ;;  %v2024_v1 = vpop.f32.mrb[70].mxu1  ;;  %2324 = vmatprep.subr.bf16.mxu1 %v19507_v35  ;;  %2640 = vmatprep.subr.bf16.mxu0 %v19507_v35  ;;  %v19573_v22 = vld [vmem:[%s24153_s4 + $0x24] sm:$0xff]   ;;  %v17591_v41 = vld [vmem:[%s24154_s5 + $0x400] ss:$16 sps:$4 sm:$0xff]  }
 0x3e3   :  { %v2165_v5 = vadd.f32 %v19364_v37, %v2083_v61  ;;  %v1914_v6 = vpop.f32.mrb[103].mxu0  ;;  %v2025_v8 = vpop.f32.mrb[71].mxu1  ;;  %2325 = vmatpush1.bf16.msra.mxu1 %v19503_v24  ;;  %2641 = vmatpush1.bf16.msra.mxu0 %v19503_v24  ;;  %v17593_v23 = vld [vmem:[%s24154_s5 + $0x404] ss:$16 sps:$4 sm:$0xff]   ;;  %v19602_v52 = vld [vmem:[%s24153_s4 + $0x2c] sm:$0xff]  }
 0x3e4   :  { %v2166_v25 = vadd.f32 %v19370_v39, %v2084_v57  ;;  %v19538_v39 = vld [vmem:[%s24153_s4] sm:$0xff]   ;;  %v19597_v61 = vld [vmem:[%s24153_s4 + $0x10] sm:$0xff]   ;;  %v2167_v57 = vadd.f32 %v19367_v38, %v19513_v50  ;;  %v2168_v0 = vadd.f32 %v19373_v40, %v2086_v62  ;;  %v19629_v50 = vld [vmem:[%s24153_s4 + $0x18] ss:$0 sps:$4 sm:$0xff]  }
 0x3e5   :  { %v2225_v26 = vmax.f32 %v2165_v5, 0.0  ;;  %v17599_v54 = vld [vmem:[%s24154_s5 + $0x424] ss:$16 sps:$4 sm:$0xff]   ;;  %v17597_v56 = vld [vmem:[%s24154_s5 + $0x420] ss:$16 sps:$4 sm:$0xff]  }
 0x3e6   :  { %v2226_v29 = vmax.f32 %v2166_v25, 0.0  ;;  %v17605_v1 = vld [vmem:[%s24154_s5 + $0x444] ss:$16 sps:$4 sm:$0xff]   ;;  %v17603_v38 = vld [vmem:[%s24154_s5 + $0x440] ss:$16 sps:$4 sm:$0xff]   ;;  %v2228_v40 = vmax.f32 %v2168_v0, 0.0 }
 0x3e7   :  { %v2257_v31 = vpack.c.bf16 %v2225_v26, %v2225_v26  ;;  %v2227_v62 = vmax.f32 %v2167_v57, 0.0  ;;  %v19634_v5 = vld [vmem:[%s24153_s4 + $0x34] ss:$0 sps:$4 sm:$0xff]   ;;  %v17609_v8 = vld [vmem:[%s24154_s5 + $0x460] ss:$16 sps:$4 sm:$0xff]  }
 0x3e8   :  { %v19523_v11 = vpack.c.bf16 %v2226_v29, %v2226_v29  ;;  %v17611_v6 = vld [vmem:[%s24154_s5 + $0x464] ss:$16 sps:$4 sm:$0xff]   ;;  %v19644_v25 = vpack.c.bf16 %v2228_v40, %v2228_v40  ;;  %v17645_v57 = vld [vmem:[%s24154_s5 + $0x520] ss:$16 sps:$4 sm:$0xff]   ;;  %v17584_v40 = vld [vmem:[%s24154_s5 + $0x3cc] ss:$16 sps:$4 sm:$0xff]  }
 0x3e9   :  { %v19529_v37 = vsel %vm2299_vm1, %v2257_v31, 0  ;;  %v2259_v26 = vpack.c.bf16 %v2227_v62, %v2227_v62  ;;  %v17617_v29 = vld [vmem:[%s24154_s5 + $0x484] ss:$16 sps:$4 sm:$0xff]   ;;  %v17615_v31 = vld [vmem:[%s24154_s5 + $0x480] ss:$16 sps:$4 sm:$0xff]  }
 0x3ea   :  { %14491 = vmatprep.subr.msk.bf16.mxu1 %vm2299_vm1, %v19523_v11  ;;  %14512 = vmatprep.subr.msk.bf16.mxu0 %vm2299_vm1, %v19523_v11  ;;  %v17653_v0 = vld [vmem:[%s24154_s5 + $0x544] ss:$16 sps:$4 sm:$0xff]   ;;  %v17582_v62 = vld [vmem:[%s24154_s5 + $0x3c8] ss:$16 sps:$4 sm:$0xff]  }
 0x3eb   :  { %2327 = vmatpush1.bf16.msra.mxu1 %v19529_v37  ;;  %2643 = vmatpush1.bf16.msra.mxu0 %v19529_v37 }
 0x3ec   :  { %2383 = vmatprep.subr.bf16.mxu1 %v19389_v7  ;;  %3519 = vmatprep.subr.bf16.mxu0 %v17581_v12  ;;  %v19661_v12 = vsel %vm2299_vm1, %v2259_v26, 0  ;;  %v17594_v26 = vld [vmem:[%s24154_s5 + $0x408] ss:$16 sps:$4 sm:$0xff]  }
 0x3ee   :  { %14492 = vmatmul.mubr.msk.bf16.vlgmr.msra.gmra.mrb[72].mxu1 %vm2286_vm2, %v19538_v39  ;;  %14513 = vmatmul.mubr.msk.bf16.vlgmr.msra.gmra.mrb[104].mxu0 %vm2286_vm2, %v19543_v13 }
 0x3ef   :  { %2384 = vmatpush1.bf16.msra.mxu1 %v19385_v3  ;;  %2354 = vmatprep.mubr.bf16.mxu1 %v24165_v10 }
 0x3f0   :  { %2385 = vmatprep.subr.bf16.mxu1 %v19409_v48  ;;  %2670 = vmatprep.mubr.bf16.mxu0 %v24165_v10 }
 0x3f1   :  { %3520 = vmatpush1.bf16.msra.mxu0 %v17579_v17  ;;  %v17623_v17 = vld [vmem:[%s24154_s5 + $0x4a4] ss:$16 sps:$4 sm:$0xff]  }
 0x3f2   :  { %3521 = vmatprep.subr.bf16.mxu0 %v17587_v18  ;;  %v17621_v18 = vld [vmem:[%s24154_s5 + $0x4a0] ss:$16 sps:$4 sm:$0xff]  }
 0x3f3   :  { %2386 = vmatpush1.bf16.msra.mxu1 %v19405_v44 }
 0x3f4   :  { %2387 = vmatprep.subr.bf16.mxu1 %v19429_v19 }
 0x3f5   :  { %3522 = vmatpush1.bf16.msra.mxu0 %v17585_v20  ;;  %v17629_v20 = vld [vmem:[%s24154_s5 + $0x4c4] ss:$16 sps:$4 sm:$0xff]  }
 0x3f6   :  { %14493 = vmatmul.mubr.msk.bf16.gmra.mrb[76].mxu1 %vm2286_vm2, %v19568_v21  ;;  %14514 = vmatmul.mubr.msk.bf16.gmra.mrb[108].mxu0 %vm2286_vm2, %v19573_v22 }
 0x3f7   :  { %2388 = vmatpush1.bf16.msra.mxu1 %v19425_v15  ;;  %2364 = vmatprep.mubr.bf16.mxu1 %v24165_v10 }
 0x3f8   :  { %2389 = vmatprep.subr.bf16.mxu1 %v19449_v63  ;;  %2680 = vmatprep.mubr.bf16.mxu0 %v24165_v10 }
 0x3f9   :  { %3523 = vmatprep.subr.bf16.mxu0 %v17593_v23  ;;  %v17627_v23 = vld [vmem:[%s24154_s5 + $0x4c0] ss:$16 sps:$4 sm:$0xff]  }
 0x3fa   :  { %3524 = vmatpush1.bf16.msra.mxu0 %v17591_v41  ;;  %v17633_v41 = vld [vmem:[%s24154_s5 + $0x4e0] ss:$16 sps:$4 sm:$0xff]  }
 0x3fb   :  { %2390 = vmatpush1.bf16.msra.mxu1 %v19445_v59  ;;  %3525 = vmatprep.subr.bf16.mxu0 %v17599_v54  ;;  %v17641_v54 = vld [vmem:[%s24154_s5 + $0x504] ss:$16 sps:$4 sm:$0xff]  }
 0x3fc   :  { %2391 = vmatprep.subr.bf16.mxu1 %v19469_v53 }
 0x3fe   :  { %14494 = vmatmul.mubr.msk.bf16.gmra.mrb[80].mxu1 %vm2286_vm2, %v19597_v61  ;;  %14515 = vmatmul.mubr.msk.bf16.gmra.mrb[112].mxu0 %vm2286_vm2, %v19602_v52 }
 0x3ff   :  { %2392 = vmatpush1.bf16.msra.mxu1 %v19465_v47  ;;  %2374 = vmatprep.mubr.bf16.mxu1 %v24165_v10 }
 0x400   :  { %2393 = vmatprep.subr.bf16.mxu1 %v19489_v42  ;;  %2690 = vmatprep.mubr.bf16.mxu0 %v24165_v10 }
 0x401   :  { %3526 = vmatpush1.bf16.msra.mxu0 %v17597_v56  ;;  %v17639_v56 = vld [vmem:[%s24154_s5 + $0x500] ss:$16 sps:$4 sm:$0xff]  }
 0x402   :  { %3527 = vmatprep.subr.bf16.mxu0 %v17605_v1  ;;  %v17651_v1 = vld [vmem:[%s24154_s5 + $0x540] ss:$16 sps:$4 sm:$0xff]  }
 0x403   :  { %2394 = vmatpush1.bf16.msra.mxu1 %v19485_v51 }
 0x404   :  { %2395 = vmatprep.subr.bf16.mxu1 %v19509_v55 }
 0x405   :  { %3528 = vmatpush1.bf16.msra.mxu0 %v17603_v38  ;;  %v17657_v38 = vld [vmem:[%s24154_s5 + $0x560] ss:$16 sps:$4 sm:$0xff]  }
 0x406   :  { %14495 = vmatmul.mubr.msk.bf16.gmra.mrb[84].mxu1 %vm2286_vm2, %v19629_v50  ;;  %14516 = vmatmul.mubr.msk.bf16.gmra.mrb[116].mxu0 %vm2286_vm2, %v19634_v5 }
 0x407   :  { %2396 = vmatpush1.bf16.msra.mxu1 %v19505_v30  ;;  %2415 = vmatprep.mubr.bf16.mxu1 %v24165_v10 }
 0x408   :  { %14496 = vmatprep.subr.msk.bf16.mxu1 %vm2299_vm1, %v19644_v25  ;;  %3529 = vmatprep.subr.bf16.mxu0 %v17611_v6  ;;  %v17588_v6 = vld [vmem:[%s24154_s5 + $0x3e8] ss:$16 sps:$4 sm:$0xff]  }
 0x409   :  { %3530 = vmatpush1.bf16.msra.mxu0 %v17609_v8  ;;  %v17596_v8 = vld [vmem:[%s24154_s5 + $0x40c] ss:$16 sps:$4 sm:$0xff]  }
 0x40a   :  { %3531 = vmatprep.subr.bf16.mxu0 %v17617_v29  ;;  %v17600_v29 = vld [vmem:[%s24154_s5 + $0x428] ss:$16 sps:$4 sm:$0xff]  }
 0x40b   :  { %2398 = vmatpush1.bf16.msra.mxu1 %v19661_v12 }
 0x40c   :  { %2699 = vmatprep.subr.bf16.mxu1 %v19389_v7 }
 0x40d   :  { %3532 = vmatpush1.bf16.msra.mxu0 %v17615_v31  ;;  %v17608_v31 = vld [vmem:[%s24154_s5 + $0x44c] ss:$16 sps:$4 sm:$0xff]  }
 0x40e   :  { %14497 = vmatmul.mubr.msk.bf16.vlgmr.msra.gmra.mrb[88].mxu1 %vm2286_vm2, %v19538_v39  ;;  %3533 = vmatprep.subr.bf16.mxu0 %v17623_v17  ;;  %v17635_v39 = vld [vmem:[%s24154_s5 + $0x4e4] ss:$16 sps:$4 sm:$0xff]   ;;  %v17606_v17 = vld [vmem:[%s24154_s5 + $0x448] ss:$16 sps:$4 sm:$0xff]  }
 0x40f   :  { %2700 = vmatpush1.bf16.msra.mxu1 %v19385_v3  ;;  %2425 = vmatprep.mubr.bf16.mxu1 %v24165_v10 }
 0x410   :  { %2701 = vmatprep.subr.bf16.mxu1 %v19409_v48 }
 0x411   :  { %3534 = vmatpush1.bf16.msra.mxu0 %v17621_v18  ;;  %v17612_v18 = vld [vmem:[%s24154_s5 + $0x468] ss:$16 sps:$4 sm:$0xff]  }
 0x412   :  { %3535 = vmatprep.subr.bf16.mxu0 %v17629_v20  ;;  %v17620_v20 = vld [vmem:[%s24154_s5 + $0x48c] ss:$16 sps:$4 sm:$0xff]  }
 0x413   :  { %2702 = vmatpush1.bf16.msra.mxu1 %v19405_v44 }
 0x414   :  { %2703 = vmatprep.subr.bf16.mxu1 %v19429_v19 }
 0x415   :  { %3536 = vmatpush1.bf16.msra.mxu0 %v17627_v23  ;;  %v17665_v23 = vld [vmem:[%s24154_s5 + $0x584] ss:$16 sps:$4 sm:$0xff]  }
 0x416   :  { %14498 = vmatmul.mubr.msk.bf16.gmra.mrb[92].mxu1 %vm2286_vm2, %v19568_v21  ;;  %3537 = vmatprep.subr.bf16.mxu0 %v17635_v39  ;;  %v17647_v21 = vld [vmem:[%s24154_s5 + $0x524] ss:$16 sps:$4 sm:$0xff]   ;;  %v17663_v39 = vld [vmem:[%s24154_s5 + $0x580] ss:$16 sps:$4 sm:$0xff]  }
 0x417   :  { %2704 = vmatpush1.bf16.msra.mxu1 %v19425_v15  ;;  %2435 = vmatprep.mubr.bf16.mxu1 %v24165_v10 }
 0x418   :  { %2705 = vmatprep.subr.bf16.mxu1 %v19449_v63 }
 0x419   :  { %3538 = vmatpush1.bf16.msra.mxu0 %v17633_v41  ;;  %v17626_v41 = vld [vmem:[%s24154_s5 + $0x4ac] ss:$16 sps:$4 sm:$0xff]  }
 0x41a   :  { %3539 = vmatprep.subr.bf16.mxu0 %v17641_v54  ;;  %v17669_v54 = vld [vmem:[%s24154_s5 + $0x5a0] ss:$16 sps:$4 sm:$0xff]  }
 0x41b   :  { %2706 = vmatpush1.bf16.msra.mxu1 %v19445_v59 }
 0x41c   :  { %2707 = vmatprep.subr.bf16.mxu1 %v19469_v53 }
 0x41d   :  { %3540 = vmatpush1.bf16.msra.mxu0 %v17639_v56  ;;  %v17671_v56 = vld [vmem:[%s24154_s5 + $0x5a4] ss:$16 sps:$4 sm:$0xff]  }
 0x41e   :  { %14499 = vmatmul.mubr.msk.bf16.gmra.mrb[96].mxu1 %vm2286_vm2, %v19597_v61  ;;  %3541 = vmatprep.subr.bf16.mxu0 %v17647_v21  ;;  %v17659_v61 = vld [vmem:[%s24154_s5 + $0x564] ss:$16 sps:$4 sm:$0xff]   ;;  %v17624_v21 = vld [vmem:[%s24154_s5 + $0x4a8] ss:$16 sps:$4 sm:$0xff]  }
 0x41f   :  { %2708 = vmatpush1.bf16.msra.mxu1 %v19465_v47  ;;  %2445 = vmatprep.mubr.bf16.mxu1 %v24165_v10 }
 0x420   :  { %2709 = vmatprep.subr.bf16.mxu1 %v19489_v42 }
 0x421   :  { %3542 = vmatpush1.bf16.msra.mxu0 %v17645_v57  ;;  %v17632_v57 = vld [vmem:[%s24154_s5 + $0x4cc] ss:$16 sps:$4 sm:$0xff]  }
 0x422   :  { %3543 = vmatprep.subr.bf16.mxu0 %v17653_v0  ;;  %v17630_v0 = vld [vmem:[%s24154_s5 + $0x4c8] ss:$16 sps:$4 sm:$0xff]  }
 0x423   :  { %2710 = vmatpush1.bf16.msra.mxu1 %v19485_v51 }
 0x424   :  { %2711 = vmatprep.subr.bf16.mxu1 %v19509_v55 }
 0x425   :  { %3544 = vmatpush1.bf16.msra.mxu0 %v17651_v1  ;;  %v17677_v1 = vld [vmem:[%s24154_s5 + $0x5c4] ss:$16 sps:$4 sm:$0xff]  }
 0x426   :  { %14500 = vmatmul.mubr.msk.bf16.gmra.mrb[100].mxu1 %vm2286_vm2, %v19629_v50  ;;  %3545 = vmatprep.subr.bf16.mxu0 %v17659_v61  ;;  %v17590_v50 = vld [vmem:[%s24154_s5 + $0x3ec] ss:$16 sps:$4 sm:$0xff]   ;;  %v17636_v61 = vld [vmem:[%s24154_s5 + $0x4e8] ss:$16 sps:$4 sm:$0xff]  }
 0x427   :  { %2712 = vmatpush1.bf16.msra.mxu1 %v19505_v30  ;;  %2731 = vmatprep.mubr.bf16.mxu1 %v24165_v10 }
 0x428   :  { %14517 = vmatprep.subr.msk.bf16.mxu1 %vm2299_vm1, %v19644_v25 }
 0x429   :  { %3546 = vmatpush1.bf16.msra.mxu0 %v17657_v38  ;;  %v17644_v38 = vld [vmem:[%s24154_s5 + $0x50c] ss:$16 sps:$4 sm:$0xff]  }
 0x42a   :  { %3547 = vmatprep.subr.bf16.mxu0 %v17665_v23 }
 0x42b   :  { %2714 = vmatpush1.bf16.msra.mxu1 %v19661_v12 }
 0x42c   :  { %3661 = vmatprep.subr.bf16.mxu1 %v17584_v40  ;;  %v17642_v40 = vld [vmem:[%s24154_s5 + $0x508] ss:$16 sps:$4 sm:$0xff]  }
 0x42d   :  { %3548 = vmatpush1.bf16.msra.mxu0 %v17663_v39 }
 0x42e   :  { %14518 = vmatmul.mubr.msk.bf16.vlgmr.msra.gmra.mrb[104].mxu1 %vm2286_vm2, %v19543_v13  ;;  %v17602_v13 = vld [vmem:[%s24154_s5 + $0x42c] ss:$16 sps:$4 sm:$0xff]   ;;  %3549 = vmatprep.subr.bf16.mxu0 %v17671_v56 }
 0x42f   :  { %2741 = vmatprep.mubr.bf16.mxu1 %v24165_v10  ;;  %3662 = vmatpush1.bf16.msra.mxu1 %v17582_v62  ;;  %v17650_v62 = vld [vmem:[%s24154_s5 + $0x52c] ss:$16 sps:$4 sm:$0xff]  }
 0x430   :  { %3663 = vmatprep.subr.bf16.mxu1 %v17590_v50  ;;  %v17648_v50 = vld [vmem:[%s24154_s5 + $0x528] ss:$16 sps:$4 sm:$0xff]  }
 0x431   :  { %3550 = vmatpush1.bf16.msra.mxu0 %v17669_v54 }
 0x432   :  { %3590 = vmatprep.subr.bf16.mxu0 %v17677_v1 }
 0x433   :  { %3664 = vmatpush1.bf16.msra.mxu1 %v17588_v6  ;;  %v17656_v6 = vld [vmem:[%s24154_s5 + $0x54c] ss:$16 sps:$4 sm:$0xff]  }
 0x434   :  { %3665 = vmatprep.subr.bf16.mxu1 %v17596_v8  ;;  %v17654_v8 = vld [vmem:[%s24154_s5 + $0x548] ss:$16 sps:$4 sm:$0xff]  }
 0x436   :  { %14519 = vmatmul.mubr.msk.bf16.gmra.mrb[108].mxu1 %vm2286_vm2, %v19573_v22  ;;  %v17614_v22 = vld [vmem:[%s24154_s5 + $0x46c] ss:$16 sps:$4 sm:$0xff]  }
 0x437   :  { %2751 = vmatprep.mubr.bf16.mxu1 %v24165_v10  ;;  %3666 = vmatpush1.bf16.msra.mxu1 %v17594_v26  ;;  %v17662_v26 = vld [vmem:[%s24154_s5 + $0x56c] ss:$16 sps:$4 sm:$0xff]  }
 0x438   :  { %3667 = vmatprep.subr.bf16.mxu1 %v17602_v13  ;;  %v17660_v13 = vld [vmem:[%s24154_s5 + $0x568] ss:$16 sps:$4 sm:$0xff]  }
 0x43b   :  { %3668 = vmatpush1.bf16.msra.mxu1 %v17600_v29  ;;  %v17668_v29 = vld [vmem:[%s24154_s5 + $0x58c] ss:$16 sps:$4 sm:$0xff]  }
 0x43c   :  { %3669 = vmatprep.subr.bf16.mxu1 %v17608_v31  ;;  %v17666_v31 = vld [vmem:[%s24154_s5 + $0x588] ss:$16 sps:$4 sm:$0xff]  }
 0x43e   :  { %14520 = vmatmul.mubr.msk.bf16.gmra.mrb[112].mxu1 %vm2286_vm2, %v19602_v52  ;;  %v17618_v52 = vld [vmem:[%s24154_s5 + $0x488] ss:$16 sps:$4 sm:$0xff]  }
 0x43f   :  { %2761 = vmatprep.mubr.bf16.mxu1 %v24165_v10  ;;  %3670 = vmatpush1.bf16.msra.mxu1 %v17606_v17  ;;  %v17674_v17 = vld [vmem:[%s24154_s5 + $0x5ac] ss:$16 sps:$4 sm:$0xff]  }
 0x440   :  { %3671 = vmatprep.subr.bf16.mxu1 %v17614_v22  ;;  %v17672_v22 = vld [vmem:[%s24154_s5 + $0x5a8] ss:$16 sps:$4 sm:$0xff]  }
 0x443   :  { %3672 = vmatpush1.bf16.msra.mxu1 %v17612_v18  ;;  %v17680_v18 = vld [vmem:[%s24154_s5 + $0x5cc] ss:$16 sps:$4 sm:$0xff]  }
 0x444   :  { %3673 = vmatprep.subr.bf16.mxu1 %v17620_v20 }
 0x446   :  { %14521 = vmatmul.mubr.msk.bf16.gmra.mrb[116].mxu1 %vm2286_vm2, %v19634_v5  ;;  %v17638_v5 = vld [vmem:[%s24154_s5 + $0x4ec] ss:$16 sps:$4 sm:$0xff]  }
 0x447   :  { %3674 = vmatpush1.bf16.msra.mxu1 %v17618_v52 }
 0x448   :  { %3675 = vmatprep.subr.bf16.mxu1 %v17626_v41 }
 0x44b   :  { %3676 = vmatpush1.bf16.msra.mxu1 %v17624_v21 }
 0x44c   :  { %3677 = vmatprep.subr.bf16.mxu1 %v17632_v57 }
 0x44f   :  { %3678 = vmatpush1.bf16.msra.mxu1 %v17630_v0 }
 0x450   :  { %3679 = vmatprep.subr.bf16.mxu1 %v17638_v5 }
 0x453   :  { %3680 = vmatpush1.bf16.msra.mxu1 %v17636_v61  ;;  %v17675_v61 = vld [vmem:[%s24154_s5 + $0x5c0] ss:$16 sps:$4 sm:$0xff]  }
 0x454   :  { %3681 = vmatprep.subr.bf16.mxu1 %v17644_v38  ;;  %v17678_v38 = vld [vmem:[%s24154_s5 + $0x5c8] ss:$16 sps:$4 sm:$0xff]  }
 0x457   :  { %3682 = vmatpush1.bf16.msra.mxu1 %v17642_v40  ;;  %v17683_v40 = vld [vmem:[%s24154_s5 + $0x5e4] ss:$16 sps:$4 sm:$0xff]  }
 0x458   :  { %3683 = vmatprep.subr.bf16.mxu1 %v17650_v62  ;;  %v17686_v62 = vld [vmem:[%s24154_s5 + $0x5ec] ss:$16 sps:$4 sm:$0xff]  }
 0x45b   :  { %3684 = vmatpush1.bf16.msra.mxu1 %v17648_v50 }
 0x45c   :  { %3685 = vmatprep.subr.bf16.mxu1 %v17656_v6  ;;  %v17681_v6 = vld [vmem:[%s24154_s5 + $0x5e0] ss:$16 sps:$4 sm:$0xff]  }
 0x45f   :  { %3686 = vmatpush1.bf16.msra.mxu1 %v17654_v8  ;;  %v17684_v8 = vld [vmem:[%s24154_s5 + $0x5e8] ss:$16 sps:$4 sm:$0xff]  }
 0x460   :  { %3687 = vmatprep.subr.bf16.mxu1 %v17662_v26 }
 0x463   :  { %3688 = vmatpush1.bf16.msra.mxu1 %v17660_v13 }
 0x464   :  { %3689 = vmatprep.subr.bf16.mxu1 %v17668_v29  ;;  %v17689_v29 = vld [vmem:[%s24154_s5 + $0x604] ss:$16 sps:$4 sm:$0xff]  }
 0x467   :  { %3690 = vmatpush1.bf16.msra.mxu1 %v17666_v31  ;;  %v17692_v31 = vld [vmem:[%s24154_s5 + $0x60c] ss:$16 sps:$4 sm:$0xff]  }
 0x468   :  { %3691 = vmatprep.subr.bf16.mxu1 %v17674_v17 }
 0x46b   :  { %3692 = vmatpush1.bf16.msra.mxu1 %v17672_v22 }
 0x46c   :  { %3732 = vmatprep.subr.bf16.mxu1 %v17680_v18 }
 0x4c1   :  { %v2346_v20 = vpop.f32.mrb[72].mxu1  ;;  %v2662_v23 = vpop.f32.mrb[104].mxu0 }
 0x4c2   :  { %v2348_v52 = vpop.f32.mrb[73].mxu1  ;;  %v2664_v39 = vpop.f32.mrb[105].mxu0 }
 0x4c3   :  { %v2350_v41 = vpop.f32.mrb[74].mxu1  ;;  %v2666_v54 = vpop.f32.mrb[106].mxu0 }
 0x4c4   :  { %v19860_v56 = vpack.c.bf16 %v2350_v41, %v2346_v20  ;;  %v2352_v21 = vpop.f32.mrb[75].mxu1  ;;  %v2770_v57 = vpack.c.bf16 %v2666_v54, %v2662_v23  ;;  %v2668_v0 = vpop.f32.mrb[107].mxu0  ;;  %v17687_v54 = vld [vmem:[%s24154_s5 + $0x600] ss:$16 sps:$4 sm:$0xff]  }
 0x4c5   :  { %v19862_v5 = vpack.c.bf16 %v2352_v21, %v2348_v52  ;;  %v2771_v1 = vpack.c.bf16 %v2668_v0, %v2664_v39  ;;  %v17690_v21 = vld [vmem:[%s24154_s5 + $0x608] ss:$16 sps:$4 sm:$0xff]   ;;  %v17695_v0 = vld [vmem:[%s24154_s5 + $0x624] ss:$16 sps:$4 sm:$0xff]  }
 0x4c7   :  { %3551 = vmatprep.mubr.bf16.mxu0 %v2771_v1  ;;  %3693 = vmatprep.mubr.bf16.mxu1 %v2771_v1  ;;  %v17698_v1 = vld [vmem:[%s24154_s5 + $0x62c] ss:$16 sps:$4 sm:$0xff]  }
 0x4c8   :  { %3552 = vmatmul.mubr.bf16.vlgmr.msra.gmra.mrb[120].mxu0 %v2770_v57  ;;  %3694 = vmatmul.mubr.bf16.vlgmr.msra.gmra.mrb[120].mxu1 %v2770_v57 }
 0x4c9   :  { %v2356_v50 = vpop.f32.mrb[76].mxu1  ;;  %3591 = vmatpush1.bf16.msra.mxu0 %v17675_v61  ;;  %3733 = vmatpush1.bf16.msra.mxu1 %v17678_v38  ;;  %v2672_v26 = vpop.f32.mrb[108].mxu0  ;;  %v17693_v38 = vld [vmem:[%s24154_s5 + $0x620] ss:$16 sps:$4 sm:$0xff]  }
 0x4ca   :  { %v2358_v13 = vpop.f32.mrb[77].mxu1  ;;  %3592 = vmatprep.subr.bf16.mxu0 %v17683_v40  ;;  %3734 = vmatprep.subr.bf16.mxu1 %v17686_v62  ;;  %v2674_v17 = vpop.f32.mrb[109].mxu0  ;;  %v17696_v40 = vld [vmem:[%s24154_s5 + $0x628] ss:$16 sps:$4 sm:$0xff]  }
 0x4cb   :  { %v2360_v22 = vpop.f32.mrb[78].mxu1  ;;  %v2676_v18 = vpop.f32.mrb[110].mxu0 }
 0x4cc   :  { %v19888_v20 = vpack.c.bf16 %v2360_v22, %v2356_v50  ;;  %v2362_v23 = vpop.f32.mrb[79].mxu1  ;;  %v2774_v52 = vpack.c.bf16 %v2676_v18, %v2672_v26  ;;  %v2678_v39 = vpop.f32.mrb[111].mxu0 }
 0x4cd   :  { %v19890_v41 = vpack.c.bf16 %v2362_v23, %v2358_v13  ;;  %3593 = vmatpush1.bf16.msra.mxu0 %v17681_v6  ;;  %3735 = vmatpush1.bf16.msra.mxu1 %v17684_v8  ;;  %v2775_v57 = vpack.c.bf16 %v2678_v39, %v2674_v17  ;;  %v17701_v6 = vld [vmem:[%s24154_s5 + $0x644] ss:$16 sps:$4 sm:$0xff]   ;;  %v17704_v8 = vld [vmem:[%s24154_s5 + $0x64c] ss:$16 sps:$4 sm:$0xff]   ;;  %v17702_v39 = vld [vmem:[%s24154_s5 + $0x648] ss:$16 sps:$4 sm:$0xff]  }
 0x4ce   :  { %3594 = vmatprep.subr.bf16.mxu0 %v17689_v29  ;;  %3736 = vmatprep.subr.bf16.mxu1 %v17692_v31 }
 0x4cf   :  { %3561 = vmatprep.mubr.bf16.mxu0 %v2775_v57  ;;  %3703 = vmatprep.mubr.bf16.mxu1 %v2775_v57  ;;  %v17710_v57 = vld [vmem:[%s24154_s5 + $0x66c] ss:$16 sps:$4 sm:$0xff]  }
 0x4d0   :  { %3562 = vmatmul.mubr.bf16.gmra.mrb[124].mxu0 %v2774_v52  ;;  %3704 = vmatmul.mubr.bf16.gmra.mrb[124].mxu1 %v2774_v52  ;;  %v17699_v52 = vld [vmem:[%s24154_s5 + $0x640] ss:$16 sps:$4 sm:$0xff]  }
 0x4d1   :  { %v2366_v61 = vpop.f32.mrb[80].mxu1  ;;  %3595 = vmatpush1.bf16.msra.mxu0 %v17687_v54  ;;  %3737 = vmatpush1.bf16.msra.mxu1 %v17690_v21  ;;  %v2682_v62 = vpop.f32.mrb[112].mxu0  ;;  %v17707_v21 = vld [vmem:[%s24154_s5 + $0x664] ss:$16 sps:$4 sm:$0xff]  }
 0x4d2   :  { %v2368_v50 = vpop.f32.mrb[81].mxu1  ;;  %3596 = vmatprep.subr.bf16.mxu0 %v17695_v0  ;;  %3738 = vmatprep.subr.bf16.mxu1 %v17698_v1  ;;  %v2684_v26 = vpop.f32.mrb[113].mxu0  ;;  %v17705_v1 = vld [vmem:[%s24154_s5 + $0x660] ss:$16 sps:$4 sm:$0xff]  }
 0x4d3   :  { %v2370_v13 = vpop.f32.mrb[82].mxu1  ;;  %v2686_v29 = vpop.f32.mrb[114].mxu0 }
 0x4d4   :  { %v19916_v31 = vpack.c.bf16 %v2370_v13, %v2366_v61  ;;  %v2372_v17 = vpop.f32.mrb[83].mxu1  ;;  %v2778_v22 = vpack.c.bf16 %v2686_v29, %v2682_v62  ;;  %v2688_v18 = vpop.f32.mrb[115].mxu0  ;;  %v17708_v61 = vld [vmem:[%s24154_s5 + $0x668] ss:$16 sps:$4 sm:$0xff]   ;;  %v17713_v62 = vld [vmem:[%s24154_s5 + $0x684] ss:$16 sps:$4 sm:$0xff]  }
 0x4d5   :  { %v19918_v23 = vpack.c.bf16 %v2372_v17, %v2368_v50  ;;  %3597 = vmatpush1.bf16.msra.mxu0 %v17693_v38  ;;  %3739 = vmatpush1.bf16.msra.mxu1 %v17696_v40  ;;  %v2779_v54 = vpack.c.bf16 %v2688_v18, %v2684_v26  ;;  %v17716_v50 = vld [vmem:[%s24154_s5 + $0x68c] ss:$16 sps:$4 sm:$0xff]   ;;  %v17711_v18 = vld [vmem:[%s24154_s5 + $0x680] ss:$16 sps:$4 sm:$0xff]  }
 0x4d6   :  { %3598 = vmatprep.subr.bf16.mxu0 %v17701_v6  ;;  %3740 = vmatprep.subr.bf16.mxu1 %v17704_v8 }
 0x4d7   :  { %3571 = vmatprep.mubr.bf16.mxu0 %v2779_v54  ;;  %3713 = vmatprep.mubr.bf16.mxu1 %v2779_v54  ;;  %v17722_v54 = vld [vmem:[%s24154_s5 + $0x6ac] ss:$16 sps:$4 sm:$0xff]  }
 0x4d8   :  { %3572 = vmatmul.mubr.bf16.gmra.mrb[128].mxu0 %v2778_v22  ;;  %3714 = vmatmul.mubr.bf16.gmra.mrb[128].mxu1 %v2778_v22 }
 0x4d9   :  { %v19932_v0 = vpop.f32.mrb[84].mxu1  ;;  %3599 = vmatpush1.bf16.msra.mxu0 %v17699_v52  ;;  %3741 = vmatpush1.bf16.msra.mxu1 %v17702_v39  ;;  %v2692_v38 = vpop.f32.mrb[116].mxu0  ;;  %v17714_v52 = vld [vmem:[%s24154_s5 + $0x688] ss:$16 sps:$4 sm:$0xff]   ;;  %v17719_v39 = vld [vmem:[%s24154_s5 + $0x6a4] ss:$16 sps:$4 sm:$0xff]  }
 0x4da   :  { %v19940_v40 = vpop.f32.mrb[85].mxu1  ;;  %3600 = vmatprep.subr.bf16.mxu0 %v17707_v21  ;;  %3742 = vmatprep.subr.bf16.mxu1 %v17710_v57  ;;  %v2694_v6 = vpop.f32.mrb[117].mxu0  ;;  %v2782_v17 = vpack.c.bf16 %v2692_v38, %v2692_v38  ;;  %v17717_v57 = vld [vmem:[%s24154_s5 + $0x6a0] ss:$16 sps:$4 sm:$0xff]   ;;  %v17725_v38 = vld [vmem:[%s24154_s5 + $0x6c4] ss:$16 sps:$4 sm:$0xff]  }
 0x4db   :  { %v2380_v8 = vpop.f32.mrb[86].mxu1  ;;  %v2783_v26 = vpack.c.bf16 %v2694_v6, %v2694_v6  ;;  %v2696_v13 = vpop.f32.mrb[118].mxu0 }
 0x4dc   :  { %v2381_v29 = vpop.f32.mrb[87].mxu1  ;;  %v2697_v22 = vpop.f32.mrb[119].mxu0  ;;  %v17723_v13 = vld [vmem:[%s24154_s5 + $0x6c0] ss:$16 sps:$4 sm:$0xff]  }
 0x4dd   :  { %3601 = vmatpush1.bf16.msra.mxu0 %v17705_v1  ;;  %3743 = vmatpush1.bf16.msra.mxu1 %v17708_v61  ;;  %v17720_v1 = vld [vmem:[%s24154_s5 + $0x6a8] ss:$16 sps:$4 sm:$0xff]   ;;  %v17734_v22 = vld [vmem:[%s24154_s5 + $0x6ec] ss:$16 sps:$4 sm:$0xff]  }
 0x4de   :  { %3602 = vmatprep.subr.bf16.mxu0 %v17713_v62  ;;  %3744 = vmatprep.subr.bf16.mxu1 %v17716_v50  ;;  %v17728_v62 = vld [vmem:[%s24154_s5 + $0x6cc] ss:$16 sps:$4 sm:$0xff]   ;;  %v17726_v29 = vld [vmem:[%s24154_s5 + $0x6c8] ss:$16 sps:$4 sm:$0xff]  }
 0x4df   :  { %3581 = vmatprep.mubr.bf16.mxu0 %v2783_v26  ;;  %3723 = vmatprep.mubr.bf16.mxu1 %v2783_v26 }
 0x4e0   :  { %3582 = vmatmul.mubr.bf16.gmra.mrb[132].mxu0 %v2782_v17  ;;  %3724 = vmatmul.mubr.bf16.gmra.mrb[132].mxu1 %v2782_v17  ;;  %v17731_v17 = vld [vmem:[%s24154_s5 + $0x6e4] ss:$16 sps:$4 sm:$0xff]  }
 0x4e1   :  { %v2417_v21 = vpop.f32.mrb[88].mxu1  ;;  %3603 = vmatpush1.bf16.msra.mxu0 %v17711_v18  ;;  %3745 = vmatpush1.bf16.msra.mxu1 %v17714_v52  ;;  %v17729_v52 = vld [vmem:[%s24154_s5 + $0x6e0] ss:$16 sps:$4 sm:$0xff]  }
 0x4e2   :  { %v2419_v61 = vpop.f32.mrb[89].mxu1  ;;  %3604 = vmatprep.subr.bf16.mxu0 %v17719_v39  ;;  %3746 = vmatprep.subr.bf16.mxu1 %v17722_v54  ;;  %v17732_v39 = vld [vmem:[%s24154_s5 + $0x6e8] ss:$16 sps:$4 sm:$0xff]  }
 0x4e3   :  { %v2421_v50 = vpop.f32.mrb[90].mxu1 }
 0x4e4   :  { %v19972_v6 = vpack.c.bf16 %v2421_v50, %v2417_v21  ;;  %v2423_v8 = vpop.f32.mrb[91].mxu1  ;;  %v17737_v21 = vld [vmem:[%s24154_s5 + $0x704] ss:$16 sps:$4 sm:$0xff]   ;;  %v17735_v50 = vld [vmem:[%s24154_s5 + $0x700] ss:$16 sps:$4 sm:$0xff]  }
 0x4e5   :  { %v19974_v26 = vpack.c.bf16 %v2423_v8, %v2419_v61  ;;  %3605 = vmatpush1.bf16.msra.mxu0 %v17717_v57  ;;  %3747 = vmatpush1.bf16.msra.mxu1 %v17720_v1  ;;  %v17740_v57 = vld [vmem:[%s24154_s5 + $0x70c] ss:$16 sps:$4 sm:$0xff]   ;;  %v17738_v8 = vld [vmem:[%s24154_s5 + $0x708] ss:$16 sps:$4 sm:$0xff]  }
 0x4e6   :  { %3606 = vmatprep.subr.bf16.mxu0 %v17725_v38  ;;  %3748 = vmatprep.subr.bf16.mxu1 %v17728_v62 }
 0x4e9   :  { %v2427_v18 = vpop.f32.mrb[92].mxu1  ;;  %3607 = vmatpush1.bf16.msra.mxu0 %v17723_v13  ;;  %3749 = vmatpush1.bf16.msra.mxu1 %v17726_v29  ;;  %v17743_v13 = vld [vmem:[%s24154_s5 + $0x724] ss:$16 sps:$4 sm:$0xff]   ;;  %v17746_v29 = vld [vmem:[%s24154_s5 + $0x72c] ss:$16 sps:$4 sm:$0xff]  }
 0x4ea   :  { %v2429_v54 = vpop.f32.mrb[93].mxu1  ;;  %3608 = vmatprep.subr.bf16.mxu0 %v17731_v17  ;;  %3750 = vmatprep.subr.bf16.mxu1 %v17734_v22  ;;  %v17741_v22 = vld [vmem:[%s24154_s5 + $0x720] ss:$16 sps:$4 sm:$0xff]  }
 0x4eb   :  { %v2431_v1 = vpop.f32.mrb[94].mxu1 }
 0x4ec   :  { %v20000_v61 = vpack.c.bf16 %v2431_v1, %v2427_v18  ;;  %v2433_v38 = vpop.f32.mrb[95].mxu1  ;;  %v17744_v18 = vld [vmem:[%s24154_s5 + $0x728] ss:$16 sps:$4 sm:$0xff]  }
 0x4ed   :  { %v20002_v62 = vpack.c.bf16 %v2433_v38, %v2429_v54  ;;  %3609 = vmatpush1.bf16.msra.mxu0 %v17729_v52  ;;  %3751 = vmatpush1.bf16.msra.mxu1 %v17732_v39  ;;  %v17749_v39 = vld [vmem:[%s24154_s5 + $0x744] ss:$16 sps:$4 sm:$0xff]   ;;  %v17752_v54 = vld [vmem:[%s24154_s5 + $0x74c] ss:$16 sps:$4 sm:$0xff]  }
 0x4ee   :  { %3610 = vmatprep.subr.bf16.mxu0 %v17737_v21  ;;  %3752 = vmatprep.subr.bf16.mxu1 %v17740_v57 }
 0x4f1   :  { %v2437_v17 = vpop.f32.mrb[96].mxu1  ;;  %3611 = vmatpush1.bf16.msra.mxu0 %v17735_v50  ;;  %3753 = vmatpush1.bf16.msra.mxu1 %v17738_v8  ;;  %v17747_v50 = vld [vmem:[%s24154_s5 + $0x740] ss:$16 sps:$4 sm:$0xff]   ;;  %v17750_v8 = vld [vmem:[%s24154_s5 + $0x748] ss:$16 sps:$4 sm:$0xff]  }
 0x4f2   :  { %v2439_v52 = vpop.f32.mrb[97].mxu1  ;;  %3612 = vmatprep.subr.bf16.mxu0 %v17743_v13  ;;  %3754 = vmatprep.subr.bf16.mxu1 %v17746_v29  ;;  %v17755_v13 = vld [vmem:[%s24154_s5 + $0x764] ss:$16 sps:$4 sm:$0xff]   ;;  %v17758_v29 = vld [vmem:[%s24154_s5 + $0x76c] ss:$16 sps:$4 sm:$0xff]  }
 0x4f3   :  { %v2441_v21 = vpop.f32.mrb[98].mxu1 }
 0x4f4   :  { %v20028_v57 = vpack.c.bf16 %v2441_v21, %v2437_v17  ;;  %v2443_v1 = vpop.f32.mrb[99].mxu1 }
 0x4f5   :  { %v20030_v38 = vpack.c.bf16 %v2443_v1, %v2439_v52  ;;  %3613 = vmatpush1.bf16.msra.mxu0 %v17741_v22  ;;  %3755 = vmatpush1.bf16.msra.mxu1 %v17744_v18  ;;  %v17753_v22 = vld [vmem:[%s24154_s5 + $0x760] ss:$16 sps:$4 sm:$0xff]   ;;  %v17756_v18 = vld [vmem:[%s24154_s5 + $0x768] ss:$16 sps:$4 sm:$0xff]  }
 0x4f6   :  { %3614 = vmatprep.subr.bf16.mxu0 %v17749_v39  ;;  %3756 = vmatprep.subr.bf16.mxu1 %v17752_v54  ;;  %v17761_v39 = vld [vmem:[%s24154_s5 + $0x4] ss:$16 sps:$4 sm:$0xff]   ;;  %v17764_v54 = vld [vmem:[%s24154_s5 + $0xc] ss:$16 sps:$4 sm:$0xff]  }
 0x4f9   :  { %v20044_v17 = vpop.f32.mrb[100].mxu1  ;;  %3615 = vmatpush1.bf16.msra.mxu0 %v17747_v50  ;;  %3757 = vmatpush1.bf16.msra.mxu1 %v17750_v8 }
 0x4fa   :  { %v20052_v52 = vpop.f32.mrb[101].mxu1  ;;  %3616 = vmatprep.subr.bf16.mxu0 %v17755_v13  ;;  %3758 = vmatprep.subr.bf16.mxu1 %v17758_v29 }
 0x4fb   :  { %v2451_v21 = vpop.f32.mrb[102].mxu1 }
 0x4fc   :  { %v2452_v1 = vpop.f32.mrb[103].mxu1 }
 0x4fd   :  { %3617 = vmatpush1.bf16.msra.mxu0 %v17753_v22  ;;  %3759 = vmatpush1.bf16.msra.mxu1 %v17756_v18  ;;  %v17767_v22 = vld [vmem:[%s24154_s5 + $0x24] ss:$16 sps:$4 sm:$0xff]   ;;  %v17770_v18 = vld [vmem:[%s24154_s5 + $0x2c] ss:$16 sps:$4 sm:$0xff]  }
 0x4fe   :  { %4415 = vmatprep.subr.bf16.mxu0 %v17761_v39  ;;  %4557 = vmatprep.subr.bf16.mxu1 %v17764_v54  ;;  %v17765_v39 = vld [vmem:[%s24154_s5 + $0x20] ss:$16 sps:$4 sm:$0xff]   ;;  %v17768_v54 = vld [vmem:[%s24154_s5 + $0x28] ss:$16 sps:$4 sm:$0xff]   ;;  %v17773_v1 = vld [vmem:[%s24154_s5 + $0x44] ss:$16 sps:$4 sm:$0xff]  }
 0x501   :  { %v2733_v50 = vpop.f32.mrb[104].mxu1 }
 0x502   :  { %v2735_v8 = vpop.f32.mrb[105].mxu1 }
 0x503   :  { %v2737_v10 = vpop.f32.mrb[106].mxu1 }
 0x504   :  { %v2772_v9 = vpack.c.bf16 %v2737_v10, %v2733_v50  ;;  %v2739_v13 = vpop.f32.mrb[107].mxu1 }
 0x505   :  { %v2773_v29 = vpack.c.bf16 %v2739_v13, %v2735_v8  ;;  %v17771_v13 = vld [vmem:[%s24154_s5 + $0x40] ss:$16 sps:$4 sm:$0xff]  }
 0x507   :  { %14762 = vmatprep.mubr.msk.bf16.mxu0 %vm826_vm0, %v2773_v29  ;;  %14766 = vmatprep.mubr.msk.bf16.mxu1 %vm826_vm0, %v2773_v29  ;;  %v17774_v29 = vld [vmem:[%s24154_s5 + $0x48] ss:$16 sps:$4 sm:$0xff]  }
 0x508   :  { %3623 = vmatmul.mubr.bf16.vlgmr.msra.gmra.mrb[120].mxu0 %v2772_v9  ;;  %3765 = vmatmul.mubr.bf16.vlgmr.msra.gmra.mrb[120].mxu1 %v2772_v9  ;;  %v17776_v9 = vld [vmem:[%s24154_s5 + $0x4c] ss:$16 sps:$4 sm:$0xff]  }
 0x509   :  { %4416 = vmatpush1.bf16.msra.mxu0 %v17759_v36  ;;  %4558 = vmatpush1.bf16.msra.mxu1 %v17762_v28  ;;  %v2743_v10 = vpop.f32.mrb[108].mxu1 }
 0x50a   :  { %v2745_v21 = vpop.f32.mrb[109].mxu1  ;;  %4417 = vmatprep.subr.bf16.mxu0 %v17767_v22  ;;  %4559 = vmatprep.subr.bf16.mxu1 %v17770_v18  ;;  %v17779_v22 = vld [vmem:[%s24154_s5 + $0x64] ss:$16 sps:$4 sm:$0xff]   ;;  %v17782_v18 = vld [vmem:[%s24154_s5 + $0x6c] ss:$16 sps:$4 sm:$0xff]  }
 0x50b   :  { %v2747_v28 = vpop.f32.mrb[110].mxu1 }
 0x50c   :  { %v2776_v36 = vpack.c.bf16 %v2747_v28, %v2743_v10  ;;  %v2749_v50 = vpop.f32.mrb[111].mxu1 }
 0x50d   :  { %v2777_v8 = vpack.c.bf16 %v2749_v50, %v2745_v21  ;;  %4418 = vmatpush1.bf16.msra.mxu0 %v17765_v39  ;;  %4560 = vmatpush1.bf16.msra.mxu1 %v17768_v54  ;;  %v17777_v39 = vld [vmem:[%s24154_s5 + $0x60] ss:$16 sps:$4 sm:$0xff]   ;;  %v17780_v54 = vld [vmem:[%s24154_s5 + $0x68] ss:$16 sps:$4 sm:$0xff]  }
 0x50e   :  { %4419 = vmatprep.subr.bf16.mxu0 %v17773_v1  ;;  %4561 = vmatprep.subr.bf16.mxu1 %v17776_v9  ;;  %v17785_v1 = vld [vmem:[%s24154_s5 + $0x84] ss:$16 sps:$4 sm:$0xff]   ;;  %v17788_v9 = vld [vmem:[%s24154_s5 + $0x8c] ss:$16 sps:$4 sm:$0xff]  }
 0x50f   :  { %14763 = vmatprep.mubr.msk.bf16.mxu0 %vm826_vm0, %v2777_v8  ;;  %14767 = vmatprep.mubr.msk.bf16.mxu1 %vm826_vm0, %v2777_v8 }
 0x510   :  { %3633 = vmatmul.mubr.bf16.gmra.mrb[124].mxu0 %v2776_v36  ;;  %3775 = vmatmul.mubr.bf16.gmra.mrb[124].mxu1 %v2776_v36 }
 0x511   :  { %4420 = vmatpush1.bf16.msra.mxu0 %v17771_v13  ;;  %4562 = vmatpush1.bf16.msra.mxu1 %v17774_v29  ;;  %v2753_v10 = vpop.f32.mrb[112].mxu1  ;;  %v17783_v13 = vld [vmem:[%s24154_s5 + $0x80] ss:$16 sps:$4 sm:$0xff]   ;;  %v17786_v29 = vld [vmem:[%s24154_s5 + $0x88] ss:$16 sps:$4 sm:$0xff]  }
 0x512   :  { %v2755_v21 = vpop.f32.mrb[113].mxu1  ;;  %4421 = vmatprep.subr.bf16.mxu0 %v17779_v22  ;;  %4563 = vmatprep.subr.bf16.mxu1 %v17782_v18  ;;  %v17791_v22 = vld [vmem:[%s24154_s5 + $0xa4] ss:$16 sps:$4 sm:$0xff]   ;;  %v17794_v18 = vld [vmem:[%s24154_s5 + $0xac] ss:$16 sps:$4 sm:$0xff]  }
 0x513   :  { %v2757_v28 = vpop.f32.mrb[114].mxu1 }
 0x514   :  { %v2780_v36 = vpack.c.bf16 %v2757_v28, %v2753_v10  ;;  %v2759_v50 = vpop.f32.mrb[115].mxu1  ;;  %v17800_v28 = vld [vmem:[%s24154_s5 + $0xcc] ss:$16 sps:$4 sm:$0xff]  }
 0x515   :  { %v2781_v8 = vpack.c.bf16 %v2759_v50, %v2755_v21  ;;  %4422 = vmatpush1.bf16.msra.mxu0 %v17777_v39  ;;  %4564 = vmatpush1.bf16.msra.mxu1 %v17780_v54  ;;  %v17789_v39 = vld [vmem:[%s24154_s5 + $0xa0] ss:$16 sps:$4 sm:$0xff]   ;;  %v17792_v54 = vld [vmem:[%s24154_s5 + $0xa8] ss:$16 sps:$4 sm:$0xff]  }
 0x516   :  { %4423 = vmatprep.subr.bf16.mxu0 %v17785_v1  ;;  %4565 = vmatprep.subr.bf16.mxu1 %v17788_v9  ;;  %v17797_v9 = vld [vmem:[%s24154_s5 + $0xc4] ss:$16 sps:$4 sm:$0xff]  }
 0x517   :  { %14764 = vmatprep.mubr.msk.bf16.mxu0 %vm826_vm0, %v2781_v8  ;;  %14768 = vmatprep.mubr.msk.bf16.mxu1 %vm826_vm0, %v2781_v8 }
 0x518   :  { %3643 = vmatmul.mubr.bf16.gmra.mrb[128].mxu0 %v2780_v36  ;;  %3785 = vmatmul.mubr.bf16.gmra.mrb[128].mxu1 %v2780_v36 }
 0x519   :  { %4424 = vmatpush1.bf16.msra.mxu0 %v17783_v13  ;;  %4566 = vmatpush1.bf16.msra.mxu1 %v17786_v29  ;;  %v2763_v10 = vpop.f32.mrb[116].mxu1  ;;  %v17795_v13 = vld [vmem:[%s24154_s5 + $0xc0] ss:$16 sps:$4 sm:$0xff]   ;;  %v17798_v29 = vld [vmem:[%s24154_s5 + $0xc8] ss:$16 sps:$4 sm:$0xff]  }
 0x51a   :  { %4425 = vmatprep.subr.bf16.mxu0 %v17791_v22  ;;  %4567 = vmatprep.subr.bf16.mxu1 %v17794_v18  ;;  %v2765_v21 = vpop.f32.mrb[117].mxu1  ;;  %v2784_v50 = vpack.c.bf16 %v2763_v10, %v2763_v10  ;;  %v17803_v22 = vld [vmem:[%s24154_s5 + $0xe4] ss:$16 sps:$4 sm:$0xff]   ;;  %v17806_v18 = vld [vmem:[%s24154_s5 + $0xec] ss:$16 sps:$4 sm:$0xff]  }
 0x51b   :  { %v2785_v1 = vpack.c.bf16 %v2765_v21, %v2765_v21  ;;  %v2767_v36 = vpop.f32.mrb[118].mxu1  ;;  %v17801_v10 = vld [vmem:[%s24154_s5 + $0xe0] ss:$16 sps:$4 sm:$0xff]   ;;  %v17812_v21 = vld [vmem:[%s24154_s5 + $0x10c] ss:$16 sps:$4 sm:$0xff]  }
 0x51c   :  { %v2768_v8 = vpop.f32.mrb[119].mxu1  ;;  %v17813_v36 = vld [vmem:[%s24154_s5 + $0x120] ss:$16 sps:$4 sm:$0xff]  }
 0x51d   :  { %4426 = vmatpush1.bf16.msra.mxu0 %v17789_v39  ;;  %4568 = vmatpush1.bf16.msra.mxu1 %v17792_v54  ;;  %v17804_v39 = vld [vmem:[%s24154_s5 + $0xe8] ss:$16 sps:$4 sm:$0xff]   ;;  %v17809_v54 = vld [vmem:[%s24154_s5 + $0x104] ss:$16 sps:$4 sm:$0xff]  }
 0x51e   :  { %14765 = vmatprep.mubr.msk.bf16.mxu0 %vm826_vm0, %v2785_v1  ;;  %14769 = vmatprep.mubr.msk.bf16.mxu1 %vm826_vm0, %v2785_v1  ;;  %v17807_v1 = vld [vmem:[%s24154_s5 + $0x100] ss:$16 sps:$4 sm:$0xff]   ;;  %v17821_v8 = vld [vmem:[%s24154_s5 + $0x144] ss:$16 sps:$4 sm:$0xff]  }
 0x51f   :  { %4427 = vmatprep.subr.bf16.mxu0 %v17797_v9  ;;  %4569 = vmatprep.subr.bf16.mxu1 %v17800_v28  ;;  %v17815_v9 = vld [vmem:[%s24154_s5 + $0x124] ss:$16 sps:$4 sm:$0xff]   ;;  %v17818_v28 = vld [vmem:[%s24154_s5 + $0x12c] ss:$16 sps:$4 sm:$0xff]  }
 0x520   :  { %3653 = vmatmul.mubr.bf16.gmra.mrb[136].mxu0 %v2784_v50  ;;  %3795 = vmatmul.mubr.bf16.gmra.mrb[136].mxu1 %v2784_v50  ;;  %v17816_v50 = vld [vmem:[%s24154_s5 + $0x128] ss:$16 sps:$4 sm:$0xff]  }
 0x521   :  { %4428 = vmatpush1.bf16.msra.mxu0 %v17795_v13  ;;  %4570 = vmatpush1.bf16.msra.mxu1 %v17798_v29  ;;  %v17824_v13 = vld [vmem:[%s24154_s5 + $0x14c] ss:$16 sps:$4 sm:$0xff]   ;;  %v17819_v29 = vld [vmem:[%s24154_s5 + $0x140] ss:$16 sps:$4 sm:$0xff]  }
 0x522   :  { %4447 = vmatprep.mubr.bf16.mxu0 %v19862_v5  ;;  %4589 = vmatprep.mubr.bf16.mxu1 %v19862_v5  ;;  %v17810_v5 = vld [vmem:[%s24154_s5 + $0x108] ss:$16 sps:$4 sm:$0xff]  }
 0x523   :  { %4429 = vmatprep.subr.bf16.mxu0 %v17803_v22  ;;  %4571 = vmatprep.subr.bf16.mxu1 %v17806_v18  ;;  %v17822_v22 = vld [vmem:[%s24154_s5 + $0x148] ss:$16 sps:$4 sm:$0xff]   ;;  %v17827_v18 = vld [vmem:[%s24154_s5 + $0x164] ss:$16 sps:$4 sm:$0xff]  }
 0x525   :  { %4430 = vmatpush1.bf16.msra.mxu0 %v17801_v10  ;;  %4572 = vmatpush1.bf16.msra.mxu1 %v17804_v39  ;;  %v17830_v10 = vld [vmem:[%s24154_s5 + $0x16c] ss:$16 sps:$4 sm:$0xff]   ;;  %v17825_v39 = vld [vmem:[%s24154_s5 + $0x160] ss:$16 sps:$4 sm:$0xff]  }
 0x526   :  { %4431 = vmatprep.subr.bf16.mxu0 %v17809_v54  ;;  %4573 = vmatprep.subr.bf16.mxu1 %v17812_v21  ;;  %v17828_v54 = vld [vmem:[%s24154_s5 + $0x168] ss:$16 sps:$4 sm:$0xff]   ;;  %v17833_v21 = vld [vmem:[%s24154_s5 + $0x184] ss:$16 sps:$4 sm:$0xff]  }
 0x529   :  { %4432 = vmatpush1.bf16.msra.mxu0 %v17807_v1  ;;  %4574 = vmatpush1.bf16.msra.mxu1 %v17810_v5  ;;  %v17836_v1 = vld [vmem:[%s24154_s5 + $0x18c] ss:$16 sps:$4 sm:$0xff]   ;;  %v17831_v5 = vld [vmem:[%s24154_s5 + $0x180] ss:$16 sps:$4 sm:$0xff]  }
 0x52a   :  { %4433 = vmatprep.subr.bf16.mxu0 %v17815_v9  ;;  %4575 = vmatprep.subr.bf16.mxu1 %v17818_v28  ;;  %v17834_v9 = vld [vmem:[%s24154_s5 + $0x188] ss:$16 sps:$4 sm:$0xff]   ;;  %v17839_v28 = vld [vmem:[%s24154_s5 + $0x1a4] ss:$16 sps:$4 sm:$0xff]  }
 0x52d   :  { %4434 = vmatpush1.bf16.msra.mxu0 %v17813_v36  ;;  %4576 = vmatpush1.bf16.msra.mxu1 %v17816_v50  ;;  %v17842_v36 = vld [vmem:[%s24154_s5 + $0x1ac] ss:$16 sps:$4 sm:$0xff]   ;;  %v17837_v50 = vld [vmem:[%s24154_s5 + $0x1a0] ss:$16 sps:$4 sm:$0xff]  }
 0x52e   :  { %4435 = vmatprep.subr.bf16.mxu0 %v17821_v8  ;;  %4577 = vmatprep.subr.bf16.mxu1 %v17824_v13  ;;  %v17840_v8 = vld [vmem:[%s24154_s5 + $0x1a8] ss:$16 sps:$4 sm:$0xff]   ;;  %v17845_v13 = vld [vmem:[%s24154_s5 + $0x1c4] ss:$16 sps:$4 sm:$0xff]  }
 0x531   :  { %4436 = vmatpush1.bf16.msra.mxu0 %v17819_v29  ;;  %4578 = vmatpush1.bf16.msra.mxu1 %v17822_v22  ;;  %v17848_v29 = vld [vmem:[%s24154_s5 + $0x1cc] ss:$16 sps:$4 sm:$0xff]   ;;  %v17843_v22 = vld [vmem:[%s24154_s5 + $0x1c0] ss:$16 sps:$4 sm:$0xff]  }
 0x532   :  { %4437 = vmatprep.subr.bf16.mxu0 %v17827_v18  ;;  %4579 = vmatprep.subr.bf16.mxu1 %v17830_v10  ;;  %v17846_v18 = vld [vmem:[%s24154_s5 + $0x1c8] ss:$16 sps:$4 sm:$0xff]   ;;  %v17851_v10 = vld [vmem:[%s24154_s5 + $0x1e4] ss:$16 sps:$4 sm:$0xff]  }
 0x535   :  { %4438 = vmatpush1.bf16.msra.mxu0 %v17825_v39  ;;  %4580 = vmatpush1.bf16.msra.mxu1 %v17828_v54  ;;  %v17854_v39 = vld [vmem:[%s24154_s5 + $0x1ec] ss:$16 sps:$4 sm:$0xff]   ;;  %v17849_v54 = vld [vmem:[%s24154_s5 + $0x1e0] ss:$16 sps:$4 sm:$0xff]  }
 0x536   :  { %4439 = vmatprep.subr.bf16.mxu0 %v17833_v21  ;;  %4581 = vmatprep.subr.bf16.mxu1 %v17836_v1  ;;  %v17852_v21 = vld [vmem:[%s24154_s5 + $0x1e8] ss:$16 sps:$4 sm:$0xff]   ;;  %v17857_v1 = vld [vmem:[%s24154_s5 + $0x204] ss:$16 sps:$4 sm:$0xff]  }
 0x539   :  { %4440 = vmatpush1.bf16.msra.mxu0 %v17831_v5  ;;  %4582 = vmatpush1.bf16.msra.mxu1 %v17834_v9  ;;  %v17860_v5 = vld [vmem:[%s24154_s5 + $0x20c] ss:$16 sps:$4 sm:$0xff]   ;;  %v17855_v9 = vld [vmem:[%s24154_s5 + $0x200] ss:$16 sps:$4 sm:$0xff]  }
 0x53a   :  { %4441 = vmatprep.subr.bf16.mxu0 %v17839_v28  ;;  %4583 = vmatprep.subr.bf16.mxu1 %v17842_v36  ;;  %v17858_v28 = vld [vmem:[%s24154_s5 + $0x208] ss:$16 sps:$4 sm:$0xff]   ;;  %v17863_v36 = vld [vmem:[%s24154_s5 + $0x224] ss:$16 sps:$4 sm:$0xff]  }
 0x53d   :  { %4442 = vmatpush1.bf16.msra.mxu0 %v17837_v50  ;;  %4584 = vmatpush1.bf16.msra.mxu1 %v17840_v8  ;;  %v17866_v50 = vld [vmem:[%s24154_s5 + $0x22c] ss:$16 sps:$4 sm:$0xff]   ;;  %v17861_v8 = vld [vmem:[%s24154_s5 + $0x220] ss:$16 sps:$4 sm:$0xff]  }
 0x53e   :  { %4443 = vmatprep.subr.bf16.mxu0 %v17845_v13  ;;  %4585 = vmatprep.subr.bf16.mxu1 %v17848_v29  ;;  %v17864_v13 = vld [vmem:[%s24154_s5 + $0x228] ss:$16 sps:$4 sm:$0xff]   ;;  %v17869_v29 = vld [vmem:[%s24154_s5 + $0x244] ss:$16 sps:$4 sm:$0xff]  }
 0x541   :  { %4444 = vmatpush1.bf16.msra.mxu0 %v17843_v22  ;;  %4586 = vmatpush1.bf16.msra.mxu1 %v17846_v18  ;;  %v17870_v22 = vld [vmem:[%s24154_s5 + $0x248] ss:$16 sps:$4 sm:$0xff]   ;;  %v17875_v18 = vld [vmem:[%s24154_s5 + $0x264] ss:$16 sps:$4 sm:$0xff]  }
 0x542   :  { %4445 = vmatprep.subr.bf16.mxu0 %v17851_v10  ;;  %4587 = vmatprep.subr.bf16.mxu1 %v17854_v39  ;;  %v17878_v10 = vld [vmem:[%s24154_s5 + $0x26c] ss:$16 sps:$4 sm:$0xff]   ;;  %v17873_v39 = vld [vmem:[%s24154_s5 + $0x260] ss:$16 sps:$4 sm:$0xff]  }
 0x545   :  { %4446 = vmatpush1.bf16.msra.mxu0 %v17849_v54  ;;  %4588 = vmatpush1.bf16.msra.mxu1 %v17852_v21  ;;  %v17876_v54 = vld [vmem:[%s24154_s5 + $0x268] ss:$16 sps:$4 sm:$0xff]   ;;  %v17881_v21 = vld [vmem:[%s24154_s5 + $0x284] ss:$16 sps:$4 sm:$0xff]  }
 0x546   :  { %4486 = vmatprep.subr.bf16.mxu0 %v17857_v1  ;;  %4628 = vmatprep.subr.bf16.mxu1 %v17860_v5  ;;  %v17882_v1 = vld [vmem:[%s24154_s5 + $0x288] ss:$16 sps:$4 sm:$0xff]   ;;  %v2467_v5 = vpack.c.bf16 %v19940_v40, %v19940_v40 }
 0x547   :  { %v17888_v40 = vld [vmem:[%s24154_s5 + $0x2a8] ss:$16 sps:$4 sm:$0xff]  }
 0x548   :  { %4448 = vmatmul.mubr.bf16.vlgmr.msra.gmra.mrb[120].mxu0 %v19860_v56  ;;  %4590 = vmatmul.mubr.bf16.vlgmr.msra.gmra.mrb[120].mxu1 %v19860_v56  ;;  %v17872_v56 = vld [vmem:[%s24154_s5 + $0x24c] ss:$16 sps:$4 sm:$0xff]  }
 0x549   :  { %4457 = vmatprep.mubr.bf16.mxu0 %v19890_v41  ;;  %4487 = vmatpush1.bf16.msra.mxu0 %v17855_v9  ;;  %v17887_v9 = vld [vmem:[%s24154_s5 + $0x2a4] ss:$16 sps:$4 sm:$0xff]  }
 0x54a   :  { %4599 = vmatprep.mubr.bf16.mxu1 %v19890_v41  ;;  %4629 = vmatpush1.bf16.msra.mxu1 %v17858_v28  ;;  %v17867_v41 = vld [vmem:[%s24154_s5 + $0x240] ss:$16 sps:$4 sm:$0xff]   ;;  %v17890_v28 = vld [vmem:[%s24154_s5 + $0x2ac] ss:$16 sps:$4 sm:$0xff]  }
 0x54b   :  { %4488 = vmatprep.subr.bf16.mxu0 %v17863_v36  ;;  %4630 = vmatprep.subr.bf16.mxu1 %v17866_v50  ;;  %v17885_v36 = vld [vmem:[%s24154_s5 + $0x2a0] ss:$16 sps:$4 sm:$0xff]   ;;  %v17893_v50 = vld [vmem:[%s24154_s5 + $0x2c4] ss:$16 sps:$4 sm:$0xff]  }
 0x54d   :  { %4489 = vmatpush1.bf16.msra.mxu0 %v17861_v8  ;;  %v17891_v8 = vld [vmem:[%s24154_s5 + $0x2c0] ss:$16 sps:$4 sm:$0xff]  }
 0x54e   :  { %4631 = vmatpush1.bf16.msra.mxu1 %v17864_v13  ;;  %4490 = vmatprep.subr.bf16.mxu0 %v17869_v29  ;;  %v2466_v13 = vpack.c.bf16 %v19932_v0, %v19932_v0  ;;  %v17894_v29 = vld [vmem:[%s24154_s5 + $0x2c8] ss:$16 sps:$4 sm:$0xff]   ;;  %v17897_v0 = vld [vmem:[%s24154_s5 + $0x2e0] ss:$16 sps:$4 sm:$0xff]  }
 0x54f   :  { %4632 = vmatprep.subr.bf16.mxu1 %v17872_v56  ;;  %v17899_v56 = vld [vmem:[%s24154_s5 + $0x2e4] ss:$16 sps:$4 sm:$0xff]  }
 0x550   :  { %4458 = vmatmul.mubr.bf16.gmra.mrb[124].mxu0 %v19888_v20  ;;  %4600 = vmatmul.mubr.bf16.gmra.mrb[124].mxu1 %v19888_v20  ;;  %v17884_v20 = vld [vmem:[%s24154_s5 + $0x28c] ss:$16 sps:$4 sm:$0xff]  }
 0x551   :  { %4467 = vmatprep.mubr.bf16.mxu0 %v19918_v23  ;;  %4491 = vmatpush1.bf16.msra.mxu0 %v17867_v41  ;;  %v17902_v41 = vld [vmem:[%s24154_s5 + $0x2ec] ss:$16 sps:$4 sm:$0xff]  }
 0x552   :  { %4609 = vmatprep.mubr.bf16.mxu1 %v19918_v23  ;;  %4633 = vmatpush1.bf16.msra.mxu1 %v17870_v22  ;;  %v17879_v23 = vld [vmem:[%s24154_s5 + $0x280] ss:$16 sps:$4 sm:$0xff]   ;;  %v17900_v22 = vld [vmem:[%s24154_s5 + $0x2e8] ss:$16 sps:$4 sm:$0xff]  }
 0x553   :  { %4492 = vmatprep.subr.bf16.mxu0 %v17875_v18  ;;  %4634 = vmatprep.subr.bf16.mxu1 %v17878_v10  ;;  %v17905_v18 = vld [vmem:[%s24154_s5 + $0x304] ss:$16 sps:$4 sm:$0xff]   ;;  %v17908_v10 = vld [vmem:[%s24154_s5 + $0x30c] ss:$16 sps:$4 sm:$0xff]  }
 0x555   :  { %4493 = vmatpush1.bf16.msra.mxu0 %v17873_v39  ;;  %v17903_v39 = vld [vmem:[%s24154_s5 + $0x300] ss:$16 sps:$4 sm:$0xff]  }
 0x556   :  { %4635 = vmatpush1.bf16.msra.mxu1 %v17876_v54  ;;  %4494 = vmatprep.subr.bf16.mxu0 %v17881_v21  ;;  %v17911_v54 = vld [vmem:[%s24154_s5 + $0x324] ss:$16 sps:$4 sm:$0xff]   ;;  %v17914_v21 = vld [vmem:[%s24154_s5 + $0x32c] ss:$16 sps:$4 sm:$0xff]  }
 0x557   :  { %4636 = vmatprep.subr.bf16.mxu1 %v17884_v20  ;;  %v17909_v20 = vld [vmem:[%s24154_s5 + $0x320] ss:$16 sps:$4 sm:$0xff]  }
 0x558   :  { %4468 = vmatmul.mubr.bf16.gmra.mrb[128].mxu0 %v19916_v31  ;;  %4610 = vmatmul.mubr.bf16.gmra.mrb[128].mxu1 %v19916_v31  ;;  %v17896_v31 = vld [vmem:[%s24154_s5 + $0x2cc] ss:$16 sps:$4 sm:$0xff]  }
 0x559   :  { %4477 = vmatprep.mubr.bf16.mxu0 %v2467_v5  ;;  %4495 = vmatpush1.bf16.msra.mxu0 %v17879_v23  ;;  %v17912_v23 = vld [vmem:[%s24154_s5 + $0x328] ss:$16 sps:$4 sm:$0xff]  }
 0x55a   :  { %4619 = vmatprep.mubr.bf16.mxu1 %v2467_v5  ;;  %4637 = vmatpush1.bf16.msra.mxu1 %v17882_v1  ;;  %v17917_v1 = vld [vmem:[%s24154_s5 + $0x344] ss:$16 sps:$4 sm:$0xff]   ;;  %v17920_v5 = vld [vmem:[%s24154_s5 + $0x34c] ss:$16 sps:$4 sm:$0xff]  }
 0x55b   :  { %4496 = vmatprep.subr.bf16.mxu0 %v17887_v9  ;;  %4638 = vmatprep.subr.bf16.mxu1 %v17890_v28  ;;  %v17915_v9 = vld [vmem:[%s24154_s5 + $0x340] ss:$16 sps:$4 sm:$0xff]   ;;  %v17918_v28 = vld [vmem:[%s24154_s5 + $0x348] ss:$16 sps:$4 sm:$0xff]  }
 0x55d   :  { %4497 = vmatpush1.bf16.msra.mxu0 %v17885_v36  ;;  %v17923_v36 = vld [vmem:[%s24154_s5 + $0x364] ss:$16 sps:$4 sm:$0xff]  }
 0x55e   :  { %4639 = vmatpush1.bf16.msra.mxu1 %v17888_v40  ;;  %4498 = vmatprep.subr.bf16.mxu0 %v17893_v50  ;;  %v17926_v40 = vld [vmem:[%s24154_s5 + $0x36c] ss:$16 sps:$4 sm:$0xff]   ;;  %v17921_v50 = vld [vmem:[%s24154_s5 + $0x360] ss:$16 sps:$4 sm:$0xff]  }
 0x55f   :  { %4640 = vmatprep.subr.bf16.mxu1 %v17896_v31  ;;  %v17924_v31 = vld [vmem:[%s24154_s5 + $0x368] ss:$16 sps:$4 sm:$0xff]  }
 0x560   :  { %4478 = vmatmul.mubr.bf16.gmra.mrb[140].mxu0 %v2466_v13  ;;  %4620 = vmatmul.mubr.bf16.gmra.mrb[140].mxu1 %v2466_v13  ;;  %v17932_v13 = vld [vmem:[%s24154_s5 + $0x38c] ss:$16 sps:$4 sm:$0xff]  }
 0x561   :  { %4499 = vmatpush1.bf16.msra.mxu0 %v17891_v8  ;;  %14890 = vmatprep.mubr.msk.bf16.mxu0 %vm826_vm0, %v19974_v26  ;;  %v17929_v8 = vld [vmem:[%s24154_s5 + $0x384] ss:$16 sps:$4 sm:$0xff]  }
 0x562   :  { %4641 = vmatpush1.bf16.msra.mxu1 %v17894_v29  ;;  %14894 = vmatprep.mubr.msk.bf16.mxu1 %vm826_vm0, %v19974_v26  ;;  %v17906_v26 = vld [vmem:[%s24154_s5 + $0x308] ss:$16 sps:$4 sm:$0xff]   ;;  %v17927_v29 = vld [vmem:[%s24154_s5 + $0x380] ss:$16 sps:$4 sm:$0xff]  }
 0x563   :  { %4500 = vmatprep.subr.bf16.mxu0 %v17899_v56  ;;  %4642 = vmatprep.subr.bf16.mxu1 %v17902_v41  ;;  %v17930_v56 = vld [vmem:[%s24154_s5 + $0x388] ss:$16 sps:$4 sm:$0xff]   ;;  %v17935_v41 = vld [vmem:[%s24154_s5 + $0x3a4] ss:$16 sps:$4 sm:$0xff]  }
 0x565   :  { %4501 = vmatpush1.bf16.msra.mxu0 %v17897_v0  ;;  %v17938_v0 = vld [vmem:[%s24154_s5 + $0x3ac] ss:$16 sps:$4 sm:$0xff]  }
 0x566   :  { %4643 = vmatpush1.bf16.msra.mxu1 %v17900_v22  ;;  %4502 = vmatprep.subr.bf16.mxu0 %v17905_v18  ;;  %v17933_v22 = vld [vmem:[%s24154_s5 + $0x3a0] ss:$16 sps:$4 sm:$0xff]   ;;  %v17936_v18 = vld [vmem:[%s24154_s5 + $0x3a8] ss:$16 sps:$4 sm:$0xff]  }
 0x567   :  { %4644 = vmatprep.subr.bf16.mxu1 %v17908_v10  ;;  %v17981_v10 = vld [vmem:[%s24154_s5 + $0x844] ss:$16 sps:$4 sm:$0xff]  }
 0x569   :  { %4503 = vmatpush1.bf16.msra.mxu0 %v17903_v39  ;;  %v17984_v39 = vld [vmem:[%s24154_s5 + $0x84c] ss:$16 sps:$4 sm:$0xff]  }
 0x56a   :  { %4645 = vmatpush1.bf16.msra.mxu1 %v17906_v26  ;;  %4504 = vmatprep.subr.bf16.mxu0 %v17911_v54  ;;  %v17979_v26 = vld [vmem:[%s24154_s5 + $0x840] ss:$16 sps:$4 sm:$0xff]   ;;  %v17982_v54 = vld [vmem:[%s24154_s5 + $0x848] ss:$16 sps:$4 sm:$0xff]  }
 0x56b   :  { %4646 = vmatprep.subr.bf16.mxu1 %v17914_v21  ;;  %v17987_v21 = vld [vmem:[%s24154_s5 + $0x864] ss:$16 sps:$4 sm:$0xff]  }
 0x56d   :  { %4505 = vmatpush1.bf16.msra.mxu0 %v17909_v20  ;;  %v17990_v20 = vld [vmem:[%s24154_s5 + $0x86c] ss:$16 sps:$4 sm:$0xff]  }
 0x56e   :  { %4647 = vmatpush1.bf16.msra.mxu1 %v17912_v23  ;;  %4506 = vmatprep.subr.bf16.mxu0 %v17917_v1  ;;  %v17985_v23 = vld [vmem:[%s24154_s5 + $0x860] ss:$16 sps:$4 sm:$0xff]   ;;  %v17988_v1 = vld [vmem:[%s24154_s5 + $0x868] ss:$16 sps:$4 sm:$0xff]  }
 0x56f   :  { %4648 = vmatprep.subr.bf16.mxu1 %v17920_v5  ;;  %v17993_v5 = vld [vmem:[%s24154_s5 + $0x884] ss:$16 sps:$4 sm:$0xff]  }
 0x571   :  { %4507 = vmatpush1.bf16.msra.mxu0 %v17915_v9  ;;  %v17996_v9 = vld [vmem:[%s24154_s5 + $0x88c] ss:$16 sps:$4 sm:$0xff]  }
 0x572   :  { %4649 = vmatpush1.bf16.msra.mxu1 %v17918_v28  ;;  %4508 = vmatprep.subr.bf16.mxu0 %v17923_v36  ;;  %v17991_v28 = vld [vmem:[%s24154_s5 + $0x880] ss:$16 sps:$4 sm:$0xff]   ;;  %v17994_v36 = vld [vmem:[%s24154_s5 + $0x888] ss:$16 sps:$4 sm:$0xff]  }
 0x573   :  { %4650 = vmatprep.subr.bf16.mxu1 %v17926_v40  ;;  %v17999_v40 = vld [vmem:[%s24154_s5 + $0x8a4] ss:$16 sps:$4 sm:$0xff]  }
 0x575   :  { %4509 = vmatpush1.bf16.msra.mxu0 %v17921_v50  ;;  %v18002_v50 = vld [vmem:[%s24154_s5 + $0x8ac] ss:$16 sps:$4 sm:$0xff]  }
 0x576   :  { %4651 = vmatpush1.bf16.msra.mxu1 %v17924_v31  ;;  %4510 = vmatprep.subr.bf16.mxu0 %v17929_v8  ;;  %v17997_v31 = vld [vmem:[%s24154_s5 + $0x8a0] ss:$16 sps:$4 sm:$0xff]   ;;  %v18000_v8 = vld [vmem:[%s24154_s5 + $0x8a8] ss:$16 sps:$4 sm:$0xff]  }
 0x577   :  { %4652 = vmatprep.subr.bf16.mxu1 %v17932_v13  ;;  %v18005_v13 = vld [vmem:[%s24154_s5 + $0x8c4] ss:$16 sps:$4 sm:$0xff]  }
 0x579   :  { %4511 = vmatpush1.bf16.msra.mxu0 %v17927_v29  ;;  %v18008_v29 = vld [vmem:[%s24154_s5 + $0x8cc] ss:$16 sps:$4 sm:$0xff]  }
 0x57a   :  { %4653 = vmatpush1.bf16.msra.mxu1 %v17930_v56  ;;  %4512 = vmatprep.subr.bf16.mxu0 %v17935_v41  ;;  %v18003_v56 = vld [vmem:[%s24154_s5 + $0x8c0] ss:$16 sps:$4 sm:$0xff]   ;;  %v18006_v41 = vld [vmem:[%s24154_s5 + $0x8c8] ss:$16 sps:$4 sm:$0xff]  }
 0x57b   :  { %4654 = vmatprep.subr.bf16.mxu1 %v17938_v0  ;;  %v18011_v0 = vld [vmem:[%s24154_s5 + $0x8e4] ss:$16 sps:$4 sm:$0xff]  }
 0x57d   :  { %4513 = vmatpush1.bf16.msra.mxu0 %v17933_v22  ;;  %v18014_v22 = vld [vmem:[%s24154_s5 + $0x8ec] ss:$16 sps:$4 sm:$0xff]  }
 0x57e   :  { %4655 = vmatpush1.bf16.msra.mxu1 %v17936_v18  ;;  %4737 = vmatprep.subr.bf16.mxu0 %v19387_v4  ;;  %v24176_v4 = vmov 0   ;;  %v18009_v18 = vld [vmem:[%s24154_s5 + $0x8e0] ss:$16 sps:$4 sm:$0xff]  }
 0x57f   :  { %4808 = vmatprep.subr.bf16.mxu1 %v19389_v7  ;;  %v17939_v7 = vld [vmem:[%s24153_s4 + $0x38] sm:$0xff]  }
 0x580   :  { %4519 = vmatmul.mubr.bf16.vlgmr.msra.gmra.mrb[120].mxu0 %v19972_v6 }
 0x581   :  { %4661 = vmatmul.mubr.bf16.vlgmr.msra.gmra.mrb[120].mxu1 %v19972_v6  ;;  %14891 = vmatprep.mubr.msk.bf16.mxu0 %vm826_vm0, %v20002_v62  ;;  %v17972_v6 = vld [vmem:[%s24154_s5 + $0x80c] ss:$16 sps:$4 sm:$0xff]  }
 0x582   :  { %14895 = vmatprep.mubr.msk.bf16.mxu1 %vm826_vm0, %v20002_v62  ;;  %4738 = vmatpush1.bf16.msra.mxu0 %v19383_v2  ;;  %v2469_v2 = vpack.c.bf16 %v20052_v52, %v20052_v52  ;;  %v17970_v62 = vld [vmem:[%s24154_s5 + $0x808] ss:$16 sps:$4 sm:$0xff]  }
 0x583   :  { %4809 = vmatpush1.bf16.msra.mxu1 %v19385_v3  ;;  %4739 = vmatprep.subr.bf16.mxu0 %v19407_v45  ;;  %v2468_v3 = vpack.c.bf16 %v20044_v17, %v20044_v17  ;;  %v17973_v17 = vld [vmem:[%s24154_s5 + $0x820] ss:$16 sps:$4 sm:$0xff]   ;;  %v17976_v52 = vld [vmem:[%s24154_s5 + $0x828] ss:$16 sps:$4 sm:$0xff]  }
 0x584   :  { %4810 = vmatprep.subr.bf16.mxu1 %v19409_v48 }
 0x586   :  { %4740 = vmatpush1.bf16.msra.mxu0 %v19403_v43  ;;  %v17940_v43 = vld [vmem:[%s24153_s4 + $0x40] sm:$0xff]  }
 0x587   :  { %4811 = vmatpush1.bf16.msra.mxu1 %v19405_v44  ;;  %4741 = vmatprep.subr.bf16.mxu0 %v19427_v16  ;;  %v17941_v44 = vld [vmem:[%s24153_s4 + $0x48] sm:$0xff]   ;;  %v17942_v16 = vld [vmem:[%s24153_s4 + $0x50] ss:$0 sps:$4 sm:$0xff]  }
 0x588   :  { %4812 = vmatprep.subr.bf16.mxu1 %v19429_v19  ;;  %4529 = vmatmul.mubr.bf16.gmra.mrb[124].mxu0 %v20000_v61 }
 0x589   :  { %4671 = vmatmul.mubr.bf16.gmra.mrb[124].mxu1 %v20000_v61  ;;  %14892 = vmatprep.mubr.msk.bf16.mxu0 %vm826_vm0, %v20030_v38  ;;  %v17967_v61 = vld [vmem:[%s24154_s5 + $0x800] ss:$16 sps:$4 sm:$0xff]  }
 0x58a   :  { %14896 = vmatprep.mubr.msk.bf16.mxu1 %vm826_vm0, %v20030_v38  ;;  %4742 = vmatpush1.bf16.msra.mxu0 %v19423_v14  ;;  %v17978_v38 = vld [vmem:[%s24154_s5 + $0x82c] ss:$16 sps:$4 sm:$0xff]  }
 0x58b   :  { %4813 = vmatpush1.bf16.msra.mxu1 %v19425_v15  ;;  %4743 = vmatprep.subr.bf16.mxu0 %v19447_v60 }
 0x58c   :  { %4814 = vmatprep.subr.bf16.mxu1 %v19449_v63  ;;  %v17943_v63 = vld [vmem:[%s24154_s5 + $0x780] ss:$16 sps:$4 sm:$0xff]  }
 0x58e   :  { %4744 = vmatpush1.bf16.msra.mxu0 %v19443_v58 }
 0x58f   :  { %4815 = vmatpush1.bf16.msra.mxu1 %v19445_v59  ;;  %4745 = vmatprep.subr.bf16.mxu0 %v19467_v49  ;;  %v17948_v49 = vld [vmem:[%s24154_s5 + $0x78c] ss:$16 sps:$4 sm:$0xff]  }
 0x590   :  { %4816 = vmatprep.subr.bf16.mxu1 %v19469_v53  ;;  %4539 = vmatmul.mubr.bf16.gmra.mrb[128].mxu0 %v20028_v57  ;;  %v17951_v53 = vld [vmem:[%s24154_s5 + $0x7a4] ss:$16 sps:$4 sm:$0xff]  }
 0x591   :  { %4681 = vmatmul.mubr.bf16.gmra.mrb[128].mxu1 %v20028_v57  ;;  %14893 = vmatprep.mubr.msk.bf16.mxu0 %vm826_vm0, %v2469_v2  ;;  %v17975_v57 = vld [vmem:[%s24154_s5 + $0x824] ss:$16 sps:$4 sm:$0xff]  }
 0x592   :  { %14897 = vmatprep.mubr.msk.bf16.mxu1 %vm826_vm0, %v2469_v2  ;;  %4746 = vmatpush1.bf16.msra.mxu0 %v19463_v46  ;;  %v17945_v46 = vld [vmem:[%s24154_s5 + $0x784] ss:$16 sps:$4 sm:$0xff]   ;;  %v18012_v2 = vld [vmem:[%s24154_s5 + $0x8e8] ss:$16 sps:$4 sm:$0xff]  }
 0x593   :  { %4817 = vmatpush1.bf16.msra.mxu1 %v19465_v47  ;;  %4747 = vmatprep.subr.bf16.mxu0 %v19487_v32  ;;  %v17946_v47 = vld [vmem:[%s24154_s5 + $0x788] ss:$16 sps:$4 sm:$0xff]  }
 0x594   :  { %4818 = vmatprep.subr.bf16.mxu1 %v19489_v42  ;;  %v17952_v32 = vld [vmem:[%s24154_s5 + $0x7a8] ss:$16 sps:$4 sm:$0xff]   ;;  %v17957_v42 = vld [vmem:[%s24154_s5 + $0x7c4] ss:$16 sps:$4 sm:$0xff]  }
 0x596   :  { %4748 = vmatpush1.bf16.msra.mxu0 %v19483_v27  ;;  %v17954_v27 = vld [vmem:[%s24154_s5 + $0x7ac] ss:$16 sps:$4 sm:$0xff]  }
 0x597   :  { %4819 = vmatpush1.bf16.msra.mxu1 %v19485_v51  ;;  %4749 = vmatprep.subr.bf16.mxu0 %v19507_v35  ;;  %v17949_v51 = vld [vmem:[%s24154_s5 + $0x7a0] ss:$16 sps:$4 sm:$0xff]   ;;  %v17958_v35 = vld [vmem:[%s24154_s5 + $0x7c8] ss:$16 sps:$4 sm:$0xff]  }
 0x598   :  { %4820 = vmatprep.subr.bf16.mxu1 %v19509_v55  ;;  %4549 = vmatmul.mubr.bf16.gmra.mrb[144].mxu0 %v2468_v3  ;;  %v17963_v55 = vld [vmem:[%s24154_s5 + $0x7e4] ss:$16 sps:$4 sm:$0xff]  }
 0x599   :  { %4691 = vmatmul.mubr.bf16.gmra.mrb[144].mxu1 %v2468_v3  ;;  %4769 = vmatprep.mubr.bf16.mxu0 %v24176_v4  ;;  %v18017_v3 = vld [vmem:[%s24154_s5 + $0x904] ss:$16 sps:$4 sm:$0xff]  }
 0x59a   :  { %4750 = vmatpush1.bf16.msra.mxu0 %v19503_v24  ;;  %4840 = vmatprep.mubr.bf16.mxu1 %v24176_v4  ;;  %v17960_v24 = vld [vmem:[%s24154_s5 + $0x7cc] ss:$16 sps:$4 sm:$0xff]  }
 0x59b   :  { %4821 = vmatpush1.bf16.msra.mxu1 %v19505_v30  ;;  %14909 = vmatprep.subr.msk.bf16.mxu0 %vm2299_vm1, %v19523_v11  ;;  %v17955_v30 = vld [vmem:[%s24154_s5 + $0x7c0] ss:$16 sps:$4 sm:$0xff]   ;;  %v17966_v11 = vld [vmem:[%s24154_s5 + $0x7ec] ss:$16 sps:$4 sm:$0xff]  }
 0x59c   :  { %14914 = vmatprep.subr.msk.bf16.mxu1 %vm2299_vm1, %v19644_v25  ;;  %v17964_v25 = vld [vmem:[%s24154_s5 + $0x7e8] ss:$16 sps:$4 sm:$0xff]  }
 0x59e   :  { %4752 = vmatpush1.bf16.msra.mxu0 %v19529_v37  ;;  %v17961_v37 = vld [vmem:[%s24154_s5 + $0x7e0] ss:$16 sps:$4 sm:$0xff]  }
 0x59f   :  { %4823 = vmatpush1.bf16.msra.mxu1 %v19661_v12  ;;  %5628 = vmatprep.subr.bf16.mxu0 %v17945_v46  ;;  %v17969_v12 = vld [vmem:[%s24154_s5 + $0x804] ss:$16 sps:$4 sm:$0xff]   ;;  %v18030_v46 = vld [vmem:[%s24154_s5 + $0x948] ss:$16 sps:$4 sm:$0xff]  }
 0x5a0   :  { %5770 = vmatprep.subr.bf16.mxu1 %v17948_v49 }
 0x5a1   :  { %14910 = vmatmul.mubr.msk.bf16.vlgmr.msra.gmra.mrb[148].mxu0 %vm2286_vm2, %v17939_v7 }
 0x5a2   :  { %4779 = vmatprep.mubr.bf16.mxu0 %v24176_v4  ;;  %14915 = vmatmul.mubr.msk.bf16.vlgmr.msra.gmra.mrb[148].mxu1 %vm2286_vm2, %v17939_v7  ;;  %v18020_v7 = vld [vmem:[%s24154_s5 + $0x90c] ss:$16 sps:$4 sm:$0xff]  }
 0x5a3   :  { %4850 = vmatprep.mubr.bf16.mxu1 %v24176_v4  ;;  %5629 = vmatpush1.bf16.msra.mxu0 %v17943_v63  ;;  %v18027_v63 = vld [vmem:[%s24154_s5 + $0x940] ss:$16 sps:$4 sm:$0xff]  }
 0x5a4   :  { %5771 = vmatpush1.bf16.msra.mxu1 %v17946_v47  ;;  %5630 = vmatprep.subr.bf16.mxu0 %v17951_v53  ;;  %v18032_v47 = vld [vmem:[%s24154_s5 + $0x94c] ss:$16 sps:$4 sm:$0xff]  }
 0x5a5   :  { %5772 = vmatprep.subr.bf16.mxu1 %v17954_v27 }
 0x5a7   :  { %5631 = vmatpush1.bf16.msra.mxu0 %v17949_v51 }
 0x5a8   :  { %5773 = vmatpush1.bf16.msra.mxu1 %v17952_v32  ;;  %5632 = vmatprep.subr.bf16.mxu0 %v17957_v42 }
 0x5a9   :  { %14911 = vmatmul.mubr.msk.bf16.gmra.mrb[152].mxu0 %vm2286_vm2, %v17940_v43  ;;  %5774 = vmatprep.subr.bf16.mxu1 %v17960_v24 }
 0x5aa   :  { %4789 = vmatprep.mubr.bf16.mxu0 %v24176_v4  ;;  %14916 = vmatmul.mubr.msk.bf16.gmra.mrb[152].mxu1 %vm2286_vm2, %v17940_v43  ;;  %v18015_v43 = vld [vmem:[%s24154_s5 + $0x900] ss:$16 sps:$4 sm:$0xff]  }
 0x5ab   :  { %4860 = vmatprep.mubr.bf16.mxu1 %v24176_v4  ;;  %5633 = vmatpush1.bf16.msra.mxu0 %v17955_v30 }
 0x5ac   :  { %5775 = vmatpush1.bf16.msra.mxu1 %v17958_v35  ;;  %5634 = vmatprep.subr.bf16.mxu0 %v17963_v55 }
 0x5ad   :  { %5776 = vmatprep.subr.bf16.mxu1 %v17966_v11  ;;  %v18035_v11 = vld [vmem:[%s24154_s5 + $0x964] ss:$16 sps:$4 sm:$0xff]  }
 0x5af   :  { %5635 = vmatpush1.bf16.msra.mxu0 %v17961_v37 }
 0x5b0   :  { %5777 = vmatpush1.bf16.msra.mxu1 %v17964_v25  ;;  %5636 = vmatprep.subr.bf16.mxu0 %v17969_v12  ;;  %v18033_v25 = vld [vmem:[%s24154_s5 + $0x960] ss:$16 sps:$4 sm:$0xff]   ;;  %v18044_v12 = vld [vmem:[%s24154_s5 + $0x98c] ss:$16 sps:$4 sm:$0xff]  }
 0x5b1   :  { %14912 = vmatmul.mubr.msk.bf16.gmra.mrb[156].mxu0 %vm2286_vm2, %v17941_v44  ;;  %5778 = vmatprep.subr.bf16.mxu1 %v17972_v6 }
 0x5b2   :  { %4799 = vmatprep.mubr.bf16.mxu0 %v24176_v4  ;;  %14917 = vmatmul.mubr.msk.bf16.gmra.mrb[156].mxu1 %vm2286_vm2, %v17941_v44  ;;  %v18018_v44 = vld [vmem:[%s24154_s5 + $0x908] ss:$16 sps:$4 sm:$0xff]  }
 0x5b3   :  { %v20518_v45 = vpop.f32.mrb[132].mxu0  ;;  %v20520_v48 = vpop.f32.mrb[132].mxu1  ;;  %4870 = vmatprep.mubr.bf16.mxu1 %v24176_v4  ;;  %5637 = vmatpush1.bf16.msra.mxu0 %v17967_v61 }
 0x5b4   :  { %v20523_v14 = vpop.f32.mrb[133].mxu0  ;;  %v20525_v15 = vpop.f32.mrb[133].mxu1  ;;  %5779 = vmatpush1.bf16.msra.mxu1 %v17970_v62  ;;  %5638 = vmatprep.subr.bf16.mxu0 %v17975_v57 }
 0x5b5   :  { %v3587_v19 = vpop.f32.mrb[134].mxu0  ;;  %v3729_v58 = vpop.f32.mrb[134].mxu1  ;;  %5780 = vmatprep.subr.bf16.mxu1 %v17978_v38 }
 0x5b6   :  { %v3588_v59 = vpop.f32.mrb[135].mxu0  ;;  %v3730_v60 = vpop.f32.mrb[135].mxu1  ;;  %v18026_v19 = vld [vmem:[%s24154_s5 + $0x92c] ss:$16 sps:$4 sm:$0xff]   ;;  %v18021_v58 = vld [vmem:[%s24154_s5 + $0x920] ss:$16 sps:$4 sm:$0xff]  }
 0x5b7   :  { %5639 = vmatpush1.bf16.msra.mxu0 %v17973_v17  ;;  %v18024_v59 = vld [vmem:[%s24154_s5 + $0x928] ss:$16 sps:$4 sm:$0xff]   ;;  %v18029_v60 = vld [vmem:[%s24154_s5 + $0x944] ss:$16 sps:$4 sm:$0xff]  }
 0x5b8   :  { %5781 = vmatpush1.bf16.msra.mxu1 %v17976_v52  ;;  %5640 = vmatprep.subr.bf16.mxu0 %v17981_v10 }
 0x5b9   :  { %14913 = vmatmul.mubr.msk.bf16.gmra.mrb[160].mxu0 %vm2286_vm2, %v17942_v16  ;;  %5782 = vmatprep.subr.bf16.mxu1 %v17984_v39 }
 0x5ba   :  { %14918 = vmatmul.mubr.msk.bf16.gmra.mrb[160].mxu1 %vm2286_vm2, %v17942_v16  ;;  %v18023_v16 = vld [vmem:[%s24154_s5 + $0x924] ss:$16 sps:$4 sm:$0xff]  }
 0x5bb   :  { %5641 = vmatpush1.bf16.msra.mxu0 %v17979_v26 }
 0x5bc   :  { %5783 = vmatpush1.bf16.msra.mxu1 %v17982_v54  ;;  %5642 = vmatprep.subr.bf16.mxu0 %v17987_v21 }
 0x5bd   :  { %5784 = vmatprep.subr.bf16.mxu1 %v17990_v20 }
 0x5bf   :  { %5643 = vmatpush1.bf16.msra.mxu0 %v17985_v23 }
 0x5c0   :  { %5785 = vmatpush1.bf16.msra.mxu1 %v17988_v1  ;;  %5644 = vmatprep.subr.bf16.mxu0 %v17993_v5 }
 0x5c1   :  { %5786 = vmatprep.subr.bf16.mxu1 %v17996_v9 }
 0x5c3   :  { %5645 = vmatpush1.bf16.msra.mxu0 %v17991_v28 }
 0x5c4   :  { %5787 = vmatpush1.bf16.msra.mxu1 %v17994_v36  ;;  %5646 = vmatprep.subr.bf16.mxu0 %v17999_v40 }
 0x5c5   :  { %5788 = vmatprep.subr.bf16.mxu1 %v18002_v50 }
 0x5c7   :  { %5647 = vmatpush1.bf16.msra.mxu0 %v17997_v31 }
 0x5c8   :  { %5789 = vmatpush1.bf16.msra.mxu1 %v18000_v8  ;;  %5648 = vmatprep.subr.bf16.mxu0 %v18005_v13 }
 0x5c9   :  { %5790 = vmatprep.subr.bf16.mxu1 %v18008_v29 }
 0x5cb   :  { %5649 = vmatpush1.bf16.msra.mxu0 %v18003_v56 }
 0x5cc   :  { %5791 = vmatpush1.bf16.msra.mxu1 %v18006_v41  ;;  %5650 = vmatprep.subr.bf16.mxu0 %v18011_v0 }
 0x5cd   :  { %5792 = vmatprep.subr.bf16.mxu1 %v18014_v22 }
 0x5cf   :  { %5651 = vmatpush1.bf16.msra.mxu0 %v18009_v18 }
 0x5d0   :  { %5793 = vmatpush1.bf16.msra.mxu1 %v18012_v2  ;;  %5652 = vmatprep.subr.bf16.mxu0 %v18017_v3 }
 0x5d1   :  { %5794 = vmatprep.subr.bf16.mxu1 %v18020_v7 }
 0x5d3   :  { %5653 = vmatpush1.bf16.msra.mxu0 %v18015_v43  ;;  %v18039_v43 = vld [vmem:[%s24154_s5 + $0x980] ss:$16 sps:$4 sm:$0xff]  }
 0x5d4   :  { %5795 = vmatpush1.bf16.msra.mxu1 %v18018_v44  ;;  %5654 = vmatprep.subr.bf16.mxu0 %v18023_v16  ;;  %v18042_v44 = vld [vmem:[%s24154_s5 + $0x988] ss:$16 sps:$4 sm:$0xff]  }
 0x5d5   :  { %5796 = vmatprep.subr.bf16.mxu1 %v18026_v19 }
 0x5d7   :  { %5655 = vmatpush1.bf16.msra.mxu0 %v18021_v58  ;;  %v18047_v58 = vld [vmem:[%s24154_s5 + $0x9a4] ss:$16 sps:$4 sm:$0xff]  }
 0x5d8   :  { %5797 = vmatpush1.bf16.msra.mxu1 %v18024_v59  ;;  %5656 = vmatprep.subr.bf16.mxu0 %v18029_v60  ;;  %v18050_v59 = vld [vmem:[%s24154_s5 + $0x9ac] ss:$16 sps:$4 sm:$0xff]  }
 0x5d9   :  { %5798 = vmatprep.subr.bf16.mxu1 %v18032_v47 }
 0x5db   :  { %5657 = vmatpush1.bf16.msra.mxu0 %v18027_v63  ;;  %v18045_v63 = vld [vmem:[%s24154_s5 + $0x9a0] ss:$16 sps:$4 sm:$0xff]  }
 0x5dc   :  { %5799 = vmatpush1.bf16.msra.mxu1 %v18030_v46  ;;  %5658 = vmatprep.subr.bf16.mxu0 %v18035_v11  ;;  %v18048_v46 = vld [vmem:[%s24154_s5 + $0x9a8] ss:$16 sps:$4 sm:$0xff]  }
 0x5dd   :  { %v18054_v11 = vld [vmem:[%s24154_s5 + $0x9c8] ss:$16 sps:$4 sm:$0xff]  }
 0x5df   :  { %5659 = vmatpush1.bf16.msra.mxu0 %v18033_v25  ;;  %v18059_v25 = vld [vmem:[%s24154_s5 + $0x9e4] ss:$16 sps:$4 sm:$0xff]  }
 0x5f3   :  { %v3654_v49 = vpop.f32.mrb[136].mxu0  ;;  %v3796_v53 = vpop.f32.mrb[136].mxu1 }
 0x5f4   :  { %v3655_v27 = vadd.f32 %v3654_v49, %v20518_v45  ;;  %v3797_v51 = vadd.f32 %v3796_v53, %v20520_v48  ;;  %v3656_v32 = vpop.f32.mrb[137].mxu0  ;;  %v3798_v42 = vpop.f32.mrb[137].mxu1  ;;  %v18038_v45 = vld [vmem:[%s24154_s5 + $0x96c] ss:$16 sps:$4 sm:$0xff]   ;;  %v18053_v49 = vld [vmem:[%s24154_s5 + $0x9c4] ss:$16 sps:$4 sm:$0xff]  }
 0x5f5   :  { %v3657_v24 = vadd.f32 %v3656_v32, %v20523_v14  ;;  %v3799_v30 = vadd.f32 %v3798_v42, %v20525_v15  ;;  %v3658_v35 = vpop.f32.mrb[138].mxu0  ;;  %v3800_v55 = vpop.f32.mrb[138].mxu1  ;;  %v18036_v14 = vld [vmem:[%s24154_s5 + $0x968] ss:$16 sps:$4 sm:$0xff]   ;;  %5800 = vmatprep.subr.bf16.mxu1 %v18038_v45  ;;  %v18041_v15 = vld [vmem:[%s24154_s5 + $0x984] ss:$16 sps:$4 sm:$0xff]  }
 0x5f6   :  { %v3659_v37 = vpop.f32.mrb[139].mxu0  ;;  %v3801_v48 = vpop.f32.mrb[139].mxu1  ;;  %5801 = vmatpush1.bf16.msra.mxu1 %v18036_v14  ;;  %5699 = vmatprep.subr.bf16.mxu0 %v18041_v15  ;;  %v18056_v53 = vld [vmem:[%s24154_s5 + $0x9cc] ss:$16 sps:$4 sm:$0xff]   ;;  %v18051_v55 = vld [vmem:[%s24154_s5 + $0x9c0] ss:$16 sps:$4 sm:$0xff]  }
 0x5f7   :  { %5841 = vmatprep.subr.bf16.mxu1 %v18044_v12  ;;  %v18062_v14 = vld [vmem:[%s24154_s5 + $0x9ec] ss:$16 sps:$4 sm:$0xff]   ;;  %v18057_v12 = vld [vmem:[%s24154_s5 + $0x9e0] ss:$16 sps:$4 sm:$0xff]  }
 0x633   :  { %v4479_v6 = vpop.f32.mrb[140].mxu0  ;;  %v4621_v61 = vpop.f32.mrb[140].mxu1 }
 0x634   :  { %v4480_v62 = vadd.f32 %v4479_v6, %v3655_v27  ;;  %v4622_v57 = vadd.f32 %v4621_v61, %v3797_v51  ;;  %v4481_v38 = vpop.f32.mrb[141].mxu0  ;;  %v4623_v17 = vpop.f32.mrb[141].mxu1  ;;  %v18060_v6 = vld [vmem:[%s24154_s5 + $0x9e8] ss:$16 sps:$4 sm:$0xff]  }
 0x635   :  { %v4482_v52 = vadd.f32 %v4481_v38, %v3657_v24  ;;  %v4624_v10 = vadd.f32 %v4623_v17, %v3799_v30  ;;  %v4483_v39 = vpop.f32.mrb[142].mxu0  ;;  %v4625_v26 = vpop.f32.mrb[142].mxu1 }
 0x636   :  { %v4484_v54 = vpop.f32.mrb[143].mxu0  ;;  %v4626_v21 = vpop.f32.mrb[143].mxu1 }
 0x637   :  { %v18063_v21 = vld [vmem:[%s24154_s5 + $0xa00] ss:$16 sps:$4 sm:$0xff]  }
 0x66b   :  { %v4550_v20 = vpop.f32.mrb[144].mxu0 }
 0x66c   :  { %v20734_v23 = vadd.f32 %v4550_v20, %v4480_v62  ;;  %v4692_v1 = vpop.f32.mrb[144].mxu1  ;;  %v4552_v5 = vpop.f32.mrb[145].mxu0  ;;  %v18065_v62 = vld [vmem:[%s24154_s5 + $0xa04] ss:$16 sps:$4 sm:$0xff]   ;;  %v18066_v20 = vld [vmem:[%s24154_s5 + $0xa08] ss:$16 sps:$4 sm:$0xff]  }
 0x66d   :  { %v20736_v9 = vadd.f32 %v4692_v1, %v4622_v57  ;;  %v20738_v28 = vadd.f32 %v4552_v5, %v4482_v52  ;;  %v4694_v36 = vpop.f32.mrb[145].mxu1  ;;  %v4554_v40 = vpop.f32.mrb[146].mxu0  ;;  %v18068_v57 = vld [vmem:[%s24154_s5 + $0xa0c] ss:$16 sps:$4 sm:$0xff]  }
 0x66e   :  { %v20740_v50 = vadd.f32 %v4694_v36, %v4624_v10  ;;  %v4696_v31 = vpop.f32.mrb[146].mxu1  ;;  %v4555_v8 = vpop.f32.mrb[147].mxu0  ;;  %v18071_v40 = vld [vmem:[%s24154_s5 + $0xa24] ss:$16 sps:$4 sm:$0xff]  }
 0x66f   :  { %v4697_v13 = vpop.f32.mrb[147].mxu1  ;;  %v18074_v31 = vld [vmem:[%s24154_s5 + $0xa2c] ss:$16 sps:$4 sm:$0xff]  }
 0x670   :  { %v18069_v13 = vld [vmem:[%s24154_s5 + $0xa20] ss:$16 sps:$4 sm:$0xff]  }
 0x674   :  { %v4771_v29 = vpop.f32.mrb[148].mxu0 }
 0x675   :  { %v4773_v56 = vpop.f32.mrb[149].mxu0  ;;  %v4842_v41 = vpop.f32.mrb[148].mxu1 }
 0x676   :  { %v4775_v0 = vpop.f32.mrb[150].mxu0  ;;  %v4844_v22 = vpop.f32.mrb[149].mxu1 }
 0x677   :  { %v4879_v18 = vpack.c.bf16 %v4775_v0, %v4771_v29  ;;  %v4777_v2 = vpop.f32.mrb[151].mxu0  ;;  %v4846_v3 = vpop.f32.mrb[150].mxu1  ;;  %v18072_v29 = vld [vmem:[%s24154_s5 + $0xa28] ss:$16 sps:$4 sm:$0xff]   ;;  %v18080_v0 = vld [vmem:[%s24154_s5 + $0xa4c] ss:$16 sps:$4 sm:$0xff]  }
 0x678   :  { %v4880_v7 = vpack.c.bf16 %v4777_v2, %v4773_v56  ;;  %v20748_v16 = vpack.c.bf16 %v4846_v3, %v4842_v41  ;;  %v4848_v19 = vpop.f32.mrb[151].mxu1  ;;  %v18077_v41 = vld [vmem:[%s24154_s5 + $0xa44] ss:$16 sps:$4 sm:$0xff]  }
 0x679   :  { %v20756_v60 = vpack.c.bf16 %v4848_v19, %v4844_v22 }
 0x67a   :  { %5660 = vmatprep.mubr.bf16.mxu0 %v4880_v7  ;;  %5802 = vmatprep.mubr.bf16.mxu1 %v4880_v7 }
 0x67b   :  { %5661 = vmatmul.mubr.bf16.vlgmr.msra.gmra.mrb[120].mxu0 %v4879_v18  ;;  %5803 = vmatmul.mubr.bf16.vlgmr.msra.gmra.mrb[120].mxu1 %v4879_v18 }
 0x67c   :  { %5700 = vmatpush1.bf16.msra.mxu0 %v18039_v43  ;;  %5842 = vmatpush1.bf16.msra.mxu1 %v18042_v44  ;;  %v4781_v47 = vpop.f32.mrb[152].mxu0 }
 0x67d   :  { %5701 = vmatprep.subr.bf16.mxu0 %v18047_v58  ;;  %5843 = vmatprep.subr.bf16.mxu1 %v18050_v59  ;;  %v4783_v27 = vpop.f32.mrb[153].mxu0  ;;  %v4852_v51 = vpop.f32.mrb[152].mxu1  ;;  %v18075_v58 = vld [vmem:[%s24154_s5 + $0xa40] ss:$16 sps:$4 sm:$0xff]   ;;  %v18078_v59 = vld [vmem:[%s24154_s5 + $0xa48] ss:$16 sps:$4 sm:$0xff]  }
 0x67e   :  { %v4785_v32 = vpop.f32.mrb[154].mxu0  ;;  %v4854_v42 = vpop.f32.mrb[153].mxu1 }
 0x67f   :  { %v4883_v24 = vpack.c.bf16 %v4785_v32, %v4781_v47  ;;  %v4787_v30 = vpop.f32.mrb[155].mxu0  ;;  %v4856_v35 = vpop.f32.mrb[154].mxu1  ;;  %v18086_v47 = vld [vmem:[%s24154_s5 + $0xa6c] ss:$16 sps:$4 sm:$0xff]   ;;  %v18087_v32 = vld [vmem:[%s24154_s5 + $0xa80] ss:$16 sps:$4 sm:$0xff]  }
 0x680   :  { %5702 = vmatpush1.bf16.msra.mxu0 %v18045_v63  ;;  %5844 = vmatpush1.bf16.msra.mxu1 %v18048_v46  ;;  %v4884_v45 = vpack.c.bf16 %v4787_v30, %v4783_v27  ;;  %v20776_v37 = vpack.c.bf16 %v4856_v35, %v4852_v51  ;;  %v4858_v48 = vpop.f32.mrb[155].mxu1  ;;  %v18083_v46 = vld [vmem:[%s24154_s5 + $0xa64] ss:$16 sps:$4 sm:$0xff]   ;;  %v18092_v51 = vld [vmem:[%s24154_s5 + $0xa8c] ss:$16 sps:$4 sm:$0xff]  }
 0x681   :  { %5703 = vmatprep.subr.bf16.mxu0 %v18053_v49  ;;  %5845 = vmatprep.subr.bf16.mxu1 %v18056_v53  ;;  %v20784_v15 = vpack.c.bf16 %v4858_v48, %v4854_v42  ;;  %v18081_v49 = vld [vmem:[%s24154_s5 + $0xa60] ss:$16 sps:$4 sm:$0xff]   ;;  %v18084_v53 = vld [vmem:[%s24154_s5 + $0xa68] ss:$16 sps:$4 sm:$0xff]   ;;  %v18089_v27 = vld [vmem:[%s24154_s5 + $0xa84] ss:$16 sps:$4 sm:$0xff]  }
 0x682   :  { %5670 = vmatprep.mubr.bf16.mxu0 %v4884_v45  ;;  %5812 = vmatprep.mubr.bf16.mxu1 %v4884_v45  ;;  %v18090_v42 = vld [vmem:[%s24154_s5 + $0xa88] ss:$16 sps:$4 sm:$0xff]   ;;  %v18093_v30 = vld [vmem:[%s24154_s5 + $0xaa0] ss:$16 sps:$4 sm:$0xff]  }
 0x683   :  { %5671 = vmatmul.mubr.bf16.gmra.mrb[124].mxu0 %v4883_v24  ;;  %5813 = vmatmul.mubr.bf16.gmra.mrb[124].mxu1 %v4883_v24  ;;  %v18095_v24 = vld [vmem:[%s24154_s5 + $0xaa4] ss:$16 sps:$4 sm:$0xff]   ;;  %v18096_v35 = vld [vmem:[%s24154_s5 + $0xaa8] ss:$16 sps:$4 sm:$0xff]   ;;  %v18099_v45 = vld [vmem:[%s24154_s5 + $0xac0] ss:$16 sps:$4 sm:$0xff]  }
 0x684   :  { %5704 = vmatpush1.bf16.msra.mxu0 %v18051_v55  ;;  %5846 = vmatpush1.bf16.msra.mxu1 %v18054_v11  ;;  %v4791_v61 = vpop.f32.mrb[156].mxu0  ;;  %v18101_v55 = vld [vmem:[%s24154_s5 + $0xac4] ss:$16 sps:$4 sm:$0xff]   ;;  %v18104_v11 = vld [vmem:[%s24154_s5 + $0xacc] ss:$16 sps:$4 sm:$0xff]  }
 0x685   :  { %5705 = vmatprep.subr.bf16.mxu0 %v18059_v25  ;;  %5847 = vmatprep.subr.bf16.mxu1 %v18062_v14  ;;  %v4793_v38 = vpop.f32.mrb[157].mxu0  ;;  %v4862_v17 = vpop.f32.mrb[156].mxu1  ;;  %v18102_v48 = vld [vmem:[%s24154_s5 + $0xac8] ss:$16 sps:$4 sm:$0xff]   ;;  %v18107_v25 = vld [vmem:[%s24154_s5 + $0xae4] ss:$16 sps:$4 sm:$0xff]  }
 0x686   :  { %v4795_v52 = vpop.f32.mrb[158].mxu0  ;;  %v4864_v10 = vpop.f32.mrb[157].mxu1  ;;  %v18110_v14 = vld [vmem:[%s24154_s5 + $0xaec] ss:$16 sps:$4 sm:$0xff]  }
 0x687   :  { %v4887_v39 = vpack.c.bf16 %v4795_v52, %v4791_v61  ;;  %v4797_v26 = vpop.f32.mrb[159].mxu0  ;;  %v4866_v54 = vpop.f32.mrb[158].mxu1  ;;  %v18113_v61 = vld [vmem:[%s24154_s5 + $0xb04] ss:$16 sps:$4 sm:$0xff]   ;;  %v18122_v52 = vld [vmem:[%s24154_s5 + $0xb2c] ss:$16 sps:$4 sm:$0xff]  }
 0x688   :  { %5706 = vmatpush1.bf16.msra.mxu0 %v18057_v12  ;;  %5848 = vmatpush1.bf16.msra.mxu1 %v18060_v6  ;;  %v4888_v1 = vpack.c.bf16 %v4797_v26, %v4793_v38  ;;  %v20804_v5 = vpack.c.bf16 %v4866_v54, %v4862_v17  ;;  %v4868_v36 = vpop.f32.mrb[159].mxu1  ;;  %v18105_v12 = vld [vmem:[%s24154_s5 + $0xae0] ss:$16 sps:$4 sm:$0xff]   ;;  %v18108_v6 = vld [vmem:[%s24154_s5 + $0xae8] ss:$16 sps:$4 sm:$0xff]  }
 0x689   :  { %5707 = vmatprep.subr.bf16.mxu0 %v18065_v62  ;;  %5849 = vmatprep.subr.bf16.mxu1 %v18068_v57  ;;  %v20812_v8 = vpack.c.bf16 %v4868_v36, %v4864_v10  ;;  %v18116_v62 = vld [vmem:[%s24154_s5 + $0xb0c] ss:$16 sps:$4 sm:$0xff]   ;;  %v18111_v57 = vld [vmem:[%s24154_s5 + $0xb00] ss:$16 sps:$4 sm:$0xff]   ;;  %v18114_v38 = vld [vmem:[%s24154_s5 + $0xb08] ss:$16 sps:$4 sm:$0xff]  }
 0x68a   :  { %5680 = vmatprep.mubr.bf16.mxu0 %v4888_v1  ;;  %5822 = vmatprep.mubr.bf16.mxu1 %v4888_v1  ;;  %v18119_v17 = vld [vmem:[%s24154_s5 + $0xb24] ss:$16 sps:$4 sm:$0xff]   ;;  %v18117_v10 = vld [vmem:[%s24154_s5 + $0xb20] ss:$16 sps:$4 sm:$0xff]  }
 0x68b   :  { %5681 = vmatmul.mubr.bf16.gmra.mrb[128].mxu0 %v4887_v39  ;;  %5823 = vmatmul.mubr.bf16.gmra.mrb[128].mxu1 %v4887_v39  ;;  %v18120_v39 = vld [vmem:[%s24154_s5 + $0xb28] ss:$16 sps:$4 sm:$0xff]  }
 0x68c   :  { %5708 = vmatpush1.bf16.msra.mxu0 %v18063_v21  ;;  %5850 = vmatpush1.bf16.msra.mxu1 %v18066_v20  ;;  %v4801_v56 = vpop.f32.mrb[160].mxu0 }
 0x68d   :  { %5709 = vmatprep.subr.bf16.mxu0 %v18071_v40  ;;  %5851 = vmatprep.subr.bf16.mxu1 %v18074_v31  ;;  %v4803_v22 = vpop.f32.mrb[161].mxu0  ;;  %v20826_v18 = vpop.f32.mrb[160].mxu1  ;;  %v4891_v43 = vpack.c.bf16 %v4801_v56, %v4801_v56  ;;  %v5940_v40 = vld [vmem:[#allocation6] sm:$0xf]  ;;  %v24178_v56 = vld [vmem:[#allocation19_spill] sm:$0xff] }
 0x68e   :  { %v4892_v2 = vpack.c.bf16 %v4803_v22, %v4803_v22  ;;  %v4805_v3 = vpop.f32.mrb[162].mxu0  ;;  %v20828_v7 = vpop.f32.mrb[161].mxu1  ;;  %v20955_v31 = vrot.slane %v5940_v40, %v19352_v33 }
 0x68f   :  { %v4806_v44 = vpop.f32.mrb[163].mxu0  ;;  %v4876_v19 = vpop.f32.mrb[162].mxu1  ;;  %v4894_v26 = vpack.c.bf16 %v20828_v7, %v20828_v7 }
 0x690   :  { %5710 = vmatpush1.bf16.msra.mxu0 %v18069_v13  ;;  %5852 = vmatpush1.bf16.msra.mxu1 %v18072_v29  ;;  %v4877_v63 = vpop.f32.mrb[163].mxu1  ;;  %v24177_v13 = vld [vmem:[#allocation18_spill] sm:$0xff] }
 0x691   :  { %5711 = vmatprep.subr.bf16.mxu0 %v18077_v41  ;;  %5853 = vmatprep.subr.bf16.mxu1 %v18080_v0  ;;  %v20961_v29 = vrot.slane %v5940_v40, %v24177_v13  ;;  %v20964_v41 = vrot.slane %v5940_v40, %v24178_v56 }
 0x692   :  { %5690 = vmatprep.mubr.bf16.mxu0 %v4892_v2  ;;  %5832 = vmatprep.mubr.bf16.mxu1 %v4892_v2 }
 0x693   :  { %5691 = vmatmul.mubr.bf16.gmra.mrb[164].mxu0 %v4891_v43  ;;  %5833 = vmatmul.mubr.bf16.gmra.mrb[164].mxu1 %v4891_v43 }
 0x694   :  { %5712 = vmatpush1.bf16.msra.mxu0 %v18075_v58  ;;  %5854 = vmatpush1.bf16.msra.mxu1 %v18078_v59 }
 0x695   :  { %5713 = vmatprep.subr.bf16.mxu0 %v18083_v46  ;;  %5855 = vmatprep.subr.bf16.mxu1 %v18086_v47 }
 0x696   :  { %15159 = vmatprep.mubr.msk.bf16.mxu0 %vm826_vm0, %v20756_v60  ;;  %15163 = vmatprep.mubr.msk.bf16.mxu1 %vm826_vm0, %v20756_v60  ;;  %v18098_v60 = vld [vmem:[%s24154_s5 + $0xaac] ss:$16 sps:$4 sm:$0xff]  }
 0x698   :  { %5714 = vmatpush1.bf16.msra.mxu0 %v18081_v49  ;;  %5856 = vmatpush1.bf16.msra.mxu1 %v18084_v53 }
 0x699   :  { %5715 = vmatprep.subr.bf16.mxu0 %v18089_v27  ;;  %5857 = vmatprep.subr.bf16.mxu1 %v18092_v51 }
 0x69c   :  { %5716 = vmatpush1.bf16.msra.mxu0 %v18087_v32  ;;  %5858 = vmatpush1.bf16.msra.mxu1 %v18090_v42 }
 0x69d   :  { %5717 = vmatprep.subr.bf16.mxu0 %v18095_v24  ;;  %5859 = vmatprep.subr.bf16.mxu1 %v18098_v60 }
 0x6a0   :  { %5718 = vmatpush1.bf16.msra.mxu0 %v18093_v30  ;;  %5860 = vmatpush1.bf16.msra.mxu1 %v18096_v35 }
 0x6a1   :  { %5719 = vmatprep.subr.bf16.mxu0 %v18101_v55  ;;  %5861 = vmatprep.subr.bf16.mxu1 %v18104_v11 }
 0x6a4   :  { %5720 = vmatpush1.bf16.msra.mxu0 %v18099_v45  ;;  %5862 = vmatpush1.bf16.msra.mxu1 %v18102_v48 }
 0x6a5   :  { %5721 = vmatprep.subr.bf16.mxu0 %v18107_v25  ;;  %5863 = vmatprep.subr.bf16.mxu1 %v18110_v14 }
 0x6a8   :  { %5722 = vmatpush1.bf16.msra.mxu0 %v18105_v12  ;;  %5864 = vmatpush1.bf16.msra.mxu1 %v18108_v6 }
 0x6a9   :  { %5723 = vmatprep.subr.bf16.mxu0 %v18113_v61  ;;  %5865 = vmatprep.subr.bf16.mxu1 %v18116_v62 }
 0x6ac   :  { %5724 = vmatpush1.bf16.msra.mxu0 %v18111_v57  ;;  %5866 = vmatpush1.bf16.msra.mxu1 %v18114_v38 }
 0x6ad   :  { %5725 = vmatprep.subr.bf16.mxu0 %v18119_v17  ;;  %5867 = vmatprep.subr.bf16.mxu1 %v18122_v52 }
 0x6b0   :  { %5726 = vmatpush1.bf16.msra.mxu0 %v18117_v10  ;;  %5868 = vmatpush1.bf16.msra.mxu1 %v18120_v39 }
 0x6b3   :  { %5732 = vmatmul.mubr.bf16.vlgmr.msra.gmra.mrb[120].mxu0 %v20748_v16  ;;  %5874 = vmatmul.mubr.bf16.vlgmr.msra.gmra.mrb[120].mxu1 %v20748_v16  ;;  %v4893_v16 = vpack.c.bf16 %v20826_v18, %v20826_v18 }
 0x6b4   :  { %15160 = vmatprep.mubr.msk.bf16.mxu0 %vm826_vm0, %v20784_v15  ;;  %15164 = vmatprep.mubr.msk.bf16.mxu1 %vm826_vm0, %v20784_v15 }
 0x6bb   :  { %5742 = vmatmul.mubr.bf16.gmra.mrb[124].mxu0 %v20776_v37  ;;  %5884 = vmatmul.mubr.bf16.gmra.mrb[124].mxu1 %v20776_v37 }
 0x6bc   :  { %15161 = vmatprep.mubr.msk.bf16.mxu0 %vm826_vm0, %v20812_v8  ;;  %15165 = vmatprep.mubr.msk.bf16.mxu1 %vm826_vm0, %v20812_v8  ;;  %v20958_v8 = vrot.slane %v5940_v40, %v19355_v34 }
 0x6c3   :  { %5752 = vmatmul.mubr.bf16.gmra.mrb[128].mxu0 %v20804_v5  ;;  %5894 = vmatmul.mubr.bf16.gmra.mrb[128].mxu1 %v20804_v5 }
 0x6c4   :  { %15162 = vmatprep.mubr.msk.bf16.mxu0 %vm826_vm0, %v4894_v26  ;;  %15166 = vmatprep.mubr.msk.bf16.mxu1 %vm826_vm0, %v4894_v26 }
 0x6cb   :  { %5762 = vmatmul.mubr.bf16.gmra.mrb[168].mxu0 %v4893_v16  ;;  %5904 = vmatmul.mubr.bf16.gmra.mrb[168].mxu1 %v4893_v16 }
 0x6cc   :  { %6096 = vmatprep.mubr.bf16.mxu0 %v24176_v4  ;;  %6147 = vmatprep.mubr.bf16.mxu1 %v24176_v4 }
 0x766   :  { %v20946_v37 = vpop.f32.mrb[164].mxu0  ;;  %v20948_v15 = vpop.f32.mrb[164].mxu1 }
 0x767   :  { %v20950_v54 = vpop.f32.mrb[165].mxu0  ;;  %v20952_v21 = vpop.f32.mrb[165].mxu1 }
 0x768   :  { %v5696_v20 = vpop.f32.mrb[166].mxu0  ;;  %v5838_v1 = vpop.f32.mrb[166].mxu1 }
 0x769   :  { %v5697_v5 = vpop.f32.mrb[167].mxu0  ;;  %v5839_v36 = vpop.f32.mrb[167].mxu1 }
 0x786   :  { %v5733_v0 = vpop.f32.mrb[120].mxu0  ;;  %v5875_v22 = vpop.f32.mrb[120].mxu1 }
 0x787   :  { %v5962_v18 = vadd.f32 %v20955_v31, %v5733_v0  ;;  %v5964_v2 = vadd.f32 %v20958_v8, %v5875_v22  ;;  %v5735_v3 = vpop.f32.mrb[121].mxu0  ;;  %v5877_v7 = vpop.f32.mrb[121].mxu1 }
 0x788   :  { %v5963_v43 = vadd.f32 %v20961_v29, %v5735_v3  ;;  %v5965_v44 = vadd.f32 %v20964_v41, %v5877_v7  ;;  %v5737_v19 = vpop.f32.mrb[122].mxu0  ;;  %v5879_v58 = vpop.f32.mrb[122].mxu1 }
 0x789   :  { %v5966_v59 = vadd.f32 %v20955_v31, %v5737_v19  ;;  %v5968_v63 = vadd.f32 %v20958_v8, %v5879_v58  ;;  %v5739_v46 = vpop.f32.mrb[123].mxu0  ;;  %v5881_v47 = vpop.f32.mrb[123].mxu1  ;;  %v5990_v27 = vmax.f32 %v5962_v18, 0.0  ;;  %v5992_v51 = vmax.f32 %v5964_v2, 0.0 }
 0x78a   :  { %v5967_v49 = vadd.f32 %v20961_v29, %v5739_v46  ;;  %v5969_v53 = vadd.f32 %v20964_v41, %v5881_v47  ;;  %v5991_v24 = vmax.f32 %v5963_v43, 0.0  ;;  %v5993_v60 = vmax.f32 %v5965_v44, 0.0 }
 0x78b   :  { %v5994_v32 = vmax.f32 %v5966_v59, 0.0  ;;  %v5996_v42 = vmax.f32 %v5968_v63, 0.0 }
 0x78c   :  { %v5995_v30 = vmax.f32 %v5967_v49, 0.0  ;;  %v5997_v35 = vmax.f32 %v5969_v53, 0.0 }
 0x78d   :  { %v20974_v55 = vpack.c.bf16 %v5994_v32, %v5990_v27  ;;  %v20976_v11 = vpack.c.bf16 %v5996_v42, %v5992_v51 }
 0x78e   :  { %v20978_v45 = vpack.c.bf16 %v5995_v30, %v5991_v24  ;;  %v20980_v48 = vpack.c.bf16 %v5997_v35, %v5993_v60  ;;  %v5743_v25 = vpop.f32.mrb[124].mxu0  ;;  %v5885_v14 = vpop.f32.mrb[124].mxu1 }
 0x78f   :  { %v5970_v12 = vadd.f32 %v20955_v31, %v5743_v25  ;;  %v5972_v6 = vadd.f32 %v20958_v8, %v5885_v14  ;;  %v5745_v61 = vpop.f32.mrb[125].mxu0  ;;  %v5887_v62 = vpop.f32.mrb[125].mxu1 }
 0x790   :  { %v5971_v57 = vadd.f32 %v20961_v29, %v5745_v61  ;;  %v5973_v38 = vadd.f32 %v20964_v41, %v5887_v62  ;;  %v5747_v17 = vpop.f32.mrb[126].mxu0  ;;  %v5889_v52 = vpop.f32.mrb[126].mxu1  ;;  %6064 = vmatprep.subr.bf16.mxu0 %v20978_v45  ;;  %6115 = vmatprep.subr.bf16.mxu1 %v20980_v48 }
 0x791   :  { %v5974_v10 = vadd.f32 %v20955_v31, %v5747_v17  ;;  %v5976_v39 = vadd.f32 %v20958_v8, %v5889_v52  ;;  %v5749_v26 = vpop.f32.mrb[127].mxu0  ;;  %v5891_v16 = vpop.f32.mrb[127].mxu1  ;;  %6065 = vmatpush1.bf16.msra.mxu0 %v20974_v55  ;;  %6116 = vmatpush1.bf16.msra.mxu1 %v20976_v11  ;;  %v5998_v5 = vmax.f32 %v5970_v12, 0.0  ;;  %v6000_v36 = vmax.f32 %v5972_v6, 0.0 }
 0x792   :  { %v5975_v20 = vadd.f32 %v20961_v29, %v5749_v26  ;;  %v5977_v1 = vadd.f32 %v20964_v41, %v5891_v16  ;;  %v5999_v22 = vmax.f32 %v5971_v57, 0.0  ;;  %v6001_v18 = vmax.f32 %v5973_v38, 0.0 }
 0x793   :  { %v6002_v40 = vmax.f32 %v5974_v10, 0.0  ;;  %v6004_v0 = vmax.f32 %v5976_v39, 0.0 }
 0x794   :  { %v6003_v2 = vmax.f32 %v5975_v20, 0.0  ;;  %v6005_v3 = vmax.f32 %v5977_v1, 0.0 }
 0x795   :  { %v20994_v7 = vpack.c.bf16 %v6002_v40, %v5998_v5  ;;  %v20996_v43 = vpack.c.bf16 %v6004_v0, %v6000_v36 }
 0x796   :  { %v20998_v44 = vpack.c.bf16 %v6003_v2, %v5999_v22  ;;  %v21000_v19 = vpack.c.bf16 %v6005_v3, %v6001_v18  ;;  %v5753_v58 = vpop.f32.mrb[128].mxu0  ;;  %v5895_v59 = vpop.f32.mrb[128].mxu1 }
 0x797   :  { %v5978_v63 = vadd.f32 %v20955_v31, %v5753_v58  ;;  %v5980_v46 = vadd.f32 %v20958_v8, %v5895_v59  ;;  %v5755_v47 = vpop.f32.mrb[129].mxu0  ;;  %v5897_v49 = vpop.f32.mrb[129].mxu1 }
 0x798   :  { %v5979_v53 = vadd.f32 %v20961_v29, %v5755_v47  ;;  %v5981_v27 = vadd.f32 %v20964_v41, %v5897_v49  ;;  %v5757_v51 = vpop.f32.mrb[130].mxu0  ;;  %v5899_v32 = vpop.f32.mrb[130].mxu1  ;;  %6066 = vmatprep.subr.bf16.mxu0 %v20998_v44  ;;  %6117 = vmatprep.subr.bf16.mxu1 %v21000_v19 }
 0x799   :  { %v5982_v42 = vadd.f32 %v20955_v31, %v5757_v51  ;;  %v5984_v24 = vadd.f32 %v20958_v8, %v5899_v32  ;;  %v5759_v60 = vpop.f32.mrb[131].mxu0  ;;  %v5901_v30 = vpop.f32.mrb[131].mxu1  ;;  %6067 = vmatpush1.bf16.msra.mxu0 %v20994_v7  ;;  %6118 = vmatpush1.bf16.msra.mxu1 %v20996_v43  ;;  %v6006_v14 = vmax.f32 %v5978_v63, 0.0  ;;  %v6008_v12 = vmax.f32 %v5980_v46, 0.0 }
 0x79a   :  { %v5983_v35 = vadd.f32 %v20961_v29, %v5759_v60  ;;  %v5985_v25 = vadd.f32 %v20964_v41, %v5901_v30  ;;  %v6007_v62 = vmax.f32 %v5979_v53, 0.0  ;;  %v6009_v57 = vmax.f32 %v5981_v27, 0.0  ;;  %v18127_v60 = vld [vmem:[%s24157_s8 + $0x2a0] ss:$12 sps:$4 sm:$0xff]   ;;  %v18155_v30 = vld [vmem:[%s24157_s8 + $0x2a8] ss:$12 sps:$4 sm:$0xff]  }
 0x79b   :  { %v6010_v6 = vmax.f32 %v5982_v42, 0.0  ;;  %v6012_v61 = vmax.f32 %v5984_v24, 0.0  ;;  %v18125_v24 = vld [vmem:[#allocation7 + $0xc] sm:$0xff]  }
 0x79c   :  { %v6011_v38 = vmax.f32 %v5983_v35, 0.0  ;;  %v6013_v17 = vmax.f32 %v5985_v25, 0.0  ;;  %v18132_v35 = vld [vmem:[%s24157_s8 + $0x2bc] ss:$12 sps:$4 sm:$0xff]   ;;  %v18159_v25 = vld [vmem:[%s24157_s8 + $0x380] ss:$12 sps:$4 sm:$0xff]  }
 0x79d   :  { %v21014_v52 = vpack.c.bf16 %v6010_v6, %v6006_v14  ;;  %v21016_v10 = vpack.c.bf16 %v6012_v61, %v6008_v12  ;;  %v18130_v14 = vld [vmem:[%s24157_s8 + $0x2b8] ss:$12 sps:$4 sm:$0xff]   ;;  %v18160_v12 = vld [vmem:[%s24157_s8 + $0x2c0] ss:$12 sps:$4 sm:$0xff]  }
 0x79e   :  { %v21018_v39 = vpack.c.bf16 %v6011_v38, %v6007_v62  ;;  %v21020_v26 = vpack.c.bf16 %v6013_v17, %v6009_v57  ;;  %v5763_v16 = vpop.f32.mrb[168].mxu0  ;;  %v5905_v20 = vpop.f32.mrb[168].mxu1  ;;  %v18135_v6 = vld [vmem:[%s24157_s8 + $0x2d4] ss:$12 sps:$4 sm:$0xff]   ;;  %v18164_v61 = vld [vmem:[%s24157_s8 + $0x398] ss:$12 sps:$4 sm:$0xff]  }
 0x79f   :  { %v5764_v1 = vadd.f32 %v5763_v16, %v20946_v37  ;;  %v5906_v5 = vadd.f32 %v5905_v20, %v20948_v15  ;;  %v5765_v36 = vpop.f32.mrb[169].mxu0  ;;  %v5907_v40 = vpop.f32.mrb[169].mxu1  ;;  %v18126_v62 = vld [vmem:[#allocation7 + $0x14] ss:$0 sps:$4 sm:$0xff]   ;;  %v18133_v57 = vld [vmem:[%s24157_s8 + $0x2d0] ss:$12 sps:$4 sm:$0xff]  }
 0x7a0   :  { %v5766_v0 = vadd.f32 %v5765_v36, %v20950_v54  ;;  %v5908_v22 = vadd.f32 %v5907_v40, %v20952_v21  ;;  %v5767_v18 = vpop.f32.mrb[170].mxu0  ;;  %v5909_v2 = vpop.f32.mrb[170].mxu1  ;;  %6068 = vmatprep.subr.bf16.mxu0 %v21018_v39  ;;  %6119 = vmatprep.subr.bf16.mxu1 %v21020_v26  ;;  %v18165_v38 = vld [vmem:[%s24157_s8 + $0x2d8] ss:$12 sps:$4 sm:$0xff]   ;;  %v18136_v16 = vld [vmem:[%s24157_s8 + $0x2e8] ss:$12 sps:$4 sm:$0xff]  }
 0x7a1   :  { %v5936_v3 = vadd.f32 %v5764_v1, %v20734_v23  ;;  %v5938_v58 = vadd.f32 %v5906_v5, %v20736_v9  ;;  %v5768_v59 = vpop.f32.mrb[171].mxu0  ;;  %v5910_v37 = vpop.f32.mrb[171].mxu1  ;;  %6069 = vmatpush1.bf16.msra.mxu0 %v21014_v52  ;;  %6120 = vmatpush1.bf16.msra.mxu1 %v21016_v10  ;;  %v18138_v17 = vld [vmem:[%s24157_s8 + $0x2ec] ss:$12 sps:$4 sm:$0xff]   ;;  %v18141_v20 = vld [vmem:[%s24157_s8 + $0x304] ss:$12 sps:$4 sm:$0xff]  }
 0x7a2   :  { %v5937_v15 = vadd.f32 %v5766_v0, %v20738_v28  ;;  %v5939_v54 = vadd.f32 %v5908_v22, %v20740_v50  ;;  %v18139_v1 = vld [vmem:[%s24157_s8 + $0x300] ss:$12 sps:$4 sm:$0xff]   ;;  %v18144_v5 = vld [vmem:[%s24157_s8 + $0x31c] ss:$12 sps:$4 sm:$0xff]   ;;  %v18142_v36 = vld [vmem:[%s24157_s8 + $0x318] ss:$12 sps:$4 sm:$0xff]  }
 0x7a3   :  { %v5986_v21 = vadd.f32 %v20955_v31, %v5936_v3  ;;  %v5988_v63 = vadd.f32 %v20958_v8, %v5938_v58  ;;  %v18123_v31 = vld [vmem:[#allocation7] sm:$0xff]   ;;  %v18124_v8 = vld [vmem:[#allocation7 + $0x8] ss:$0 sps:$4 sm:$0xff]   ;;  %v18151_v3 = vld [vmem:[%s24157_s8 + $0x360] ss:$12 sps:$4 sm:$0xff]  }
 0x7a4   :  { %v5987_v46 = vadd.f32 %v20961_v29, %v5937_v15  ;;  %v5989_v23 = vadd.f32 %v20964_v41, %v5939_v54  ;;  %v18129_v29 = vld [vmem:[%s24157_s8 + $0x2a4] ss:$12 sps:$4 sm:$0xff]   ;;  %v18154_v41 = vld [vmem:[%s24157_s8 + $0x368] ss:$12 sps:$4 sm:$0xff]   ;;  %v18150_v22 = vld [vmem:[%s24157_s8 + $0x34c] ss:$12 sps:$4 sm:$0xff]  }
 0x7a5   :  { %v6014_v47 = vmax.f32 %v5986_v21, 0.0  ;;  %v6016_v9 = vmax.f32 %v5988_v63, 0.0  ;;  %v18147_v40 = vld [vmem:[%s24157_s8 + $0x334] ss:$12 sps:$4 sm:$0xff]   ;;  %v18145_v0 = vld [vmem:[%s24157_s8 + $0x330] ss:$12 sps:$4 sm:$0xff]  }
 0x7a6   :  { %v6015_v49 = vmax.f32 %v5987_v46, 0.0  ;;  %v6017_v53 = vmax.f32 %v5989_v23, 0.0  ;;  %v18148_v18 = vld [vmem:[%s24157_s8 + $0x348] ss:$12 sps:$4 sm:$0xff]   ;;  %v18153_v2 = vld [vmem:[%s24157_s8 + $0x364] ss:$12 sps:$4 sm:$0xff]  }
 0x7a7   :  { %v6030_v27 = vpack.c.bf16 %v6014_v47, %v6014_v47  ;;  %v6032_v51 = vpack.c.bf16 %v6016_v9, %v6016_v9  ;;  %v18158_v58 = vld [vmem:[%s24157_s8 + $0x37c] ss:$12 sps:$4 sm:$0xff]   ;;  %v18156_v59 = vld [vmem:[%s24157_s8 + $0x378] ss:$12 sps:$4 sm:$0xff]   ;;  %v18163_v37 = vld [vmem:[%s24157_s8 + $0x394] ss:$12 sps:$4 sm:$0xff]  }
 0x7a8   :  { %v21038_v32 = vpack.c.bf16 %v6015_v49, %v6015_v49  ;;  %v21040_v42 = vpack.c.bf16 %v6017_v53, %v6017_v53  ;;  %v18161_v15 = vld [vmem:[%s24157_s8 + $0x390] ss:$12 sps:$4 sm:$0xff]   ;;  %v18168_v54 = vld [vmem:[%s24157_s8 + $0x3ac] ss:$12 sps:$4 sm:$0xff]   ;;  %v18166_v63 = vld [vmem:[%s24157_s8 + $0x3a8] ss:$12 sps:$4 sm:$0xff]  }
 0x7a9   :  { %v21043_v28 = vsel %vm2299_vm1, %v6030_v27, 0  ;;  %v21046_v50 = vsel %vm2299_vm1, %v6032_v51, 0  ;;  %v18169_v21 = vld [vmem:[%s24157_s8 + $0x3b0] ss:$12 sps:$4 sm:$0xff]   ;;  %v18171_v23 = vld [vmem:[%s24157_s8 + $0x3c0] ss:$12 sps:$4 sm:$0xff]  }
 0x7aa   :  { %15169 = vmatprep.subr.msk.bf16.mxu0 %vm2299_vm1, %v21038_v32  ;;  %15172 = vmatprep.subr.msk.bf16.mxu1 %vm2299_vm1, %v21040_v42  ;;  %v18170_v46 = vld [vmem:[%s24157_s8 + $0x2f0] ss:$12 sps:$4 sm:$0xff]   ;;  %v18174_v9 = vld [vmem:[%s24157_s8 + $0x3c8] ss:$12 sps:$4 sm:$0xff]   ;;  %v18179_v27 = vld [vmem:[%s24157_s8 + $0x3e0] ss:$12 sps:$4 sm:$0xff]  }
 0x7ab   :  { %6071 = vmatpush1.bf16.msra.mxu0 %v21043_v28  ;;  %6122 = vmatpush1.bf16.msra.mxu1 %v21046_v50  ;;  %v18173_v47 = vld [vmem:[%s24157_s8 + $0x3c4] ss:$12 sps:$4 sm:$0xff]   ;;  %v18175_v49 = vld [vmem:[%s24157_s8 + $0x308] ss:$12 sps:$4 sm:$0xff]  }
 0x7ac   :  { %6304 = vmatprep.subr.bf16.mxu0 %v20978_v45  ;;  %6355 = vmatprep.subr.bf16.mxu1 %v20980_v48  ;;  %v18178_v53 = vld [vmem:[%s24157_s8 + $0x3dc] ss:$12 sps:$4 sm:$0xff]   ;;  %v18176_v51 = vld [vmem:[%s24157_s8 + $0x3d8] ss:$12 sps:$4 sm:$0xff]  }
 0x7ae   :  { %15170 = vmatmul.mubr.msk.bf16.vlgmr.msra.gmra.mrb[172].mxu0 %vm6045_vm3, %v18123_v31  ;;  %15173 = vmatmul.mubr.msk.bf16.vlgmr.msra.gmra.mrb[172].mxu1 %vm6045_vm3, %v18123_v31  ;;  %v18180_v31 = vld [vmem:[%s24157_s8 + $0x320] ss:$12 sps:$4 sm:$0xff]  }
 0x7af   :  { %6305 = vmatpush1.bf16.msra.mxu0 %v20974_v55  ;;  %6356 = vmatpush1.bf16.msra.mxu1 %v20976_v11 }
 0x7b0   :  { %6306 = vmatprep.subr.bf16.mxu0 %v20998_v44  ;;  %6357 = vmatprep.subr.bf16.mxu1 %v21000_v19 }
 0x7b1   :  { %6106 = vmatprep.mubr.bf16.mxu0 %v24176_v4  ;;  %6157 = vmatprep.mubr.bf16.mxu1 %v24176_v4 }
 0x7b3   :  { %6307 = vmatpush1.bf16.msra.mxu0 %v20994_v7  ;;  %6358 = vmatpush1.bf16.msra.mxu1 %v20996_v43 }
 0x7b4   :  { %6308 = vmatprep.subr.bf16.mxu0 %v21018_v39  ;;  %6359 = vmatprep.subr.bf16.mxu1 %v21020_v26 }
 0x7b6   :  { %15171 = vmatmul.mubr.msk.bf16.gmra.mrb[176].mxu0 %vm6045_vm3, %v18124_v8  ;;  %15174 = vmatmul.mubr.msk.bf16.gmra.mrb[176].mxu1 %vm6045_vm3, %v18124_v8  ;;  %v18181_v8 = vld [vmem:[%s24157_s8 + $0x3f0] ss:$12 sps:$4 sm:$0xff]  }
 0x7b7   :  { %6309 = vmatpush1.bf16.msra.mxu0 %v21014_v52  ;;  %6360 = vmatpush1.bf16.msra.mxu1 %v21016_v10 }
 0x7b8   :  { %15177 = vmatprep.subr.msk.bf16.mxu0 %vm2299_vm1, %v21038_v32  ;;  %15180 = vmatprep.subr.msk.bf16.mxu1 %vm2299_vm1, %v21040_v42 }
 0x7b9   :  { %6336 = vmatprep.mubr.bf16.mxu0 %v24176_v4  ;;  %6387 = vmatprep.mubr.bf16.mxu1 %v24176_v4 }
 0x7bb   :  { %6311 = vmatpush1.bf16.msra.mxu0 %v21043_v28  ;;  %6362 = vmatpush1.bf16.msra.mxu1 %v21046_v50 }
 0x7bc   :  { %6982 = vmatprep.subr.bf16.mxu0 %v18129_v29  ;;  %16907 = vmatprep.subr.bf16.mxu1 %v18154_v41  ;;  %v18183_v29 = vld [vmem:[%s24157_s8 + $0x3f4] ss:$12 sps:$4 sm:$0xff]   ;;  %v18184_v41 = vld [vmem:[%s24157_s8 + $0x3f8] ss:$12 sps:$4 sm:$0xff]  }
 0x7be   :  { %15178 = vmatmul.mubr.msk.bf16.vlgmr.msra.gmra.mrb[180].mxu0 %vm6045_vm3, %v18125_v24  ;;  %15181 = vmatmul.mubr.msk.bf16.vlgmr.msra.gmra.mrb[180].mxu1 %vm6045_vm3, %v18125_v24  ;;  %v18185_v24 = vld [vmem:[%s24157_s8 + $0x338] ss:$12 sps:$4 sm:$0xff]  }
 0x7bf   :  { %6346 = vmatprep.mubr.bf16.mxu0 %v24176_v4  ;;  %6397 = vmatprep.mubr.bf16.mxu1 %v24176_v4 }
 0x7c0   :  { %6983 = vmatpush1.bf16.msra.mxu0 %v18127_v60  ;;  %16908 = vmatpush3.bf16.msra.mxu1 %v18155_v30  ;;  %v18188_v60 = vld [vmem:[%s24157_s8 + $0x40c] ss:$12 sps:$4 sm:$0xff]   ;;  %v18189_v30 = vld [vmem:[%s24157_s8 + $0x410] ss:$12 sps:$4 sm:$0xff]  }
 0x7c1   :  { %6984 = vmatprep.subr.bf16.mxu0 %v18132_v35  ;;  %16909 = vmatprep.subr.bf16.mxu1 %v18159_v25  ;;  %v18186_v35 = vld [vmem:[%s24157_s8 + $0x408] ss:$12 sps:$4 sm:$0xff]   ;;  %v18190_v25 = vld [vmem:[%s24157_s8 + $0x350] ss:$12 sps:$4 sm:$0xff]  }
 0x7c4   :  { %6985 = vmatpush1.bf16.msra.mxu0 %v18130_v14  ;;  %16910 = vmatpush3.bf16.msra.mxu1 %v18160_v12  ;;  %v18193_v14 = vld [vmem:[%s24157_s8 + $0x424] ss:$12 sps:$4 sm:$0xff]  }
 0x7c5   :  { %6986 = vmatprep.subr.bf16.mxu0 %v18135_v6  ;;  %16911 = vmatprep.subr.bf16.mxu1 %v18164_v61 }
 0x7c6   :  { %15179 = vmatmul.mubr.msk.bf16.gmra.mrb[184].mxu0 %vm6045_vm3, %v18126_v62  ;;  %15182 = vmatmul.mubr.msk.bf16.gmra.mrb[184].mxu1 %vm6045_vm3, %v18126_v62 }
 0x7c8   :  { %6987 = vmatpush1.bf16.msra.mxu0 %v18133_v57  ;;  %16912 = vmatpush3.bf16.msra.mxu1 %v18165_v38 }
 0x7c9   :  { %6988 = vmatprep.subr.bf16.mxu0 %v18138_v17  ;;  %16913 = vmatprep.subr.bf16.mxu1 %v18169_v21 }
 0x7cc   :  { %6989 = vmatpush1.bf16.msra.mxu0 %v18136_v16  ;;  %16914 = vmatpush3.bf16.msra.mxu1 %v18170_v46 }
 0x7cd   :  { %6990 = vmatprep.subr.bf16.mxu0 %v18141_v20  ;;  %16915 = vmatprep.subr.bf16.mxu1 %v18174_v9 }
 0x7d0   :  { %6991 = vmatpush1.bf16.msra.mxu0 %v18139_v1  ;;  %16916 = vmatpush3.bf16.msra.mxu1 %v18175_v49 }
 0x7d1   :  { %6992 = vmatprep.subr.bf16.mxu0 %v18144_v5  ;;  %16917 = vmatprep.subr.bf16.mxu1 %v18179_v27  ;;  %v18191_v27 = vld [vmem:[%s24157_s8 + $0x420] ss:$12 sps:$4 sm:$0xff]  }
 0x7d4   :  { %6993 = vmatpush1.bf16.msra.mxu0 %v18142_v36  ;;  %16918 = vmatpush3.bf16.msra.mxu1 %v18180_v31 }
 0x7d5   :  { %6994 = vmatprep.subr.bf16.mxu0 %v18147_v40  ;;  %16919 = vmatprep.subr.bf16.mxu1 %v18184_v41  ;;  %v18198_v41 = vld [vmem:[%s24157_s8 + $0x440] ss:$12 sps:$4 sm:$0xff]  }
 0x7d8   :  { %6995 = vmatpush1.bf16.msra.mxu0 %v18145_v0  ;;  %16920 = vmatpush3.bf16.msra.mxu1 %v18185_v24 }
 0x7d9   :  { %6996 = vmatprep.subr.bf16.mxu0 %v18150_v22  ;;  %16921 = vmatprep.subr.bf16.mxu1 %v18189_v30  ;;  %v18201_v30 = vld [vmem:[%s24157_s8 + $0x454] ss:$12 sps:$4 sm:$0xff]  }
 0x7dc   :  { %6997 = vmatpush1.bf16.msra.mxu0 %v18148_v18  ;;  %16922 = vmatpush3.bf16.msra.mxu1 %v18190_v25 }
 0x7dd   :  { %6998 = vmatprep.subr.bf16.mxu0 %v18153_v2  ;;  %7132 = vmatprep.subr.bf16.mxu1 %v24176_v4 }
 0x7e0   :  { %6999 = vmatpush1.bf16.msra.mxu0 %v18151_v3 }
 0x7e1   :  { %7000 = vmatprep.subr.bf16.mxu0 %v18158_v58 }
 0x7e4   :  { %7001 = vmatpush1.bf16.msra.mxu0 %v18156_v59 }
 0x7e5   :  { %7002 = vmatprep.subr.bf16.mxu0 %v18163_v37 }
 0x7e8   :  { %7003 = vmatpush1.bf16.msra.mxu0 %v18161_v15 }
 0x7e9   :  { %7004 = vmatprep.subr.bf16.mxu0 %v18168_v54 }
 0x7ec   :  { %7005 = vmatpush1.bf16.msra.mxu0 %v18166_v63 }
 0x7ed   :  { %7006 = vmatprep.subr.bf16.mxu0 %v18173_v47 }
 0x7f0   :  { %7007 = vmatpush1.bf16.msra.mxu0 %v18171_v23 }
 0x7f1   :  { %7008 = vmatprep.subr.bf16.mxu0 %v18178_v53 }
 0x7f4   :  { %7009 = vmatpush1.bf16.msra.mxu0 %v18176_v51  ;;  %v18194_v51 = vld [vmem:[%s24157_s8 + $0x428] ss:$12 sps:$4 sm:$0xff]  }
 0x7f5   :  { %7010 = vmatprep.subr.bf16.mxu0 %v18183_v29  ;;  %v18195_v29 = vld [vmem:[%s24157_s8 + $0x438] ss:$12 sps:$4 sm:$0xff]  }
 0x7f8   :  { %7011 = vmatpush1.bf16.msra.mxu0 %v18181_v8  ;;  %v18197_v8 = vld [vmem:[%s24157_s8 + $0x43c] ss:$12 sps:$4 sm:$0xff]  }
 0x7f9   :  { %7012 = vmatprep.subr.bf16.mxu0 %v18188_v60 }
 0x7fc   :  { %7013 = vmatpush1.bf16.msra.mxu0 %v18186_v35 }
 0x7fd   :  { %7033 = vmatprep.subr.bf16.mxu0 %v18193_v14 }
 0x881   :  { %v6098_v12 = vpop.f32.mrb[172].mxu0  ;;  %v6149_v6 = vpop.f32.mrb[172].mxu1 }
 0x882   :  { %v6100_v61 = vpop.f32.mrb[173].mxu0  ;;  %v6151_v62 = vpop.f32.mrb[173].mxu1 }
 0x883   :  { %v6102_v57 = vpop.f32.mrb[174].mxu0  ;;  %v6153_v38 = vpop.f32.mrb[174].mxu1 }
 0x884   :  { %v21234_v17 = vpack.c.bf16 %v6102_v57, %v6098_v12  ;;  %v6104_v16 = vpop.f32.mrb[175].mxu0  ;;  %v21236_v20 = vpack.c.bf16 %v6153_v38, %v6149_v6  ;;  %v6155_v1 = vpop.f32.mrb[175].mxu1  ;;  %v18199_v38 = vld [vmem:[%s24157_s8 + $0x450] ss:$12 sps:$4 sm:$0xff]  }
 0x885   :  { %v21238_v5 = vpack.c.bf16 %v6104_v16, %v6100_v61  ;;  %v21240_v36 = vpack.c.bf16 %v6155_v1, %v6151_v62  ;;  %v18202_v16 = vld [vmem:[%s24157_s8 + $0x458] ss:$12 sps:$4 sm:$0xff]  }
 0x886   :  { %v18205_v1 = vld [vmem:[%s24157_s8 + $0x46c] ss:$12 sps:$4 sm:$0xff]  }
 0x889   :  { %v21242_v40 = vpop.f32.mrb[176].mxu0  ;;  %v21244_v0 = vpop.f32.mrb[176].mxu1 }
 0x88a   :  { %v21246_v22 = vpop.f32.mrb[177].mxu0  ;;  %v21248_v18 = vpop.f32.mrb[177].mxu1 }
 0x88b   :  { %v6112_v2 = vpop.f32.mrb[178].mxu0  ;;  %v6163_v3 = vpop.f32.mrb[178].mxu1 }
 0x88c   :  { %v6113_v58 = vpop.f32.mrb[179].mxu0  ;;  %v6164_v59 = vpop.f32.mrb[179].mxu1  ;;  %v18203_v2 = vld [vmem:[%s24157_s8 + $0x468] ss:$12 sps:$4 sm:$0xff]   ;;  %v18206_v3 = vld [vmem:[%s24157_s8 + $0x470] ss:$12 sps:$4 sm:$0xff]  }
 0x88d   :  { %v18209_v58 = vld [vmem:[%s24157_s8 + $0x484] ss:$12 sps:$4 sm:$0xff]   ;;  %v18207_v59 = vld [vmem:[%s24157_s8 + $0x480] ss:$12 sps:$4 sm:$0xff]  }
 0x891   :  { %v6338_v37 = vpop.f32.mrb[180].mxu0  ;;  %v6389_v15 = vpop.f32.mrb[180].mxu1 }
 0x892   :  { %v6340_v54 = vpop.f32.mrb[181].mxu0  ;;  %v6391_v21 = vpop.f32.mrb[181].mxu1 }
 0x893   :  { %v6342_v63 = vpop.f32.mrb[182].mxu0  ;;  %v6393_v46 = vpop.f32.mrb[182].mxu1 }
 0x894   :  { %v6406_v23 = vpack.c.bf16 %v6342_v63, %v6338_v37  ;;  %v6344_v47 = vpop.f32.mrb[183].mxu0  ;;  %v21250_v9 = vpack.c.bf16 %v6393_v46, %v6389_v15  ;;  %v6395_v49 = vpop.f32.mrb[183].mxu1  ;;  %v18210_v37 = vld [vmem:[%s24157_s8 + $0x488] ss:$12 sps:$4 sm:$0xff]   ;;  %v18215_v46 = vld [vmem:[%s24157_s8 + $0x4b0] ss:$12 sps:$4 sm:$0xff]  }
 0x895   :  { %v6407_v53 = vpack.c.bf16 %v6344_v47, %v6340_v54  ;;  %v6409_v31 = vpack.c.bf16 %v6395_v49, %v6391_v21  ;;  %v18213_v15 = vld [vmem:[%s24157_s8 + $0x49c] ss:$12 sps:$4 sm:$0xff]   ;;  %v18211_v54 = vld [vmem:[%s24157_s8 + $0x498] ss:$12 sps:$4 sm:$0xff]   ;;  %v18214_v21 = vld [vmem:[%s24157_s8 + $0x4a0] ss:$12 sps:$4 sm:$0xff]  }
 0x896   :  { %v18217_v63 = vld [vmem:[%s24157_s8 + $0x4b4] ss:$12 sps:$4 sm:$0xff]   ;;  %v18221_v47 = vld [vmem:[%s24157_s8 + $0x4cc] ss:$12 sps:$4 sm:$0xff]  }
 0x897   :  { %7014 = vmatprep.mubr.bf16.mxu0 %v6407_v53  ;;  %7116 = vmatprep.mubr.bf16.mxu1 %v6407_v53  ;;  %v18219_v49 = vld [vmem:[%s24157_s8 + $0x4c8] ss:$12 sps:$4 sm:$0xff]   ;;  %v18222_v53 = vld [vmem:[%s24157_s8 + $0x4d0] ss:$12 sps:$4 sm:$0xff]  }
 0x898   :  { %7015 = vmatmul.mubr.bf16.vlgmr.msra.gmra.mrb[188].mxu0 %v6406_v23  ;;  %7117 = vmatmul.mubr.bf16.vlgmr.msra.gmra.mrb[188].mxu1 %v6406_v23  ;;  %v18218_v23 = vld [vmem:[%s24157_s8 + $0x4b8] ss:$12 sps:$4 sm:$0xff]  }
 0x899   :  { %7034 = vmatpush1.bf16.msra.mxu0 %v18191_v27  ;;  %7133 = vmatpush1.bf16.msra.mxu1 %v18194_v51  ;;  %v6348_v24 = vpop.f32.mrb[184].mxu0  ;;  %v21267_v60 = vpop.f32.mrb[184].mxu1  ;;  %v18225_v27 = vld [vmem:[%s24157_s8 + $0x4e4] ss:$12 sps:$4 sm:$0xff]   ;;  %v18223_v51 = vld [vmem:[%s24157_s8 + $0x4e0] ss:$12 sps:$4 sm:$0xff]  }
 0x89a   :  { %7035 = vmatprep.subr.bf16.mxu0 %v18197_v8  ;;  %7134 = vmatprep.subr.bf16.mxu1 %v24176_v4  ;;  %v6350_v35 = vpop.f32.mrb[185].mxu0  ;;  %v21273_v25 = vpop.f32.mrb[185].mxu1  ;;  %v6410_v61 = vpack.c.bf16 %v6348_v24, %v6348_v24  ;;  %v18229_v8 = vld [vmem:[%s24157_s8 + $0x4fc] ss:$12 sps:$4 sm:$0xff]   ;;  %v18233_v24 = vld [vmem:[%s24157_s8 + $0x514] ss:$12 sps:$4 sm:$0xff]  }
 0x89b   :  { %v6411_v14 = vpack.c.bf16 %v6350_v35, %v6350_v35  ;;  %v6352_v12 = vpop.f32.mrb[186].mxu0  ;;  %v6403_v6 = vpop.f32.mrb[186].mxu1  ;;  %v18234_v35 = vld [vmem:[%s24157_s8 + $0x518] ss:$12 sps:$4 sm:$0xff]  }
 0x89c   :  { %v6353_v62 = vpop.f32.mrb[187].mxu0  ;;  %v6404_v57 = vpop.f32.mrb[187].mxu1  ;;  %v18235_v12 = vld [vmem:[%s24157_s8 + $0x528] ss:$12 sps:$4 sm:$0xff]   ;;  %v18238_v6 = vld [vmem:[%s24157_s8 + $0x530] ss:$12 sps:$4 sm:$0xff]  }
 0x89d   :  { %7036 = vmatpush1.bf16.msra.mxu0 %v18195_v29  ;;  %7135 = vmatpush1.bf16.msra.mxu1 %v18198_v41  ;;  %v18227_v29 = vld [vmem:[%s24157_s8 + $0x4f8] ss:$12 sps:$4 sm:$0xff]   ;;  %v18230_v41 = vld [vmem:[%s24157_s8 + $0x500] ss:$12 sps:$4 sm:$0xff]   ;;  %v18242_v62 = vld [vmem:[%s24157_s8 + $0xc8] ss:$12 sps:$4 sm:$0xff]  }
 0x89e   :  { %7037 = vmatprep.subr.bf16.mxu0 %v18201_v30  ;;  %7136 = vmatprep.subr.bf16.mxu1 %v24176_v4  ;;  %v18231_v30 = vld [vmem:[%s24157_s8 + $0x510] ss:$12 sps:$4 sm:$0xff]   ;;  %v18239_v57 = vld [vmem:[%s24157_s8] ss:$12 sps:$4 sm:$0xff]  }
 0x89f   :  { %7024 = vmatprep.mubr.bf16.mxu0 %v6411_v14  ;;  %7124 = vmatprep.mubr.bf16.mxu1 %v6411_v14  ;;  %v18237_v14 = vld [vmem:[%s24157_s8 + $0x52c] ss:$12 sps:$4 sm:$0xff]  }
 0x8a0   :  { %7025 = vmatmul.mubr.bf16.gmra.mrb[192].mxu0 %v6410_v61  ;;  %7125 = vmatmul.mubr.bf16.gmra.mrb[192].mxu1 %v6410_v61  ;;  %v18241_v61 = vld [vmem:[%s24157_s8 + $0x4] ss:$12 sps:$4 sm:$0xff]  }
 0x8a1   :  { %7038 = vmatpush1.bf16.msra.mxu0 %v18199_v38  ;;  %7137 = vmatpush1.bf16.msra.mxu1 %v18202_v16  ;;  %v18243_v38 = vld [vmem:[%s24157_s8 + $0x8] ss:$12 sps:$4 sm:$0xff]  }
 0x8a2   :  { %7039 = vmatprep.subr.bf16.mxu0 %v18205_v1  ;;  %7138 = vmatprep.subr.bf16.mxu1 %v24176_v4  ;;  %v18246_v16 = vld [vmem:[%s24157_s8 + $0x1c] ss:$12 sps:$4 sm:$0xff]   ;;  %v18247_v1 = vld [vmem:[%s24157_s8 + $0xe0] ss:$12 sps:$4 sm:$0xff]  }
 0x8a3   :  { %15379 = vmatprep.mubr.msk.bf16.mxu0 %vm6975_vm4, %v6409_v31  ;;  %15381 = vmatprep.mubr.msk.bf16.mxu1 %vm6975_vm4, %v6409_v31  ;;  %v18226_v31 = vld [vmem:[%s24157_s8 + $0x4e8] ss:$12 sps:$4 sm:$0xff]  }
 0x8a5   :  { %7040 = vmatpush1.bf16.msra.mxu0 %v18203_v2  ;;  %7139 = vmatpush1.bf16.msra.mxu1 %v18206_v3  ;;  %v6413_v2 = vpack.c.bf16 %v21273_v25, %v21273_v25  ;;  %v18244_v3 = vld [vmem:[%s24157_s8 + $0x18] ss:$12 sps:$4 sm:$0xff]   ;;  %v18251_v25 = vld [vmem:[%s24157_s8 + $0x34] ss:$12 sps:$4 sm:$0xff]  }
 0x8a6   :  { %7041 = vmatprep.subr.bf16.mxu0 %v18209_v58  ;;  %7140 = vmatprep.subr.bf16.mxu1 %v24176_v4  ;;  %v18248_v58 = vld [vmem:[%s24157_s8 + $0x20] ss:$12 sps:$4 sm:$0xff]  }
 0x8a9   :  { %7042 = vmatpush1.bf16.msra.mxu0 %v18207_v59  ;;  %7141 = vmatpush1.bf16.msra.mxu1 %v18210_v37  ;;  %v6412_v59 = vpack.c.bf16 %v21267_v60, %v21267_v60  ;;  %v18249_v37 = vld [vmem:[%s24157_s8 + $0x30] ss:$12 sps:$4 sm:$0xff]  }
 0x8aa   :  { %7043 = vmatprep.subr.bf16.mxu0 %v18213_v15  ;;  %7142 = vmatprep.subr.bf16.mxu1 %v24176_v4  ;;  %v18253_v15 = vld [vmem:[%s24157_s8 + $0x38] ss:$12 sps:$4 sm:$0xff]   ;;  %v18257_v60 = vld [vmem:[%s24157_s8 + $0x110] ss:$12 sps:$4 sm:$0xff]  }
 0x8ad   :  { %7044 = vmatpush1.bf16.msra.mxu0 %v18211_v54  ;;  %7143 = vmatpush1.bf16.msra.mxu1 %v18214_v21  ;;  %v18256_v54 = vld [vmem:[%s24157_s8 + $0x4c] ss:$12 sps:$4 sm:$0xff]   ;;  %v18254_v21 = vld [vmem:[%s24157_s8 + $0x48] ss:$12 sps:$4 sm:$0xff]  }
 0x8ae   :  { %7045 = vmatprep.subr.bf16.mxu0 %v18217_v63  ;;  %7144 = vmatprep.subr.bf16.mxu1 %v24176_v4  ;;  %v18258_v63 = vld [vmem:[%s24157_s8 + $0x50] ss:$12 sps:$4 sm:$0xff]  }
 0x8b1   :  { %7046 = vmatpush1.bf16.msra.mxu0 %v18215_v46  ;;  %7145 = vmatpush1.bf16.msra.mxu1 %v18218_v23  ;;  %v18261_v46 = vld [vmem:[%s24157_s8 + $0x64] ss:$12 sps:$4 sm:$0xff]   ;;  %v18262_v23 = vld [vmem:[%s24157_s8 + $0x128] ss:$12 sps:$4 sm:$0xff]  }
 0x8b2   :  { %7047 = vmatprep.subr.bf16.mxu0 %v18221_v47  ;;  %7146 = vmatprep.subr.bf16.mxu1 %v24176_v4  ;;  %v18259_v47 = vld [vmem:[%s24157_s8 + $0x60] ss:$12 sps:$4 sm:$0xff]  }
 0x8b5   :  { %7048 = vmatpush1.bf16.msra.mxu0 %v18219_v49  ;;  %7147 = vmatpush1.bf16.msra.mxu1 %v18222_v53  ;;  %v18266_v49 = vld [vmem:[%s24157_s8 + $0x7c] ss:$12 sps:$4 sm:$0xff]   ;;  %v18267_v53 = vld [vmem:[%s24157_s8 + $0x140] ss:$12 sps:$4 sm:$0xff]  }
 0x8b6   :  { %7049 = vmatprep.subr.bf16.mxu0 %v18225_v27  ;;  %7148 = vmatprep.subr.bf16.mxu1 %v24176_v4  ;;  %v18264_v27 = vld [vmem:[%s24157_s8 + $0x78] ss:$12 sps:$4 sm:$0xff]  }
 0x8b9   :  { %7050 = vmatpush1.bf16.msra.mxu0 %v18223_v51  ;;  %7149 = vmatpush1.bf16.msra.mxu1 %v18226_v31  ;;  %v18268_v51 = vld [vmem:[%s24157_s8 + $0x80] ss:$12 sps:$4 sm:$0xff]  }
 0x8ba   :  { %7051 = vmatprep.subr.bf16.mxu0 %v18229_v8  ;;  %7150 = vmatprep.subr.bf16.mxu1 %v24176_v4  ;;  %v18271_v31 = vld [vmem:[%s24157_s8 + $0x94] ss:$12 sps:$4 sm:$0xff]   ;;  %v18272_v8 = vld [vmem:[%s24157_s8 + $0x158] ss:$12 sps:$4 sm:$0xff]  }
 0x8bd   :  { %7052 = vmatpush1.bf16.msra.mxu0 %v18227_v29  ;;  %7151 = vmatpush1.bf16.msra.mxu1 %v18230_v41  ;;  %v18269_v29 = vld [vmem:[%s24157_s8 + $0x90] ss:$12 sps:$4 sm:$0xff]   ;;  %v18273_v41 = vld [vmem:[%s24157_s8 + $0x98] ss:$12 sps:$4 sm:$0xff]  }
 0x8be   :  { %7053 = vmatprep.subr.bf16.mxu0 %v18233_v24  ;;  %7152 = vmatprep.subr.bf16.mxu1 %v24176_v4  ;;  %v18276_v24 = vld [vmem:[%s24157_s8 + $0xac] ss:$12 sps:$4 sm:$0xff]  }
 0x8c1   :  { %7054 = vmatpush1.bf16.msra.mxu0 %v18231_v30  ;;  %7153 = vmatpush1.bf16.msra.mxu1 %v18234_v35  ;;  %v18277_v30 = vld [vmem:[%s24157_s8 + $0x170] ss:$12 sps:$4 sm:$0xff]   ;;  %v18274_v35 = vld [vmem:[%s24157_s8 + $0xa8] ss:$12 sps:$4 sm:$0xff]  }
 0x8c2   :  { %7055 = vmatprep.subr.bf16.mxu0 %v18237_v14  ;;  %7154 = vmatprep.subr.bf16.mxu1 %v24176_v4  ;;  %v18278_v14 = vld [vmem:[%s24157_s8 + $0xb0] ss:$12 sps:$4 sm:$0xff]  }
 0x8c5   :  { %7056 = vmatpush1.bf16.msra.mxu0 %v18235_v12  ;;  %7155 = vmatpush1.bf16.msra.mxu1 %v18238_v6  ;;  %v18281_v12 = vld [vmem:[%s24157_s8 + $0xc4] ss:$12 sps:$4 sm:$0xff]   ;;  %v18279_v6 = vld [vmem:[%s24157_s8 + $0xc0] ss:$12 sps:$4 sm:$0xff]  }
 0x8c6   :  { %7634 = vmatprep.subr.bf16.mxu0 %v18241_v61  ;;  %16935 = vmatprep.subr.bf16.mxu1 %v18242_v62  ;;  %v18282_v61 = vld [vmem:[%s24157_s8 + $0x188] ss:$12 sps:$4 sm:$0xff]  }
 0x8c7   :  { %v18285_v62 = vld [vmem:[%s24157_s8 + $0xdc] ss:$12 sps:$4 sm:$0xff]  }
 0x8c8   :  { %7066 = vmatmul.mubr.bf16.vlgmr.msra.gmra.mrb[188].mxu0 %v21250_v9  ;;  %7165 = vmatmul.mubr.bf16.vlgmr.msra.gmra.mrb[196].mxu1 %v21250_v9  ;;  %v18252_v9 = vld [vmem:[%s24157_s8 + $0xf8] ss:$12 sps:$4 sm:$0xff]  }
 0x8c9   :  { %7635 = vmatpush1.bf16.msra.mxu0 %v18239_v57  ;;  %16936 = vmatpush3.bf16.msra.mxu1 %v18243_v38  ;;  %v6171_v57 = vpack.c.bf16 %v21246_v22, %v21246_v22  ;;  %v18283_v38 = vld [vmem:[%s24157_s8 + $0xd8] ss:$12 sps:$4 sm:$0xff]   ;;  %v18287_v22 = vld [vmem:[%s24157_s8 + $0xf0] ss:$12 sps:$4 sm:$0xff]  }
 0x8ca   :  { %7636 = vmatprep.subr.bf16.mxu0 %v18246_v16  ;;  %16937 = vmatprep.subr.bf16.mxu1 %v18247_v1  ;;  %v18286_v16 = vld [vmem:[%s24157_s8 + $0x1a0] ss:$12 sps:$4 sm:$0xff]  }
 0x8cb   :  { %15380 = vmatprep.mubr.msk.bf16.mxu0 %vm6975_vm4, %v6413_v2  ;;  %15382 = vmatprep.mubr.msk.bf16.mxu1 %vm6975_vm4, %v6413_v2  ;;  %v18289_v1 = vld [vmem:[%s24157_s8 + $0xf4] ss:$12 sps:$4 sm:$0xff]   ;;  %v18290_v2 = vld [vmem:[%s24157_s8 + $0x1b8] ss:$12 sps:$4 sm:$0xff]  }
 0x8cd   :  { %7637 = vmatpush1.bf16.msra.mxu0 %v18244_v3  ;;  %16938 = vmatpush3.bf16.msra.mxu1 %v18248_v58  ;;  %v6170_v3 = vpack.c.bf16 %v21242_v40, %v21242_v40  ;;  %v18293_v58 = vld [vmem:[%s24157_s8 + $0x10c] ss:$12 sps:$4 sm:$0xff]   ;;  %v18294_v40 = vld [vmem:[%s24157_s8 + $0x1d0] ss:$12 sps:$4 sm:$0xff]  }
 0x8ce   :  { %7638 = vmatprep.subr.bf16.mxu0 %v18251_v25  ;;  %16939 = vmatprep.subr.bf16.mxu1 %v18252_v9  ;;  %v18291_v25 = vld [vmem:[%s24157_s8 + $0x108] ss:$12 sps:$4 sm:$0xff]   ;;  %v18297_v9 = vld [vmem:[%s24157_s8 + $0x124] ss:$12 sps:$4 sm:$0xff]  }
 0x8d0   :  { %7076 = vmatmul.mubr.bf16.gmra.mrb[196].mxu0 %v6412_v59  ;;  %7173 = vmatmul.mubr.bf16.gmra.mrb[200].mxu1 %v6412_v59  ;;  %v18295_v59 = vld [vmem:[%s24157_s8 + $0x120] ss:$12 sps:$4 sm:$0xff]  }
 0x8d1   :  { %7639 = vmatpush1.bf16.msra.mxu0 %v18249_v37  ;;  %7666 = vmatprep.mubr.bf16.mxu0 %v21238_v5  ;;  %v18298_v37 = vld [vmem:[%s24157_s8 + $0x1e8] ss:$12 sps:$4 sm:$0xff]  }
 0x8d2   :  { %16940 = vmatpush3.bf16.msra.mxu1 %v18253_v15  ;;  %7768 = vmatprep.mubr.bf16.mxu1 %v21238_v5  ;;  %v18263_v5 = vld [vmem:[%s24157_s8 + $0x68] ss:$12 sps:$4 sm:$0xff]  }
 0x8d3   :  { %7640 = vmatprep.subr.bf16.mxu0 %v18256_v54  ;;  %16941 = vmatprep.subr.bf16.mxu1 %v18257_v60  ;;  %v18301_v15 = vld [vmem:[%s24157_s8 + $0x13c] ss:$12 sps:$4 sm:$0xff]   ;;  %v18299_v54 = vld [vmem:[%s24157_s8 + $0x138] ss:$12 sps:$4 sm:$0xff]   ;;  %v18302_v60 = vld [vmem:[%s24157_s8 + $0x200] ss:$12 sps:$4 sm:$0xff]  }
 0x8d5   :  { %7641 = vmatpush1.bf16.msra.mxu0 %v18254_v21  ;;  %v18305_v21 = vld [vmem:[%s24157_s8 + $0x154] ss:$12 sps:$4 sm:$0xff]  }
 0x8d6   :  { %16942 = vmatpush3.bf16.msra.mxu1 %v18258_v63  ;;  %7642 = vmatprep.subr.bf16.mxu0 %v18261_v46  ;;  %v18303_v63 = vld [vmem:[%s24157_s8 + $0x150] ss:$12 sps:$4 sm:$0xff]   ;;  %v18306_v46 = vld [vmem:[%s24157_s8 + $0x218] ss:$12 sps:$4 sm:$0xff]  }
 0x8d7   :  { %16943 = vmatprep.subr.bf16.mxu1 %v18262_v23  ;;  %v18309_v23 = vld [vmem:[%s24157_s8 + $0x16c] ss:$12 sps:$4 sm:$0xff]  }
 0x8d9   :  { %7643 = vmatpush1.bf16.msra.mxu0 %v18259_v47  ;;  %v18307_v47 = vld [vmem:[%s24157_s8 + $0x168] ss:$12 sps:$4 sm:$0xff]  }
 0x8da   :  { %16944 = vmatpush3.bf16.msra.mxu1 %v18263_v5  ;;  %7644 = vmatprep.subr.bf16.mxu0 %v18266_v49  ;;  %v18310_v5 = vld [vmem:[%s24157_s8 + $0x230] ss:$12 sps:$4 sm:$0xff]  }
 0x8db   :  { %16945 = vmatprep.subr.bf16.mxu1 %v18267_v53  ;;  %v18313_v49 = vld [vmem:[%s24157_s8 + $0x184] ss:$12 sps:$4 sm:$0xff]   ;;  %v18311_v53 = vld [vmem:[%s24157_s8 + $0x180] ss:$12 sps:$4 sm:$0xff]  }
 0x8dd   :  { %7645 = vmatpush1.bf16.msra.mxu0 %v18264_v27  ;;  %v18314_v27 = vld [vmem:[%s24157_s8 + $0x248] ss:$12 sps:$4 sm:$0xff]  }
 0x8de   :  { %16946 = vmatpush3.bf16.msra.mxu1 %v18268_v51  ;;  %7646 = vmatprep.subr.bf16.mxu0 %v18271_v31  ;;  %v18317_v51 = vld [vmem:[%s24157_s8 + $0x19c] ss:$12 sps:$4 sm:$0xff]   ;;  %v18315_v31 = vld [vmem:[%s24157_s8 + $0x198] ss:$12 sps:$4 sm:$0xff]  }
 0x8df   :  { %16947 = vmatprep.subr.bf16.mxu1 %v18272_v8  ;;  %v18318_v8 = vld [vmem:[%s24157_s8 + $0x260] ss:$12 sps:$4 sm:$0xff]  }
 0x8e1   :  { %7647 = vmatpush1.bf16.msra.mxu0 %v18269_v29  ;;  %v18321_v29 = vld [vmem:[%s24157_s8 + $0x1b4] ss:$12 sps:$4 sm:$0xff]  }
 0x8e2   :  { %16948 = vmatpush3.bf16.msra.mxu1 %v18273_v41  ;;  %7648 = vmatprep.subr.bf16.mxu0 %v18276_v24  ;;  %v18322_v41 = vld [vmem:[%s24157_s8 + $0x278] ss:$12 sps:$4 sm:$0xff]  }
 0x8e3   :  { %16949 = vmatprep.subr.bf16.mxu1 %v18277_v30  ;;  %v18325_v24 = vld [vmem:[%s24157_s8 + $0x1cc] ss:$12 sps:$4 sm:$0xff]   ;;  %v18323_v30 = vld [vmem:[%s24157_s8 + $0x1c8] ss:$12 sps:$4 sm:$0xff]  }
 0x8e5   :  { %7649 = vmatpush1.bf16.msra.mxu0 %v18274_v35  ;;  %v18326_v35 = vld [vmem:[%s24157_s8 + $0x290] ss:$12 sps:$4 sm:$0xff]  }
 0x8e6   :  { %16950 = vmatpush3.bf16.msra.mxu1 %v18278_v14  ;;  %7650 = vmatprep.subr.bf16.mxu0 %v18281_v12  ;;  %v18329_v14 = vld [vmem:[%s24157_s8 + $0x1e4] ss:$12 sps:$4 sm:$0xff]   ;;  %v18332_v12 = vld [vmem:[%s24157_s8 + $0x1fc] ss:$12 sps:$4 sm:$0xff]  }
 0x8e7   :  { %7784 = vmatprep.subr.bf16.mxu1 %v24176_v4 }
 0x8e9   :  { %7769 = vmatmul.mubr.bf16.vlgmr.msra.gmra.mrb[204].mxu1 %v21234_v17  ;;  %7651 = vmatpush1.bf16.msra.mxu0 %v18279_v6  ;;  %v6173_v6 = vpack.c.bf16 %v21248_v18, %v21248_v18  ;;  %v18333_v18 = vld [vmem:[%s24157_s8 + $0x210] ss:$12 sps:$4 sm:$0xff]  }
 0x8ea   :  { %7776 = vmatprep.mubr.bf16.mxu1 %v6171_v57  ;;  %7785 = vmatpush1.bf16.msra.mxu1 %v18282_v61  ;;  %v18330_v61 = vld [vmem:[%s24157_s8 + $0x1f8] ss:$12 sps:$4 sm:$0xff]  }
 0x8eb   :  { %7652 = vmatprep.subr.bf16.mxu0 %v18285_v62  ;;  %7786 = vmatprep.subr.bf16.mxu1 %v24176_v4  ;;  %v18338_v62 = vld [vmem:[%s24157_s8 + $0x22c] ss:$12 sps:$4 sm:$0xff]  }
 0x8ed   :  { %7653 = vmatpush1.bf16.msra.mxu0 %v18283_v38  ;;  %v18364_v38 = vld [vmem:[%s24157_s8 + $0x58c] ss:$12 sps:$4 sm:$0xff]  }
 0x8ee   :  { %7787 = vmatpush1.bf16.msra.mxu1 %v18286_v16  ;;  %7654 = vmatprep.subr.bf16.mxu0 %v18289_v1  ;;  %v18362_v16 = vld [vmem:[%s24157_s8 + $0x588] ss:$12 sps:$4 sm:$0xff]  }
 0x8ef   :  { %7788 = vmatprep.subr.bf16.mxu1 %v24176_v4  ;;  %v18380_v1 = vld [vmem:[%s24157_s8 + $0x608] ss:$12 sps:$4 sm:$0xff]  }
 0x8f1   :  { %7777 = vmatmul.mubr.bf16.gmra.mrb[208].mxu1 %v6170_v3  ;;  %7655 = vmatpush1.bf16.msra.mxu0 %v18287_v22  ;;  %v18367_v22 = vld [vmem:[%s24157_s8 + $0x5a4] ss:$12 sps:$4 sm:$0xff]  }
 0x8f2   :  { %7789 = vmatpush1.bf16.msra.mxu1 %v18290_v2  ;;  %15469 = vmatprep.mubr.msk.bf16.mxu1 %vm6975_vm4, %v21240_v36  ;;  %v18381_v2 = vld [vmem:[%s24157_s8 + $0x548] ss:$12 sps:$4 sm:$0xff]  }
 0x8f3   :  { %7656 = vmatprep.subr.bf16.mxu0 %v18293_v58  ;;  %7790 = vmatprep.subr.bf16.mxu1 %v24176_v4  ;;  %v18370_v58 = vld [vmem:[%s24157_s8 + $0x5bc] ss:$12 sps:$4 sm:$0xff]  }
 0x8f5   :  { %7657 = vmatpush1.bf16.msra.mxu0 %v18291_v25  ;;  %v18368_v25 = vld [vmem:[%s24157_s8 + $0x5b8] ss:$12 sps:$4 sm:$0xff]  }
 0x8f6   :  { %7791 = vmatpush1.bf16.msra.mxu1 %v18294_v40  ;;  %7658 = vmatprep.subr.bf16.mxu0 %v18297_v9  ;;  %v18373_v40 = vld [vmem:[%s24157_s8 + $0x5d4] ss:$12 sps:$4 sm:$0xff]   ;;  %v18371_v9 = vld [vmem:[%s24157_s8 + $0x5d0] ss:$12 sps:$4 sm:$0xff]  }
 0x8f7   :  { %7792 = vmatprep.subr.bf16.mxu1 %v24176_v4 }
 0x8f9   :  { %7659 = vmatpush1.bf16.msra.mxu0 %v18295_v59  ;;  %v18376_v59 = vld [vmem:[%s24157_s8 + $0x5ec] ss:$12 sps:$4 sm:$0xff]  }
 0x8fa   :  { %7793 = vmatpush1.bf16.msra.mxu1 %v18298_v37  ;;  %7660 = vmatprep.subr.bf16.mxu0 %v18301_v15  ;;  %v18374_v37 = vld [vmem:[%s24157_s8 + $0x5e8] ss:$12 sps:$4 sm:$0xff]   ;;  %v18379_v15 = vld [vmem:[%s24157_s8 + $0x604] ss:$12 sps:$4 sm:$0xff]  }
 0x8fb   :  { %7794 = vmatprep.subr.bf16.mxu1 %v24176_v4 }
 0x8fd   :  { %7661 = vmatpush1.bf16.msra.mxu0 %v18299_v54  ;;  %v18377_v54 = vld [vmem:[%s24157_s8 + $0x600] ss:$12 sps:$4 sm:$0xff]  }
 0x8fe   :  { %7795 = vmatpush1.bf16.msra.mxu1 %v18302_v60  ;;  %7662 = vmatprep.subr.bf16.mxu0 %v18305_v21  ;;  %v18384_v60 = vld [vmem:[%s24157_s8 + $0x61c] ss:$12 sps:$4 sm:$0xff]   ;;  %v18385_v21 = vld [vmem:[%s24157_s8 + $0x620] ss:$12 sps:$4 sm:$0xff]  }
 0x8ff   :  { %7796 = vmatprep.subr.bf16.mxu1 %v24176_v4 }
 0x901   :  { %7663 = vmatpush1.bf16.msra.mxu0 %v18303_v63  ;;  %v18382_v63 = vld [vmem:[%s24157_s8 + $0x618] ss:$12 sps:$4 sm:$0xff]  }
 0x902   :  { %7797 = vmatpush1.bf16.msra.mxu1 %v18306_v46  ;;  %7664 = vmatprep.subr.bf16.mxu0 %v18309_v23  ;;  %v18386_v46 = vld [vmem:[%s24157_s8 + $0x560] ss:$12 sps:$4 sm:$0xff]  }
 0x903   :  { %7798 = vmatprep.subr.bf16.mxu1 %v24176_v4  ;;  %v18389_v23 = vld [vmem:[%s24157_s8 + $0x634] ss:$12 sps:$4 sm:$0xff]  }
 0x905   :  { %7665 = vmatpush1.bf16.msra.mxu0 %v18307_v47  ;;  %v18390_v47 = vld [vmem:[%s24157_s8 + $0x638] ss:$12 sps:$4 sm:$0xff]  }
 0x906   :  { %7799 = vmatpush1.bf16.msra.mxu1 %v18310_v5  ;;  %7685 = vmatprep.subr.bf16.mxu0 %v18313_v49  ;;  %v18387_v5 = vld [vmem:[%s24157_s8 + $0x630] ss:$12 sps:$4 sm:$0xff]   ;;  %v18391_v49 = vld [vmem:[%s24157_s8 + $0x578] ss:$12 sps:$4 sm:$0xff]  }
 0x907   :  { %7800 = vmatprep.subr.bf16.mxu1 %v24176_v4 }
 0x908   :  { %7667 = vmatmul.mubr.bf16.vlgmr.msra.gmra.mrb[188].mxu0 %v21234_v17  ;;  %v18319_v17 = vld [vmem:[%s24157_s8 + $0x1b0] ss:$12 sps:$4 sm:$0xff]  }
 0x909   :  { %7676 = vmatprep.mubr.bf16.mxu0 %v6171_v57  ;;  %7686 = vmatpush1.bf16.msra.mxu0 %v18311_v53  ;;  %v18352_v57 = vld [vmem:[#allocation7 + $0x20] ss:$0 sps:$4 sm:$0xff]  }
 0x90a   :  { %7801 = vmatpush1.bf16.msra.mxu1 %v18314_v27  ;;  %7687 = vmatprep.subr.bf16.mxu0 %v18317_v51  ;;  %v18394_v51 = vld [vmem:[%s24157_s8 + $0x64c] ss:$12 sps:$4 sm:$0xff]  }
 0x90b   :  { %7802 = vmatprep.subr.bf16.mxu1 %v24176_v4 }
 0x90d   :  { %7688 = vmatpush1.bf16.msra.mxu0 %v18315_v31  ;;  %v18395_v31 = vld [vmem:[%s24157_s8 + $0x650] ss:$12 sps:$4 sm:$0xff]  }
 0x90e   :  { %7803 = vmatpush1.bf16.msra.mxu1 %v18318_v8  ;;  %7689 = vmatprep.subr.bf16.mxu0 %v18321_v29 }
 0x90f   :  { %7804 = vmatprep.subr.bf16.mxu1 %v24176_v4 }
 0x910   :  { %7677 = vmatmul.mubr.bf16.gmra.mrb[200].mxu0 %v6170_v3  ;;  %v18365_v3 = vld [vmem:[%s24157_s8 + $0x5a0] ss:$12 sps:$4 sm:$0xff]  }
 0x911   :  { %7690 = vmatpush1.bf16.msra.mxu0 %v18319_v17  ;;  %15467 = vmatprep.mubr.msk.bf16.mxu0 %vm6975_vm4, %v21240_v36  ;;  %v18327_v36 = vld [vmem:[%s24157_s8 + $0x1e0] ss:$12 sps:$4 sm:$0xff]   ;;  %v18392_v17 = vld [vmem:[%s24157_s8 + $0x648] ss:$12 sps:$4 sm:$0xff]  }
 0x912   :  { %7805 = vmatpush1.bf16.msra.mxu1 %v18322_v41  ;;  %7691 = vmatprep.subr.bf16.mxu0 %v18325_v24  ;;  %v18396_v41 = vld [vmem:[%s24157_s8 + $0x590] ss:$12 sps:$4 sm:$0xff]  }
 0x913   :  { %7806 = vmatprep.subr.bf16.mxu1 %v24176_v4 }
 0x915   :  { %7692 = vmatpush1.bf16.msra.mxu0 %v18323_v30 }
 0x916   :  { %7807 = vmatpush1.bf16.msra.mxu1 %v18326_v35  ;;  %7693 = vmatprep.subr.bf16.mxu0 %v18329_v14  ;;  %v18397_v35 = vld [vmem:[%s24157_s8 + $0x660] ss:$12 sps:$4 sm:$0xff]   ;;  %v18399_v14 = vld [vmem:[%s24157_s8 + $0x664] ss:$12 sps:$4 sm:$0xff]  }
 0x917   :  { %7850 = vmatprep.subr.bf16.mxu1 %v20978_v45  ;;  %v18335_v45 = vld [vmem:[%s24157_s8 + $0x214] ss:$12 sps:$4 sm:$0xff]  }
 0x919   :  { %7817 = vmatmul.mubr.bf16.vlgmr.msra.gmra.mrb[212].mxu1 %v21236_v20  ;;  %7694 = vmatpush1.bf16.msra.mxu0 %v18327_v36  ;;  %v18400_v36 = vld [vmem:[%s24157_s8 + $0x668] ss:$12 sps:$4 sm:$0xff]  }
 0x91a   :  { %15470 = vmatprep.mubr.msk.bf16.mxu1 %vm6975_vm4, %v6173_v6  ;;  %7851 = vmatpush1.bf16.msra.mxu1 %v20974_v55  ;;  %v6172_v55 = vpack.c.bf16 %v21244_v0, %v21244_v0  ;;  %v18342_v0 = vld [vmem:[#allocation7 + $0x18] sm:$0xff]  }
 0x91b   :  { %7852 = vmatprep.subr.bf16.mxu1 %v20998_v44  ;;  %7695 = vmatprep.subr.bf16.mxu0 %v18332_v12  ;;  %v18336_v44 = vld [vmem:[%s24157_s8 + $0x228] ss:$12 sps:$4 sm:$0xff]  }
 0x91c   :  { %v18401_v12 = vld [vmem:[%s24157_s8 + $0x5a8] ss:$12 sps:$4 sm:$0xff]  }
 0x91d   :  { %7696 = vmatpush1.bf16.msra.mxu0 %v18330_v61 }
 0x91e   :  { %7853 = vmatpush1.bf16.msra.mxu1 %v20994_v7  ;;  %7697 = vmatprep.subr.bf16.mxu0 %v18335_v45  ;;  %v18341_v7 = vld [vmem:[%s24157_s8 + $0x244] ss:$12 sps:$4 sm:$0xff]  }
 0x91f   :  { %7854 = vmatprep.subr.bf16.mxu1 %v21018_v39  ;;  %v18339_v39 = vld [vmem:[%s24157_s8 + $0x240] ss:$12 sps:$4 sm:$0xff]  }
 0x921   :  { %7825 = vmatmul.mubr.bf16.gmra.mrb[216].mxu1 %v6172_v55  ;;  %7698 = vmatpush1.bf16.msra.mxu0 %v18333_v18 }
 0x922   :  { %7855 = vmatpush1.bf16.msra.mxu1 %v21014_v52  ;;  %7699 = vmatprep.subr.bf16.mxu0 %v18338_v62  ;;  %v18345_v52 = vld [vmem:[%s24157_s8 + $0x25c] ss:$12 sps:$4 sm:$0xff]  }
 0x923   :  { %15473 = vmatprep.subr.msk.bf16.mxu1 %vm2299_vm1, %v21038_v32  ;;  %7882 = vmatprep.mubr.bf16.mxu1 %v24176_v4  ;;  %v18343_v32 = vld [vmem:[%s24157_s8 + $0x258] ss:$12 sps:$4 sm:$0xff]   ;;  %v18404_v62 = vld [vmem:[%s24157_s8 + $0x67c] ss:$12 sps:$4 sm:$0xff]  }
 0x925   :  { %7700 = vmatpush1.bf16.msra.mxu0 %v18336_v44 }
 0x926   :  { %7857 = vmatpush1.bf16.msra.mxu1 %v21043_v28  ;;  %7701 = vmatprep.subr.bf16.mxu0 %v18341_v7  ;;  %v18348_v28 = vld [vmem:[%s24157_s8 + $0x274] ss:$12 sps:$4 sm:$0xff]  }
 0x927   :  { %7901 = vmatprep.subr.bf16.mxu1 %v20980_v48  ;;  %v18346_v48 = vld [vmem:[%s24157_s8 + $0x270] ss:$12 sps:$4 sm:$0xff]  }
 0x929   :  { %15474 = vmatmul.mubr.msk.bf16.vlgmr.msra.gmra.mrb[220].mxu1 %vm6045_vm3, %v18342_v0  ;;  %7702 = vmatpush1.bf16.msra.mxu0 %v18339_v39 }
 0x92a   :  { %7902 = vmatpush1.bf16.msra.mxu1 %v20976_v11  ;;  %7703 = vmatprep.subr.bf16.mxu0 %v18345_v52  ;;  %v18351_v11 = vld [vmem:[%s24157_s8 + $0x28c] ss:$12 sps:$4 sm:$0xff]  }
 0x92b   :  { %7903 = vmatprep.subr.bf16.mxu1 %v21000_v19  ;;  %7892 = vmatprep.mubr.bf16.mxu1 %v24176_v4  ;;  %v18349_v19 = vld [vmem:[%s24157_s8 + $0x288] ss:$12 sps:$4 sm:$0xff]   ;;  %v18406_v52 = vld [vmem:[%s24157_s8 + $0x5c0] ss:$12 sps:$4 sm:$0xff]  }
 0x92d   :  { %7704 = vmatpush1.bf16.msra.mxu0 %v18343_v32 }
 0x92e   :  { %7904 = vmatpush1.bf16.msra.mxu1 %v20996_v43  ;;  %7705 = vmatprep.subr.bf16.mxu0 %v18348_v28  ;;  %v18353_v43 = vld [vmem:[%s24157_s8 + $0x540] ss:$12 sps:$4 sm:$0xff]  }
 0x92f   :  { %7905 = vmatprep.subr.bf16.mxu1 %v21020_v26  ;;  %v18358_v26 = vld [vmem:[%s24157_s8 + $0x55c] ss:$12 sps:$4 sm:$0xff]  }
 0x931   :  { %7706 = vmatpush1.bf16.msra.mxu0 %v18346_v48  ;;  %15475 = vmatmul.mubr.msk.bf16.gmra.mrb[224].mxu1 %vm6045_vm3, %v18352_v57  ;;  %v18407_v48 = vld [vmem:[%s24157_s8 + $0x690] ss:$12 sps:$4 sm:$0xff]  }
 0x932   :  { %7906 = vmatpush1.bf16.msra.mxu1 %v21016_v10  ;;  %7707 = vmatprep.subr.bf16.mxu0 %v18351_v11  ;;  %v18355_v10 = vld [vmem:[%s24157_s8 + $0x544] ss:$12 sps:$4 sm:$0xff]  }
 0x933   :  { %15476 = vmatprep.subr.msk.bf16.mxu1 %vm2299_vm1, %v21040_v42  ;;  %7933 = vmatprep.mubr.bf16.mxu1 %v24176_v4  ;;  %v18356_v42 = vld [vmem:[%s24157_s8 + $0x558] ss:$12 sps:$4 sm:$0xff]  }
 0x934   :  { %v18410_v11 = vld [vmem:[%s24157_s8 + $0x698] ss:$12 sps:$4 sm:$0xff]  }
 0x935   :  { %7708 = vmatpush1.bf16.msra.mxu0 %v18349_v19  ;;  %v18411_v19 = vld [vmem:[%s24157_s8 + $0x5d8] ss:$12 sps:$4 sm:$0xff]  }
 0x936   :  { %7908 = vmatpush1.bf16.msra.mxu1 %v21046_v50  ;;  %8527 = vmatprep.subr.bf16.mxu0 %v18355_v10  ;;  %v18359_v50 = vld [vmem:[%s24157_s8 + $0x570] ss:$12 sps:$4 sm:$0xff]  }
 0x937   :  { %16963 = vmatprep.subr.bf16.mxu1 %v18380_v1  ;;  %v18415_v10 = vld [vmem:[%s24157_s8 + $0x6b0] ss:$12 sps:$4 sm:$0xff]  }
 0x938   :  { %7718 = vmatmul.mubr.bf16.vlgmr.msra.gmra.mrb[188].mxu0 %v21236_v20  ;;  %v18361_v20 = vld [vmem:[%s24157_s8 + $0x574] ss:$12 sps:$4 sm:$0xff]  }
 0x939   :  { %15468 = vmatprep.mubr.msk.bf16.mxu0 %vm6975_vm4, %v6173_v6  ;;  %15477 = vmatmul.mubr.msk.bf16.vlgmr.msra.gmra.mrb[228].mxu1 %vm6045_vm3, %v18342_v0  ;;  %v18402_v0 = vld [vmem:[%s24157_s8 + $0x678] ss:$12 sps:$4 sm:$0xff]  }
 0x93a   :  { %7943 = vmatprep.mubr.bf16.mxu1 %v24176_v4  ;;  %8528 = vmatpush1.bf16.msra.mxu0 %v18353_v43  ;;  %v18414_v43 = vld [vmem:[%s24157_s8 + $0x6ac] ss:$12 sps:$4 sm:$0xff]  }
 0x93b   :  { %8529 = vmatprep.subr.bf16.mxu0 %v18358_v26  ;;  %16964 = vmatpush3.bf16.msra.mxu1 %v18381_v2  ;;  %v18412_v26 = vld [vmem:[%s24157_s8 + $0x6a8] ss:$12 sps:$4 sm:$0xff]  }
 0x93c   :  { %16965 = vmatprep.subr.bf16.mxu1 %v18385_v21 }
 0x93e   :  { %8530 = vmatpush1.bf16.msra.mxu0 %v18356_v42  ;;  %v18416_v42 = vld [vmem:[%s24157_s8 + $0x5f0] ss:$12 sps:$4 sm:$0xff]  }
 0x93f   :  { %8531 = vmatprep.subr.bf16.mxu0 %v18361_v20  ;;  %16966 = vmatpush3.bf16.msra.mxu1 %v18386_v46 }
 0x940   :  { %7728 = vmatmul.mubr.bf16.gmra.mrb[204].mxu0 %v6172_v55  ;;  %16967 = vmatprep.subr.bf16.mxu1 %v18390_v47  ;;  %v18405_v55 = vld [vmem:[%s24157_s8 + $0x680] ss:$12 sps:$4 sm:$0xff]  }
 0x941   :  { %15478 = vmatmul.mubr.msk.bf16.gmra.mrb[232].mxu1 %vm6045_vm3, %v18352_v57  ;;  %v18409_v57 = vld [vmem:[%s24157_s8 + $0x694] ss:$12 sps:$4 sm:$0xff]  }
 0x942   :  { %8532 = vmatpush1.bf16.msra.mxu0 %v18359_v50  ;;  %v18419_v50 = vld [vmem:[%s24157_s8 + $0x6c4] ss:$12 sps:$4 sm:$0xff]  }
 0x943   :  { %8533 = vmatprep.subr.bf16.mxu0 %v18364_v38  ;;  %16968 = vmatpush3.bf16.msra.mxu1 %v18391_v49 }
 0x944   :  { %16969 = vmatprep.subr.bf16.mxu1 %v18395_v31 }
 0x946   :  { %8534 = vmatpush1.bf16.msra.mxu0 %v18362_v16 }
 0x947   :  { %8535 = vmatprep.subr.bf16.mxu0 %v18367_v22  ;;  %16970 = vmatpush3.bf16.msra.mxu1 %v18396_v41 }
 0x948   :  { %16971 = vmatprep.subr.bf16.mxu1 %v18400_v36 }
 0x94a   :  { %8536 = vmatpush1.bf16.msra.mxu0 %v18365_v3 }
 0x94b   :  { %8537 = vmatprep.subr.bf16.mxu0 %v18370_v58  ;;  %16972 = vmatpush3.bf16.msra.mxu1 %v18401_v12 }
 0x94c   :  { %16973 = vmatprep.subr.bf16.mxu1 %v18405_v55 }
 0x94e   :  { %8538 = vmatpush1.bf16.msra.mxu0 %v18368_v25 }
 0x94f   :  { %8539 = vmatprep.subr.bf16.mxu0 %v18373_v40  ;;  %16974 = vmatpush3.bf16.msra.mxu1 %v18406_v52 }
 0x950   :  { %16975 = vmatprep.subr.bf16.mxu1 %v18410_v11 }
 0x952   :  { %8540 = vmatpush1.bf16.msra.mxu0 %v18371_v9 }
 0x953   :  { %8541 = vmatprep.subr.bf16.mxu0 %v18376_v59  ;;  %16976 = vmatpush3.bf16.msra.mxu1 %v18411_v19 }
 0x954   :  { %16977 = vmatprep.subr.bf16.mxu1 %v18415_v10  ;;  %v18420_v10 = vld [vmem:[%s24157_s8 + $0x6c8] ss:$12 sps:$4 sm:$0xff]  }
 0x956   :  { %8542 = vmatpush1.bf16.msra.mxu0 %v18374_v37 }
 0x957   :  { %8543 = vmatprep.subr.bf16.mxu0 %v18379_v15  ;;  %16978 = vmatpush3.bf16.msra.mxu1 %v18416_v42  ;;  %v18421_v42 = vld [vmem:[%s24157_s8 + $0x6d8] ss:$12 sps:$4 sm:$0xff]  }
 0x958   :  { %8677 = vmatprep.subr.bf16.mxu1 %v24176_v4 }
 0x95a   :  { %8544 = vmatpush1.bf16.msra.mxu0 %v18377_v54 }
 0x95b   :  { %8545 = vmatprep.subr.bf16.mxu0 %v18384_v60 }
 0x95e   :  { %8546 = vmatpush1.bf16.msra.mxu0 %v18382_v63 }
 0x95f   :  { %8547 = vmatprep.subr.bf16.mxu0 %v18389_v23 }
 0x962   :  { %8548 = vmatpush1.bf16.msra.mxu0 %v18387_v5 }
 0x963   :  { %8549 = vmatprep.subr.bf16.mxu0 %v18394_v51 }
 0x966   :  { %8550 = vmatpush1.bf16.msra.mxu0 %v18392_v17 }
 0x967   :  { %8551 = vmatprep.subr.bf16.mxu0 %v18399_v14 }
 0x96a   :  { %8552 = vmatpush1.bf16.msra.mxu0 %v18397_v35 }
 0x96b   :  { %v16923_v53 = vpop.f32.mrb[188].mxu1  ;;  %8553 = vmatprep.subr.bf16.mxu0 %v18404_v62 }
 0x96c   :  { %v16924_v27 = vpop.f32.mrb[189].mxu1 }
 0x96d   :  { %v16925_v8 = vadd.f32 %v16924_v27, %v16923_v53  ;;  %v16926_v29 = vpop.f32.mrb[190].mxu1 }
 0x96e   :  { %v16927_v24 = vpop.f32.mrb[191].mxu1  ;;  %8554 = vmatpush1.bf16.msra.mxu0 %v18402_v0 }
 0x96f   :  { %v16928_v30 = vadd.f32 %v16927_v24, %v16926_v29  ;;  %8555 = vmatprep.subr.bf16.mxu0 %v18409_v57 }
 0x972   :  { %8556 = vmatpush1.bf16.msra.mxu0 %v18407_v48 }
 0x973   :  { %v7026_v6 = vpop.f32.mrb[192].mxu0  ;;  %v16929_v61 = vpop.f32.mrb[192].mxu1  ;;  %8557 = vmatprep.subr.bf16.mxu0 %v18414_v43  ;;  %v18417_v43 = vld [vmem:[%s24157_s8 + $0x6c0] ss:$12 sps:$4 sm:$0xff]  }
 0x974   :  { %v7028_v45 = vpop.f32.mrb[193].mxu0  ;;  %v16930_v18 = vpop.f32.mrb[193].mxu1 }
 0x975   :  { %v16931_v44 = vadd.f32 %v16930_v18, %v16929_v61  ;;  %v7030_v7 = vpop.f32.mrb[194].mxu0  ;;  %v16932_v39 = vpop.f32.mrb[194].mxu1 }
 0x976   :  { %v7031_v32 = vpop.f32.mrb[195].mxu0  ;;  %v16933_v28 = vpop.f32.mrb[195].mxu1  ;;  %8558 = vmatpush1.bf16.msra.mxu0 %v18412_v26  ;;  %v18423_v26 = vld [vmem:[%s24157_s8 + $0x6dc] ss:$12 sps:$4 sm:$0xff]  }
 0x977   :  { %8578 = vmatprep.subr.bf16.mxu0 %v18419_v50  ;;  %v18424_v50 = vld [vmem:[%s24157_s8 + $0x6e0] ss:$12 sps:$4 sm:$0xff]  }
 0x99b   :  { %v7166_v20 = vpop.f32.mrb[196].mxu1 }
 0x99c   :  { %v7167_v38 = vadd.f32 %v16925_v8, %v7166_v20  ;;  %v7168_v16 = vpop.f32.mrb[197].mxu1 }
 0x99d   :  { %v7169_v1 = vpop.f32.mrb[198].mxu1 }
 0x99e   :  { %v7170_v22 = vadd.f32 %v16928_v30, %v7169_v1  ;;  %v7171_v2 = vpop.f32.mrb[199].mxu1 }
 0x9a3   :  { %v7077_v3 = vpop.f32.mrb[196].mxu0  ;;  %v7174_v58 = vpop.f32.mrb[200].mxu1 }
 0x9a4   :  { %v7078_v25 = vadd.f32 %v7077_v3, %v7026_v6  ;;  %v7175_v40 = vadd.f32 %v16931_v44, %v7174_v58  ;;  %v7079_v9 = vpop.f32.mrb[197].mxu0  ;;  %v7176_v59 = vpop.f32.mrb[201].mxu1  ;;  %v18425_v58 = vld [vmem:[%s24157_s8 + $0x6f0] ss:$12 sps:$4 sm:$0xff]  }
 0x9a5   :  { %v7080_v37 = vadd.f32 %v7079_v9, %v7028_v45  ;;  %v7081_v15 = vpop.f32.mrb[198].mxu0  ;;  %v7177_v54 = vpop.f32.mrb[202].mxu1  ;;  %v18429_v9 = vld [vmem:[%s24157_s8 + $0x708] ss:$12 sps:$4 sm:$0xff]   ;;  %v18432_v59 = vld [vmem:[%s24157_s8 + $0x710] ss:$12 sps:$4 sm:$0xff]  }
 0x9a6   :  { %v7082_v60 = vpop.f32.mrb[199].mxu0  ;;  %v7178_v21 = vpop.f32.mrb[203].mxu1  ;;  %v18435_v15 = vld [vmem:[%s24157_s8 + $0x724] ss:$12 sps:$4 sm:$0xff]  }
 0x9bc   :  { %v16951_v63 = vpop.f32.mrb[204].mxu1 }
 0x9bd   :  { %v16952_v46 = vpop.f32.mrb[205].mxu1 }
 0x9be   :  { %v16953_v23 = vadd.f32 %v16952_v46, %v16951_v63  ;;  %v16954_v47 = vpop.f32.mrb[206].mxu1  ;;  %v18433_v46 = vld [vmem:[%s24157_s8 + $0x720] ss:$12 sps:$4 sm:$0xff]  }
 0x9bf   :  { %v16955_v5 = vpop.f32.mrb[207].mxu1 }
 0x9c0   :  { %v16956_v49 = vadd.f32 %v16955_v5, %v16954_v47  ;;  %v7771_v53 = vadd.f32 %v16953_v23, %v7167_v38  ;;  %v18427_v38 = vld [vmem:[%s24157_s8 + $0x6f4] ss:$12 sps:$4 sm:$0xff]   ;;  %v18439_v5 = vld [vmem:[%s24157_s8 + $0x73c] ss:$12 sps:$4 sm:$0xff]  }
 0x9c1   :  { %v18436_v23 = vld [vmem:[%s24157_s8 + $0x728] ss:$12 sps:$4 sm:$0xff]  }
 0x9c2   :  { %v7774_v27 = vadd.f32 %v16956_v49, %v7170_v22 }
 0x9c4   :  { %v16957_v51 = vpop.f32.mrb[208].mxu1 }
 0x9c5   :  { %v16958_v31 = vpop.f32.mrb[209].mxu1 }
 0x9c6   :  { %v16959_v8 = vadd.f32 %v16958_v31, %v16957_v51  ;;  %v16960_v29 = vpop.f32.mrb[210].mxu1  ;;  %v18437_v51 = vld [vmem:[%s24157_s8 + $0x738] ss:$12 sps:$4 sm:$0xff]   ;;  %v18440_v31 = vld [vmem:[%s24157_s8 + $0x740] ss:$12 sps:$4 sm:$0xff]  }
 0x9c7   :  { %v16961_v17 = vpop.f32.mrb[211].mxu1 }
 0x9c8   :  { %v7779_v41 = vadd.f32 %v16959_v8, %v7175_v40  ;;  %v18431_v40 = vld [vmem:[%s24157_s8 + $0x70c] ss:$12 sps:$4 sm:$0xff]  }
 0x9e3   :  { %v7678_v24 = vpop.f32.mrb[200].mxu0 }
 0x9e4   :  { %v21840_v30 = vadd.f32 %v7678_v24, %v7078_v25  ;;  %v7680_v35 = vpop.f32.mrb[201].mxu0  ;;  %v18428_v25 = vld [vmem:[%s24157_s8 + $0x6f8] ss:$12 sps:$4 sm:$0xff]  }
 0x9e5   :  { %v21842_v14 = vadd.f32 %v7680_v35, %v7080_v37  ;;  %v7682_v36 = vpop.f32.mrb[202].mxu0 }
 0x9e6   :  { %v7683_v12 = vpop.f32.mrb[203].mxu0 }
 0x9e7   :  { %v18441_v12 = vld [vmem:[%s24157_s8 + $0x750] ss:$12 sps:$4 sm:$0xff]  }
 0x9ec   :  { %v7818_v6 = vpop.f32.mrb[212].mxu1 }
 0x9ed   :  { %v21844_v61 = vadd.f32 %v7818_v6, %v7771_v53  ;;  %v7820_v45 = vpop.f32.mrb[213].mxu1  ;;  %v18447_v6 = vld [vmem:[%s24157_s8 + $0x76c] ss:$12 sps:$4 sm:$0xff]  }
 0x9ee   :  { %v7821_v18 = vpop.f32.mrb[214].mxu1  ;;  %v18445_v45 = vld [vmem:[%s24157_s8 + $0x768] ss:$12 sps:$4 sm:$0xff]  }
 0x9ef   :  { %v21846_v62 = vadd.f32 %v7821_v18, %v7774_v27  ;;  %v7823_v55 = vpop.f32.mrb[215].mxu1  ;;  %v18448_v18 = vld [vmem:[%s24157_s8 + $0x770] ss:$12 sps:$4 sm:$0xff]  }
 0x9f0   :  { %v18451_v55 = vld [vmem:[%s24157_s8 + $0x784] ss:$12 sps:$4 sm:$0xff]  }
 0x9f4   :  { %v7826_v44 = vpop.f32.mrb[216].mxu1 }
 0x9f5   :  { %v21848_v7 = vadd.f32 %v7826_v44, %v7779_v41  ;;  %v7828_v39 = vpop.f32.mrb[217].mxu1  ;;  %v18443_v41 = vld [vmem:[%s24157_s8 + $0x754] ss:$12 sps:$4 sm:$0xff]  }
 0x9f6   :  { %v7829_v0 = vpop.f32.mrb[218].mxu1  ;;  %v18449_v44 = vld [vmem:[%s24157_s8 + $0x780] ss:$12 sps:$4 sm:$0xff]   ;;  %v18452_v39 = vld [vmem:[%s24157_s8 + $0x788] ss:$12 sps:$4 sm:$0xff]  }
 0x9f7   :  { %v7830_v52 = vpop.f32.mrb[219].mxu1  ;;  %v18455_v0 = vld [vmem:[%s24157_s8 + $0x79c] ss:$12 sps:$4 sm:$0xff]  }
 0x9f8   :  { %v18453_v52 = vld [vmem:[%s24157_s8 + $0x798] ss:$12 sps:$4 sm:$0xff]  }
 0x9fc   :  { %v7884_v32 = vpop.f32.mrb[220].mxu1 }
 0x9fd   :  { %v7886_v28 = vpop.f32.mrb[221].mxu1 }
 0x9fe   :  { %v7888_v48 = vpop.f32.mrb[222].mxu1 }
 0x9ff   :  { %v7952_v57 = vpack.c.bf16 %v7888_v48, %v7884_v32  ;;  %v7890_v11 = vpop.f32.mrb[223].mxu1  ;;  %v18456_v32 = vld [vmem:[%s24157_s8 + $0x7a0] ss:$12 sps:$4 sm:$0xff]   ;;  %v18457_v48 = vld [vmem:[%s24157_s8 + $0x7b0] ss:$12 sps:$4 sm:$0xff]  }
 0xa00   :  { %v7953_v19 = vpack.c.bf16 %v7890_v11, %v7886_v28  ;;  %v18459_v28 = vld [vmem:[%s24157_s8 + $0x7b4] ss:$12 sps:$4 sm:$0xff]   ;;  %v18463_v11 = vld [vmem:[%s24157_s8 + $0x7cc] ss:$12 sps:$4 sm:$0xff]  }
 0xa02   :  { %8559 = vmatprep.mubr.bf16.mxu0 %v7953_v19  ;;  %8661 = vmatprep.mubr.bf16.mxu1 %v7953_v19  ;;  %v18461_v19 = vld [vmem:[%s24157_s8 + $0x7c8] ss:$12 sps:$4 sm:$0xff]  }
 0xa03   :  { %8560 = vmatmul.mubr.bf16.vlgmr.msra.gmra.mrb[188].mxu0 %v7952_v57  ;;  %8662 = vmatmul.mubr.bf16.vlgmr.msra.gmra.mrb[236].mxu1 %v7952_v57  ;;  %v18460_v57 = vld [vmem:[%s24157_s8 + $0x7b8] ss:$12 sps:$4 sm:$0xff]  }
 0xa04   :  { %8579 = vmatpush1.bf16.msra.mxu0 %v18417_v43  ;;  %8678 = vmatpush1.bf16.msra.mxu1 %v18420_v10  ;;  %v7894_v20 = vpop.f32.mrb[224].mxu1  ;;  %v18464_v43 = vld [vmem:[%s24157_s8 + $0x7d0] ss:$12 sps:$4 sm:$0xff]  }
 0xa05   :  { %8580 = vmatprep.subr.bf16.mxu0 %v18423_v26  ;;  %8679 = vmatprep.subr.bf16.mxu1 %v24176_v4  ;;  %v7896_v16 = vpop.f32.mrb[225].mxu1  ;;  %v7956_v2 = vpack.c.bf16 %v7894_v20, %v7894_v20 }
 0xa06   :  { %v7957_v1 = vpack.c.bf16 %v7896_v16, %v7896_v16  ;;  %v7898_v22 = vpop.f32.mrb[226].mxu1 }
 0xa07   :  { %v7899_v3 = vpop.f32.mrb[227].mxu1  ;;  %v15814_v22 = vld [vmem:[%s24160_s11 + $0xa00] sm:$0xff] }
 0xa08   :  { %8581 = vmatpush1.bf16.msra.mxu0 %v18421_v42  ;;  %8680 = vmatpush1.bf16.msra.mxu1 %v18424_v50 }
 0xa09   :  { %8582 = vmatprep.subr.bf16.mxu0 %v18427_v38  ;;  %8681 = vmatprep.subr.bf16.mxu1 %v24176_v4 }
 0xa0a   :  { %8569 = vmatprep.mubr.bf16.mxu0 %v7957_v1  ;;  %8669 = vmatprep.mubr.bf16.mxu1 %v7957_v1 }
 0xa0b   :  { %8570 = vmatmul.mubr.bf16.gmra.mrb[208].mxu0 %v7956_v2  ;;  %8670 = vmatmul.mubr.bf16.gmra.mrb[240].mxu1 %v7956_v2  ;;  %v15818_v2 = vld [vmem:[%s24160_s11 + $0xa20] sm:$0xff] }
 0xa0c   :  { %8583 = vmatpush1.bf16.msra.mxu0 %v18425_v58  ;;  %8682 = vmatpush1.bf16.msra.mxu1 %v18428_v25  ;;  %v7935_v37 = vpop.f32.mrb[228].mxu1  ;;  %v16006_v3 = vcombine.low %v15814_v22, %v15818_v2  ;;  %v16007_v58 = vcombine.high %v15814_v22, %v15818_v2 }
 0xa0d   :  { %8584 = vmatprep.subr.bf16.mxu0 %v18431_v40  ;;  %8683 = vmatprep.subr.bf16.mxu1 %v24176_v4  ;;  %v7937_v54 = vpop.f32.mrb[229].mxu1 }
 0xa0e   :  { %v7939_v60 = vpop.f32.mrb[230].mxu1 }
 0xa0f   :  { %v21889_v21 = vpack.c.bf16 %v7939_v60, %v7935_v37  ;;  %v7941_v63 = vpop.f32.mrb[231].mxu1  ;;  %v15822_v37 = vld [vmem:[%s24160_s11 + $0xa40] sm:$0xff] }
 0xa10   :  { %8585 = vmatpush1.bf16.msra.mxu0 %v18429_v9  ;;  %8684 = vmatpush1.bf16.msra.mxu1 %v18432_v59  ;;  %v7955_v47 = vpack.c.bf16 %v7941_v63, %v7937_v54 }
 0xa11   :  { %8586 = vmatprep.subr.bf16.mxu0 %v18435_v15  ;;  %8685 = vmatprep.subr.bf16.mxu1 %v24176_v4  ;;  %v15826_v15 = vld [vmem:[%s24160_s11 + $0xa60] sm:$0xff] }
 0xa12   :  { %15675 = vmatprep.mubr.msk.bf16.mxu0 %vm6975_vm4, %v7955_v47  ;;  %15677 = vmatprep.mubr.msk.bf16.mxu1 %vm6975_vm4, %v7955_v47  ;;  %v16014_v63 = vcombine.low %v15822_v37, %v15826_v15 }
 0xa13   :  { %v7729_v49 = vpop.f32.mrb[204].mxu0 }
 0xa14   :  { %8587 = vmatpush1.bf16.msra.mxu0 %v18433_v46  ;;  %8686 = vmatpush1.bf16.msra.mxu1 %v18436_v23  ;;  %v21904_v53 = vadd.f32 %v7729_v49, %v21840_v30  ;;  %v7731_v27 = vpop.f32.mrb[205].mxu0  ;;  %v7945_v8 = vpop.f32.mrb[232].mxu1  ;;  %v16015_v46 = vcombine.high %v15822_v37, %v15826_v15 }
 0xa15   :  { %v21913_v29 = vadd.f32 %v7731_v27, %v21842_v14  ;;  %v7733_v17 = vpop.f32.mrb[206].mxu0  ;;  %8588 = vmatprep.subr.bf16.mxu0 %v18439_v5  ;;  %8687 = vmatprep.subr.bf16.mxu1 %v24176_v4  ;;  %v7947_v24 = vpop.f32.mrb[233].mxu1  ;;  %v18444_v14 = vld [vmem:[%s24157_s8 + $0x758] ss:$12 sps:$4 sm:$0xff]   ;;  %v7958_v26 = vpack.c.bf16 %v7945_v8, %v7945_v8  ;;  %v8734_v5 = vld [vmem:[#allocation9] sm:$0x7] }
 0xa16   :  { %v7734_v30 = vpop.f32.mrb[207].mxu0  ;;  %v7949_v35 = vpop.f32.mrb[234].mxu1  ;;  %v7959_v10 = vpack.c.bf16 %v7947_v24, %v7947_v24  ;;  %v8739_v49 = vrot.slane %v8734_v5, %v19352_v33  ;;  %v8743_v27 = vrot.slane %v8734_v5, %v24177_v13 }
 0xa17   :  { %v7950_v36 = vpop.f32.mrb[235].mxu1 }
 0xa18   :  { %8589 = vmatpush1.bf16.msra.mxu0 %v18437_v51  ;;  %8688 = vmatpush1.bf16.msra.mxu1 %v18440_v31 }
 0xa19   :  { %8590 = vmatprep.subr.bf16.mxu0 %v18443_v41  ;;  %8689 = vmatprep.subr.bf16.mxu1 %v24176_v4  ;;  %v8747_v41 = vrot.slane %v8734_v5, %v19355_v34  ;;  %v15686_v5 = vld [vmem:[%s24160_s11 + $0x600] sm:$0xff] }
 0xa1c   :  { %8591 = vmatpush1.bf16.msra.mxu0 %v18441_v12  ;;  %8690 = vmatpush1.bf16.msra.mxu1 %v18444_v14 }
 0xa1d   :  { %8592 = vmatprep.subr.bf16.mxu0 %v18447_v6  ;;  %8691 = vmatprep.subr.bf16.mxu1 %v24176_v4 }
 0xa20   :  { %8593 = vmatpush1.bf16.msra.mxu0 %v18445_v45  ;;  %8692 = vmatpush1.bf16.msra.mxu1 %v18448_v18 }
 0xa21   :  { %8594 = vmatprep.subr.bf16.mxu0 %v18451_v55  ;;  %8693 = vmatprep.subr.bf16.mxu1 %v24176_v4 }
 0xa24   :  { %8595 = vmatpush1.bf16.msra.mxu0 %v18449_v44  ;;  %8694 = vmatpush1.bf16.msra.mxu1 %v18452_v39 }
 0xa25   :  { %8596 = vmatprep.subr.bf16.mxu0 %v18455_v0  ;;  %8695 = vmatprep.subr.bf16.mxu1 %v24176_v4 }
 0xa28   :  { %8597 = vmatpush1.bf16.msra.mxu0 %v18453_v52  ;;  %8696 = vmatpush1.bf16.msra.mxu1 %v18456_v32 }
 0xa29   :  { %8598 = vmatprep.subr.bf16.mxu0 %v18459_v28  ;;  %8697 = vmatprep.subr.bf16.mxu1 %v24176_v4 }
 0xa2c   :  { %8599 = vmatpush1.bf16.msra.mxu0 %v18457_v48  ;;  %8698 = vmatpush1.bf16.msra.mxu1 %v18460_v57 }
 0xa2d   :  { %8600 = vmatprep.subr.bf16.mxu0 %v18463_v11  ;;  %8699 = vmatprep.subr.bf16.mxu1 %v24176_v4 }
 0xa30   :  { %8601 = vmatpush1.bf16.msra.mxu0 %v18461_v19  ;;  %8700 = vmatpush1.bf16.msra.mxu1 %v18464_v43 }
 0xa31   :  { %10348 = vmatprep.subr.bf16.mxu0 %v16007_v58 }
 0xa33   :  { %8611 = vmatmul.mubr.bf16.vlgmr.msra.gmra.mrb[188].mxu0 %v21889_v21  ;;  %8710 = vmatmul.mubr.bf16.vlgmr.msra.gmra.mrb[244].mxu1 %v21889_v21 }
 0xa34   :  { %15676 = vmatprep.mubr.msk.bf16.mxu0 %vm6975_vm4, %v7959_v10  ;;  %15678 = vmatprep.mubr.msk.bf16.mxu1 %vm6975_vm4, %v7959_v10 }
 0xa35   :  { %10349 = vmatpush1.bf16.msra.mxu0 %v16006_v3 }
 0xa36   :  { %10350 = vmatprep.subr.bf16.mxu0 %v16015_v46 }
 0xa39   :  { %10351 = vmatpush1.bf16.msra.mxu0 %v16014_v63 }
 0xa3b   :  { %8621 = vmatmul.mubr.bf16.gmra.mrb[212].mxu0 %v7958_v26  ;;  %8718 = vmatmul.mubr.bf16.gmra.mrb[248].mxu1 %v7958_v26 }
 0xa3c   :  { %8821 = vmatprep.mubr.bf16.mxu1 %v24176_v4  ;;  %10380 = vmatprep.mubr.bf16.mxu0 %v24176_v4 }
 0xad6   :  { %v16979_v42 = vpop.f32.mrb[236].mxu1 }
 0xad7   :  { %v16980_v50 = vpop.f32.mrb[237].mxu1 }
 0xad8   :  { %v16981_v20 = vadd.f32 %v16980_v50, %v16979_v42  ;;  %v16982_v38 = vpop.f32.mrb[238].mxu1 }
 0xad9   :  { %v16983_v16 = vpop.f32.mrb[239].mxu1 }
 0xada   :  { %v16984_v1 = vadd.f32 %v16983_v16, %v16982_v38 }
 0xade   :  { %v8571_v25 = vpop.f32.mrb[208].mxu0  ;;  %v16985_v40 = vpop.f32.mrb[240].mxu1 }
 0xadf   :  { %v8573_v9 = vpop.f32.mrb[209].mxu0  ;;  %v16986_v59 = vpop.f32.mrb[241].mxu1 }
 0xae0   :  { %v16987_v54 = vadd.f32 %v16986_v59, %v16985_v40  ;;  %v8575_v60 = vpop.f32.mrb[210].mxu0  ;;  %v16988_v21 = vpop.f32.mrb[242].mxu1 }
 0xae1   :  { %v8576_v23 = vpop.f32.mrb[211].mxu0  ;;  %v16989_v47 = vpop.f32.mrb[243].mxu1 }
 0xae2   :  { %v15682_v47 = vld [vmem:[%s24159_s10 + $0x4] sm:$0xf] }
 0xb06   :  { %v8612_v51 = vpop.f32.mrb[188].mxu0  ;;  %v8711_v31 = vpop.f32.mrb[244].mxu1 }
 0xb07   :  { %v8751_v8 = vadd.f32 %v8739_v49, %v8612_v51  ;;  %v8712_v17 = vadd.f32 %v16981_v20, %v8711_v31  ;;  %v8614_v24 = vpop.f32.mrb[189].mxu0  ;;  %v8713_v30 = vpop.f32.mrb[245].mxu1  ;;  %v15694_v51 = vld [vmem:[%s24160_s11 + $0x640] sm:$0xff] }
 0xb08   :  { %v8752_v35 = vadd.f32 %v8743_v27, %v8614_v24  ;;  %v8616_v36 = vpop.f32.mrb[190].mxu0  ;;  %v8714_v12 = vpop.f32.mrb[246].mxu1  ;;  %v15698_v31 = vld [vmem:[%s24160_s11 + $0x660] sm:$0xff] }
 0xb09   :  { %v8727_v14 = vadd.f32 %v8712_v17, %v21844_v61  ;;  %v8754_v6 = vadd.f32 %v8739_v49, %v8616_v36  ;;  %v8715_v45 = vadd.f32 %v16984_v1, %v8714_v12  ;;  %v8618_v18 = vpop.f32.mrb[191].mxu0  ;;  %v8716_v55 = vpop.f32.mrb[247].mxu1  ;;  %v8760_v39 = vmax.f32 %v8751_v8, 0.0  ;;  %v15706_v24 = vld [vmem:[%s24160_s11 + $0x6a0] sm:$0xff] }
 0xb0a   :  { %v8755_v44 = vadd.f32 %v8743_v27, %v8618_v18  ;;  %v8761_v28 = vmax.f32 %v8752_v35, 0.0  ;;  %v15887_v17 = vcombine.high %v15694_v51, %v15698_v31  ;;  %v15886_v30 = vcombine.low %v15694_v51, %v15698_v31  ;;  %v15710_v36 = vld [vmem:[%s24160_s11 + $0x6c0] sm:$0xff] }
 0xb0b   :  { %v8753_v0 = vadd.f32 %v8747_v41, %v8727_v14  ;;  %v8763_v52 = vmax.f32 %v8754_v6, 0.0  ;;  %v8730_v32 = vadd.f32 %v8715_v45, %v21846_v62  ;;  %v15714_v12 = vld [vmem:[%s24160_s11 + $0x6e0] sm:$0xff] }
 0xb0c   :  { %v8764_v48 = vmax.f32 %v8755_v44, 0.0  ;;  %v15903_v6 = vcombine.high %v15710_v36, %v15714_v12  ;;  %v15718_v45 = vld [vmem:[%s24160_s11 + $0x700] sm:$0xff]  ;;  %v15902_v55 = vcombine.low %v15710_v36, %v15714_v12 }
 0xb0d   :  { %v21999_v57 = vpack.c.bf16 %v8763_v52, %v8760_v39  ;;  %v8756_v11 = vadd.f32 %v8747_v41, %v8730_v32  ;;  %v8762_v61 = vmax.f32 %v8753_v0, 0.0  ;;  %v15722_v18 = vld [vmem:[%s24160_s11 + $0x720] sm:$0xff] }
 0xb0e   :  { %v22001_v19 = vpack.c.bf16 %v8764_v48, %v8761_v28  ;;  %v8622_v43 = vpop.f32.mrb[212].mxu0  ;;  %v8719_v10 = vpop.f32.mrb[248].mxu1  ;;  %v15911_v44 = vcombine.high %v15718_v45, %v15722_v18  ;;  %v15726_v39 = vld [vmem:[%s24160_s11 + $0x740] sm:$0xff]  ;;  %v15910_v52 = vcombine.low %v15718_v45, %v15722_v18 }
 0xb0f   :  { %v8765_v26 = vmax.f32 %v8756_v11, 0.0  ;;  %v8623_v42 = vadd.f32 %v8622_v43, %v8571_v25  ;;  %v8720_v50 = vadd.f32 %v16987_v54, %v8719_v10  ;;  %v8624_v20 = vpop.f32.mrb[213].mxu0  ;;  %v8721_v38 = vpop.f32.mrb[249].mxu1  ;;  %v15730_v0 = vld [vmem:[%s24160_s11 + $0x760] sm:$0xff] }
 0xb10   :  { %v8625_v16 = vadd.f32 %v8624_v20, %v8573_v9  ;;  %v8626_v1 = vpop.f32.mrb[214].mxu0  ;;  %v8722_v22 = vpop.f32.mrb[250].mxu1  ;;  %8789 = vmatprep.subr.bf16.mxu1 %v22001_v19  ;;  %v15919_v32 = vcombine.high %v15726_v39, %v15730_v0  ;;  %v15734_v28 = vld [vmem:[%s24160_s11 + $0x780] sm:$0xff]  ;;  %v15918_v11 = vcombine.low %v15726_v39, %v15730_v0 }
 0xb11   :  { %v22004_v62 = vpack.c.bf16 %v8765_v26, %v8762_v61  ;;  %v8731_v2 = vadd.f32 %v8623_v42, %v21904_v53  ;;  %v8733_v3 = vadd.f32 %v8720_v50, %v21848_v7  ;;  %v8627_v58 = vpop.f32.mrb[215].mxu0  ;;  %v8723_v40 = vpop.f32.mrb[251].mxu1  ;;  %8790 = vmatpush1.bf16.msra.mxu1 %v21999_v57  ;;  %v8775_v7 = vld [vmem:[%s24159_s10] sm:$0xf] }
 0xb12   :  { %v8732_v25 = vadd.f32 %v8625_v16, %v21913_v29  ;;  %v18719_v29 = vmov 0.0   ;;  %v15738_v48 = vld [vmem:[%s24160_s11 + $0x7a0] sm:$0xff] }
 0xb13   :  { %v8757_v59 = vadd.f32 %v8739_v49, %v8731_v2  ;;  %v8759_v9 = vadd.f32 %v8747_v41, %v8733_v3  ;;  %v15690_v49 = vld [vmem:[%s24160_s11 + $0x620] sm:$0xff]  ;;  %v15927_v43 = vcombine.high %v15734_v28, %v15738_v48  ;;  %v15926_v26 = vcombine.low %v15734_v28, %v15738_v48 }
 0xb14   :  { %v8758_v37 = vadd.f32 %v8743_v27, %v8732_v25  ;;  %v15879_v27 = vcombine.high %v15686_v5, %v15690_v49  ;;  %v15878_v8 = vcombine.low %v15686_v5, %v15690_v49  ;;  %v15702_v41 = vld [vmem:[%s24160_s11 + $0x680] sm:$0xff] }
 0xb15   :  { %v8766_v15 = vmax.f32 %v8757_v59, 0.0  ;;  %v8768_v53 = vmax.f32 %v8759_v9, 0.0  ;;  %v15895_v35 = vcombine.high %v15702_v41, %v15706_v24  ;;  %v15894_v14 = vcombine.low %v15702_v41, %v15706_v24  ;;  %v15742_v10 = vld [vmem:[%s24160_s11 + $0x7c0] sm:$0xff] }
 0xb16   :  { %v8767_v54 = vmax.f32 %v8758_v37, 0.0  ;;  %v15746_v61 = vld [vmem:[%s24160_s11 + $0x7e0] sm:$0xff] }
 0xb17   :  { %v8772_v60 = vpack.c.bf16 %v8766_v15, %v8766_v15  ;;  %v8774_v46 = vpack.c.bf16 %v8768_v53, %v8768_v53  ;;  %v15935_v42 = vcombine.high %v15742_v10, %v15746_v61  ;;  %v15750_v50 = vld [vmem:[%s24160_s11 + $0x800] sm:$0xff]  ;;  %v15934_v38 = vcombine.low %v15742_v10, %v15746_v61 }
 0xb18   :  { %v22010_v21 = vpack.c.bf16 %v8767_v54, %v8767_v54  ;;  %v15754_v20 = vld [vmem:[%s24160_s11 + $0x820] sm:$0xff] }
 0xb19   :  { %v22013_v63 = vsel %vm2299_vm1, %v8772_v60, 0  ;;  %v22028_v23 = vsel %vm2299_vm1, %v8774_v46, 0  ;;  %v15943_v16 = vcombine.high %v15750_v50, %v15754_v20  ;;  %v15758_v1 = vld [vmem:[%s24160_s11 + $0x840] sm:$0xff]  ;;  %v15942_v2 = vcombine.low %v15750_v50, %v15754_v20  ;;  %v15815_v20 = vld [vmem:[%s24160_s11 + $0xa08] sm:$0xff] }
 0xb1a   :  { %15679 = vmatprep.subr.msk.bf16.mxu1 %vm2299_vm1, %v22010_v21  ;;  %v15762_v22 = vld [vmem:[%s24160_s11 + $0x860] sm:$0xff] }
 0xb1b   :  { %8792 = vmatpush1.bf16.msra.mxu1 %v22013_v63  ;;  %v15951_v3 = vcombine.high %v15758_v1, %v15762_v22  ;;  %v15766_v58 = vld [vmem:[%s24160_s11 + $0x880] sm:$0xff]  ;;  %v15950_v25 = vcombine.low %v15758_v1, %v15762_v22 }
 0xb1c   :  { %17088 = vmatprep.subr.bf16.mxu1 %v18719_v29  ;;  %v15770_v40 = vld [vmem:[%s24160_s11 + $0x8a0] sm:$0xff] }
 0xb1d   :  { %v15959_v59 = vcombine.high %v15766_v58, %v15770_v40  ;;  %v15774_v37 = vld [vmem:[%s24160_s11 + $0x8c0] sm:$0xff]  ;;  %v15958_v9 = vcombine.low %v15766_v58, %v15770_v40  ;;  %v15687_v40 = vld [vmem:[%s24160_s11 + $0x608] sm:$0xff] }
 0xb1e   :  { %15680 = vmatmul.mubr.msk.bf16.vlgmr.msra.gmra.mrb[252].mxu1 %vm8776_vm5, %v8775_v7  ;;  %v15778_v15 = vld [vmem:[%s24160_s11 + $0x8e0] sm:$0xff] }
 0xb1f   :  { %17089 = vmatpush3.bf16.msra.mxu1 %v22004_v62  ;;  %17092 = vmatprep.mubr.msk.bf16.mxu1 %vm18720_vm6, %v18719_v29  ;;  %v15967_v54 = vcombine.high %v15774_v37, %v15778_v15  ;;  %v15966_v60 = vcombine.low %v15774_v37, %v15778_v15  ;;  %v15830_v53 = vld [vmem:[%s24160_s11 + $0xa80] sm:$0xff] }
 0xb20   :  { %17090 = vmatprep.subr.bf16.mxu1 %v18719_v29  ;;  %v15782_v5 = vld [vmem:[%s24160_s11 + $0x900] sm:$0xff] }
 0xb21   :  { %v15786_v49 = vld [vmem:[%s24160_s11 + $0x920] sm:$0xff] }
 0xb22   :  { %v15974_v51 = vcombine.low %v15782_v5, %v15786_v49  ;;  %v15838_v31 = vld [vmem:[%s24160_s11 + $0xac0] sm:$0xff] }
 0xb23   :  { %17091 = vmatpush3.bf16.msra.mxu1 %v22028_v23  ;;  %v15846_v12 = vld [vmem:[%s24160_s11 + $0xb00] sm:$0xff] }
 0xb24   :  { %9070 = vmatprep.subr.bf16.mxu1 %v22001_v19  ;;  %v15798_v18 = vld [vmem:[%s24160_s11 + $0x980] sm:$0xff] }
 0xb25   :  { %v15854_v0 = vld [vmem:[%s24160_s11 + $0xb40] sm:$0xff] }
 0xb26   :  { %17093 = vmatmul.mubr.msk.bf16.vlgmr.msra.gmra.mrb[0].mxu1 %vm8776_vm5, %v8775_v7  ;;  %v15834_v7 = vld [vmem:[%s24160_s11 + $0xaa0] sm:$0xff] }
 0xb27   :  { %9071 = vmatpush1.bf16.msra.mxu1 %v21999_v57  ;;  %9102 = vmatprep.mubr.bf16.mxu1 %v24176_v4  ;;  %v16023_v46 = vcombine.high %v15830_v53, %v15834_v7  ;;  %v15806_v48 = vld [vmem:[%s24160_s11 + $0x9c0] sm:$0xff] }
 0xb28   :  { %15683 = vmatprep.subr.msk.bf16.mxu1 %vm2299_vm1, %v22010_v21  ;;  %v15862_v61 = vld [vmem:[%s24160_s11 + $0xb80] sm:$0xff] }
 0xb29   :  { %10352 = vmatprep.subr.bf16.mxu0 %v16023_v46  ;;  %v15870_v22 = vld [vmem:[%s24160_s11 + $0xbc0] sm:$0xff] }
 0xb2b   :  { %9073 = vmatpush1.bf16.msra.mxu1 %v22013_v63 }
 0xb2c   :  { %17096 = vmatprep.subr.bf16.mxu1 %v18719_v29 }
 0xb2e   :  { %15684 = vmatmul.mubr.msk.bf16.vlgmr.msra.gmra.mrb[4].mxu1 %vm8776_vm5, %v15682_v47 }
 0xb2f   :  { %17097 = vmatpush3.bf16.msra.mxu1 %v22004_v62  ;;  %17100 = vmatprep.mubr.msk.bf16.mxu1 %vm18720_vm6, %v18719_v29 }
 0xb30   :  { %17098 = vmatprep.subr.bf16.mxu1 %v18719_v29 }
 0xb33   :  { %17099 = vmatpush3.bf16.msra.mxu1 %v22028_v23 }
 0xb34   :  { %10307 = vmatprep.subr.bf16.mxu1 %v15879_v27  ;;  %v15975_v27 = vcombine.high %v15782_v5, %v15786_v49  ;;  %v15823_v49 = vld [vmem:[%s24160_s11 + $0xa48] sm:$0xff] }
 0xb36   :  { %17101 = vmatmul.mubr.msk.bf16.vlgmr.msra.gmra.mrb[8].mxu1 %vm8776_vm5, %v15682_v47  ;;  %v16022_v47 = vcombine.low %v15830_v53, %v15834_v7 }
 0xb37   :  { %10308 = vmatpush1.bf16.msra.mxu1 %v15878_v8  ;;  %v15842_v8 = vld [vmem:[%s24160_s11 + $0xae0] sm:$0xff] }
 0xb38   :  { %10309 = vmatprep.subr.bf16.mxu1 %v15887_v17  ;;  %10353 = vmatpush1.bf16.msra.mxu0 %v16022_v47  ;;  %v15790_v17 = vld [vmem:[%s24160_s11 + $0x940] sm:$0xff]  ;;  %v16030_v41 = vcombine.low %v15838_v31, %v15842_v8  ;;  %v16031_v24 = vcombine.high %v15838_v31, %v15842_v8 }
 0xb3a   :  { %10354 = vmatprep.subr.bf16.mxu0 %v16031_v24 }
 0xb3b   :  { %10310 = vmatpush1.bf16.msra.mxu1 %v15886_v30  ;;  %v15794_v30 = vld [vmem:[%s24160_s11 + $0x960] sm:$0xff] }
 0xb3c   :  { %10311 = vmatprep.subr.bf16.mxu1 %v15895_v35  ;;  %v15982_v35 = vcombine.low %v15790_v17, %v15794_v30  ;;  %v15983_v36 = vcombine.high %v15790_v17, %v15794_v30  ;;  %10355 = vmatpush1.bf16.msra.mxu0 %v16030_v41  ;;  %v15831_v30 = vld [vmem:[%s24160_s11 + $0xa88] sm:$0xff] }
 0xb3f   :  { %10312 = vmatpush1.bf16.msra.mxu1 %v15894_v14  ;;  %v15850_v14 = vld [vmem:[%s24160_s11 + $0xb20] sm:$0xff] }
 0xb40   :  { %10313 = vmatprep.subr.bf16.mxu1 %v15903_v6  ;;  %v16039_v6 = vcombine.high %v15846_v12, %v15850_v14  ;;  %v16038_v45 = vcombine.low %v15846_v12, %v15850_v14  ;;  %v15695_v12 = vld [vmem:[%s24160_s11 + $0x648] sm:$0xff] }
 0xb41   :  { %v15699_v14 = vld [vmem:[%s24160_s11 + $0x668] sm:$0xff] }
 0xb42   :  { %10356 = vmatprep.subr.bf16.mxu0 %v16039_v6 }
 0xb43   :  { %10314 = vmatpush1.bf16.msra.mxu1 %v15902_v55  ;;  %v15802_v55 = vld [vmem:[%s24160_s11 + $0x9a0] sm:$0xff]  ;;  %10357 = vmatpush1.bf16.msra.mxu0 %v16038_v45 }
 0xb44   :  { %10315 = vmatprep.subr.bf16.mxu1 %v15911_v44  ;;  %v15991_v44 = vcombine.high %v15798_v18, %v15802_v55  ;;  %v15990_v39 = vcombine.low %v15798_v18, %v15802_v55  ;;  %v15839_v18 = vld [vmem:[%s24160_s11 + $0xac8] sm:$0xff] }
 0xb45   :  { %v15843_v55 = vld [vmem:[%s24160_s11 + $0xae8] sm:$0xff] }
 0xb47   :  { %10316 = vmatpush1.bf16.msra.mxu1 %v15910_v52  ;;  %v15858_v52 = vld [vmem:[%s24160_s11 + $0xb60] sm:$0xff] }
 0xb48   :  { %10317 = vmatprep.subr.bf16.mxu1 %v15919_v32  ;;  %v16046_v32 = vcombine.low %v15854_v0, %v15858_v52  ;;  %v16047_v28 = vcombine.high %v15854_v0, %v15858_v52 }
 0xb4a   :  { %10358 = vmatprep.subr.bf16.mxu0 %v16047_v28  ;;  %v15707_v28 = vld [vmem:[%s24160_s11 + $0x6a8] sm:$0xff] }
 0xb4b   :  { %10318 = vmatpush1.bf16.msra.mxu1 %v15918_v11  ;;  %v15810_v11 = vld [vmem:[%s24160_s11 + $0x9e0] sm:$0xff]  ;;  %10359 = vmatpush1.bf16.msra.mxu0 %v16046_v32  ;;  %v15703_v32 = vld [vmem:[%s24160_s11 + $0x688] sm:$0xff] }
 0xb4c   :  { %10319 = vmatprep.subr.bf16.mxu1 %v15927_v43  ;;  %v15999_v43 = vcombine.high %v15806_v48, %v15810_v11  ;;  %v15998_v10 = vcombine.low %v15806_v48, %v15810_v11  ;;  %v16033_v11 = vcombine.high %v15839_v18, %v15843_v55 }
 0xb4f   :  { %10320 = vmatpush1.bf16.msra.mxu1 %v15926_v26  ;;  %v15866_v26 = vld [vmem:[%s24160_s11 + $0xba0] sm:$0xff] }
 0xb50   :  { %10321 = vmatprep.subr.bf16.mxu1 %v15935_v42  ;;  %v16055_v42 = vcombine.high %v15862_v61, %v15866_v26  ;;  %v16054_v50 = vcombine.low %v15862_v61, %v15866_v26  ;;  %v15847_v61 = vld [vmem:[%s24160_s11 + $0xb08] sm:$0xff] }
 0xb51   :  { %v15851_v26 = vld [vmem:[%s24160_s11 + $0xb28] sm:$0xff] }
 0xb52   :  { %10360 = vmatprep.subr.bf16.mxu0 %v16055_v42  ;;  %v15897_v42 = vcombine.high %v15703_v32, %v15707_v28 }
 0xb53   :  { %10322 = vmatpush1.bf16.msra.mxu1 %v15934_v38  ;;  %v15819_v38 = vld [vmem:[%s24160_s11 + $0xa28] sm:$0xff]  ;;  %10361 = vmatpush1.bf16.msra.mxu0 %v16054_v50  ;;  %v16032_v50 = vcombine.low %v15839_v18, %v15843_v55 }
 0xb54   :  { %10323 = vmatprep.subr.bf16.mxu1 %v15943_v16  ;;  %v16009_v16 = vcombine.high %v15815_v20, %v15819_v38  ;;  %v16008_v1 = vcombine.low %v15815_v20, %v15819_v38  ;;  %v15711_v20 = vld [vmem:[%s24160_s11 + $0x6c8] sm:$0xff] }
 0xb55   :  { %v15715_v38 = vld [vmem:[%s24160_s11 + $0x6e8] sm:$0xff] }
 0xb56   :  { %v15743_v55 = vld [vmem:[%s24160_s11 + $0x7c8] sm:$0xff] }
 0xb57   :  { %10324 = vmatpush1.bf16.msra.mxu1 %v15942_v2  ;;  %v15874_v2 = vld [vmem:[%s24160_s11 + $0xbe0] sm:$0xff] }
 0xb58   :  { %10325 = vmatprep.subr.bf16.mxu1 %v15951_v3  ;;  %v16063_v3 = vcombine.high %v15870_v22, %v15874_v2  ;;  %v16062_v58 = vcombine.low %v15870_v22, %v15874_v2  ;;  %v15855_v22 = vld [vmem:[%s24160_s11 + $0xb48] sm:$0xff] }
 0xb59   :  { %v15859_v2 = vld [vmem:[%s24160_s11 + $0xb68] sm:$0xff] }
 0xb5a   :  { %10362 = vmatprep.subr.bf16.mxu0 %v16063_v3  ;;  %v15905_v3 = vcombine.high %v15711_v20, %v15715_v38 }
 0xb5b   :  { %10326 = vmatpush1.bf16.msra.mxu1 %v15950_v25  ;;  %10363 = vmatpush1.bf16.msra.mxu0 %v16062_v58  ;;  %v15691_v25 = vld [vmem:[%s24160_s11 + $0x628] sm:$0xff]  ;;  %v16040_v58 = vcombine.low %v15847_v61, %v15851_v26 }
 0xb5c   :  { %10327 = vmatprep.subr.bf16.mxu1 %v15959_v59  ;;  %v15881_v59 = vcombine.high %v15687_v40, %v15691_v25  ;;  %v15880_v37 = vcombine.low %v15687_v40, %v15691_v25  ;;  %v15719_v40 = vld [vmem:[%s24160_s11 + $0x708] sm:$0xff] }
 0xb5d   :  { %v15723_v25 = vld [vmem:[%s24160_s11 + $0x728] sm:$0xff] }
 0xb5e   :  { %10389 = vmatprep.subr.bf16.mxu0 %v15881_v59  ;;  %v16049_v59 = vcombine.high %v15855_v22, %v15859_v2 }
 0xb5f   :  { %10328 = vmatpush1.bf16.msra.mxu1 %v15958_v9 }
 0xb60   :  { %10329 = vmatprep.subr.bf16.mxu1 %v15967_v54 }
 0xb63   :  { %10330 = vmatpush1.bf16.msra.mxu1 %v15966_v60 }
 0xb64   :  { %10331 = vmatprep.subr.bf16.mxu1 %v15975_v27  ;;  %v15827_v27 = vld [vmem:[%s24160_s11 + $0xa68] sm:$0xff] }
 0xb65   :  { %v16017_v24 = vcombine.high %v15823_v49, %v15827_v27 }
 0xb67   :  { %10332 = vmatpush1.bf16.msra.mxu1 %v15974_v51 }
 0xb68   :  { %10333 = vmatprep.subr.bf16.mxu1 %v15983_v36  ;;  %v16016_v36 = vcombine.low %v15823_v49, %v15827_v27  ;;  %v15912_v27 = vcombine.low %v15719_v40, %v15723_v25 }
 0xb6b   :  { %10334 = vmatpush1.bf16.msra.mxu1 %v15982_v35  ;;  %v15835_v35 = vld [vmem:[%s24160_s11 + $0xaa8] sm:$0xff] }
 0xb6c   :  { %10335 = vmatprep.subr.bf16.mxu1 %v15991_v44  ;;  %v16025_v6 = vcombine.high %v15831_v30, %v15835_v35  ;;  %v16024_v52 = vcombine.low %v15831_v30, %v15835_v35  ;;  %v15735_v30 = vld [vmem:[%s24160_s11 + $0x788] sm:$0xff] }
 0xb6d   :  { %v15739_v35 = vld [vmem:[%s24160_s11 + $0x7a8] sm:$0xff] }
 0xb6f   :  { %10336 = vmatpush1.bf16.msra.mxu1 %v15990_v39  ;;  %v15889_v39 = vcombine.high %v15695_v12, %v15699_v14 }
 0xb70   :  { %10337 = vmatprep.subr.bf16.mxu1 %v15999_v43 }
 0xb73   :  { %10338 = vmatpush1.bf16.msra.mxu1 %v15998_v10  ;;  %v15888_v10 = vcombine.low %v15695_v12, %v15699_v14  ;;  %v15688_v14 = vld [vmem:[%s24160_s11 + $0x610] sm:$0xff] }
 0xb74   :  { %10430 = vmatprep.subr.bf16.mxu1 %v16009_v16  ;;  %v16041_v16 = vcombine.high %v15847_v61, %v15851_v26 }
 0xbf1   :  { %v22193_v15 = vpop.f32.mrb[252].mxu1 }
 0xbf2   :  { %v22195_v9 = vpop.f32.mrb[253].mxu1 }
 0xbf3   :  { %v8827_v54 = vpop.f32.mrb[254].mxu1 }
 0xbf4   :  { %v8828_v60 = vpop.f32.mrb[255].mxu1  ;;  %v15863_v54 = vld [vmem:[%s24160_s11 + $0xb88] sm:$0xff] }
 0xbf5   :  { %v15867_v60 = vld [vmem:[%s24160_s11 + $0xba8] sm:$0xff] }
 0xbf6   :  { %v16057_v49 = vcombine.high %v15863_v54, %v15867_v60 }
 0xbf9   :  { %v22197_v53 = vpop.f32.mrb[0].mxu1 }
 0xbfa   :  { %v17094_v7 = vpop.f32.mrb[1].mxu1 }
 0xbfb   :  { %v8867_v46 = vpop.f32.mrb[2].mxu1  ;;  %v15913_v7 = vcombine.high %v15719_v40, %v15723_v25 }
 0xbfc   :  { %v17095_v47 = vpop.f32.mrb[3].mxu1  ;;  %v16048_v46 = vcombine.low %v15855_v22, %v15859_v2 }
 0xbfd   :  { %v15727_v47 = vld [vmem:[%s24160_s11 + $0x748] sm:$0xff] }
 0xc01   :  { %v9104_v5 = vpop.f32.mrb[4].mxu1 }
 0xc02   :  { %v9106_v51 = vpop.f32.mrb[5].mxu1  ;;  %v22207_v17 = vpack.c.bf16 %v9104_v5, %v9104_v5  ;;  %v15731_v5 = vld [vmem:[%s24160_s11 + $0x768] sm:$0xff] }
 0xc03   :  { %v22205_v31 = vpack.c.bf16 %v9106_v51, %v9106_v51  ;;  %v9108_v8 = vpop.f32.mrb[6].mxu1  ;;  %v15871_v51 = vld [vmem:[%s24160_s11 + $0xbc8] sm:$0xff]  ;;  %v15920_v12 = vcombine.low %v15727_v47, %v15731_v5 }
 0xc04   :  { %v9109_v41 = vpop.f32.mrb[7].mxu1  ;;  %v15875_v8 = vld [vmem:[%s24160_s11 + $0xbe8] sm:$0xff] }
 0xc05   :  { %10339 = vmatprep.mubr.bf16.mxu1 %v22205_v31  ;;  %v15921_v41 = vcombine.high %v15727_v47, %v15731_v5  ;;  %v16064_v18 = vcombine.low %v15871_v51, %v15875_v8 }
 0xc06   :  { %10340 = vmatmul.mubr.bf16.vlgmr.msra.gmra.mrb[12].mxu1 %v22207_v17 }
 0xc07   :  { %10431 = vmatpush1.bf16.msra.mxu1 %v16008_v1  ;;  %10462 = vmatprep.mubr.bf16.mxu1 %v24176_v4  ;;  %v15896_v1 = vcombine.low %v15703_v32, %v15707_v28  ;;  %v15696_v32 = vld [vmem:[%s24160_s11 + $0x650] sm:$0xff] }
 0xc08   :  { %10432 = vmatprep.subr.bf16.mxu1 %v16017_v24  ;;  %v16056_v24 = vcombine.low %v15863_v54, %v15867_v60  ;;  %v15700_v28 = vld [vmem:[%s24160_s11 + $0x670] sm:$0xff] }
 0xc09   :  { %v9145_v45 = vpop.f32.mrb[8].mxu1  ;;  %v15891_v61 = vcombine.high %v15696_v32, %v15700_v28 }
 0xc0a   :  { %v22230_v44 = vpack.c.bf16 %v9145_v45, %v9145_v45  ;;  %v17102_v0 = vpop.f32.mrb[9].mxu1  ;;  %v15929_v45 = vcombine.high %v15735_v30, %v15739_v35 }
 0xc0b   :  { %10433 = vmatpush1.bf16.msra.mxu1 %v16016_v36  ;;  %v9148_v48 = vpop.f32.mrb[10].mxu1  ;;  %v16065_v36 = vcombine.high %v15871_v51, %v15875_v8 }
 0xc0c   :  { %10381 = vmatmul.mubr.bf16.vlgmr.msra.gmra.mrb[216].mxu0 %v22230_v44  ;;  %10434 = vmatprep.subr.bf16.mxu1 %v16025_v6  ;;  %v17103_v43 = vpop.f32.mrb[11].mxu1  ;;  %v15692_v6 = vld [vmem:[%s24160_s11 + $0x630] sm:$0xff] }
 0xc0d   :  { %10390 = vmatpush1.bf16.msra.mxu0 %v15880_v37  ;;  %10421 = vmatprep.mubr.bf16.mxu0 %v22205_v31  ;;  %v15904_v37 = vcombine.low %v15711_v20, %v15715_v38  ;;  %v15883_v0 = vcombine.high %v15688_v14, %v15692_v6  ;;  %v15751_v43 = vld [vmem:[%s24160_s11 + $0x808] sm:$0xff]  ;;  %v15890_v38 = vcombine.low %v15696_v32, %v15700_v28 }
 0xc0e   :  { %10391 = vmatprep.subr.bf16.mxu0 %v15889_v39  ;;  %v15747_v39 = vld [vmem:[%s24160_s11 + $0x7e8] sm:$0xff] }
 0xc0f   :  { %10435 = vmatpush1.bf16.msra.mxu1 %v16024_v52  ;;  %v15928_v52 = vcombine.low %v15735_v30, %v15739_v35  ;;  %v15937_v48 = vcombine.high %v15743_v55, %v15747_v39  ;;  %v15936_v26 = vcombine.low %v15743_v55, %v15747_v39 }
 0xc10   :  { %10436 = vmatprep.subr.bf16.mxu1 %v16033_v11  ;;  %v15882_v11 = vcombine.low %v15688_v14, %v15692_v6 }
 0xc11   :  { %10392 = vmatpush1.bf16.msra.mxu0 %v15888_v10  ;;  %v15755_v10 = vld [vmem:[%s24160_s11 + $0x828] sm:$0xff] }
 0xc12   :  { %10393 = vmatprep.subr.bf16.mxu0 %v15897_v42  ;;  %v15704_v42 = vld [vmem:[%s24160_s11 + $0x690] sm:$0xff]  ;;  %v15945_v20 = vcombine.high %v15751_v43, %v15755_v10  ;;  %v15944_v2 = vcombine.low %v15751_v43, %v15755_v10 }
 0xc13   :  { %10437 = vmatpush1.bf16.msra.mxu1 %v16032_v50  ;;  %v15708_v50 = vld [vmem:[%s24160_s11 + $0x6b0] sm:$0xff] }
 0xc14   :  { %10438 = vmatprep.subr.bf16.mxu1 %v16041_v16  ;;  %v15759_v16 = vld [vmem:[%s24160_s11 + $0x848] sm:$0xff]  ;;  %v15899_v22 = vcombine.high %v15704_v42, %v15708_v50  ;;  %v15898_v25 = vcombine.low %v15704_v42, %v15708_v50 }
 0xc15   :  { %10394 = vmatpush1.bf16.msra.mxu0 %v15896_v1  ;;  %v15763_v1 = vld [vmem:[%s24160_s11 + $0x868] sm:$0xff] }
 0xc16   :  { %10395 = vmatprep.subr.bf16.mxu0 %v15905_v3  ;;  %v15712_v3 = vld [vmem:[%s24160_s11 + $0x6d0] sm:$0xff]  ;;  %v15953_v40 = vcombine.high %v15759_v16, %v15763_v1  ;;  %v15952_v60 = vcombine.low %v15759_v16, %v15763_v1 }
 0xc17   :  { %10439 = vmatpush1.bf16.msra.mxu1 %v16040_v58  ;;  %v15716_v58 = vld [vmem:[%s24160_s11 + $0x6f0] sm:$0xff] }
 0xc18   :  { %10440 = vmatprep.subr.bf16.mxu1 %v16049_v59  ;;  %v15767_v59 = vld [vmem:[%s24160_s11 + $0x888] sm:$0xff]  ;;  %v15907_v54 = vcombine.high %v15712_v3, %v15716_v58  ;;  %v15906_v5 = vcombine.low %v15712_v3, %v15716_v58 }
 0xc19   :  { %10396 = vmatpush1.bf16.msra.mxu0 %v15904_v37  ;;  %v15771_v37 = vld [vmem:[%s24160_s11 + $0x8a8] sm:$0xff] }
 0xc1a   :  { %10397 = vmatprep.subr.bf16.mxu0 %v15913_v7  ;;  %v15720_v7 = vld [vmem:[%s24160_s11 + $0x710] sm:$0xff]  ;;  %v15961_v47 = vcombine.high %v15767_v59, %v15771_v37  ;;  %v15960_v8 = vcombine.low %v15767_v59, %v15771_v37 }
 0xc1b   :  { %10441 = vmatpush1.bf16.msra.mxu1 %v16048_v46  ;;  %v15724_v46 = vld [vmem:[%s24160_s11 + $0x730] sm:$0xff] }
 0xc1c   :  { %10442 = vmatprep.subr.bf16.mxu1 %v16057_v49  ;;  %v15775_v49 = vld [vmem:[%s24160_s11 + $0x8c8] sm:$0xff]  ;;  %v15915_v51 = vcombine.high %v15720_v7, %v15724_v46  ;;  %v15914_v35 = vcombine.low %v15720_v7, %v15724_v46 }
 0xc1d   :  { %10398 = vmatpush1.bf16.msra.mxu0 %v15912_v27  ;;  %v15779_v27 = vld [vmem:[%s24160_s11 + $0x8e8] sm:$0xff] }
 0xc1e   :  { %10399 = vmatprep.subr.bf16.mxu0 %v15921_v41  ;;  %v15728_v41 = vld [vmem:[%s24160_s11 + $0x750] sm:$0xff]  ;;  %v15969_v30 = vcombine.high %v15775_v49, %v15779_v27  ;;  %v15968_v6 = vcombine.low %v15775_v49, %v15779_v27 }
 0xc1f   :  { %10443 = vmatpush1.bf16.msra.mxu1 %v16056_v24  ;;  %v15732_v24 = vld [vmem:[%s24160_s11 + $0x770] sm:$0xff] }
 0xc20   :  { %10444 = vmatprep.subr.bf16.mxu1 %v16065_v36  ;;  %v15783_v36 = vld [vmem:[%s24160_s11 + $0x908] sm:$0xff]  ;;  %v15923_v14 = vcombine.high %v15728_v41, %v15732_v24  ;;  %v15922_v39 = vcombine.low %v15728_v41, %v15732_v24 }
 0xc21   :  { %10400 = vmatpush1.bf16.msra.mxu0 %v15920_v12  ;;  %v15787_v12 = vld [vmem:[%s24160_s11 + $0x928] sm:$0xff] }
 0xc22   :  { %10401 = vmatprep.subr.bf16.mxu0 %v15929_v45  ;;  %v15736_v45 = vld [vmem:[%s24160_s11 + $0x790] sm:$0xff]  ;;  %v15977_v55 = vcombine.high %v15783_v36, %v15787_v12  ;;  %v15976_v28 = vcombine.low %v15783_v36, %v15787_v12 }
 0xc23   :  { %10445 = vmatpush1.bf16.msra.mxu1 %v16064_v18  ;;  %v15740_v18 = vld [vmem:[%s24160_s11 + $0x7b0] sm:$0xff] }
 0xc24   :  { %10471 = vmatprep.subr.bf16.mxu1 %v15883_v0  ;;  %v15791_v0 = vld [vmem:[%s24160_s11 + $0x948] sm:$0xff]  ;;  %v15931_v32 = vcombine.high %v15736_v45, %v15740_v18  ;;  %v15930_v10 = vcombine.low %v15736_v45, %v15740_v18 }
 0xc25   :  { %10402 = vmatpush1.bf16.msra.mxu0 %v15928_v52  ;;  %v15795_v52 = vld [vmem:[%s24160_s11 + $0x968] sm:$0xff] }
 0xc26   :  { %10463 = vmatmul.mubr.bf16.vlgmr.msra.gmra.mrb[16].mxu1 %v22230_v44  ;;  %10403 = vmatprep.subr.bf16.mxu0 %v15937_v48  ;;  %v15744_v48 = vld [vmem:[%s24160_s11 + $0x7d0] sm:$0xff]  ;;  %v15985_v43 = vcombine.high %v15791_v0, %v15795_v52  ;;  %v15984_v50 = vcombine.low %v15791_v0, %v15795_v52 }
 0xc27   :  { %10472 = vmatpush1.bf16.msra.mxu1 %v15882_v11  ;;  %10503 = vmatprep.mubr.bf16.mxu1 %v22205_v31  ;;  %v15748_v11 = vld [vmem:[%s24160_s11 + $0x7f0] sm:$0xff] }
 0xc28   :  { %10473 = vmatprep.subr.bf16.mxu1 %v15891_v61  ;;  %v15799_v61 = vld [vmem:[%s24160_s11 + $0x988] sm:$0xff]  ;;  %v15939_v42 = vcombine.high %v15744_v48, %v15748_v11  ;;  %v15938_v1 = vcombine.low %v15744_v48, %v15748_v11 }
 0xc29   :  { %10404 = vmatpush1.bf16.msra.mxu0 %v15936_v26  ;;  %v15803_v26 = vld [vmem:[%s24160_s11 + $0x9a8] sm:$0xff] }
 0xc2a   :  { %10405 = vmatprep.subr.bf16.mxu0 %v15945_v20  ;;  %v15752_v20 = vld [vmem:[%s24160_s11 + $0x810] sm:$0xff]  ;;  %v15993_v16 = vcombine.high %v15799_v61, %v15803_v26  ;;  %v15992_v58 = vcombine.low %v15799_v61, %v15803_v26 }
 0xc2b   :  { %10474 = vmatpush1.bf16.msra.mxu1 %v15890_v38  ;;  %v15756_v38 = vld [vmem:[%s24160_s11 + $0x830] sm:$0xff] }
 0xc2c   :  { %10475 = vmatprep.subr.bf16.mxu1 %v15899_v22  ;;  %v15807_v22 = vld [vmem:[%s24160_s11 + $0x9c8] sm:$0xff]  ;;  %v15947_v3 = vcombine.high %v15752_v20, %v15756_v38  ;;  %v15946_v37 = vcombine.low %v15752_v20, %v15756_v38 }
 0xc2d   :  { %10406 = vmatpush1.bf16.msra.mxu0 %v15944_v2  ;;  %v15811_v2 = vld [vmem:[%s24160_s11 + $0x9e8] sm:$0xff] }
 0xc2e   :  { %10407 = vmatprep.subr.bf16.mxu0 %v15953_v40  ;;  %v15760_v40 = vld [vmem:[%s24160_s11 + $0x850] sm:$0xff]  ;;  %v16001_v59 = vcombine.high %v15807_v22, %v15811_v2  ;;  %v16000_v46 = vcombine.low %v15807_v22, %v15811_v2 }
 0xc2f   :  { %10476 = vmatpush1.bf16.msra.mxu1 %v15898_v25  ;;  %v15764_v25 = vld [vmem:[%s24160_s11 + $0x870] sm:$0xff] }
 0xc30   :  { %10477 = vmatprep.subr.bf16.mxu1 %v15907_v54  ;;  %v15816_v54 = vld [vmem:[%s24160_s11 + $0xa10] sm:$0xff]  ;;  %v15955_v7 = vcombine.high %v15760_v40, %v15764_v25  ;;  %v15954_v27 = vcombine.low %v15760_v40, %v15764_v25 }
 0xc31   :  { %10408 = vmatpush1.bf16.msra.mxu0 %v15952_v60  ;;  %v15820_v60 = vld [vmem:[%s24160_s11 + $0xa30] sm:$0xff] }
 0xc32   :  { %10409 = vmatprep.subr.bf16.mxu0 %v15961_v47  ;;  %v15768_v47 = vld [vmem:[%s24160_s11 + $0x890] sm:$0xff]  ;;  %v16011_v49 = vcombine.high %v15816_v54, %v15820_v60  ;;  %v16010_v24 = vcombine.low %v15816_v54, %v15820_v60 }
 0xc33   :  { %10478 = vmatpush1.bf16.msra.mxu1 %v15906_v5  ;;  %v15772_v5 = vld [vmem:[%s24160_s11 + $0x8b0] sm:$0xff] }
 0xc34   :  { %10479 = vmatprep.subr.bf16.mxu1 %v15915_v51  ;;  %v15824_v51 = vld [vmem:[%s24160_s11 + $0xa50] sm:$0xff]  ;;  %v15963_v41 = vcombine.high %v15768_v47, %v15772_v5  ;;  %v15962_v12 = vcombine.low %v15768_v47, %v15772_v5 }
 0xc35   :  { %10410 = vmatpush1.bf16.msra.mxu0 %v15960_v8  ;;  %v15828_v8 = vld [vmem:[%s24160_s11 + $0xa70] sm:$0xff] }
 0xc36   :  { %10411 = vmatprep.subr.bf16.mxu0 %v15969_v30  ;;  %v15776_v30 = vld [vmem:[%s24160_s11 + $0x8d0] sm:$0xff]  ;;  %v16019_v36 = vcombine.high %v15824_v51, %v15828_v8  ;;  %v16018_v18 = vcombine.low %v15824_v51, %v15828_v8 }
 0xc37   :  { %10480 = vmatpush1.bf16.msra.mxu1 %v15914_v35  ;;  %v15780_v35 = vld [vmem:[%s24160_s11 + $0x8f0] sm:$0xff] }
 0xc38   :  { %10481 = vmatprep.subr.bf16.mxu1 %v15923_v14  ;;  %v15832_v14 = vld [vmem:[%s24160_s11 + $0xa90] sm:$0xff]  ;;  %v15971_v45 = vcombine.high %v15776_v30, %v15780_v35  ;;  %v15970_v52 = vcombine.low %v15776_v30, %v15780_v35 }
 0xc39   :  { %10412 = vmatpush1.bf16.msra.mxu0 %v15968_v6  ;;  %v15836_v6 = vld [vmem:[%s24160_s11 + $0xab0] sm:$0xff] }
 0xc3a   :  { %10413 = vmatprep.subr.bf16.mxu0 %v15977_v55  ;;  %v15784_v55 = vld [vmem:[%s24160_s11 + $0x910] sm:$0xff]  ;;  %v16027_v0 = vcombine.high %v15832_v14, %v15836_v6  ;;  %v16026_v11 = vcombine.low %v15832_v14, %v15836_v6 }
 0xc3b   :  { %10482 = vmatpush1.bf16.msra.mxu1 %v15922_v39  ;;  %v15788_v39 = vld [vmem:[%s24160_s11 + $0x930] sm:$0xff] }
 0xc3c   :  { %10483 = vmatprep.subr.bf16.mxu1 %v15931_v32  ;;  %v15840_v32 = vld [vmem:[%s24160_s11 + $0xad0] sm:$0xff]  ;;  %v15979_v48 = vcombine.high %v15784_v55, %v15788_v39  ;;  %v15978_v26 = vcombine.low %v15784_v55, %v15788_v39 }
 0xc3d   :  { %10414 = vmatpush1.bf16.msra.mxu0 %v15976_v28  ;;  %v15844_v28 = vld [vmem:[%s24160_s11 + $0xaf0] sm:$0xff] }
 0xc3e   :  { %10415 = vmatprep.subr.bf16.mxu0 %v15985_v43  ;;  %v15792_v43 = vld [vmem:[%s24160_s11 + $0x950] sm:$0xff]  ;;  %v16035_v61 = vcombine.high %v15840_v32, %v15844_v28  ;;  %v16034_v38 = vcombine.low %v15840_v32, %v15844_v28 }
 0xc3f   :  { %10484 = vmatpush1.bf16.msra.mxu1 %v15930_v10  ;;  %v15796_v10 = vld [vmem:[%s24160_s11 + $0x970] sm:$0xff] }
 0xc40   :  { %10485 = vmatprep.subr.bf16.mxu1 %v15939_v42  ;;  %v15848_v42 = vld [vmem:[%s24160_s11 + $0xb10] sm:$0xff]  ;;  %v15987_v20 = vcombine.high %v15792_v43, %v15796_v10  ;;  %v15986_v2 = vcombine.low %v15792_v43, %v15796_v10 }
 0xc41   :  { %10416 = vmatpush1.bf16.msra.mxu0 %v15984_v50  ;;  %v15852_v50 = vld [vmem:[%s24160_s11 + $0xb30] sm:$0xff] }
 0xc42   :  { %10417 = vmatprep.subr.bf16.mxu0 %v15993_v16  ;;  %v15800_v16 = vld [vmem:[%s24160_s11 + $0x990] sm:$0xff]  ;;  %v16043_v22 = vcombine.high %v15848_v42, %v15852_v50  ;;  %v16042_v25 = vcombine.low %v15848_v42, %v15852_v50 }
 0xc43   :  { %10486 = vmatpush1.bf16.msra.mxu1 %v15938_v1  ;;  %v15804_v1 = vld [vmem:[%s24160_s11 + $0x9b0] sm:$0xff] }
 0xc44   :  { %10487 = vmatprep.subr.bf16.mxu1 %v15947_v3  ;;  %v15856_v3 = vld [vmem:[%s24160_s11 + $0xb50] sm:$0xff]  ;;  %v15995_v40 = vcombine.high %v15800_v16, %v15804_v1  ;;  %v15994_v60 = vcombine.low %v15800_v16, %v15804_v1 }
 0xc45   :  { %10418 = vmatpush1.bf16.msra.mxu0 %v15992_v58  ;;  %v15860_v58 = vld [vmem:[%s24160_s11 + $0xb70] sm:$0xff] }
 0xc46   :  { %10419 = vmatprep.subr.bf16.mxu0 %v16001_v59  ;;  %v15808_v59 = vld [vmem:[%s24160_s11 + $0x9d0] sm:$0xff]  ;;  %v16051_v54 = vcombine.high %v15856_v3, %v15860_v58  ;;  %v16050_v5 = vcombine.low %v15856_v3, %v15860_v58 }
 0xc47   :  { %10488 = vmatpush1.bf16.msra.mxu1 %v15946_v37  ;;  %v15812_v37 = vld [vmem:[%s24160_s11 + $0x9f0] sm:$0xff] }
 0xc48   :  { %10489 = vmatprep.subr.bf16.mxu1 %v15955_v7  ;;  %v15864_v7 = vld [vmem:[%s24160_s11 + $0xb90] sm:$0xff]  ;;  %v16003_v47 = vcombine.high %v15808_v59, %v15812_v37  ;;  %v16002_v8 = vcombine.low %v15808_v59, %v15812_v37  ;;  %v15857_v37 = vld [vmem:[%s24160_s11 + $0xb58] sm:$0xff] }
 0xc49   :  { %10420 = vmatpush1.bf16.msra.mxu0 %v16000_v46  ;;  %v15868_v46 = vld [vmem:[%s24160_s11 + $0xbb0] sm:$0xff] }
 0xc4a   :  { %10512 = vmatprep.subr.bf16.mxu0 %v16011_v49  ;;  %v15817_v49 = vld [vmem:[%s24160_s11 + $0xa18] sm:$0xff]  ;;  %v16059_v51 = vcombine.high %v15864_v7, %v15868_v46  ;;  %v16058_v35 = vcombine.low %v15864_v7, %v15868_v46 }
 0xc4b   :  { %10490 = vmatpush1.bf16.msra.mxu1 %v15954_v27  ;;  %v15821_v27 = vld [vmem:[%s24160_s11 + $0xa38] sm:$0xff] }
 0xc4c   :  { %10422 = vmatmul.mubr.bf16.vlgmr.msra.gmra.mrb[220].mxu0 %v22207_v17  ;;  %10491 = vmatprep.subr.bf16.mxu1 %v15963_v41  ;;  %v15872_v41 = vld [vmem:[%s24160_s11 + $0xbd0] sm:$0xff]  ;;  %v16013_v30 = vcombine.high %v15817_v49, %v15821_v27  ;;  %v16012_v6 = vcombine.low %v15817_v49, %v15821_v27  ;;  %v15721_v46 = vld [vmem:[%s24160_s11 + $0x718] sm:$0xff] }
 0xc4d   :  { %10513 = vmatpush1.bf16.msra.mxu0 %v16010_v24  ;;  %10544 = vmatprep.mubr.bf16.mxu0 %v24176_v4  ;;  %v15876_v24 = vld [vmem:[%s24160_s11 + $0xbf0] sm:$0xff]  ;;  %v15865_v27 = vld [vmem:[%s24160_s11 + $0xb98] sm:$0xff] }
 0xc4e   :  { %10514 = vmatprep.subr.bf16.mxu0 %v16019_v36  ;;  %v15825_v36 = vld [vmem:[%s24160_s11 + $0xa58] sm:$0xff]  ;;  %v16067_v14 = vcombine.high %v15872_v41, %v15876_v24  ;;  %v16066_v39 = vcombine.low %v15872_v41, %v15876_v24 }
 0xc4f   :  { %10492 = vmatpush1.bf16.msra.mxu1 %v15962_v12  ;;  %v15829_v12 = vld [vmem:[%s24160_s11 + $0xa78] sm:$0xff] }
 0xc50   :  { %10493 = vmatprep.subr.bf16.mxu1 %v15971_v45  ;;  %v15689_v45 = vld [vmem:[%s24160_s11 + $0x618] sm:$0xff]  ;;  %v16021_v55 = vcombine.high %v15825_v36, %v15829_v12  ;;  %v16020_v28 = vcombine.low %v15825_v36, %v15829_v12 }
 0xc51   :  { %10515 = vmatpush1.bf16.msra.mxu0 %v16018_v18  ;;  %v15693_v18 = vld [vmem:[%s24160_s11 + $0x638] sm:$0xff] }
 0xc52   :  { %10516 = vmatprep.subr.bf16.mxu0 %v16027_v0  ;;  %v15833_v0 = vld [vmem:[%s24160_s11 + $0xa98] sm:$0xff]  ;;  %v15885_v32 = vcombine.high %v15689_v45, %v15693_v18  ;;  %v15884_v10 = vcombine.low %v15689_v45, %v15693_v18 }
 0xc53   :  { %10494 = vmatpush1.bf16.msra.mxu1 %v15970_v52  ;;  %v15837_v52 = vld [vmem:[%s24160_s11 + $0xab8] sm:$0xff] }
 0xc54   :  { %10495 = vmatprep.subr.bf16.mxu1 %v15979_v48  ;;  %v15697_v48 = vld [vmem:[%s24160_s11 + $0x658] sm:$0xff]  ;;  %v16029_v43 = vcombine.high %v15833_v0, %v15837_v52  ;;  %v16028_v50 = vcombine.low %v15833_v0, %v15837_v52  ;;  %v8873_v52 = vld [vmem:[%s24160_s11] sm:$0xff] }
 0xc55   :  { %10517 = vmatpush1.bf16.msra.mxu0 %v16026_v11  ;;  %v15701_v11 = vld [vmem:[%s24160_s11 + $0x678] sm:$0xff] }
 0xc56   :  { %10518 = vmatprep.subr.bf16.mxu0 %v16035_v61  ;;  %v15841_v61 = vld [vmem:[%s24160_s11 + $0xad8] sm:$0xff]  ;;  %v15893_v42 = vcombine.high %v15697_v48, %v15701_v11  ;;  %v15892_v1 = vcombine.low %v15697_v48, %v15701_v11 }
 0xc57   :  { %10496 = vmatpush1.bf16.msra.mxu1 %v15978_v26  ;;  %v15845_v26 = vld [vmem:[%s24160_s11 + $0xaf8] sm:$0xff] }
 0xc58   :  { %10497 = vmatprep.subr.bf16.mxu1 %v15987_v20  ;;  %v15705_v20 = vld [vmem:[%s24160_s11 + $0x698] sm:$0xff]  ;;  %v16037_v16 = vcombine.high %v15841_v61, %v15845_v26  ;;  %v16036_v58 = vcombine.low %v15841_v61, %v15845_v26  ;;  %v8881_v26 = vld [vmem:[%s24160_s11 + $0x40] sm:$0xff] }
 0xc59   :  { %10519 = vmatpush1.bf16.msra.mxu0 %v16034_v38  ;;  %v15709_v38 = vld [vmem:[%s24160_s11 + $0x6b8] sm:$0xff] }
 0xc5a   :  { %10520 = vmatprep.subr.bf16.mxu0 %v16043_v22  ;;  %v15849_v22 = vld [vmem:[%s24160_s11 + $0xb18] sm:$0xff]  ;;  %v15901_v3 = vcombine.high %v15705_v20, %v15709_v38  ;;  %v15900_v59 = vcombine.low %v15705_v20, %v15709_v38 }
 0xc5b   :  { %10498 = vmatpush1.bf16.msra.mxu1 %v15986_v2  ;;  %v15853_v2 = vld [vmem:[%s24160_s11 + $0xb38] sm:$0xff] }
 0xc5c   :  { %10499 = vmatprep.subr.bf16.mxu1 %v15995_v40  ;;  %v15713_v40 = vld [vmem:[%s24160_s11 + $0x6d8] sm:$0xff]  ;;  %v16044_v7 = vcombine.low %v15849_v22, %v15853_v2 }
 0xc5d   :  { %10521 = vmatpush1.bf16.msra.mxu0 %v16042_v25  ;;  %v16045_v25 = vcombine.high %v15849_v22, %v15853_v2  ;;  %v15729_v24 = vld [vmem:[%s24160_s11 + $0x758] sm:$0xff]  ;;  %v22610_v22 = vpack.c.bf16 %v22195_v9, %v22195_v9 }
 0xc5e   :  { %10522 = vmatprep.subr.bf16.mxu0 %v16051_v54  ;;  %v15861_v54 = vld [vmem:[%s24160_s11 + $0xb78] sm:$0xff] }
 0xc5f   :  { %10500 = vmatpush1.bf16.msra.mxu1 %v15994_v60  ;;  %v16052_v41 = vcombine.low %v15857_v37, %v15861_v54  ;;  %v15873_v12 = vld [vmem:[%s24160_s11 + $0xbd8] sm:$0xff] }
 0xc60   :  { %10501 = vmatprep.subr.bf16.mxu1 %v16003_v47  ;;  %v15725_v47 = vld [vmem:[%s24160_s11 + $0x738] sm:$0xff] }
 0xc61   :  { %10523 = vmatpush1.bf16.msra.mxu0 %v16050_v5  ;;  %v16053_v5 = vcombine.high %v15857_v37, %v15861_v54  ;;  %v15916_v36 = vcombine.low %v15721_v46, %v15725_v47  ;;  %v15737_v18 = vld [vmem:[%s24160_s11 + $0x798] sm:$0xff]  ;;  %v8901_v54 = vld [vmem:[%s24160_s11 + $0xe0] sm:$0xff] }
 0xc62   :  { %10524 = vmatprep.subr.bf16.mxu0 %v16059_v51  ;;  %v15869_v51 = vld [vmem:[%s24160_s11 + $0xbb8] sm:$0xff] }
 0xc63   :  { %10502 = vmatpush1.bf16.msra.mxu1 %v16002_v8  ;;  %v15917_v8 = vcombine.high %v15721_v46, %v15725_v47  ;;  %v16060_v45 = vcombine.low %v15865_v27, %v15869_v51  ;;  %v15745_v11 = vld [vmem:[%s24160_s11 + $0x7d8] sm:$0xff] }
 0xc64   :  { %10594 = vmatprep.subr.bf16.mxu1 %v16013_v30  ;;  %v15733_v30 = vld [vmem:[%s24160_s11 + $0x778] sm:$0xff] }
 0xc65   :  { %10525 = vmatpush1.bf16.msra.mxu0 %v16058_v35  ;;  %v16061_v35 = vcombine.high %v15865_v27, %v15869_v51  ;;  %v15924_v0 = vcombine.low %v15729_v24, %v15733_v30  ;;  %v15753_v38 = vld [vmem:[%s24160_s11 + $0x818] sm:$0xff]  ;;  %v8905_v27 = vld [vmem:[%s24160_s11 + $0x100] sm:$0xff] }
 0xc66   :  { %10504 = vmatmul.mubr.bf16.vlgmr.msra.gmra.mrb[20].mxu1 %v22207_v17  ;;  %10526 = vmatprep.subr.bf16.mxu0 %v16067_v14  ;;  %v15877_v14 = vld [vmem:[%s24160_s11 + $0xbf8] sm:$0xff]  ;;  %v8909_v51 = vld [vmem:[%s24160_s11 + $0x120] sm:$0xff] }
 0xc67   :  { %10595 = vmatpush1.bf16.msra.mxu1 %v16012_v6  ;;  %10626 = vmatprep.mubr.bf16.mxu1 %v24176_v4  ;;  %v15925_v6 = vcombine.high %v15729_v24, %v15733_v30  ;;  %v16068_v48 = vcombine.low %v15873_v12, %v15877_v14  ;;  %v15761_v9 = vld [vmem:[%s24160_s11 + $0x858] sm:$0xff] }
 0xc68   :  { %10596 = vmatprep.subr.bf16.mxu1 %v16021_v55  ;;  %v15741_v55 = vld [vmem:[%s24160_s11 + $0x7b8] sm:$0xff] }
 0xc69   :  { %10527 = vmatpush1.bf16.msra.mxu0 %v16066_v39  ;;  %v16069_v39 = vcombine.high %v15873_v12, %v15877_v14  ;;  %v15932_v61 = vcombine.low %v15737_v18, %v15741_v55  ;;  %v15769_v46 = vld [vmem:[%s24160_s11 + $0x898] sm:$0xff]  ;;  %v8913_v12 = vld [vmem:[%s24160_s11 + $0x140] sm:$0xff] }
 0xc6a   :  { %10553 = vmatprep.subr.bf16.mxu0 %v15885_v32  ;;  %v8877_v32 = vld [vmem:[%s24160_s11 + $0x20] sm:$0xff]  ;;  %v15773_v47 = vld [vmem:[%s24160_s11 + $0x8b8] sm:$0xff] }
 0xc6b   :  { %10597 = vmatpush1.bf16.msra.mxu1 %v16020_v28  ;;  %v15933_v28 = vcombine.high %v15737_v18, %v15741_v55  ;;  %v16070_v20 = vcombine.low %v8873_v52, %v8877_v32  ;;  %v15777_v24 = vld [vmem:[%s24160_s11 + $0x8d8] sm:$0xff]  ;;  %v8917_v14 = vld [vmem:[%s24160_s11 + $0x160] sm:$0xff] }
 0xc6c   :  { %10545 = vmatmul.mubr.bf16.vlgmr.msra.gmra.mrb[224].mxu0 %v22230_v44  ;;  %10598 = vmatprep.subr.bf16.mxu1 %v16029_v43  ;;  %v15749_v43 = vld [vmem:[%s24160_s11 + $0x7f8] sm:$0xff] }
 0xc6d   :  { %10554 = vmatpush1.bf16.msra.mxu0 %v15884_v10  ;;  %10585 = vmatprep.mubr.bf16.mxu0 %v22205_v31  ;;  %v15717_v31 = vld [vmem:[%s24160_s11 + $0x6f8] sm:$0xff]  ;;  %v16071_v10 = vcombine.high %v8873_v52, %v8877_v32  ;;  %v15940_v2 = vcombine.low %v15745_v11, %v15749_v43  ;;  %v8921_v52 = vld [vmem:[%s24160_s11 + $0x180] sm:$0xff] }
 0xc6e   :  { %10555 = vmatprep.subr.bf16.mxu0 %v15893_v42  ;;  %v15909_v60 = vcombine.high %v15713_v40, %v15717_v31  ;;  %v15908_v49 = vcombine.low %v15713_v40, %v15717_v31  ;;  %v8885_v42 = vld [vmem:[%s24160_s11 + $0x60] sm:$0xff]  ;;  %v15781_v30 = vld [vmem:[%s24160_s11 + $0x8f8] sm:$0xff] }
 0xc6f   :  { %10599 = vmatpush1.bf16.msra.mxu1 %v16028_v50  ;;  %v15941_v50 = vcombine.high %v15745_v11, %v15749_v43  ;;  %v16078_v31 = vcombine.low %v8881_v26, %v8885_v42  ;;  %v15785_v18 = vld [vmem:[%s24160_s11 + $0x918] sm:$0xff]  ;;  %v8925_v32 = vld [vmem:[%s24160_s11 + $0x1a0] sm:$0xff] }
 0xc70   :  { %10600 = vmatprep.subr.bf16.mxu1 %v16037_v16  ;;  %v15757_v16 = vld [vmem:[%s24160_s11 + $0x838] sm:$0xff] }
 0xc71   :  { %10556 = vmatpush1.bf16.msra.mxu0 %v15892_v1  ;;  %v16079_v1 = vcombine.high %v8881_v26, %v8885_v42  ;;  %v15949_v40 = vcombine.high %v15753_v38, %v15757_v16  ;;  %v15948_v37 = vcombine.low %v15753_v38, %v15757_v16  ;;  %v15789_v55 = vld [vmem:[%s24160_s11 + $0x938] sm:$0xff]  ;;  %v8929_v26 = vld [vmem:[%s24160_s11 + $0x1c0] sm:$0xff] }
 0xc72   :  { %10557 = vmatprep.subr.bf16.mxu0 %v15901_v3  ;;  %v8889_v3 = vld [vmem:[%s24160_s11 + $0x80] sm:$0xff]  ;;  %v15793_v11 = vld [vmem:[%s24160_s11 + $0x958] sm:$0xff] }
 0xc73   :  { %10601 = vmatpush1.bf16.msra.mxu1 %v16036_v58  ;;  %v8893_v58 = vld [vmem:[%s24160_s11 + $0xa0] sm:$0xff]  ;;  %v15797_v43 = vld [vmem:[%s24160_s11 + $0x978] sm:$0xff] }
 0xc74   :  { %10602 = vmatprep.subr.bf16.mxu1 %v16045_v25  ;;  %v15765_v25 = vld [vmem:[%s24160_s11 + $0x878] sm:$0xff]  ;;  %v8933_v42 = vld [vmem:[%s24160_s11 + $0x1e0] sm:$0xff] }
 0xc75   :  { %10558 = vmatpush1.bf16.msra.mxu0 %v15900_v59  ;;  %v16087_v59 = vcombine.high %v8889_v3, %v8893_v58  ;;  %v15801_v38 = vld [vmem:[%s24160_s11 + $0x998] sm:$0xff] }
 0xc76   :  { %10559 = vmatprep.subr.bf16.mxu0 %v15909_v60  ;;  %v15957_v60 = vcombine.high %v15761_v9, %v15765_v25  ;;  %v15805_v16 = vld [vmem:[%s24160_s11 + $0x9b8] sm:$0xff] }
 0xc77   :  { %10603 = vmatpush1.bf16.msra.mxu1 %v16044_v7  ;;  %v16086_v7 = vcombine.low %v8889_v3, %v8893_v58  ;;  %v8937_v3 = vld [vmem:[%s24160_s11 + $0x200] sm:$0xff] }
 0xc78   :  { %10604 = vmatprep.subr.bf16.mxu1 %v16053_v5  ;;  %v8941_v58 = vld [vmem:[%s24160_s11 + $0x220] sm:$0xff] }
 0xc79   :  { %10560 = vmatpush1.bf16.msra.mxu0 %v15908_v49  ;;  %v15956_v49 = vcombine.low %v15761_v9, %v15765_v25  ;;  %v15809_v9 = vld [vmem:[%s24160_s11 + $0x9d8] sm:$0xff] }
 0xc7a   :  { %10561 = vmatprep.subr.bf16.mxu0 %v15917_v8  ;;  %v15965_v8 = vcombine.high %v15769_v46, %v15773_v47  ;;  %v15813_v25 = vld [vmem:[%s24160_s11 + $0x9f8] sm:$0xff] }
 0xc7b   :  { %10605 = vmatpush1.bf16.msra.mxu1 %v16052_v41 }
 0xc7c   :  { %10606 = vmatprep.subr.bf16.mxu1 %v16061_v35  ;;  %v16103_v35 = vcombine.high %v8905_v27, %v8909_v51 }
 0xc7d   :  { %10562 = vmatpush1.bf16.msra.mxu0 %v15916_v36  ;;  %v15964_v36 = vcombine.low %v15769_v46, %v15773_v47  ;;  %v9001_v46 = vld [vmem:[%s24160_s11 + $0x400] sm:$0xff] }
 0xc7e   :  { %10563 = vmatprep.subr.bf16.mxu0 %v15925_v6  ;;  %v15973_v6 = vcombine.high %v15777_v24, %v15781_v30  ;;  %v9005_v47 = vld [vmem:[%s24160_s11 + $0x420] sm:$0xff] }
 0xc7f   :  { %10607 = vmatpush1.bf16.msra.mxu1 %v16060_v45  ;;  %v16102_v45 = vcombine.low %v8905_v27, %v8909_v51  ;;  %v8953_v27 = vld [vmem:[%s24160_s11 + $0x280] sm:$0xff] }
 0xc80   :  { %10608 = vmatprep.subr.bf16.mxu1 %v16069_v39  ;;  %v16111_v39 = vcombine.high %v8913_v12, %v8917_v14  ;;  %v8957_v51 = vld [vmem:[%s24160_s11 + $0x2a0] sm:$0xff] }
 0xc81   :  { %10564 = vmatpush1.bf16.msra.mxu0 %v15924_v0  ;;  %v15972_v0 = vcombine.low %v15777_v24, %v15781_v30  ;;  %v9009_v24 = vld [vmem:[%s24160_s11 + $0x440] sm:$0xff] }
 0xc82   :  { %10565 = vmatprep.subr.bf16.mxu0 %v15933_v28  ;;  %v15981_v28 = vcombine.high %v15785_v18, %v15789_v55  ;;  %v9013_v30 = vld [vmem:[%s24160_s11 + $0x460] sm:$0xff] }
 0xc83   :  { %10609 = vmatpush1.bf16.msra.mxu1 %v16068_v48  ;;  %v16110_v48 = vcombine.low %v8913_v12, %v8917_v14  ;;  %v8961_v12 = vld [vmem:[%s24160_s11 + $0x2c0] sm:$0xff] }
 0xc84   :  { %11595 = vmatprep.subr.bf16.mxu1 %v16071_v10  ;;  %v16119_v10 = vcombine.high %v8921_v52, %v8925_v32  ;;  %v8965_v14 = vld [vmem:[%s24160_s11 + $0x2e0] sm:$0xff] }
 0xc85   :  { %10566 = vmatpush1.bf16.msra.mxu0 %v15932_v61  ;;  %v15980_v61 = vcombine.low %v15785_v18, %v15789_v55  ;;  %v9017_v18 = vld [vmem:[%s24160_s11 + $0x480] sm:$0xff] }
 0xc86   :  { %10627 = vmatmul.mubr.bf16.vlgmr.msra.gmra.mrb[24].mxu1 %v22230_v44  ;;  %10567 = vmatprep.subr.bf16.mxu0 %v15941_v50  ;;  %v8897_v44 = vld [vmem:[%s24160_s11 + $0xc0] sm:$0xff]  ;;  %v15989_v50 = vcombine.high %v15793_v11, %v15797_v43 }
 0xc87   :  { %11596 = vmatpush1.bf16.msra.mxu1 %v16070_v20  ;;  %11627 = vmatprep.mubr.bf16.mxu1 %v22610_v22  ;;  %v16095_v5 = vcombine.high %v8897_v44, %v8901_v54  ;;  %v16094_v41 = vcombine.low %v8897_v44, %v8901_v54  ;;  %v16118_v20 = vcombine.low %v8921_v52, %v8925_v32  ;;  %v8945_v44 = vld [vmem:[%s24160_s11 + $0x240] sm:$0xff] }
 0xc88   :  { %11597 = vmatprep.subr.bf16.mxu1 %v16079_v1  ;;  %v16127_v1 = vcombine.high %v8929_v26, %v8933_v42  ;;  %v8949_v54 = vld [vmem:[%s24160_s11 + $0x260] sm:$0xff] }
 0xc89   :  { %10568 = vmatpush1.bf16.msra.mxu0 %v15940_v2  ;;  %v15988_v2 = vcombine.low %v15793_v11, %v15797_v43  ;;  %v9021_v55 = vld [vmem:[%s24160_s11 + $0x4a0] sm:$0xff] }
 0xc8a   :  { %10569 = vmatprep.subr.bf16.mxu0 %v15949_v40  ;;  %v15997_v40 = vcombine.high %v15801_v38, %v15805_v16  ;;  %v8969_v52 = vld [vmem:[%s24160_s11 + $0x300] sm:$0xff] }
 0xc8b   :  { %11598 = vmatpush1.bf16.msra.mxu1 %v16078_v31  ;;  %v16126_v31 = vcombine.low %v8929_v26, %v8933_v42  ;;  %v8973_v32 = vld [vmem:[%s24160_s11 + $0x320] sm:$0xff] }
 0xc8c   :  { %11599 = vmatprep.subr.bf16.mxu1 %v16087_v59  ;;  %v16135_v59 = vcombine.high %v8937_v3, %v8941_v58  ;;  %v9029_v11 = vld [vmem:[%s24160_s11 + $0x4e0] sm:$0xff]  ;;  %v16167_v43 = vcombine.high %v8969_v52, %v8973_v32 }
 0xc8d   :  { %10570 = vmatpush1.bf16.msra.mxu0 %v15948_v37  ;;  %v15996_v37 = vcombine.low %v15801_v38, %v15805_v16  ;;  %v8981_v26 = vld [vmem:[%s24160_s11 + $0x360] sm:$0xff] }
 0xc8e   :  { %10571 = vmatprep.subr.bf16.mxu0 %v15957_v60  ;;  %v16005_v60 = vcombine.high %v15809_v9, %v15813_v25  ;;  %v9037_v38 = vld [vmem:[%s24160_s11 + $0x520] sm:$0xff] }
 0xc8f   :  { %11600 = vmatpush1.bf16.msra.mxu1 %v16086_v7  ;;  %v16134_v7 = vcombine.low %v8937_v3, %v8941_v58  ;;  %v8989_v3 = vld [vmem:[%s24160_s11 + $0x3a0] sm:$0xff] }
 0xc90   :  { %11601 = vmatprep.subr.bf16.mxu1 %v16095_v5  ;;  %v16143_v5 = vcombine.high %v8945_v44, %v8949_v54 }
 0xc91   :  { %10572 = vmatpush1.bf16.msra.mxu0 %v15956_v49  ;;  %v16004_v49 = vcombine.low %v15809_v9, %v15813_v25  ;;  %v9045_v9 = vld [vmem:[%s24160_s11 + $0x560] sm:$0xff] }
 0xc92   :  { %10573 = vmatprep.subr.bf16.mxu0 %v15965_v8  ;;  %v16199_v8 = vcombine.high %v9001_v46, %v9005_v47 }
 0xc93   :  { %11602 = vmatpush1.bf16.msra.mxu1 %v16094_v41  ;;  %v16142_v41 = vcombine.low %v8945_v44, %v8949_v54  ;;  %v8997_v44 = vld [vmem:[%s24160_s11 + $0x3e0] sm:$0xff] }
 0xc94   :  { %11603 = vmatprep.subr.bf16.mxu1 %v16103_v35  ;;  %v16151_v35 = vcombine.high %v8953_v27, %v8957_v51 }
 0xc95   :  { %10574 = vmatpush1.bf16.msra.mxu0 %v15964_v36  ;;  %v16198_v36 = vcombine.low %v9001_v46, %v9005_v47  ;;  %v9053_v46 = vld [vmem:[%s24160_s11 + $0x5a0] sm:$0xff] }
 0xc96   :  { %10575 = vmatprep.subr.bf16.mxu0 %v15973_v6  ;;  %v16207_v6 = vcombine.high %v9009_v24, %v9013_v30 }
 0xc97   :  { %11604 = vmatpush1.bf16.msra.mxu1 %v16102_v45  ;;  %v16150_v45 = vcombine.low %v8953_v27, %v8957_v51  ;;  %v9006_v27 = vld [vmem:[%s24160_s11 + $0x428] sm:$0xff] }
 0xc98   :  { %11605 = vmatprep.subr.bf16.mxu1 %v16111_v39  ;;  %v16159_v39 = vcombine.high %v8961_v12, %v8965_v14 }
 0xc99   :  { %10576 = vmatpush1.bf16.msra.mxu0 %v15972_v0  ;;  %v16206_v0 = vcombine.low %v9009_v24, %v9013_v30  ;;  %v9061_v24 = vld [vmem:[%s24160_s11 + $0x5e0] sm:$0xff] }
 0xc9a   :  { %10577 = vmatprep.subr.bf16.mxu0 %v15981_v28  ;;  %v16215_v28 = vcombine.high %v9017_v18, %v9021_v55 }
 0xc9b   :  { %11606 = vmatpush1.bf16.msra.mxu1 %v16110_v48  ;;  %v16158_v48 = vcombine.low %v8961_v12, %v8965_v14  ;;  %v9014_v12 = vld [vmem:[%s24160_s11 + $0x468] sm:$0xff] }
 0xc9c   :  { %11607 = vmatprep.subr.bf16.mxu1 %v16119_v10  ;;  %v16214_v10 = vcombine.low %v9017_v18, %v9021_v55  ;;  %v8878_v18 = vld [vmem:[%s24160_s11 + $0x28] sm:$0xff]  ;;  %v22810_v55 = vpack.c.bf16 %v22193_v15, %v22193_v15 }
 0xc9d   :  { %10578 = vmatpush1.bf16.msra.mxu0 %v15980_v61  ;;  %v8977_v61 = vld [vmem:[%s24160_s11 + $0x340] sm:$0xff]  ;;  %v8882_v15 = vld [vmem:[%s24160_s11 + $0x48] sm:$0xff] }
 0xc9e   :  { %10579 = vmatprep.subr.bf16.mxu0 %v15989_v50  ;;  %v16166_v50 = vcombine.low %v8969_v52, %v8973_v32  ;;  %v16175_v16 = vcombine.high %v8977_v61, %v8981_v26  ;;  %v9018_v52 = vld [vmem:[%s24160_s11 + $0x488] sm:$0xff] }
 0xc9f   :  { %11608 = vmatpush1.bf16.msra.mxu1 %v16118_v20  ;;  %v9033_v20 = vld [vmem:[%s24160_s11 + $0x500] sm:$0xff]  ;;  %v9022_v32 = vld [vmem:[%s24160_s11 + $0x4a8] sm:$0xff] }
 0xca0   :  { %11609 = vmatprep.subr.bf16.mxu1 %v16127_v1  ;;  %v16231_v58 = vcombine.high %v9033_v20, %v9037_v38 }
 0xca1   :  { %10580 = vmatpush1.bf16.msra.mxu0 %v15988_v2  ;;  %v8985_v2 = vld [vmem:[%s24160_s11 + $0x380] sm:$0xff] }
 0xca2   :  { %10581 = vmatprep.subr.bf16.mxu0 %v15997_v40  ;;  %v16174_v40 = vcombine.low %v8977_v61, %v8981_v26  ;;  %v16183_v25 = vcombine.high %v8985_v2, %v8989_v3  ;;  %v9030_v61 = vld [vmem:[%s24160_s11 + $0x4e8] sm:$0xff]  ;;  %v22834_v26 = vpack.c.bf16 %v22197_v53, %v22197_v53 }
 0xca3   :  { %11610 = vmatpush1.bf16.msra.mxu1 %v16126_v31  ;;  %v9041_v31 = vld [vmem:[%s24160_s11 + $0x540] sm:$0xff] }
 0xca4   :  { %11611 = vmatprep.subr.bf16.mxu1 %v16135_v59  ;;  %v16230_v59 = vcombine.low %v9033_v20, %v9037_v38  ;;  %v16239_v54 = vcombine.high %v9041_v31, %v9045_v9  ;;  %v8890_v20 = vld [vmem:[%s24160_s11 + $0x88] sm:$0xff] }
 0xca5   :  { %10582 = vmatpush1.bf16.msra.mxu0 %v15996_v37  ;;  %v8993_v37 = vld [vmem:[%s24160_s11 + $0x3c0] sm:$0xff]  ;;  %v8894_v38 = vld [vmem:[%s24160_s11 + $0xa8] sm:$0xff] }
 0xca6   :  { %10583 = vmatprep.subr.bf16.mxu0 %v16005_v60  ;;  %v16182_v60 = vcombine.low %v8985_v2, %v8989_v3  ;;  %v16191_v47 = vcombine.high %v8993_v37, %v8997_v44  ;;  %v9038_v2 = vld [vmem:[%s24160_s11 + $0x528] sm:$0xff]  ;;  %v16089_v3 = vcombine.high %v8890_v20, %v8894_v38 }
 0xca7   :  { %11612 = vmatpush1.bf16.msra.mxu1 %v16134_v7  ;;  %v9049_v7 = vld [vmem:[%s24160_s11 + $0x580] sm:$0xff] }
 0xca8   :  { %11613 = vmatprep.subr.bf16.mxu1 %v16143_v5  ;;  %v16238_v5 = vcombine.low %v9041_v31, %v9045_v9  ;;  %v16247_v51 = vcombine.high %v9049_v7, %v9053_v46  ;;  %v8902_v31 = vld [vmem:[%s24160_s11 + $0xe8] sm:$0xff] }
 0xca9   :  { %10584 = vmatpush1.bf16.msra.mxu0 %v16004_v49  ;;  %v9002_v49 = vld [vmem:[%s24160_s11 + $0x408] sm:$0xff] }
 0xcaa   :  { %11636 = vmatprep.subr.bf16.mxu0 %v16199_v8  ;;  %v16190_v8 = vcombine.low %v8993_v37, %v8997_v44  ;;  %v16201_v30 = vcombine.high %v9002_v49, %v9006_v27  ;;  %v9046_v37 = vld [vmem:[%s24160_s11 + $0x568] sm:$0xff] }
 0xcab   :  { %11614 = vmatpush1.bf16.msra.mxu1 %v16142_v41  ;;  %v9057_v41 = vld [vmem:[%s24160_s11 + $0x5c0] sm:$0xff] }
 0xcac   :  { %10586 = vmatmul.mubr.bf16.vlgmr.msra.gmra.mrb[228].mxu0 %v22207_v17  ;;  %11615 = vmatprep.subr.bf16.mxu1 %v16151_v35  ;;  %v9025_v17 = vld [vmem:[%s24160_s11 + $0x4c0] sm:$0xff]  ;;  %v16246_v35 = vcombine.low %v9049_v7, %v9053_v46  ;;  %v16255_v14 = vcombine.high %v9057_v41, %v9061_v24  ;;  %v8910_v7 = vld [vmem:[%s24160_s11 + $0x128] sm:$0xff] }
 0xcad   :  { %11637 = vmatpush1.bf16.msra.mxu0 %v16198_v36  ;;  %11668 = vmatprep.mubr.bf16.mxu0 %v24176_v4  ;;  %v16223_v42 = vcombine.high %v9025_v17, %v9029_v11  ;;  %v16222_v1 = vcombine.low %v9025_v17, %v9029_v11  ;;  %v9010_v36 = vld [vmem:[%s24160_s11 + $0x448] sm:$0xff]  ;;  %v16217_v11 = vcombine.high %v9018_v52, %v9022_v32 }
 0xcae   :  { %11638 = vmatprep.subr.bf16.mxu0 %v16207_v6  ;;  %v16200_v6 = vcombine.low %v9002_v49, %v9006_v27  ;;  %v8886_v17 = vld [vmem:[%s24160_s11 + $0x68] sm:$0xff] }
 0xcaf   :  { %11616 = vmatpush1.bf16.msra.mxu1 %v16150_v45  ;;  %v8874_v45 = vld [vmem:[%s24160_s11 + $0x8] sm:$0xff]  ;;  %v16080_v53 = vcombine.low %v8882_v15, %v8886_v17 }
 0xcb0   :  { %11617 = vmatprep.subr.bf16.mxu1 %v16159_v39  ;;  %v16209_v39 = vcombine.high %v9010_v36, %v9014_v12  ;;  %v9054_v49 = vld [vmem:[%s24160_s11 + $0x5a8] sm:$0xff] }
 0xcb1   :  { %11639 = vmatpush1.bf16.msra.mxu0 %v16206_v0  ;;  %v16254_v0 = vcombine.low %v9057_v41, %v9061_v24  ;;  %v8918_v41 = vld [vmem:[%s24160_s11 + $0x168] sm:$0xff] }
 0xcb2   :  { %11640 = vmatprep.subr.bf16.mxu0 %v16215_v28  ;;  %v16073_v28 = vcombine.high %v8874_v45, %v8878_v18 }
 0xcb3   :  { %11618 = vmatpush1.bf16.msra.mxu1 %v16158_v48  ;;  %v16208_v48 = vcombine.low %v9010_v36, %v9014_v12  ;;  %v9058_v36 = vld [vmem:[%s24160_s11 + $0x5c8] sm:$0xff] }
 0xcb4   :  { %11619 = vmatprep.subr.bf16.mxu1 %v16167_v43  ;;  %v16072_v43 = vcombine.low %v8874_v45, %v8878_v18  ;;  %v9062_v12 = vld [vmem:[%s24160_s11 + $0x5e8] sm:$0xff] }
 0xcb5   :  { %11641 = vmatpush1.bf16.msra.mxu0 %v16214_v10  ;;  %v9026_v10 = vld [vmem:[%s24160_s11 + $0x4c8] sm:$0xff] }
 0xcb6   :  { %11642 = vmatprep.subr.bf16.mxu0 %v16223_v42  ;;  %v16081_v42 = vcombine.high %v8882_v15, %v8886_v17  ;;  %v8879_v15 = vld [vmem:[%s24160_s11 + $0x30] sm:$0xff] }
 0xcb7   :  { %11620 = vmatpush1.bf16.msra.mxu1 %v16166_v50  ;;  %v16216_v50 = vcombine.low %v9018_v52, %v9022_v32  ;;  %v16257_v32 = vcombine.high %v9058_v36, %v9062_v12 }
 0xcb8   :  { %11621 = vmatprep.subr.bf16.mxu1 %v16175_v16  ;;  %v16225_v16 = vcombine.high %v9026_v10, %v9030_v61 }
 0xcb9   :  { %11643 = vmatpush1.bf16.msra.mxu0 %v16222_v1  ;;  %v9034_v1 = vld [vmem:[%s24160_s11 + $0x508] sm:$0xff] }
 0xcba   :  { %11644 = vmatprep.subr.bf16.mxu0 %v16231_v58  ;;  %v16224_v58 = vcombine.low %v9026_v10, %v9030_v61  ;;  %v16233_v9 = vcombine.high %v9034_v1, %v9038_v2  ;;  %v8930_v10 = vld [vmem:[%s24160_s11 + $0x1c8] sm:$0xff] }
 0xcbb   :  { %11622 = vmatpush1.bf16.msra.mxu1 %v16174_v40  ;;  %v8898_v40 = vld [vmem:[%s24160_s11 + $0xc8] sm:$0xff] }
 0xcbc   :  { %11623 = vmatprep.subr.bf16.mxu1 %v16183_v25  ;;  %v16088_v25 = vcombine.low %v8890_v20, %v8894_v38  ;;  %v16097_v44 = vcombine.high %v8898_v40, %v8902_v31  ;;  %v8934_v61 = vld [vmem:[%s24160_s11 + $0x1e8] sm:$0xff] }
 0xcbd   :  { %11645 = vmatpush1.bf16.msra.mxu0 %v16230_v59  ;;  %v9042_v59 = vld [vmem:[%s24160_s11 + $0x548] sm:$0xff] }
 0xcbe   :  { %11646 = vmatprep.subr.bf16.mxu0 %v16239_v54  ;;  %v16232_v54 = vcombine.low %v9034_v1, %v9038_v2  ;;  %v16241_v46 = vcombine.high %v9042_v59, %v9046_v37  ;;  %v8887_v1 = vld [vmem:[%s24160_s11 + $0x70] sm:$0xff] }
 0xcbf   :  { %11624 = vmatpush1.bf16.msra.mxu1 %v16182_v60  ;;  %v8906_v60 = vld [vmem:[%s24160_s11 + $0x108] sm:$0xff] }
 0xcc0   :  { %11625 = vmatprep.subr.bf16.mxu1 %v16191_v47  ;;  %v16096_v47 = vcombine.low %v8898_v40, %v8902_v31  ;;  %v16105_v27 = vcombine.high %v8906_v60, %v8910_v7  ;;  %v8938_v31 = vld [vmem:[%s24160_s11 + $0x208] sm:$0xff] }
 0xcc1   :  { %11647 = vmatpush1.bf16.msra.mxu0 %v16238_v5  ;;  %v9050_v5 = vld [vmem:[%s24160_s11 + $0x588] sm:$0xff] }
 0xcc2   :  { %11648 = vmatprep.subr.bf16.mxu0 %v16247_v51  ;;  %v16240_v51 = vcombine.low %v9042_v59, %v9046_v37  ;;  %v16249_v24 = vcombine.high %v9050_v5, %v9054_v49  ;;  %v16248_v18 = vcombine.low %v9050_v5, %v9054_v49  ;;  %v16128_v59 = vcombine.low %v8930_v10, %v8934_v61  ;;  %v8891_v37 = vld [vmem:[%s24160_s11 + $0x90] sm:$0xff] }
 0xcc3   :  { %11626 = vmatpush1.bf16.msra.mxu1 %v16190_v8  ;;  %v8914_v8 = vld [vmem:[%s24160_s11 + $0x148] sm:$0xff]  ;;  %v8899_v49 = vld [vmem:[%s24160_s11 + $0xd0] sm:$0xff] }
 0xcc4   :  { %11718 = vmatprep.subr.bf16.mxu1 %v16201_v30 }
 0xcc5   :  { %11649 = vmatpush1.bf16.msra.mxu0 %v16246_v35  ;;  %v16104_v35 = vcombine.low %v8906_v60, %v8910_v7  ;;  %v8946_v7 = vld [vmem:[%s24160_s11 + $0x248] sm:$0xff] }
 0xcc6   :  { %11628 = vmatmul.mubr.bf16.vlgmr.msra.gmra.mrb[28].mxu1 %v22810_v55  ;;  %11650 = vmatprep.subr.bf16.mxu0 %v16255_v14 }
 0xcc7   :  { %11719 = vmatpush1.bf16.msra.mxu1 %v16200_v6  ;;  %11750 = vmatprep.mubr.bf16.mxu1 %v24176_v4  ;;  %v16113_v6 = vcombine.high %v8914_v8, %v8918_v41 }
 0xcc8   :  { %11720 = vmatprep.subr.bf16.mxu1 %v16209_v39  ;;  %v8922_v39 = vld [vmem:[%s24160_s11 + $0x188] sm:$0xff] }
 0xcc9   :  { %11651 = vmatpush1.bf16.msra.mxu0 %v16254_v0  ;;  %v8926_v0 = vld [vmem:[%s24160_s11 + $0x1a8] sm:$0xff] }
 0xcca   :  { %11677 = vmatprep.subr.bf16.mxu0 %v16073_v28  ;;  %v16112_v28 = vcombine.low %v8914_v8, %v8918_v41  ;;  %v16121_v17 = vcombine.high %v8922_v39, %v8926_v0  ;;  %v8954_v41 = vld [vmem:[%s24160_s11 + $0x288] sm:$0xff] }
 0xccb   :  { %11721 = vmatpush1.bf16.msra.mxu1 %v16208_v48  ;;  %v8875_v48 = vld [vmem:[%s24160_s11 + $0x10] sm:$0xff] }
 0xccc   :  { %11669 = vmatmul.mubr.bf16.vlgmr.msra.gmra.mrb[232].mxu0 %v22834_v26  ;;  %11722 = vmatprep.subr.bf16.mxu1 %v16217_v11  ;;  %v16075_v20 = vcombine.high %v8875_v48, %v8879_v15  ;;  %v16074_v40 = vcombine.low %v8875_v48, %v8879_v15  ;;  %v8970_v15 = vld [vmem:[%s24160_s11 + $0x308] sm:$0xff] }
 0xccd   :  { %11678 = vmatpush1.bf16.msra.mxu0 %v16072_v43  ;;  %11709 = vmatprep.mubr.bf16.mxu0 %v22610_v22  ;;  %v16256_v43 = vcombine.low %v9058_v36, %v9062_v12  ;;  %v8907_v36 = vld [vmem:[%s24160_s11 + $0x110] sm:$0xff] }
 0xcce   :  { %11679 = vmatprep.subr.bf16.mxu0 %v16081_v42  ;;  %v8911_v12 = vld [vmem:[%s24160_s11 + $0x130] sm:$0xff] }
 0xccf   :  { %11723 = vmatpush1.bf16.msra.mxu1 %v16216_v50  ;;  %v16106_v48 = vcombine.low %v8907_v36, %v8911_v12 }
 0xcd0   :  { %11724 = vmatprep.subr.bf16.mxu1 %v16225_v16  ;;  %v16120_v16 = vcombine.low %v8922_v39, %v8926_v0  ;;  %v16107_v39 = vcombine.high %v8907_v36, %v8911_v12  ;;  %v9003_v12 = vld [vmem:[%s24160_s11 + $0x410] sm:$0xff] }
 0xcd1   :  { %11680 = vmatpush1.bf16.msra.mxu0 %v16080_v53  ;;  %v8883_v53 = vld [vmem:[%s24160_s11 + $0x50] sm:$0xff] }
 0xcd2   :  { %11681 = vmatprep.subr.bf16.mxu0 %v16089_v3  ;;  %v16129_v3 = vcombine.high %v8930_v10, %v8934_v61  ;;  %v16082_v60 = vcombine.low %v8883_v53, %v8887_v1  ;;  %v8923_v10 = vld [vmem:[%s24160_s11 + $0x190] sm:$0xff] }
 0xcd3   :  { %11725 = vmatpush1.bf16.msra.mxu1 %v16224_v58  ;;  %v8927_v61 = vld [vmem:[%s24160_s11 + $0x1b0] sm:$0xff] }
 0xcd4   :  { %11726 = vmatprep.subr.bf16.mxu1 %v16233_v9  ;;  %v8942_v9 = vld [vmem:[%s24160_s11 + $0x228] sm:$0xff] }
 0xcd5   :  { %11682 = vmatpush1.bf16.msra.mxu0 %v16088_v25  ;;  %v16083_v25 = vcombine.high %v8883_v53, %v8887_v1  ;;  %v16136_v5 = vcombine.low %v8938_v31, %v8942_v9  ;;  %v8982_v53 = vld [vmem:[%s24160_s11 + $0x368] sm:$0xff]  ;;  %v16123_v1 = vcombine.high %v8923_v10, %v8927_v61 }
 0xcd6   :  { %11683 = vmatprep.subr.bf16.mxu0 %v16097_v44  ;;  %v8895_v44 = vld [vmem:[%s24160_s11 + $0xb0] sm:$0xff] }
 0xcd7   :  { %11727 = vmatpush1.bf16.msra.mxu1 %v16232_v54  ;;  %v16137_v54 = vcombine.high %v8938_v31, %v8942_v9  ;;  %v16090_v8 = vcombine.low %v8891_v37, %v8895_v44 }
 0xcd8   :  { %11728 = vmatprep.subr.bf16.mxu1 %v16241_v46  ;;  %v8950_v46 = vld [vmem:[%s24160_s11 + $0x268] sm:$0xff] }
 0xcd9   :  { %11684 = vmatpush1.bf16.msra.mxu0 %v16096_v47  ;;  %v10341_v30 = vpop.f32.mrb[12].mxu1  ;;  %v16091_v47 = vcombine.high %v8891_v37, %v8895_v44  ;;  %v8986_v37 = vld [vmem:[%s24160_s11 + $0x388] sm:$0xff] }
 0xcda   :  { %v10343_v14 = vpop.f32.mrb[13].mxu1  ;;  %11685 = vmatprep.subr.bf16.mxu0 %v16105_v27  ;;  %v8903_v27 = vld [vmem:[%s24160_s11 + $0xf0] sm:$0xff]  ;;  %v8990_v44 = vld [vmem:[%s24160_s11 + $0x3a8] sm:$0xff] }
 0xcdb   :  { %11729 = vmatpush1.bf16.msra.mxu1 %v16240_v51  ;;  %v10345_v45 = vpop.f32.mrb[14].mxu1  ;;  %v16145_v51 = vcombine.high %v8946_v7, %v8950_v46 }
 0xcdc   :  { %v10346_v52 = vpop.f32.mrb[15].mxu1  ;;  %11730 = vmatprep.subr.bf16.mxu1 %v16249_v24  ;;  %v8958_v24 = vld [vmem:[%s24160_s11 + $0x2a8] sm:$0xff] }
 0xcdd   :  { %11686 = vmatpush1.bf16.msra.mxu0 %v16104_v35  ;;  %v16144_v35 = vcombine.low %v8946_v7, %v8950_v46  ;;  %v8962_v45 = vld [vmem:[%s24160_s11 + $0x2c8] sm:$0xff]  ;;  %v16152_v0 = vcombine.low %v8954_v41, %v8958_v24  ;;  %v8915_v52 = vld [vmem:[%s24160_s11 + $0x150] sm:$0xff] }
 0xcde   :  { %11687 = vmatprep.subr.bf16.mxu0 %v16113_v6  ;;  %v16098_v6 = vcombine.low %v8899_v49, %v8903_v27  ;;  %v8939_v46 = vld [vmem:[%s24160_s11 + $0x210] sm:$0xff] }
 0xcdf   :  { %11731 = vmatpush1.bf16.msra.mxu1 %v16248_v18  ;;  %v10382_v11 = vpop.f32.mrb[216].mxu0  ;;  %v8966_v18 = vld [vmem:[%s24160_s11 + $0x2e8] sm:$0xff] }
 0xce0   :  { %v22904_v42 = vadd.f32 %v10382_v11, %v10341_v30  ;;  %v10384_v50 = vpop.f32.mrb[217].mxu0  ;;  %11732 = vmatprep.subr.bf16.mxu1 %v16257_v32  ;;  %v16099_v30 = vcombine.high %v8899_v49, %v8903_v27  ;;  %v8919_v32 = vld [vmem:[%s24160_s11 + $0x170] sm:$0xff]  ;;  %v8994_v27 = vld [vmem:[%s24160_s11 + $0x3c8] sm:$0xff] }
 0xce1   :  { %v22906_v38 = vadd.f32 %v10384_v50, %v10343_v14  ;;  %11688 = vmatpush1.bf16.msra.mxu0 %v16112_v28  ;;  %v10386_v2 = vpop.f32.mrb[218].mxu0  ;;  %v16153_v14 = vcombine.high %v8954_v41, %v8958_v24  ;;  %v16161_v28 = vcombine.high %v8962_v45, %v8966_v18  ;;  %v16115_v11 = vcombine.high %v8915_v52, %v8919_v32  ;;  %v8947_v24 = vld [vmem:[%s24160_s11 + $0x250] sm:$0xff] }
 0xce2   :  { %11689 = vmatprep.subr.bf16.mxu0 %v16121_v17  ;;  %v10387_v58 = vpop.f32.mrb[219].mxu0  ;;  %v8974_v17 = vld [vmem:[%s24160_s11 + $0x328] sm:$0xff]  ;;  %v16184_v41 = vcombine.low %v8986_v37, %v8990_v44 }
 0xce3   :  { %11733 = vmatpush1.bf16.msra.mxu1 %v16256_v43  ;;  %v16160_v43 = vcombine.low %v8962_v45, %v8966_v18  ;;  %v16169_v50 = vcombine.high %v8970_v15, %v8974_v17  ;;  %v8931_v58 = vld [vmem:[%s24160_s11 + $0x1d0] sm:$0xff] }
 0xce4   :  { %11759 = vmatprep.subr.bf16.mxu1 %v16075_v20  ;;  %v16114_v20 = vcombine.low %v8915_v52, %v8919_v32  ;;  %v8955_v18 = vld [vmem:[%s24160_s11 + $0x290] sm:$0xff] }
 0xce5   :  { %11690 = vmatpush1.bf16.msra.mxu0 %v16120_v16  ;;  %v8978_v16 = vld [vmem:[%s24160_s11 + $0x348] sm:$0xff]  ;;  %v9011_v32 = vld [vmem:[%s24160_s11 + $0x450] sm:$0xff] }
 0xce6   :  { %11751 = vmatmul.mubr.bf16.vlgmr.msra.gmra.mrb[60].mxu1 %v22834_v26  ;;  %11691 = vmatprep.subr.bf16.mxu0 %v16129_v3  ;;  %v16168_v3 = vcombine.low %v8970_v15, %v8974_v17  ;;  %v16177_v9 = vcombine.high %v8978_v16, %v8982_v53  ;;  %v16176_v7 = vcombine.low %v8978_v16, %v8982_v53  ;;  %v8963_v17 = vld [vmem:[%s24160_s11 + $0x2d0] sm:$0xff] }
 0xce7   :  { %11760 = vmatpush1.bf16.msra.mxu1 %v16074_v40  ;;  %11791 = vmatprep.mubr.bf16.mxu1 %v22610_v22  ;;  %v8935_v40 = vld [vmem:[%s24160_s11 + $0x1f0] sm:$0xff] }
 0xce8   :  { %11761 = vmatprep.subr.bf16.mxu1 %v16083_v25  ;;  %v16130_v49 = vcombine.low %v8931_v58, %v8935_v40  ;;  %v8971_v53 = vld [vmem:[%s24160_s11 + $0x310] sm:$0xff] }
 0xce9   :  { %11692 = vmatpush1.bf16.msra.mxu0 %v16128_v59  ;;  %v16122_v59 = vcombine.low %v8923_v10, %v8927_v61  ;;  %v9019_v61 = vld [vmem:[%s24160_s11 + $0x490] sm:$0xff] }
 0xcea   :  { %11693 = vmatprep.subr.bf16.mxu0 %v16137_v54 }
 0xceb   :  { %11762 = vmatpush1.bf16.msra.mxu1 %v16082_v60  ;;  %v16131_v60 = vcombine.high %v8931_v58, %v8935_v40  ;;  %v9027_v40 = vld [vmem:[%s24160_s11 + $0x4d0] sm:$0xff] }
 0xcec   :  { %11763 = vmatprep.subr.bf16.mxu1 %v16091_v47  ;;  %v8943_v47 = vld [vmem:[%s24160_s11 + $0x230] sm:$0xff] }
 0xced   :  { %11694 = vmatpush1.bf16.msra.mxu0 %v16136_v5  ;;  %v16185_v5 = vcombine.high %v8986_v37, %v8990_v44  ;;  %v16138_v36 = vcombine.low %v8939_v46, %v8943_v47  ;;  %v8979_v37 = vld [vmem:[%s24160_s11 + $0x350] sm:$0xff] }
 0xcee   :  { %11695 = vmatprep.subr.bf16.mxu0 %v16145_v51  ;;  %v8998_v51 = vld [vmem:[%s24160_s11 + $0x3e8] sm:$0xff]  ;;  %v8983_v44 = vld [vmem:[%s24160_s11 + $0x370] sm:$0xff] }
 0xcef   :  { %11764 = vmatpush1.bf16.msra.mxu1 %v16090_v8  ;;  %v16139_v8 = vcombine.high %v8939_v46, %v8943_v47  ;;  %v16192_v45 = vcombine.low %v8994_v27, %v8998_v51  ;;  %v9039_v46 = vld [vmem:[%s24160_s11 + $0x530] sm:$0xff]  ;;  %v16179_v47 = vcombine.high %v8979_v37, %v8983_v44 }
 0xcf0   :  { %11765 = vmatprep.subr.bf16.mxu1 %v16099_v30  ;;  %v8951_v30 = vld [vmem:[%s24160_s11 + $0x270] sm:$0xff] }
 0xcf1   :  { %11696 = vmatpush1.bf16.msra.mxu0 %v16144_v35  ;;  %v16193_v35 = vcombine.high %v8994_v27, %v8998_v51  ;;  %v16146_v52 = vcombine.low %v8947_v24, %v8951_v30  ;;  %v8991_v27 = vld [vmem:[%s24160_s11 + $0x3b0] sm:$0xff] }
 0xcf2   :  { %11697 = vmatprep.subr.bf16.mxu0 %v16153_v14  ;;  %v9007_v14 = vld [vmem:[%s24160_s11 + $0x430] sm:$0xff] }
 0xcf3   :  { %11766 = vmatpush1.bf16.msra.mxu1 %v16098_v6  ;;  %v16147_v6 = vcombine.high %v8947_v24, %v8951_v30  ;;  %v16202_v15 = vcombine.low %v9003_v12, %v9007_v14  ;;  %v9047_v24 = vld [vmem:[%s24160_s11 + $0x570] sm:$0xff] }
 0xcf4   :  { %11767 = vmatprep.subr.bf16.mxu1 %v16107_v39  ;;  %v8959_v39 = vld [vmem:[%s24160_s11 + $0x2b0] sm:$0xff] }
 0xcf5   :  { %11698 = vmatpush1.bf16.msra.mxu0 %v16152_v0  ;;  %v16203_v0 = vcombine.high %v9003_v12, %v9007_v14  ;;  %v16154_v10 = vcombine.low %v8955_v18, %v8959_v39  ;;  %v8999_v12 = vld [vmem:[%s24160_s11 + $0x3f0] sm:$0xff] }
 0xcf6   :  { %11699 = vmatprep.subr.bf16.mxu0 %v16161_v28  ;;  %v9015_v28 = vld [vmem:[%s24160_s11 + $0x470] sm:$0xff] }
 0xcf7   :  { %11768 = vmatpush1.bf16.msra.mxu1 %v16106_v48  ;;  %v16155_v48 = vcombine.high %v8955_v18, %v8959_v39  ;;  %v16210_v16 = vcombine.low %v9011_v32, %v9015_v28  ;;  %v9055_v18 = vld [vmem:[%s24160_s11 + $0x5b0] sm:$0xff] }
 0xcf8   :  { %11769 = vmatprep.subr.bf16.mxu1 %v16115_v11  ;;  %v8967_v11 = vld [vmem:[%s24160_s11 + $0x2f0] sm:$0xff] }
 0xcf9   :  { %11700 = vmatpush1.bf16.msra.mxu0 %v16160_v43  ;;  %v22982_v2 = vpop.f32.mrb[16].mxu1  ;;  %v16211_v43 = vcombine.high %v9011_v32, %v9015_v28  ;;  %v16162_v58 = vcombine.low %v8963_v17, %v8967_v11  ;;  %v9008_v32 = vld [vmem:[%s24160_s11 + $0x438] sm:$0xff] }
 0xcfa   :  { %v22990_v31 = vpop.f32.mrb[17].mxu1  ;;  %11701 = vmatprep.subr.bf16.mxu0 %v16169_v50  ;;  %v9023_v50 = vld [vmem:[%s24160_s11 + $0x4b0] sm:$0xff] }
 0xcfb   :  { %11770 = vmatpush1.bf16.msra.mxu1 %v16114_v20  ;;  %v10468_v25 = vpop.f32.mrb[18].mxu1  ;;  %v16163_v20 = vcombine.high %v8963_v17, %v8967_v11  ;;  %v9059_v17 = vld [vmem:[%s24160_s11 + $0x5d0] sm:$0xff] }
 0xcfc   :  { %v10469_v54 = vpop.f32.mrb[19].mxu1  ;;  %11771 = vmatprep.subr.bf16.mxu1 %v16123_v1  ;;  %v8975_v1 = vld [vmem:[%s24160_s11 + $0x330] sm:$0xff] }
 0xcfd   :  { %11702 = vmatpush1.bf16.msra.mxu0 %v16168_v3  ;;  %v16219_v3 = vcombine.high %v9019_v61, %v9023_v50  ;;  %v16171_v25 = vcombine.high %v8971_v53, %v8975_v1  ;;  %v9063_v11 = vld [vmem:[%s24160_s11 + $0x5f0] sm:$0xff] }
 0xcfe   :  { %11703 = vmatprep.subr.bf16.mxu0 %v16177_v9  ;;  %v9031_v9 = vld [vmem:[%s24160_s11 + $0x4f0] sm:$0xff] }
 0xcff   :  { %11772 = vmatpush1.bf16.msra.mxu1 %v16122_v59  ;;  %v16218_v59 = vcombine.low %v9019_v61, %v9023_v50  ;;  %v16227_v54 = vcombine.high %v9027_v40, %v9031_v9 }
 0xd00   :  { %11773 = vmatprep.subr.bf16.mxu1 %v16131_v60  ;;  %v16170_v60 = vcombine.low %v8971_v53, %v8975_v1  ;;  %v9012_v53 = vld [vmem:[%s24160_s11 + $0x458] sm:$0xff] }
 0xd01   :  { %11704 = vmatpush1.bf16.msra.mxu0 %v16176_v7  ;;  %v9035_v7 = vld [vmem:[%s24160_s11 + $0x510] sm:$0xff]  ;;  %v9016_v1 = vld [vmem:[%s24160_s11 + $0x478] sm:$0xff] }
 0xd02   :  { %11705 = vmatprep.subr.bf16.mxu0 %v16185_v5  ;;  %v16226_v5 = vcombine.low %v9027_v40, %v9031_v9  ;;  %v16235_v51 = vcombine.high %v9035_v7, %v9039_v46  ;;  %v8880_v40 = vld [vmem:[%s24160_s11 + $0x38] sm:$0xff]  ;;  %v16213_v9 = vcombine.high %v9012_v53, %v9016_v1 }
 0xd03   :  { %11774 = vmatpush1.bf16.msra.mxu1 %v16130_v49  ;;  %v8987_v49 = vld [vmem:[%s24160_s11 + $0x390] sm:$0xff] }
 0xd04   :  { %11775 = vmatprep.subr.bf16.mxu1 %v16139_v8  ;;  %v16178_v8 = vcombine.low %v8979_v37, %v8983_v44  ;;  %v16187_v30 = vcombine.high %v8987_v49, %v8991_v27  ;;  %v9024_v37 = vld [vmem:[%s24160_s11 + $0x4b8] sm:$0xff] }
 0xd05   :  { %11706 = vmatpush1.bf16.msra.mxu0 %v16184_v41  ;;  %v9043_v41 = vld [vmem:[%s24160_s11 + $0x550] sm:$0xff] }
 0xd06   :  { %11707 = vmatprep.subr.bf16.mxu0 %v16193_v35  ;;  %v16234_v35 = vcombine.low %v9035_v7, %v9039_v46  ;;  %v16243_v14 = vcombine.high %v9043_v41, %v9047_v24  ;;  %v8888_v7 = vld [vmem:[%s24160_s11 + $0x78] sm:$0xff] }
 0xd07   :  { %11776 = vmatpush1.bf16.msra.mxu1 %v16138_v36  ;;  %v8995_v36 = vld [vmem:[%s24160_s11 + $0x3d0] sm:$0xff] }
 0xd08   :  { %11777 = vmatprep.subr.bf16.mxu1 %v16147_v6  ;;  %v16186_v6 = vcombine.low %v8987_v49, %v8991_v27  ;;  %v16195_v39 = vcombine.high %v8995_v36, %v8999_v12  ;;  %v9032_v49 = vld [vmem:[%s24160_s11 + $0x4f8] sm:$0xff] }
 0xd09   :  { %11708 = vmatpush1.bf16.msra.mxu0 %v16192_v45  ;;  %v9051_v45 = vld [vmem:[%s24160_s11 + $0x590] sm:$0xff] }
 0xd0a   :  { %11800 = vmatprep.subr.bf16.mxu0 %v16203_v0  ;;  %v16242_v0 = vcombine.low %v9043_v41, %v9047_v24  ;;  %v16251_v28 = vcombine.high %v9051_v45, %v9055_v18  ;;  %v8896_v41 = vld [vmem:[%s24160_s11 + $0xb8] sm:$0xff] }
 0xd0b   :  { %11778 = vmatpush1.bf16.msra.mxu1 %v16146_v52  ;;  %v9004_v52 = vld [vmem:[%s24160_s11 + $0x418] sm:$0xff] }
 0xd0c   :  { %11710 = vmatmul.mubr.bf16.vlgmr.msra.gmra.mrb[236].mxu0 %v22810_v55  ;;  %11779 = vmatprep.subr.bf16.mxu1 %v16155_v48  ;;  %v16205_v61 = vcombine.high %v9004_v52, %v9008_v32 }
 0xd0d   :  { %11801 = vmatpush1.bf16.msra.mxu0 %v16202_v15  ;;  %11832 = vmatprep.mubr.bf16.mxu0 %v24176_v4  ;;  %v16194_v15 = vcombine.low %v8995_v36, %v8999_v12  ;;  %v9040_v36 = vld [vmem:[%s24160_s11 + $0x538] sm:$0xff] }
 0xd0e   :  { %11802 = vmatprep.subr.bf16.mxu0 %v16211_v43 }
 0xd0f   :  { %11780 = vmatpush1.bf16.msra.mxu1 %v16154_v10 }
 0xd10   :  { %11781 = vmatprep.subr.bf16.mxu1 %v16163_v20 }
 0xd11   :  { %11803 = vmatpush1.bf16.msra.mxu0 %v16210_v16  ;;  %v16250_v16 = vcombine.low %v9051_v45, %v9055_v18 }
 0xd12   :  { %11804 = vmatprep.subr.bf16.mxu0 %v16219_v3 }
 0xd13   :  { %11782 = vmatpush1.bf16.msra.mxu1 %v16162_v58  ;;  %v16204_v58 = vcombine.low %v9004_v52, %v9008_v32 }
 0xd14   :  { %11783 = vmatprep.subr.bf16.mxu1 %v16171_v25  ;;  %v16258_v25 = vcombine.low %v9059_v17, %v9063_v11 }
 0xd15   :  { %11805 = vmatpush1.bf16.msra.mxu0 %v16218_v59  ;;  %v9020_v59 = vld [vmem:[%s24160_s11 + $0x498] sm:$0xff] }
 0xd16   :  { %11806 = vmatprep.subr.bf16.mxu0 %v16227_v54  ;;  %v16212_v54 = vcombine.low %v9012_v53, %v9016_v1  ;;  %v16221_v46 = vcombine.high %v9020_v59, %v9024_v37  ;;  %v8920_v53 = vld [vmem:[%s24160_s11 + $0x178] sm:$0xff] }
 0xd17   :  { %11784 = vmatpush1.bf16.msra.mxu1 %v16170_v60  ;;  %v8884_v60 = vld [vmem:[%s24160_s11 + $0x58] sm:$0xff] }
 0xd18   :  { %11785 = vmatprep.subr.bf16.mxu1 %v16179_v47  ;;  %v16085_v27 = vcombine.high %v8884_v60, %v8888_v7 }
 0xd19   :  { %11807 = vmatpush1.bf16.msra.mxu0 %v16226_v5  ;;  %v9028_v5 = vld [vmem:[%s24160_s11 + $0x4d8] sm:$0xff] }
 0xd1a   :  { %11808 = vmatprep.subr.bf16.mxu0 %v16235_v51  ;;  %v16220_v51 = vcombine.low %v9020_v59, %v9024_v37  ;;  %v16229_v24 = vcombine.high %v9028_v5, %v9032_v49  ;;  %v8924_v37 = vld [vmem:[%s24160_s11 + $0x198] sm:$0xff] }
 0xd1b   :  { %11786 = vmatpush1.bf16.msra.mxu1 %v16178_v8  ;;  %v8892_v8 = vld [vmem:[%s24160_s11 + $0x98] sm:$0xff] }
 0xd1c   :  { %11787 = vmatprep.subr.bf16.mxu1 %v16187_v30  ;;  %v16084_v30 = vcombine.low %v8884_v60, %v8888_v7  ;;  %v16093_v12 = vcombine.high %v8892_v8, %v8896_v41  ;;  %v16092_v18 = vcombine.low %v8892_v8, %v8896_v41 }
 0xd1d   :  { %11809 = vmatpush1.bf16.msra.mxu0 %v16234_v35  ;;  %v9036_v35 = vld [vmem:[%s24160_s11 + $0x518] sm:$0xff] }
 0xd1e   :  { %11810 = vmatprep.subr.bf16.mxu0 %v16243_v14  ;;  %v16228_v14 = vcombine.low %v9028_v5, %v9032_v49  ;;  %v16237_v45 = vcombine.high %v9036_v35, %v9040_v36  ;;  %v16236_v32 = vcombine.low %v9036_v35, %v9040_v36  ;;  %v8932_v49 = vld [vmem:[%s24160_s11 + $0x1d8] sm:$0xff] }
 0xd1f   :  { %v10423_v48 = vpop.f32.mrb[220].mxu0  ;;  %11788 = vmatpush1.bf16.msra.mxu1 %v16186_v6  ;;  %v8900_v6 = vld [vmem:[%s24160_s11 + $0xd8] sm:$0xff] }
 0xd20   :  { %v23109_v43 = vadd.f32 %v22982_v2, %v10423_v48  ;;  %v10425_v10 = vpop.f32.mrb[221].mxu0  ;;  %11789 = vmatprep.subr.bf16.mxu1 %v16195_v39  ;;  %v16259_v2 = vcombine.high %v9059_v17, %v9063_v11  ;;  %v9044_v39 = vld [vmem:[%s24160_s11 + $0x558] sm:$0xff] }
 0xd21   :  { %v23112_v50 = vadd.f32 %v22990_v31, %v10425_v10  ;;  %v10427_v20 = vpop.f32.mrb[222].mxu0  ;;  %11811 = vmatpush1.bf16.msra.mxu0 %v16242_v0  ;;  %v8876_v31 = vld [vmem:[%s24160_s11 + $0x18] sm:$0xff] }
 0xd22   :  { %v10428_v3 = vpop.f32.mrb[223].mxu0  ;;  %11812 = vmatprep.subr.bf16.mxu0 %v16251_v28  ;;  %v16077_v44 = vcombine.high %v8876_v31, %v8880_v40  ;;  %v16076_v47 = vcombine.low %v8876_v31, %v8880_v40  ;;  %v9048_v0 = vld [vmem:[%s24160_s11 + $0x578] sm:$0xff] }
 0xd23   :  { %11790 = vmatpush1.bf16.msra.mxu1 %v16194_v15  ;;  %v8908_v28 = vld [vmem:[%s24160_s11 + $0x118] sm:$0xff]  ;;  %v16245_v15 = vcombine.high %v9044_v39, %v9048_v0  ;;  %v16244_v20 = vcombine.low %v9044_v39, %v9048_v0 }
 0xd24   :  { %11882 = vmatprep.subr.bf16.mxu1 %v16205_v61  ;;  %v8912_v48 = vld [vmem:[%s24160_s11 + $0x138] sm:$0xff] }
 0xd25   :  { %11813 = vmatpush1.bf16.msra.mxu0 %v16250_v16  ;;  %v9052_v11 = vld [vmem:[%s24160_s11 + $0x598] sm:$0xff]  ;;  %v16109_v61 = vcombine.high %v8908_v28, %v8912_v48 }
 0xd26   :  { %11792 = vmatmul.mubr.bf16.vlgmr.msra.gmra.mrb[64].mxu1 %v22810_v55  ;;  %11814 = vmatprep.subr.bf16.mxu0 %v16259_v2  ;;  %v9056_v10 = vld [vmem:[%s24160_s11 + $0x5b8] sm:$0xff]  ;;  %v16108_v2 = vcombine.low %v8908_v28, %v8912_v48 }
 0xd27   :  { %11883 = vmatpush1.bf16.msra.mxu1 %v16204_v58  ;;  %11914 = vmatprep.mubr.bf16.mxu1 %v24176_v4  ;;  %v8916_v16 = vld [vmem:[%s24160_s11 + $0x158] sm:$0xff]  ;;  %v16253_v1 = vcombine.high %v9052_v11, %v9056_v10  ;;  %v16252_v59 = vcombine.low %v9052_v11, %v9056_v10 }
 0xd28   :  { %11884 = vmatprep.subr.bf16.mxu1 %v16213_v9  ;;  %v9060_v58 = vld [vmem:[%s24160_s11 + $0x5d8] sm:$0xff]  ;;  %v16117_v9 = vcombine.high %v8916_v16, %v8920_v53  ;;  %v16116_v7 = vcombine.low %v8916_v16, %v8920_v53 }
 0xd29   :  { %11815 = vmatpush1.bf16.msra.mxu0 %v16258_v25  ;;  %v9064_v31 = vld [vmem:[%s24160_s11 + $0x5f8] sm:$0xff] }
 0xd2a   :  { %11841 = vmatprep.subr.bf16.mxu0 %v16077_v44  ;;  %v8928_v44 = vld [vmem:[%s24160_s11 + $0x1b8] sm:$0xff]  ;;  %v16261_v60 = vcombine.high %v9060_v58, %v9064_v31  ;;  %v16260_v5 = vcombine.low %v9060_v58, %v9064_v31 }
 0xd2b   :  { %11885 = vmatpush1.bf16.msra.mxu1 %v16212_v54  ;;  %v8956_v39 = vld [vmem:[%s24160_s11 + $0x298] sm:$0xff] }
 0xd2c   :  { %11833 = vmatmul.mubr.bf16.vlgmr.msra.gmra.mrb[240].mxu0 %v22834_v26  ;;  %11886 = vmatprep.subr.bf16.mxu1 %v16221_v46  ;;  %v16125_v46 = vcombine.high %v8924_v37, %v8928_v44  ;;  %v8960_v0 = vld [vmem:[%s24160_s11 + $0x2b8] sm:$0xff] }
 0xd2d   :  { %11842 = vmatpush1.bf16.msra.mxu0 %v16076_v47  ;;  %11873 = vmatprep.mubr.bf16.mxu0 %v22610_v22  ;;  %v8904_v22 = vld [vmem:[%s24160_s11 + $0xf8] sm:$0xff]  ;;  %v16156_v28 = vcombine.low %v8956_v39, %v8960_v0 }
 0xd2e   :  { %11843 = vmatprep.subr.bf16.mxu0 %v16085_v27  ;;  %v16101_v52 = vcombine.high %v8900_v6, %v8904_v22  ;;  %v16100_v17 = vcombine.low %v8900_v6, %v8904_v22  ;;  %v8936_v27 = vld [vmem:[%s24160_s11 + $0x1f8] sm:$0xff] }
 0xd2f   :  { %11887 = vmatpush1.bf16.msra.mxu1 %v16220_v51  ;;  %v16133_v36 = vcombine.high %v8932_v49, %v8936_v27  ;;  %v16132_v6 = vcombine.low %v8932_v49, %v8936_v27  ;;  %v8980_v11 = vld [vmem:[%s24160_s11 + $0x358] sm:$0xff]  ;;  %v16286_v49 = vld [vmem:[%s24160_s11 + $0xca0] sm:$0xff] }
 0xd30   :  { %11888 = vmatprep.subr.bf16.mxu1 %v16229_v24 }
 0xd31   :  { %11844 = vmatpush1.bf16.msra.mxu0 %v16084_v30  ;;  %v16124_v30 = vcombine.low %v8924_v37, %v8928_v44  ;;  %v16266_v37 = vld [vmem:[%s24160_s11 + $0xc00] sm:$0xff] }
 0xd32   :  { %11845 = vmatprep.subr.bf16.mxu0 %v16093_v12  ;;  %v8940_v12 = vld [vmem:[%s24160_s11 + $0x218] sm:$0xff]  ;;  %v16270_v44 = vld [vmem:[%s24160_s11 + $0xc20] sm:$0xff] }
 0xd33   :  { %11889 = vmatpush1.bf16.msra.mxu1 %v16228_v14  ;;  %v8944_v14 = vld [vmem:[%s24160_s11 + $0x238] sm:$0xff] }
 0xd34   :  { %11890 = vmatprep.subr.bf16.mxu1 %v16237_v45  ;;  %v16141_v22 = vcombine.high %v8940_v12, %v8944_v14  ;;  %v8948_v45 = vld [vmem:[%s24160_s11 + $0x258] sm:$0xff] }
 0xd35   :  { %11846 = vmatpush1.bf16.msra.mxu0 %v16092_v18  ;;  %v8952_v18 = vld [vmem:[%s24160_s11 + $0x278] sm:$0xff] }
 0xd36   :  { %11847 = vmatprep.subr.bf16.mxu0 %v16101_v52  ;;  %v8964_v52 = vld [vmem:[%s24160_s11 + $0x2d8] sm:$0xff] }
 0xd37   :  { %11891 = vmatpush1.bf16.msra.mxu1 %v16236_v32  ;;  %v8968_v32 = vld [vmem:[%s24160_s11 + $0x2f8] sm:$0xff] }
 0xd38   :  { %11892 = vmatprep.subr.bf16.mxu1 %v16245_v15  ;;  %v16165_v48 = vcombine.high %v8964_v52, %v8968_v32  ;;  %v8976_v15 = vld [vmem:[%s24160_s11 + $0x338] sm:$0xff] }
 0xd39   :  { %v10505_v3 = vpop.f32.mrb[20].mxu1  ;;  %11848 = vmatpush1.bf16.msra.mxu0 %v16100_v17  ;;  %v16164_v17 = vcombine.low %v8964_v52, %v8968_v32  ;;  %v16322_v52 = vld [vmem:[%s24160_s11 + $0xdc0] sm:$0xff] }
 0xd3a   :  { %v10507_v40 = vpop.f32.mrb[21].mxu1  ;;  %11849 = vmatprep.subr.bf16.mxu0 %v16109_v61  ;;  %v16326_v32 = vld [vmem:[%s24160_s11 + $0xde0] sm:$0xff] }
 0xd3b   :  { %v10509_v25 = vpop.f32.mrb[22].mxu1  ;;  %11893 = vmatpush1.bf16.msra.mxu1 %v16244_v20 }
 0xd3c   :  { %v10510_v54 = vpop.f32.mrb[23].mxu1  ;;  %11894 = vmatprep.subr.bf16.mxu1 %v16253_v1  ;;  %v8988_v1 = vld [vmem:[%s24160_s11 + $0x398] sm:$0xff] }
 0xd3d   :  { %11850 = vmatpush1.bf16.msra.mxu0 %v16108_v2  ;;  %v16458_v54 = vcombine.low %v16266_v37, %v16270_v44 }
 0xd3e   :  { %11851 = vmatprep.subr.bf16.mxu0 %v16117_v9  ;;  %v9000_v9 = vld [vmem:[%s24160_s11 + $0x3f8] sm:$0xff] }
 0xd3f   :  { %v10546_v47 = vpop.f32.mrb[224].mxu0  ;;  %11895 = vmatpush1.bf16.msra.mxu1 %v16252_v59 }
 0xd40   :  { %v23208_v51 = vadd.f32 %v10546_v47, %v10505_v3  ;;  %v10548_v8 = vpop.f32.mrb[225].mxu0  ;;  %11896 = vmatprep.subr.bf16.mxu1 %v16261_v60  ;;  %v8992_v3 = vld [vmem:[%s24160_s11 + $0x3b8] sm:$0xff]  ;;  %v16459_v60 = vcombine.high %v16266_v37, %v16270_v44  ;;  %v16406_v37 = vld [vmem:[%s24160_s11 + $0x1060] sm:$0xff] }
 0xd41   :  { %v23210_v41 = vadd.f32 %v10548_v8, %v10507_v40  ;;  %v10550_v24 = vpop.f32.mrb[226].mxu0  ;;  %11852 = vmatpush1.bf16.msra.mxu0 %v16116_v7  ;;  %v16189_v31 = vcombine.high %v8988_v1, %v8992_v3  ;;  %v8996_v40 = vld [vmem:[%s24160_s11 + $0x3d8] sm:$0xff]  ;;  %v16188_v25 = vcombine.low %v8988_v1, %v8992_v3  ;;  %v16274_v7 = vld [vmem:[%s24160_s11 + $0xc40] sm:$0xff] }
 0xd42   :  { %v10551_v35 = vpop.f32.mrb[227].mxu0  ;;  %11853 = vmatprep.subr.bf16.mxu0 %v16125_v46  ;;  %v16197_v59 = vcombine.high %v8996_v40, %v9000_v9  ;;  %v16278_v46 = vld [vmem:[%s24160_s11 + $0xc60] sm:$0xff]  ;;  %v16196_v27 = vcombine.low %v8996_v40, %v9000_v9 }
 0xd43   :  { %11897 = vmatpush1.bf16.msra.mxu1 %v16260_v5  ;;  %v16467_v47 = vcombine.high %v16274_v7, %v16278_v46  ;;  %v16282_v5 = vld [vmem:[%s24160_s11 + $0xc80] sm:$0xff]  ;;  %v16466_v8 = vcombine.low %v16274_v7, %v16278_v46 }
 0xd44   :  { %11928 = vmatprep.subr.bf16.mxu1 %v22001_v19  ;;  %v16140_v19 = vcombine.low %v8940_v12, %v8944_v14  ;;  %v16475_v24 = vcombine.high %v16282_v5, %v16286_v49  ;;  %v16294_v35 = vld [vmem:[%s24160_s11 + $0xce0] sm:$0xff] }
 0xd45   :  { %11854 = vmatpush1.bf16.msra.mxu0 %v16124_v30  ;;  %v16290_v30 = vld [vmem:[%s24160_s11 + $0xcc0] sm:$0xff] }
 0xd46   :  { %11915 = vmatmul.mubr.bf16.vlgmr.msra.gmra.mrb[32].mxu1 %v22834_v26  ;;  %11855 = vmatprep.subr.bf16.mxu0 %v16133_v36  ;;  %v16149_v26 = vcombine.high %v8948_v45, %v8952_v18  ;;  %v16474_v36 = vcombine.low %v16282_v5, %v16286_v49  ;;  %v16483_v12 = vcombine.high %v16290_v30, %v16294_v35  ;;  %v16298_v14 = vld [vmem:[%s24160_s11 + $0xd00] sm:$0xff] }
 0xd47   :  { %11929 = vmatpush1.bf16.msra.mxu1 %v21999_v57  ;;  %11960 = vmatprep.mubr.bf16.mxu1 %v24176_v4  ;;  %v16262_v57 = vld [vmem:[%s24159_s10 + $0x8] sm:$0xf]  ;;  %v16394_v3 = vld [vmem:[%s24160_s11 + $0x1000] sm:$0xff] }
 0xd48   :  { %16263 = vmatprep.subr.msk.bf16.mxu1 %vm2299_vm1, %v22010_v21  ;;  %v16148_v21 = vcombine.low %v8948_v45, %v8952_v18  ;;  %v16346_v9 = vld [vmem:[%s24160_s11 + $0xe80] sm:$0xff] }
 0xd49   :  { %11856 = vmatpush1.bf16.msra.mxu0 %v16132_v6  ;;  %v16302_v6 = vld [vmem:[%s24160_s11 + $0xd20] sm:$0xff] }
 0xd4a   :  { %11857 = vmatprep.subr.bf16.mxu0 %v16141_v22  ;;  %v16482_v22 = vcombine.low %v16290_v30, %v16294_v35  ;;  %v16491_v45 = vcombine.high %v16298_v14, %v16302_v6  ;;  %v16490_v18 = vcombine.low %v16298_v14, %v16302_v6  ;;  %v16414_v7 = vld [vmem:[%s24160_s11 + $0x10a0] sm:$0xff] }
 0xd4b   :  { %11931 = vmatpush1.bf16.msra.mxu1 %v22013_v63  ;;  %v16157_v63 = vcombine.high %v8956_v39, %v8960_v0  ;;  %v16314_v39 = vld [vmem:[%s24160_s11 + $0xd80] sm:$0xff] }
 0xd4c   :  { %17104 = vmatprep.subr.bf16.mxu1 %v18719_v29  ;;  %v16318_v0 = vld [vmem:[%s24160_s11 + $0xda0] sm:$0xff] }
 0xd4d   :  { %11858 = vmatpush1.bf16.msra.mxu0 %v16140_v19  ;;  %v16310_v19 = vld [vmem:[%s24160_s11 + $0xd60] sm:$0xff] }
 0xd4e   :  { %16264 = vmatmul.mubr.msk.bf16.vlgmr.msra.gmra.mrb[36].mxu1 %vm8776_vm5, %v16262_v57  ;;  %11859 = vmatprep.subr.bf16.mxu0 %v16149_v26  ;;  %v16354_v5 = vld [vmem:[%s24160_s11 + $0xec0] sm:$0xff] }
 0xd4f   :  { %17105 = vmatpush3.bf16.msra.mxu1 %v22004_v62  ;;  %17108 = vmatprep.mubr.msk.bf16.mxu1 %vm18720_vm6, %v18719_v29  ;;  %v8972_v62 = vld [vmem:[%s24160_s11 + $0x318] sm:$0xff]  ;;  %v16358_v49 = vld [vmem:[%s24160_s11 + $0xee0] sm:$0xff] }
 0xd50   :  { %17106 = vmatprep.subr.bf16.mxu1 %v18719_v29  ;;  %v16173_v29 = vcombine.high %v8972_v62, %v8976_v15  ;;  %v16172_v61 = vcombine.low %v8972_v62, %v8976_v15  ;;  %v16547_v35 = vcombine.high %v16354_v5, %v16358_v49  ;;  %v16366_v14 = vld [vmem:[%s24160_s11 + $0xf20] sm:$0xff] }
 0xd51   :  { %11860 = vmatpush1.bf16.msra.mxu0 %v16148_v21  ;;  %v16507_v21 = vcombine.high %v16314_v39, %v16318_v0 }
 0xd52   :  { %11861 = vmatprep.subr.bf16.mxu0 %v16157_v63  ;;  %v16506_v63 = vcombine.low %v16314_v39, %v16318_v0  ;;  %v16426_v0 = vld [vmem:[%s24160_s11 + $0x1100] sm:$0xff] }
 0xd53   :  { %17107 = vmatpush3.bf16.msra.mxu1 %v22028_v23  ;;  %v8984_v23 = vld [vmem:[%s24160_s11 + $0x378] sm:$0xff] }
 0xd54   :  { %v16181_v16 = vcombine.high %v8980_v11, %v8984_v23  ;;  %v16180_v58 = vcombine.low %v8980_v11, %v8984_v23  ;;  %13165 = vmatprep.subr.bf16.mxu1 %v16459_v60  ;;  %v16410_v60 = vld [vmem:[%s24160_s11 + $0x1080] sm:$0xff] }
 0xd55   :  { %11862 = vmatpush1.bf16.msra.mxu0 %v16156_v28 }
 0xd56   :  { %17109 = vmatmul.mubr.msk.bf16.vlgmr.msra.gmra.mrb[40].mxu1 %vm8776_vm5, %v16262_v57  ;;  %11863 = vmatprep.subr.bf16.mxu0 %v16165_v48  ;;  %v16515_v48 = vcombine.high %v16322_v52, %v16326_v32 }
 0xd57   :  { %13166 = vmatpush1.bf16.msra.mxu1 %v16458_v54 }
 0xd58   :  { %13167 = vmatprep.subr.bf16.mxu1 %v16467_v47 }
 0xd59   :  { %v23266_v10 = vpop.f32.mrb[24].mxu1  ;;  %11864 = vmatpush1.bf16.msra.mxu0 %v16164_v17  ;;  %v16514_v17 = vcombine.low %v16322_v52, %v16326_v32 }
 0xd5a   :  { %v23268_v20 = vpop.f32.mrb[25].mxu1  ;;  %11865 = vmatprep.subr.bf16.mxu0 %v16173_v29 }
 0xd5b   :  { %v10632_v53 = vpop.f32.mrb[26].mxu1  ;;  %13168 = vmatpush1.bf16.msra.mxu1 %v16466_v8  ;;  %v16418_v8 = vld [vmem:[%s24160_s11 + $0x10c0] sm:$0xff] }
 0xd5c   :  { %v10633_v2 = vpop.f32.mrb[27].mxu1  ;;  %13169 = vmatprep.subr.bf16.mxu1 %v16475_v24  ;;  %v16422_v24 = vld [vmem:[%s24160_s11 + $0x10e0] sm:$0xff] }
 0xd5d   :  { %11866 = vmatpush1.bf16.msra.mxu0 %v16172_v61  ;;  %v16330_v61 = vld [vmem:[%s24160_s11 + $0xe00] sm:$0xff]  ;;  %v16611_v6 = vcombine.high %v16418_v8, %v16422_v24 }
 0xd5e   :  { %11867 = vmatprep.subr.bf16.mxu0 %v16181_v16  ;;  %v16334_v16 = vld [vmem:[%s24160_s11 + $0xe20] sm:$0xff] }
 0xd5f   :  { %13170 = vmatpush1.bf16.msra.mxu1 %v16474_v36  ;;  %v16522_v53 = vcombine.low %v16330_v61, %v16334_v16  ;;  %v16523_v1 = vcombine.high %v16330_v61, %v16334_v16  ;;  %v16398_v2 = vld [vmem:[%s24160_s11 + $0x1020] sm:$0xff]  ;;  %v16602_v36 = vcombine.low %v16410_v60, %v16414_v7 }
 0xd60   :  { %13171 = vmatprep.subr.bf16.mxu1 %v16483_v12  ;;  %v16587_v40 = vcombine.high %v16394_v3, %v16398_v2  ;;  %v16362_v12 = vld [vmem:[%s24160_s11 + $0xf00] sm:$0xff] }
 0xd61   :  { %11868 = vmatpush1.bf16.msra.mxu0 %v16180_v58 }
 0xd62   :  { %11869 = vmatprep.subr.bf16.mxu0 %v16189_v31  ;;  %v16586_v31 = vcombine.low %v16394_v3, %v16398_v2  ;;  %v16390_v3 = vld [vmem:[%s24160_s11 + $0xfe0] sm:$0xff] }
 0xd63   :  { %13172 = vmatpush1.bf16.msra.mxu1 %v16482_v22  ;;  %v16546_v22 = vcombine.low %v16354_v5, %v16358_v49 }
 0xd64   :  { %13173 = vmatprep.subr.bf16.mxu1 %v16491_v45  ;;  %v16555_v45 = vcombine.high %v16362_v12, %v16366_v14 }
 0xd65   :  { %11870 = vmatpush1.bf16.msra.mxu0 %v16188_v25  ;;  %v16350_v25 = vld [vmem:[%s24160_s11 + $0xea0] sm:$0xff] }
 0xd66   :  { %11871 = vmatprep.subr.bf16.mxu0 %v16197_v59  ;;  %v16402_v59 = vld [vmem:[%s24160_s11 + $0x1040] sm:$0xff]  ;;  %v16539_v46 = vcombine.high %v16346_v9, %v16350_v25  ;;  %v16538_v30 = vcombine.low %v16346_v9, %v16350_v25 }
 0xd67   :  { %13174 = vmatpush1.bf16.msra.mxu1 %v16490_v18  ;;  %v16595_v54 = vcombine.high %v16402_v59, %v16406_v37  ;;  %v16594_v47 = vcombine.low %v16402_v59, %v16406_v37  ;;  %v16610_v18 = vcombine.low %v16418_v8, %v16422_v24  ;;  %v16442_v25 = vld [vmem:[%s24160_s11 + $0x1180] sm:$0xff] }
 0xd68   :  { %v16446_v59 = vld [vmem:[%s24160_s11 + $0x11a0] sm:$0xff] }
 0xd69   :  { %11872 = vmatpush1.bf16.msra.mxu0 %v16196_v27  ;;  %v16603_v27 = vcombine.high %v16410_v60, %v16414_v7  ;;  %v16634_v7 = vcombine.low %v16442_v25, %v16446_v59  ;;  %v16454_v8 = vld [vmem:[%s24160_s11 + $0x11e0] sm:$0xff] }
 0xd6a   :  { %13206 = vmatprep.subr.bf16.mxu0 %v16587_v40 }
 0xd6c   :  { %11874 = vmatmul.mubr.bf16.vlgmr.msra.gmra.mrb[244].mxu0 %v22810_v55  ;;  %v16306_v55 = vld [vmem:[%s24160_s11 + $0xd40] sm:$0xff] }
 0xd6d   :  { %13238 = vmatprep.mubr.bf16.mxu0 %v24176_v4  ;;  %v16499_v26 = vcombine.high %v16306_v55, %v16310_v19  ;;  %v16498_v57 = vcombine.low %v16306_v55, %v16310_v19  ;;  %13207 = vmatpush1.bf16.msra.mxu0 %v16586_v31  ;;  %v16554_v55 = vcombine.low %v16362_v12, %v16366_v14  ;;  %v16370_v19 = vld [vmem:[%s24160_s11 + $0xf40] sm:$0xff] }
 0xd6e   :  { %13208 = vmatprep.subr.bf16.mxu0 %v16595_v54  ;;  %v16635_v54 = vcombine.high %v16442_v25, %v16446_v59  ;;  %v16411_v25 = vld [vmem:[%s24160_s11 + $0x1088] sm:$0xff] }
 0xd6f   :  { %13175 = vmatprep.subr.bf16.mxu1 %v16499_v26  ;;  %v16374_v26 = vld [vmem:[%s24160_s11 + $0xf60] sm:$0xff]  ;;  %v16415_v59 = vld [vmem:[%s24160_s11 + $0x10a8] sm:$0xff] }
 0xd70   :  { %13176 = vmatpush1.bf16.msra.mxu1 %v16498_v57  ;;  %v16563_v57 = vcombine.high %v16370_v19, %v16374_v26  ;;  %v16562_v39 = vcombine.low %v16370_v19, %v16374_v26 }
 0xd71   :  { %13177 = vmatprep.subr.bf16.mxu1 %v16507_v21  ;;  %13209 = vmatpush1.bf16.msra.mxu0 %v16594_v47  ;;  %v16430_v21 = vld [vmem:[%s24160_s11 + $0x1120] sm:$0xff]  ;;  %v16399_v47 = vld [vmem:[%s24160_s11 + $0x1028] sm:$0xff] }
 0xd72   :  { %13210 = vmatprep.subr.bf16.mxu0 %v16603_v27  ;;  %v16619_v52 = vcombine.high %v16426_v0, %v16430_v21  ;;  %v16450_v27 = vld [vmem:[%s24160_s11 + $0x11c0] sm:$0xff] }
 0xd73   :  { %v16643_v24 = vcombine.high %v16450_v27, %v16454_v8 }
 0xd74   :  { %13178 = vmatpush1.bf16.msra.mxu1 %v16506_v63 }
 0xd75   :  { %13179 = vmatprep.subr.bf16.mxu1 %v16515_v48  ;;  %13211 = vmatpush1.bf16.msra.mxu0 %v16602_v36  ;;  %v16618_v48 = vcombine.low %v16426_v0, %v16430_v21  ;;  %v23454_v36 = vld [vmem:[%s24160_s11 + $0xc28] sm:$0xff] }
 0xd76   :  { %13212 = vmatprep.subr.bf16.mxu0 %v16611_v6 }
 0xd78   :  { %13180 = vmatpush1.bf16.msra.mxu1 %v16514_v17  ;;  %v16382_v17 = vld [vmem:[%s24160_s11 + $0xfa0] sm:$0xff] }
 0xd79   :  { %13181 = vmatprep.subr.bf16.mxu1 %v16523_v1  ;;  %13213 = vmatpush1.bf16.msra.mxu0 %v16610_v18 }
 0xd7a   :  { %13214 = vmatprep.subr.bf16.mxu0 %v16619_v52 }
 0xd7c   :  { %13182 = vmatpush1.bf16.msra.mxu1 %v16522_v53  ;;  %v16438_v53 = vld [vmem:[%s24160_s11 + $0x1160] sm:$0xff] }
 0xd7d   :  { %13215 = vmatpush1.bf16.msra.mxu0 %v16618_v48 }
 0xd7f   :  { %v10587_v28 = vpop.f32.mrb[228].mxu0 }
 0xd80   :  { %v23333_v62 = vadd.f32 %v23266_v10, %v10587_v28  ;;  %v10589_v15 = vpop.f32.mrb[229].mxu0  ;;  %v16338_v10 = vld [vmem:[%s24160_s11 + $0xe40] sm:$0xff] }
 0xd81   :  { %v23336_v29 = vadd.f32 %v23268_v20, %v10589_v15  ;;  %v10591_v11 = vpop.f32.mrb[230].mxu0  ;;  %v16342_v20 = vld [vmem:[%s24160_s11 + $0xe60] sm:$0xff] }
 0xd82   :  { %v10592_v23 = vpop.f32.mrb[231].mxu0  ;;  %v16531_v58 = vcombine.high %v16338_v10, %v16342_v20  ;;  %v16530_v44 = vcombine.low %v16338_v10, %v16342_v20  ;;  %v16378_v15 = vld [vmem:[%s24160_s11 + $0xf80] sm:$0xff] }
 0xd83   :  { %v16571_v61 = vcombine.high %v16378_v15, %v16382_v17  ;;  %v16570_v10 = vcombine.low %v16378_v15, %v16382_v17 }
 0xd84   :  { %13183 = vmatprep.subr.bf16.mxu1 %v16531_v58 }
 0xd85   :  { %13184 = vmatpush1.bf16.msra.mxu1 %v16530_v44 }
 0xd86   :  { %13185 = vmatprep.subr.bf16.mxu1 %v16539_v46  ;;  %v16395_v46 = vld [vmem:[%s24160_s11 + $0x1008] sm:$0xff] }
 0xd87   :  { %v16589_v5 = vcombine.high %v16395_v46, %v16399_v47  ;;  %v16588_v49 = vcombine.low %v16395_v46, %v16399_v47  ;;  %v16419_v47 = vld [vmem:[%s24160_s11 + $0x10c8] sm:$0xff] }
 0xd89   :  { %13186 = vmatpush1.bf16.msra.mxu1 %v16538_v30  ;;  %v16642_v30 = vcombine.low %v16450_v27, %v16454_v8 }
 0xd8a   :  { %13187 = vmatprep.subr.bf16.mxu1 %v16547_v35  ;;  %v23449_v35 = vld [vmem:[%s24160_s11 + $0xc08] sm:$0xff] }
 0xd8b   :  { %v16461_v12 = vcombine.high %v23449_v35, %v23454_v36  ;;  %v16460_v14 = vcombine.low %v23449_v35, %v23454_v36  ;;  %v16291_v35 = vld [vmem:[%s24160_s11 + $0xcc8] sm:$0xff] }
 0xd8c   :  { %v16295_v36 = vld [vmem:[%s24160_s11 + $0xce8] sm:$0xff] }
 0xd8d   :  { %13188 = vmatpush1.bf16.msra.mxu1 %v16546_v22 }
 0xd8e   :  { %13189 = vmatprep.subr.bf16.mxu1 %v16555_v45 }
 0xd91   :  { %13190 = vmatpush1.bf16.msra.mxu1 %v16554_v55 }
 0xd92   :  { %13191 = vmatprep.subr.bf16.mxu1 %v16563_v57 }
 0xd95   :  { %13192 = vmatpush1.bf16.msra.mxu1 %v16562_v39 }
 0xd96   :  { %13193 = vmatprep.subr.bf16.mxu1 %v16571_v61 }
 0xd99   :  { %v11629_v63 = vpop.f32.mrb[28].mxu1  ;;  %13194 = vmatpush1.bf16.msra.mxu1 %v16570_v10 }
 0xd9a   :  { %v11630_v32 = vadd.f32 %v11629_v63, %v22904_v42  ;;  %v11631_v28 = vpop.f32.mrb[29].mxu1  ;;  %v16434_v42 = vld [vmem:[%s24160_s11 + $0x1140] sm:$0xff] }
 0xd9b   :  { %v11632_v11 = vadd.f32 %v11631_v28, %v22906_v38  ;;  %v11633_v23 = vpop.f32.mrb[30].mxu1  ;;  %v16626_v1 = vcombine.low %v16434_v42, %v16438_v53  ;;  %v16627_v20 = vcombine.high %v16434_v42, %v16438_v53  ;;  %v16386_v38 = vld [vmem:[%s24160_s11 + $0xfc0] sm:$0xff] }
 0xd9c   :  { %v11634_v16 = vpop.f32.mrb[31].mxu1  ;;  %v16579_v58 = vcombine.high %v16386_v38, %v16390_v3  ;;  %v16578_v9 = vcombine.low %v16386_v38, %v16390_v3 }
 0xd9d   :  { %13216 = vmatprep.subr.bf16.mxu0 %v16627_v20  ;;  %v16407_v20 = vld [vmem:[%s24160_s11 + $0x1068] sm:$0xff] }
 0xd9e   :  { %13217 = vmatpush1.bf16.msra.mxu0 %v16626_v1  ;;  %13195 = vmatprep.subr.bf16.mxu1 %v16579_v58 }
 0xd9f   :  { %v11670_v2 = vpop.f32.mrb[232].mxu0  ;;  %13196 = vmatpush1.bf16.msra.mxu1 %v16578_v9  ;;  %13218 = vmatprep.subr.bf16.mxu0 %v16635_v54  ;;  %v16275_v54 = vld [vmem:[%s24160_s11 + $0xc48] sm:$0xff] }
 0xda0   :  { %v23424_v31 = vadd.f32 %v11670_v2, %v11630_v32  ;;  %v11672_v40 = vpop.f32.mrb[233].mxu0  ;;  %13288 = vmatprep.subr.bf16.mxu1 %v16589_v5  ;;  %v16423_v5 = vld [vmem:[%s24160_s11 + $0x10e8] sm:$0xff] }
 0xda1   :  { %v23432_v37 = vadd.f32 %v11672_v40, %v11632_v11  ;;  %v11674_v44 = vpop.f32.mrb[234].mxu0 }
 0xda2   :  { %v11675_v60 = vpop.f32.mrb[235].mxu0  ;;  %13219 = vmatpush1.bf16.msra.mxu0 %v16634_v7  ;;  %v16605_v7 = vcombine.high %v16411_v25, %v16415_v59 }
 0xda3   :  { %13220 = vmatprep.subr.bf16.mxu0 %v16643_v24  ;;  %v16279_v60 = vld [vmem:[%s24160_s11 + $0xc68] sm:$0xff] }
 0xda4   :  { %v16469_v8 = vcombine.high %v16275_v54, %v16279_v60 }
 0xda6   :  { %13221 = vmatpush1.bf16.msra.mxu0 %v16642_v30  ;;  %v16604_v30 = vcombine.low %v16411_v25, %v16415_v59  ;;  %v16315_v25 = vld [vmem:[%s24160_s11 + $0xd88] sm:$0xff] }
 0xda7   :  { %13247 = vmatprep.subr.bf16.mxu0 %v16461_v12  ;;  %v16283_v12 = vld [vmem:[%s24160_s11 + $0xc88] sm:$0xff] }
 0xda8   :  { %v16319_v59 = vld [vmem:[%s24160_s11 + $0xda8] sm:$0xff] }
 0xdb9   :  { %v11752_v6 = vpop.f32.mrb[60].mxu1 }
 0xdba   :  { %v11754_v22 = vpop.f32.mrb[61].mxu1 }
 0xdbb   :  { %v11756_v45 = vpop.f32.mrb[62].mxu1 }
 0xdbc   :  { %v11757_v18 = vpop.f32.mrb[63].mxu1  ;;  %v16613_v45 = vcombine.high %v16419_v47, %v16423_v5 }
 0xdbd   :  { %v16468_v18 = vcombine.low %v16275_v54, %v16279_v60  ;;  %v16268_v60 = vld [vmem:[%s24160_s11 + $0xc10] sm:$0xff] }
 0xddf   :  { %v11711_v55 = vpop.f32.mrb[236].mxu0 }
 0xde0   :  { %v11712_v19 = vadd.f32 %v11711_v55, %v23109_v43  ;;  %v11713_v26 = vpop.f32.mrb[237].mxu0  ;;  %v16427_v55 = vld [vmem:[%s24160_s11 + $0x1108] sm:$0xff] }
 0xde1   :  { %v11714_v57 = vadd.f32 %v11713_v26, %v23112_v50  ;;  %v11715_v39 = vpop.f32.mrb[238].mxu0 }
 0xde2   :  { %v23462_v0 = vadd.f32 %v11752_v6, %v11712_v19  ;;  %v11716_v21 = vpop.f32.mrb[239].mxu0  ;;  %v16287_v6 = vld [vmem:[%s24160_s11 + $0xca8] sm:$0xff] }
 0xde3   :  { %v23464_v63 = vadd.f32 %v11754_v22, %v11714_v57  ;;  %v16431_v19 = vld [vmem:[%s24160_s11 + $0x1128] sm:$0xff]  ;;  %v16477_v26 = vcombine.high %v16283_v12, %v16287_v6  ;;  %v16612_v57 = vcombine.low %v16419_v47, %v16423_v5  ;;  %v16476_v39 = vcombine.low %v16283_v12, %v16287_v6 }
 0xde4   :  { %v16435_v21 = vld [vmem:[%s24160_s11 + $0x1148] sm:$0xff] }
 0xdf9   :  { %v11793_v52 = vpop.f32.mrb[64].mxu1 }
 0xdfa   :  { %v11794_v32 = vadd.f32 %v11793_v52, %v23208_v51  ;;  %v11795_v28 = vpop.f32.mrb[65].mxu1  ;;  %v16439_v52 = vld [vmem:[%s24160_s11 + $0x1168] sm:$0xff] }
 0xdfb   :  { %v11796_v48 = vadd.f32 %v11795_v28, %v23210_v41  ;;  %v11797_v15 = vpop.f32.mrb[66].mxu1  ;;  %v16403_v41 = vld [vmem:[%s24160_s11 + $0x1048] sm:$0xff]  ;;  %v16620_v28 = vcombine.low %v16427_v55, %v16431_v19 }
 0xdfc   :  { %v11798_v17 = vpop.f32.mrb[67].mxu1  ;;  %v16597_v9 = vcombine.high %v16403_v41, %v16407_v20  ;;  %v16596_v44 = vcombine.low %v16403_v41, %v16407_v20  ;;  %v16303_v15 = vld [vmem:[%s24160_s11 + $0xd28] sm:$0xff] }
 0xdfd   :  { %v16629_v17 = vcombine.high %v16435_v21, %v16439_v52 }
 0xdff   :  { %v11834_v11 = vpop.f32.mrb[240].mxu0 }
 0xe00   :  { %v23468_v23 = vadd.f32 %v11834_v11, %v11794_v32  ;;  %v11836_v43 = vpop.f32.mrb[241].mxu0  ;;  %v16485_v32 = vcombine.high %v16291_v35, %v16295_v36  ;;  %v16484_v11 = vcombine.low %v16291_v35, %v16295_v36  ;;  %v16331_v35 = vld [vmem:[%s24160_s11 + $0xe08] sm:$0xff] }
 0xe01   :  { %v23470_v61 = vadd.f32 %v11836_v43, %v11796_v48  ;;  %v11838_v50 = vpop.f32.mrb[242].mxu0  ;;  %v16299_v48 = vld [vmem:[%s24160_s11 + $0xd08] sm:$0xff] }
 0xe02   :  { %v11839_v16 = vpop.f32.mrb[243].mxu0  ;;  %v16443_v43 = vld [vmem:[%s24160_s11 + $0x1188] sm:$0xff]  ;;  %v16492_v20 = vcombine.low %v16299_v48, %v16303_v15 }
 0xe03   :  { %v16447_v50 = vld [vmem:[%s24160_s11 + $0x11a8] sm:$0xff]  ;;  %v16493_v16 = vcombine.high %v16299_v48, %v16303_v15 }
 0xe04   :  { %v16637_v41 = vcombine.high %v16443_v43, %v16447_v50  ;;  %v16335_v36 = vld [vmem:[%s24160_s11 + $0xe28] sm:$0xff] }
 0xe05   :  { %v16524_v15 = vcombine.low %v16331_v35, %v16335_v36 }
 0xe19   :  { %v23472_v10 = vpop.f32.mrb[32].mxu1 }
 0xe1a   :  { %v23474_v42 = vpop.f32.mrb[33].mxu1 }
 0xe1b   :  { %v11920_v53 = vpop.f32.mrb[34].mxu1 }
 0xe1c   :  { %v11921_v1 = vpop.f32.mrb[35].mxu1  ;;  %v16628_v53 = vcombine.low %v16435_v21, %v16439_v52  ;;  %v16525_v21 = vcombine.high %v16331_v35, %v16335_v36  ;;  %v16379_v35 = vld [vmem:[%s24160_s11 + $0xf88] sm:$0xff] }
 0xe1d   :  { %v16307_v1 = vld [vmem:[%s24160_s11 + $0xd48] sm:$0xff] }
 0xe1e   :  { %v16383_v36 = vld [vmem:[%s24160_s11 + $0xfa8] sm:$0xff] }
 0xe21   :  { %v11962_v51 = vpop.f32.mrb[36].mxu1 }
 0xe22   :  { %v11964_v38 = vpop.f32.mrb[37].mxu1  ;;  %v23484_v58 = vpack.c.bf16 %v11962_v51, %v11962_v51  ;;  %v16311_v51 = vld [vmem:[%s24160_s11 + $0xd68] sm:$0xff] }
 0xe23   :  { %v23482_v3 = vpack.c.bf16 %v11964_v38, %v11964_v38  ;;  %v11966_v2 = vpop.f32.mrb[38].mxu1  ;;  %v16451_v38 = vld [vmem:[%s24160_s11 + $0x11c8] sm:$0xff]  ;;  %v16500_v54 = vcombine.low %v16307_v1, %v16311_v51 }
 0xe24   :  { %v11967_v40 = vpop.f32.mrb[39].mxu1  ;;  %v16455_v2 = vld [vmem:[%s24160_s11 + $0x11e8] sm:$0xff] }
 0xe25   :  { %13197 = vmatprep.mubr.bf16.mxu1 %v23482_v3  ;;  %v16501_v40 = vcombine.high %v16307_v1, %v16311_v51  ;;  %v16644_v5 = vcombine.low %v16451_v38, %v16455_v2 }
 0xe26   :  { %13198 = vmatmul.mubr.bf16.vlgmr.msra.gmra.mrb[44].mxu1 %v23484_v58 }
 0xe27   :  { %13289 = vmatpush1.bf16.msra.mxu1 %v16588_v49  ;;  %13320 = vmatprep.mubr.bf16.mxu1 %v24176_v4 }
 0xe28   :  { %13290 = vmatprep.subr.bf16.mxu1 %v16597_v9  ;;  %v16636_v9 = vcombine.low %v16443_v43, %v16447_v50 }
 0xe29   :  { %v12003_v46 = vpop.f32.mrb[40].mxu1 }
 0xe2a   :  { %v23507_v49 = vpack.c.bf16 %v12003_v46, %v12003_v46  ;;  %v17110_v27 = vpop.f32.mrb[41].mxu1  ;;  %v16509_v46 = vcombine.high %v16315_v25, %v16319_v59 }
 0xe2b   :  { %13291 = vmatpush1.bf16.msra.mxu1 %v16596_v44  ;;  %v12006_v24 = vpop.f32.mrb[42].mxu1  ;;  %v16645_v44 = vcombine.high %v16451_v38, %v16455_v2  ;;  %v16323_v27 = vld [vmem:[%s24160_s11 + $0xdc8] sm:$0xff] }
 0xe2c   :  { %13239 = vmatmul.mubr.bf16.vlgmr.msra.gmra.mrb[248].mxu0 %v23507_v49  ;;  %13292 = vmatprep.subr.bf16.mxu1 %v16605_v7  ;;  %v17111_v22 = vpop.f32.mrb[43].mxu1  ;;  %v16272_v7 = vld [vmem:[%s24160_s11 + $0xc30] sm:$0xff] }
 0xe2d   :  { %13248 = vmatpush1.bf16.msra.mxu0 %v16460_v14  ;;  %13279 = vmatprep.mubr.bf16.mxu0 %v23482_v3  ;;  %v16621_v14 = vcombine.high %v16427_v55, %v16431_v19  ;;  %v16463_v12 = vcombine.high %v16268_v60, %v16272_v7  ;;  %v16280_v55 = vld [vmem:[%s24160_s11 + $0xc70] sm:$0xff] }
 0xe2e   :  { %13249 = vmatprep.subr.bf16.mxu0 %v16469_v8  ;;  %v16327_v8 = vld [vmem:[%s24160_s11 + $0xde8] sm:$0xff] }
 0xe2f   :  { %13293 = vmatpush1.bf16.msra.mxu1 %v16604_v30 }
 0xe30   :  { %13294 = vmatprep.subr.bf16.mxu1 %v16613_v45  ;;  %v16508_v45 = vcombine.low %v16315_v25, %v16319_v59 }
 0xe31   :  { %13250 = vmatpush1.bf16.msra.mxu0 %v16468_v18  ;;  %v16276_v18 = vld [vmem:[%s24160_s11 + $0xc50] sm:$0xff] }
 0xe32   :  { %13251 = vmatprep.subr.bf16.mxu0 %v16477_v26  ;;  %v16517_v26 = vcombine.high %v16323_v27, %v16327_v8  ;;  %v16470_v52 = vcombine.low %v16276_v18, %v16280_v55 }
 0xe33   :  { %13295 = vmatpush1.bf16.msra.mxu1 %v16612_v57 }
 0xe34   :  { %13296 = vmatprep.subr.bf16.mxu1 %v16621_v14  ;;  %v16471_v14 = vcombine.high %v16276_v18, %v16280_v55  ;;  %v16324_v55 = vld [vmem:[%s24160_s11 + $0xdd0] sm:$0xff] }
 0xe35   :  { %13252 = vmatpush1.bf16.msra.mxu0 %v16476_v39  ;;  %v16284_v39 = vld [vmem:[%s24160_s11 + $0xc90] sm:$0xff] }
 0xe36   :  { %13253 = vmatprep.subr.bf16.mxu0 %v16485_v32  ;;  %v16339_v32 = vld [vmem:[%s24160_s11 + $0xe48] sm:$0xff] }
 0xe37   :  { %13297 = vmatpush1.bf16.msra.mxu1 %v16620_v28  ;;  %v16343_v28 = vld [vmem:[%s24160_s11 + $0xe68] sm:$0xff] }
 0xe38   :  { %13298 = vmatprep.subr.bf16.mxu1 %v16629_v17  ;;  %v16292_v17 = vld [vmem:[%s24160_s11 + $0xcd0] sm:$0xff]  ;;  %v16533_v43 = vcombine.high %v16339_v32, %v16343_v28  ;;  %v16532_v51 = vcombine.low %v16339_v32, %v16343_v28  ;;  %v16387_v32 = vld [vmem:[%s24160_s11 + $0xfc8] sm:$0xff] }
 0xe39   :  { %13254 = vmatpush1.bf16.msra.mxu0 %v16484_v11  ;;  %v16296_v11 = vld [vmem:[%s24160_s11 + $0xcf0] sm:$0xff]  ;;  %v16391_v28 = vld [vmem:[%s24160_s11 + $0xfe8] sm:$0xff] }
 0xe3a   :  { %13255 = vmatprep.subr.bf16.mxu0 %v16493_v16  ;;  %v16347_v16 = vld [vmem:[%s24160_s11 + $0xe88] sm:$0xff]  ;;  %v16487_v1 = vcombine.high %v16292_v17, %v16296_v11  ;;  %v16486_v2 = vcombine.low %v16292_v17, %v16296_v11  ;;  %v16340_v17 = vld [vmem:[%s24160_s11 + $0xe50] sm:$0xff] }
 0xe3b   :  { %13299 = vmatpush1.bf16.msra.mxu1 %v16628_v53  ;;  %v16351_v53 = vld [vmem:[%s24160_s11 + $0xea8] sm:$0xff]  ;;  %v16344_v11 = vld [vmem:[%s24160_s11 + $0xe70] sm:$0xff] }
 0xe3c   :  { %13300 = vmatprep.subr.bf16.mxu1 %v16637_v41  ;;  %v16300_v41 = vld [vmem:[%s24160_s11 + $0xd10] sm:$0xff]  ;;  %v16541_v38 = vcombine.high %v16347_v16, %v16351_v53  ;;  %v16540_v59 = vcombine.low %v16347_v16, %v16351_v53 }
 0xe3d   :  { %13256 = vmatpush1.bf16.msra.mxu0 %v16492_v20  ;;  %v16304_v20 = vld [vmem:[%s24160_s11 + $0xd30] sm:$0xff] }
 0xe3e   :  { %13257 = vmatprep.subr.bf16.mxu0 %v16501_v40  ;;  %v16355_v40 = vld [vmem:[%s24160_s11 + $0xec8] sm:$0xff]  ;;  %v16495_v25 = vcombine.high %v16300_v41, %v16304_v20  ;;  %v16396_v16 = vld [vmem:[%s24160_s11 + $0x1010] sm:$0xff] }
 0xe3f   :  { %13301 = vmatpush1.bf16.msra.mxu1 %v16636_v9  ;;  %v11875_v47 = vpop.f32.mrb[244].mxu0  ;;  %v16359_v9 = vld [vmem:[%s24160_s11 + $0xee8] sm:$0xff]  ;;  %v16400_v53 = vld [vmem:[%s24160_s11 + $0x1030] sm:$0xff] }
 0xe40   :  { %v11876_v24 = vadd.f32 %v11875_v47, %v23333_v62  ;;  %v11877_v30 = vpop.f32.mrb[245].mxu0  ;;  %13302 = vmatprep.subr.bf16.mxu1 %v16645_v44  ;;  %v16308_v44 = vld [vmem:[%s24160_s11 + $0xd50] sm:$0xff]  ;;  %v16367_v47 = vld [vmem:[%s24160_s11 + $0xf28] sm:$0xff] }
 0xe41   :  { %v11878_v6 = vadd.f32 %v11877_v30, %v23336_v29  ;;  %13258 = vmatpush1.bf16.msra.mxu0 %v16500_v54  ;;  %v11879_v22 = vpop.f32.mrb[246].mxu0  ;;  %v16462_v29 = vcombine.low %v16268_v60, %v16272_v7  ;;  %v16312_v54 = vld [vmem:[%s24160_s11 + $0xd70] sm:$0xff]  ;;  %v16549_v60 = vcombine.high %v16355_v40, %v16359_v9  ;;  %v16494_v7 = vcombine.low %v16300_v41, %v16304_v20 }
 0xe42   :  { %v23589_v19 = vadd.f32 %v23472_v10, %v11876_v24  ;;  %v11880_v62 = vpop.f32.mrb[247].mxu0  ;;  %13259 = vmatprep.subr.bf16.mxu0 %v16509_v46  ;;  %v16516_v10 = vcombine.low %v16323_v27, %v16327_v8  ;;  %v16363_v46 = vld [vmem:[%s24160_s11 + $0xf08] sm:$0xff]  ;;  %v16548_v27 = vcombine.low %v16355_v40, %v16359_v9  ;;  %v16316_v8 = vld [vmem:[%s24160_s11 + $0xd90] sm:$0xff] }
 0xe43   :  { %v23592_v57 = vadd.f32 %v23474_v42, %v11878_v6  ;;  %13303 = vmatpush1.bf16.msra.mxu1 %v16644_v5  ;;  %v16288_v42 = vld [vmem:[%s24160_s11 + $0xcb0] sm:$0xff]  ;;  %v16503_v5 = vcombine.high %v16308_v44, %v16312_v54  ;;  %v16557_v30 = vcombine.high %v16363_v46, %v16367_v47  ;;  %v16371_v6 = vld [vmem:[%s24160_s11 + $0xf48] sm:$0xff]  ;;  %v16556_v18 = vcombine.low %v16363_v46, %v16367_v47 }
 0xe44   :  { %13329 = vmatprep.subr.bf16.mxu1 %v16463_v12  ;;  %v16479_v48 = vcombine.high %v16284_v39, %v16288_v42  ;;  %v16478_v50 = vcombine.low %v16284_v39, %v16288_v42  ;;  %v16320_v24 = vld [vmem:[%s24160_s11 + $0xdb0] sm:$0xff]  ;;  %v16502_v12 = vcombine.low %v16308_v44, %v16312_v54  ;;  %v16375_v22 = vld [vmem:[%s24160_s11 + $0xf68] sm:$0xff] }
 0xe45   :  { %13260 = vmatpush1.bf16.msra.mxu0 %v16508_v45  ;;  %v16511_v45 = vcombine.high %v16316_v8, %v16320_v24  ;;  %v16328_v62 = vld [vmem:[%s24160_s11 + $0xdf0] sm:$0xff] }
 0xe46   :  { %13321 = vmatmul.mubr.bf16.vlgmr.msra.gmra.mrb[48].mxu1 %v23507_v49  ;;  %13261 = vmatprep.subr.bf16.mxu0 %v16517_v26  ;;  %v16565_v26 = vcombine.high %v16371_v6, %v16375_v22  ;;  %v16332_v39 = vld [vmem:[%s24160_s11 + $0xe10] sm:$0xff] }
 0xe47   :  { %13330 = vmatpush1.bf16.msra.mxu1 %v16462_v29  ;;  %13361 = vmatprep.mubr.bf16.mxu1 %v23482_v3  ;;  %v16510_v29 = vcombine.low %v16316_v8, %v16320_v24  ;;  %v16336_v42 = vld [vmem:[%s24160_s11 + $0xe30] sm:$0xff] }
 0xe48   :  { %13331 = vmatprep.subr.bf16.mxu1 %v16471_v14  ;;  %v16519_v14 = vcombine.high %v16324_v55, %v16328_v62  ;;  %v16348_v41 = vld [vmem:[%s24160_s11 + $0xe90] sm:$0xff] }
 0xe49   :  { %13262 = vmatpush1.bf16.msra.mxu0 %v16516_v10  ;;  %v16564_v10 = vcombine.low %v16371_v6, %v16375_v22  ;;  %v16352_v20 = vld [vmem:[%s24160_s11 + $0xeb0] sm:$0xff] }
 0xe4a   :  { %13263 = vmatprep.subr.bf16.mxu0 %v16525_v21  ;;  %v16573_v21 = vcombine.high %v16379_v35, %v16383_v36  ;;  %v16404_v40 = vld [vmem:[%s24160_s11 + $0x1050] sm:$0xff] }
 0xe4b   :  { %13332 = vmatpush1.bf16.msra.mxu1 %v16470_v52  ;;  %v16518_v52 = vcombine.low %v16324_v55, %v16328_v62  ;;  %v16408_v9 = vld [vmem:[%s24160_s11 + $0x1070] sm:$0xff] }
 0xe4c   :  { %13333 = vmatprep.subr.bf16.mxu1 %v16479_v48  ;;  %v16527_v48 = vcombine.high %v16332_v39, %v16336_v42  ;;  %v16356_v44 = vld [vmem:[%s24160_s11 + $0xed0] sm:$0xff] }
 0xe4d   :  { %13264 = vmatpush1.bf16.msra.mxu0 %v16524_v15  ;;  %v16572_v15 = vcombine.low %v16379_v35, %v16383_v36  ;;  %v16360_v54 = vld [vmem:[%s24160_s11 + $0xef0] sm:$0xff] }
 0xe4e   :  { %13265 = vmatprep.subr.bf16.mxu0 %v16533_v43  ;;  %v16581_v43 = vcombine.high %v16387_v32, %v16391_v28  ;;  %v16412_v46 = vld [vmem:[%s24160_s11 + $0x1090] sm:$0xff] }
 0xe4f   :  { %13334 = vmatpush1.bf16.msra.mxu1 %v16478_v50  ;;  %v16526_v50 = vcombine.low %v16332_v39, %v16336_v42  ;;  %v16416_v47 = vld [vmem:[%s24160_s11 + $0x10b0] sm:$0xff] }
 0xe50   :  { %13335 = vmatprep.subr.bf16.mxu1 %v16487_v1  ;;  %v16535_v1 = vcombine.high %v16340_v17, %v16344_v11  ;;  %v16364_v8 = vld [vmem:[%s24160_s11 + $0xf10] sm:$0xff] }
 0xe51   :  { %13266 = vmatpush1.bf16.msra.mxu0 %v16532_v51  ;;  %v16580_v51 = vcombine.low %v16387_v32, %v16391_v28  ;;  %v16368_v24 = vld [vmem:[%s24160_s11 + $0xf30] sm:$0xff] }
 0xe52   :  { %13267 = vmatprep.subr.bf16.mxu0 %v16541_v38  ;;  %v16591_v38 = vcombine.high %v16396_v16, %v16400_v53  ;;  %v16420_v6 = vld [vmem:[%s24160_s11 + $0x10d0] sm:$0xff] }
 0xe53   :  { %13336 = vmatpush1.bf16.msra.mxu1 %v16486_v2  ;;  %v16534_v2 = vcombine.low %v16340_v17, %v16344_v11  ;;  %v16424_v22 = vld [vmem:[%s24160_s11 + $0x10f0] sm:$0xff] }
 0xe54   :  { %13337 = vmatprep.subr.bf16.mxu1 %v16495_v25  ;;  %v16543_v25 = vcombine.high %v16348_v41, %v16352_v20  ;;  %v16372_v55 = vld [vmem:[%s24160_s11 + $0xf50] sm:$0xff] }
 0xe55   :  { %13268 = vmatpush1.bf16.msra.mxu0 %v16540_v59  ;;  %v16590_v59 = vcombine.low %v16396_v16, %v16400_v53  ;;  %v16376_v62 = vld [vmem:[%s24160_s11 + $0xf70] sm:$0xff] }
 0xe56   :  { %13269 = vmatprep.subr.bf16.mxu0 %v16549_v60  ;;  %v16599_v60 = vcombine.high %v16404_v40, %v16408_v9  ;;  %v16428_v35 = vld [vmem:[%s24160_s11 + $0x1110] sm:$0xff] }
 0xe57   :  { %13338 = vmatpush1.bf16.msra.mxu1 %v16494_v7  ;;  %v16542_v7 = vcombine.low %v16348_v41, %v16352_v20  ;;  %v16432_v36 = vld [vmem:[%s24160_s11 + $0x1130] sm:$0xff]  ;;  %v16397_v41 = vld [vmem:[%s24160_s11 + $0x1018] sm:$0xff] }
 0xe58   :  { %13339 = vmatprep.subr.bf16.mxu1 %v16503_v5  ;;  %v16551_v5 = vcombine.high %v16356_v44, %v16360_v54  ;;  %v16380_v39 = vld [vmem:[%s24160_s11 + $0xf90] sm:$0xff]  ;;  %v16401_v20 = vld [vmem:[%s24160_s11 + $0x1038] sm:$0xff] }
 0xe59   :  { %13270 = vmatpush1.bf16.msra.mxu0 %v16548_v27  ;;  %v16598_v27 = vcombine.low %v16404_v40, %v16408_v9  ;;  %v16384_v42 = vld [vmem:[%s24160_s11 + $0xfb0] sm:$0xff] }
 0xe5a   :  { %13271 = vmatprep.subr.bf16.mxu0 %v16557_v30  ;;  %v16607_v30 = vcombine.high %v16412_v46, %v16416_v47  ;;  %v16436_v32 = vld [vmem:[%s24160_s11 + $0x1150] sm:$0xff] }
 0xe5b   :  { %13340 = vmatpush1.bf16.msra.mxu1 %v16502_v12  ;;  %v16550_v12 = vcombine.low %v16356_v44, %v16360_v54  ;;  %v16440_v28 = vld [vmem:[%s24160_s11 + $0x1170] sm:$0xff]  ;;  %v16405_v44 = vld [vmem:[%s24160_s11 + $0x1058] sm:$0xff] }
 0xe5c   :  { %13341 = vmatprep.subr.bf16.mxu1 %v16511_v45  ;;  %v16559_v45 = vcombine.high %v16364_v8, %v16368_v24  ;;  %v16388_v17 = vld [vmem:[%s24160_s11 + $0xfd0] sm:$0xff]  ;;  %v16409_v54 = vld [vmem:[%s24160_s11 + $0x1078] sm:$0xff] }
 0xe5d   :  { %13272 = vmatpush1.bf16.msra.mxu0 %v16556_v18  ;;  %v16606_v18 = vcombine.low %v16412_v46, %v16416_v47  ;;  %v16392_v11 = vld [vmem:[%s24160_s11 + $0xff0] sm:$0xff]  ;;  %v16269_v46 = vld [vmem:[%s24160_s11 + $0xc18] sm:$0xff] }
 0xe5e   :  { %13273 = vmatprep.subr.bf16.mxu0 %v16565_v26  ;;  %v16615_v26 = vcombine.high %v16420_v6, %v16424_v22  ;;  %v16444_v16 = vld [vmem:[%s24160_s11 + $0x1190] sm:$0xff]  ;;  %v16273_v47 = vld [vmem:[%s24160_s11 + $0xc38] sm:$0xff] }
 0xe5f   :  { %13342 = vmatpush1.bf16.msra.mxu1 %v16510_v29  ;;  %v16558_v29 = vcombine.low %v16364_v8, %v16368_v24  ;;  %v16448_v53 = vld [vmem:[%s24160_s11 + $0x11b0] sm:$0xff]  ;;  %v16413_v8 = vld [vmem:[%s24160_s11 + $0x1098] sm:$0xff] }
 0xe60   :  { %13343 = vmatprep.subr.bf16.mxu1 %v16519_v14  ;;  %v16567_v14 = vcombine.high %v16372_v55, %v16376_v62  ;;  %v16452_v40 = vld [vmem:[%s24160_s11 + $0x11d0] sm:$0xff]  ;;  %v16417_v24 = vld [vmem:[%s24160_s11 + $0x10b8] sm:$0xff] }
 0xe61   :  { %13274 = vmatpush1.bf16.msra.mxu0 %v16564_v10  ;;  %v16614_v10 = vcombine.low %v16420_v6, %v16424_v22  ;;  %v16456_v9 = vld [vmem:[%s24160_s11 + $0x11f0] sm:$0xff]  ;;  %v16277_v6 = vld [vmem:[%s24160_s11 + $0xc58] sm:$0xff] }
 0xe62   :  { %13275 = vmatprep.subr.bf16.mxu0 %v16573_v21  ;;  %v16623_v21 = vcombine.high %v16428_v35, %v16432_v36  ;;  %v16281_v22 = vld [vmem:[%s24160_s11 + $0xc78] sm:$0xff] }
 0xe63   :  { %13344 = vmatpush1.bf16.msra.mxu1 %v16518_v52  ;;  %v16566_v52 = vcombine.low %v16372_v55, %v16376_v62  ;;  %v16421_v55 = vld [vmem:[%s24160_s11 + $0x10d8] sm:$0xff] }
 0xe64   :  { %13345 = vmatprep.subr.bf16.mxu1 %v16527_v48  ;;  %v16575_v48 = vcombine.high %v16380_v39, %v16384_v42  ;;  %v16425_v62 = vld [vmem:[%s24160_s11 + $0x10f8] sm:$0xff] }
 0xe65   :  { %13276 = vmatpush1.bf16.msra.mxu0 %v16572_v15  ;;  %v16622_v15 = vcombine.low %v16428_v35, %v16432_v36  ;;  %v16289_v35 = vld [vmem:[%s24160_s11 + $0xcb8] sm:$0xff]  ;;  %v16617_v36 = vcombine.high %v16421_v55, %v16425_v62 }
 0xe66   :  { %13277 = vmatprep.subr.bf16.mxu0 %v16581_v43  ;;  %v16631_v43 = vcombine.high %v16436_v32, %v16440_v28 }
 0xe67   :  { %13346 = vmatpush1.bf16.msra.mxu1 %v16526_v50  ;;  %v16574_v50 = vcombine.low %v16380_v39, %v16384_v42  ;;  %v16433_v39 = vld [vmem:[%s24160_s11 + $0x1138] sm:$0xff] }
 0xe68   :  { %13347 = vmatprep.subr.bf16.mxu1 %v16535_v1  ;;  %v16583_v1 = vcombine.high %v16388_v17, %v16392_v11 }
 0xe69   :  { %13278 = vmatpush1.bf16.msra.mxu0 %v16580_v51  ;;  %v16630_v51 = vcombine.low %v16436_v32, %v16440_v28 }
 0xe6a   :  { %13370 = vmatprep.subr.bf16.mxu0 %v16591_v38  ;;  %v16639_v38 = vcombine.high %v16444_v16, %v16448_v53 }
 0xe6b   :  { %13348 = vmatpush1.bf16.msra.mxu1 %v16534_v2  ;;  %v16582_v2 = vcombine.low %v16388_v17, %v16392_v11 }
 0xe6c   :  { %13280 = vmatmul.mubr.bf16.vlgmr.msra.gmra.mrb[252].mxu0 %v23484_v58  ;;  %13349 = vmatprep.subr.bf16.mxu1 %v16543_v25  ;;  %v16593_v25 = vcombine.high %v16397_v41, %v16401_v20 }
 0xe6d   :  { %13371 = vmatpush1.bf16.msra.mxu0 %v16590_v59  ;;  %13402 = vmatprep.mubr.bf16.mxu0 %v24176_v4  ;;  %v16638_v59 = vcombine.low %v16444_v16, %v16448_v53 }
 0xe6e   :  { %13372 = vmatprep.subr.bf16.mxu0 %v16599_v60  ;;  %v16647_v60 = vcombine.high %v16452_v40, %v16456_v9 }
 0xe6f   :  { %13350 = vmatpush1.bf16.msra.mxu1 %v16542_v7  ;;  %v16592_v7 = vcombine.low %v16397_v41, %v16401_v20 }
 0xe70   :  { %13351 = vmatprep.subr.bf16.mxu1 %v16551_v5  ;;  %v16601_v5 = vcombine.high %v16405_v44, %v16409_v54 }
 0xe71   :  { %13373 = vmatpush1.bf16.msra.mxu0 %v16598_v27  ;;  %v16646_v27 = vcombine.low %v16452_v40, %v16456_v9 }
 0xe72   :  { %13374 = vmatprep.subr.bf16.mxu0 %v16607_v30  ;;  %v16465_v30 = vcombine.high %v16269_v46, %v16273_v47 }
 0xe73   :  { %13352 = vmatpush1.bf16.msra.mxu1 %v16550_v12  ;;  %v16600_v12 = vcombine.low %v16405_v44, %v16409_v54 }
 0xe74   :  { %13353 = vmatprep.subr.bf16.mxu1 %v16559_v45  ;;  %v16609_v45 = vcombine.high %v16413_v8, %v16417_v24 }
 0xe75   :  { %13375 = vmatpush1.bf16.msra.mxu0 %v16606_v18  ;;  %v16464_v18 = vcombine.low %v16269_v46, %v16273_v47 }
 0xe76   :  { %13376 = vmatprep.subr.bf16.mxu0 %v16615_v26  ;;  %v16473_v26 = vcombine.high %v16277_v6, %v16281_v22 }
 0xe77   :  { %13354 = vmatpush1.bf16.msra.mxu1 %v16558_v29  ;;  %v16608_v29 = vcombine.low %v16413_v8, %v16417_v24  ;;  %v16325_v8 = vld [vmem:[%s24160_s11 + $0xdd8] sm:$0xff] }
 0xe78   :  { %13355 = vmatprep.subr.bf16.mxu1 %v16567_v14  ;;  %v16472_v14 = vcombine.low %v16277_v6, %v16281_v22  ;;  %v16329_v24 = vld [vmem:[%s24160_s11 + $0xdf8] sm:$0xff] }
 0xe79   :  { %13377 = vmatpush1.bf16.msra.mxu0 %v16614_v10  ;;  %v16429_v10 = vld [vmem:[%s24160_s11 + $0x1118] sm:$0xff]  ;;  %v16521_v6 = vcombine.high %v16325_v8, %v16329_v24 }
 0xe7a   :  { %13378 = vmatprep.subr.bf16.mxu0 %v16623_v21  ;;  %v16616_v21 = vcombine.low %v16421_v55, %v16425_v62  ;;  %v16625_v32 = vcombine.high %v16429_v10, %v16433_v39  ;;  %v16624_v11 = vcombine.low %v16429_v10, %v16433_v39  ;;  %v16333_v22 = vld [vmem:[%s24160_s11 + $0xe18] sm:$0xff]  ;;  %v18467_v55 = vld [vmem:[%s24162_s13 + $0x48] sm:$0xff]   ;;  %v16520_v62 = vcombine.low %v16325_v8, %v16329_v24 }
 0xe7b   :  { %13356 = vmatpush1.bf16.msra.mxu1 %v16566_v52  ;;  %v16293_v52 = vld [vmem:[%s24160_s11 + $0xcd8] sm:$0xff] }
 0xe7c   :  { %13357 = vmatprep.subr.bf16.mxu1 %v16575_v48  ;;  %v16437_v48 = vld [vmem:[%s24160_s11 + $0x1158] sm:$0xff] }
 0xe7d   :  { %13379 = vmatpush1.bf16.msra.mxu0 %v16622_v15  ;;  %v16441_v15 = vld [vmem:[%s24160_s11 + $0x1178] sm:$0xff] }
 0xe7e   :  { %13380 = vmatprep.subr.bf16.mxu0 %v16631_v43  ;;  %v16301_v43 = vld [vmem:[%s24160_s11 + $0xd18] sm:$0xff]  ;;  %v16633_v16 = vcombine.high %v16437_v48, %v16441_v15  ;;  %v16632_v20 = vcombine.low %v16437_v48, %v16441_v15  ;;  %v18473_v15 = vld [vmem:[%s24162_s13 + $0x60] sm:$0xff]  }
 0xe7f   :  { %13358 = vmatpush1.bf16.msra.mxu1 %v16574_v50  ;;  %v16305_v50 = vld [vmem:[%s24160_s11 + $0xd38] sm:$0xff] }
 0xe80   :  { %13359 = vmatprep.subr.bf16.mxu1 %v16583_v1  ;;  %v16445_v1 = vld [vmem:[%s24160_s11 + $0x1198] sm:$0xff]  ;;  %v16497_v41 = vcombine.high %v16301_v43, %v16305_v50  ;;  %v16496_v9 = vcombine.low %v16301_v43, %v16305_v50 }
 0xe81   :  { %13381 = vmatpush1.bf16.msra.mxu0 %v16630_v51  ;;  %v16449_v51 = vld [vmem:[%s24160_s11 + $0x11b8] sm:$0xff] }
 0xe82   :  { %13382 = vmatprep.subr.bf16.mxu0 %v16639_v38  ;;  %v16309_v38 = vld [vmem:[%s24160_s11 + $0xd58] sm:$0xff]  ;;  %v16641_v40 = vcombine.high %v16445_v1, %v16449_v51  ;;  %v16640_v54 = vcombine.low %v16445_v1, %v16449_v51 }
 0xe83   :  { %13360 = vmatpush1.bf16.msra.mxu1 %v16582_v2  ;;  %v16313_v2 = vld [vmem:[%s24160_s11 + $0xd78] sm:$0xff] }
 0xe84   :  { %13452 = vmatprep.subr.bf16.mxu1 %v16593_v25  ;;  %v16453_v25 = vld [vmem:[%s24160_s11 + $0x11d8] sm:$0xff]  ;;  %v16505_v44 = vcombine.high %v16309_v38, %v16313_v2  ;;  %v16504_v47 = vcombine.low %v16309_v38, %v16313_v2  ;;  %v18476_v38 = vld [vmem:[%s24162_s13 + $0x28] sm:$0xff]   ;;  %v18477_v2 = vld [vmem:[%s24162_s13 + $0x70] sm:$0xff]  }
 0xe85   :  { %13383 = vmatpush1.bf16.msra.mxu0 %v16638_v59  ;;  %v16457_v59 = vld [vmem:[%s24160_s11 + $0x11f8] sm:$0xff] }
 0xe86   :  { %13362 = vmatmul.mubr.bf16.vlgmr.msra.gmra.mrb[52].mxu1 %v23484_v58  ;;  %13384 = vmatprep.subr.bf16.mxu0 %v16647_v60  ;;  %v16317_v60 = vld [vmem:[%s24160_s11 + $0xd98] sm:$0xff]  ;;  %v16649_v46 = vcombine.high %v16453_v25, %v16457_v59 }
 0xe87   :  { %13453 = vmatpush1.bf16.msra.mxu1 %v16592_v7  ;;  %13484 = vmatprep.mubr.bf16.mxu1 %v24176_v4  ;;  %v16285_v4 = vld [vmem:[%s24160_s11 + $0xc98] sm:$0xff] }
 0xe88   :  { %13454 = vmatprep.subr.bf16.mxu1 %v16601_v5  ;;  %v16481_v42 = vcombine.high %v16285_v4, %v16289_v35  ;;  %v16480_v28 = vcombine.low %v16285_v4, %v16289_v35  ;;  %v16321_v7 = vld [vmem:[%s24160_s11 + $0xdb8] sm:$0xff]  ;;  %v18468_v35 = vld [vmem:[%s24162_s13 + $0x8] sm:$0xff]  }
 0xe89   :  { %13385 = vmatpush1.bf16.msra.mxu0 %v16646_v27  ;;  %v16513_v5 = vcombine.high %v16317_v60, %v16321_v7  ;;  %v16648_v27 = vcombine.low %v16453_v25, %v16457_v59  ;;  %v16345_v4 = vld [vmem:[%s24160_s11 + $0xe78] sm:$0xff] }
 0xe8a   :  { %13411 = vmatprep.subr.bf16.mxu0 %v16465_v30  ;;  %v18465_v30 = vld [vmem:[%s24162_s13 + $0x40] sm:$0xff]   ;;  %v16349_v10 = vld [vmem:[%s24160_s11 + $0xe98] sm:$0xff] }
 0xe8b   :  { %13455 = vmatpush1.bf16.msra.mxu1 %v16600_v12  ;;  %v16512_v12 = vcombine.low %v16317_v60, %v16321_v7  ;;  %v16353_v39 = vld [vmem:[%s24160_s11 + $0xeb8] sm:$0xff] }
 0xe8c   :  { %13403 = vmatmul.mubr.bf16.vlgmr.msra.gmra.mrb[0].mxu0 %v23507_v49  ;;  %13456 = vmatprep.subr.bf16.mxu1 %v16609_v45  ;;  %v16337_v45 = vld [vmem:[%s24160_s11 + $0xe38] sm:$0xff] }
 0xe8d   :  { %13412 = vmatpush1.bf16.msra.mxu0 %v16464_v18  ;;  %13443 = vmatprep.mubr.bf16.mxu0 %v23482_v3  ;;  %v16297_v3 = vld [vmem:[%s24160_s11 + $0xcf8] sm:$0xff]  ;;  %v18466_v18 = vld [vmem:[%s24162_s13] sm:$0xff]  }
 0xe8e   :  { %13413 = vmatprep.subr.bf16.mxu0 %v16473_v26  ;;  %v16489_v17 = vcombine.high %v16293_v52, %v16297_v3  ;;  %v16488_v53 = vcombine.low %v16293_v52, %v16297_v3  ;;  %v16529_v26 = vcombine.high %v16333_v22, %v16337_v45  ;;  %v16545_v3 = vcombine.high %v16349_v10, %v16353_v39  ;;  %v18472_v48 = vld [vmem:[%s24162_s13 + $0x18] sm:$0xff]  }
 0xe8f   :  { %13457 = vmatpush1.bf16.msra.mxu1 %v16608_v29  ;;  %v16341_v29 = vld [vmem:[%s24160_s11 + $0xe58] sm:$0xff] }
 0xe90   :  { %13458 = vmatprep.subr.bf16.mxu1 %v16617_v36  ;;  %v16528_v36 = vcombine.low %v16333_v22, %v16337_v45  ;;  %v16536_v52 = vcombine.low %v16341_v29, %v16345_v4  ;;  %v16365_v43 = vld [vmem:[%s24160_s11 + $0xf18] sm:$0xff]  ;;  %v18497_v22 = vld [vmem:[%s24162_s13 + $0x140] sm:$0xff]   ;;  %v18484_v45 = vld [vmem:[%s24162_s13 + $0x88] sm:$0xff]  }
 0xe91   :  { %13414 = vmatpush1.bf16.msra.mxu0 %v16472_v14  ;;  %v16537_v14 = vcombine.high %v16341_v29, %v16345_v4  ;;  %v16369_v50 = vld [vmem:[%s24160_s11 + $0xf38] sm:$0xff]  ;;  %v18490_v29 = vld [vmem:[%s24162_s13 + $0xa0] sm:$0xff]   ;;  %v18491_v4 = vld [vmem:[%s24162_s13 + $0xe8] sm:$0xff]  }
 0xe92   :  { %13415 = vmatprep.subr.bf16.mxu0 %v16481_v42  ;;  %v18470_v42 = vld [vmem:[%s24162_s13 + $0x10] sm:$0xff]   ;;  %v16561_v51 = vcombine.high %v16365_v43, %v16369_v50  ;;  %v16381_v25 = vld [vmem:[%s24160_s11 + $0xf98] sm:$0xff] }
 0xe93   :  { %13459 = vmatpush1.bf16.msra.mxu1 %v16616_v21  ;;  %v18471_v21 = vld [vmem:[%s24162_s13 + $0x58] sm:$0xff]  }
 0xe94   :  { %13460 = vmatprep.subr.bf16.mxu1 %v16625_v32  ;;  %v16357_v32 = vld [vmem:[%s24160_s11 + $0xed8] sm:$0xff] }
 0xe95   :  { %13416 = vmatpush1.bf16.msra.mxu0 %v16480_v28  ;;  %v16361_v28 = vld [vmem:[%s24160_s11 + $0xef8] sm:$0xff] }
 0xe96   :  { %13417 = vmatprep.subr.bf16.mxu0 %v16489_v17  ;;  %v16544_v17 = vcombine.low %v16349_v10, %v16353_v39  ;;  %v16552_v1 = vcombine.low %v16357_v32, %v16361_v28  ;;  %v16385_v59 = vld [vmem:[%s24160_s11 + $0xfb8] sm:$0xff] }
 0xe97   :  { %13461 = vmatpush1.bf16.msra.mxu1 %v16624_v11  ;;  %v16553_v11 = vcombine.high %v16357_v32, %v16361_v28  ;;  %v16577_v7 = vcombine.high %v16381_v25, %v16385_v59  ;;  %v18496_v10 = vld [vmem:[%s24162_s13 + $0xb8] sm:$0xff]  }
 0xe98   :  { %13462 = vmatprep.subr.bf16.mxu1 %v16633_v16  ;;  %v18474_v16 = vld [vmem:[%s24162_s13 + $0x20] sm:$0xff]   ;;  %v24030_v32 = vld [vmem:[#allocation10] sm:$0xff] }
 0xe99   :  { %13418 = vmatpush1.bf16.msra.mxu0 %v16488_v53  ;;  %v18475_v53 = vld [vmem:[%s24162_s13 + $0x68] sm:$0xff]  }
 0xe9a   :  { %13419 = vmatprep.subr.bf16.mxu0 %v16497_v41  ;;  %v16373_v41 = vld [vmem:[%s24160_s11 + $0xf58] sm:$0xff] }
 0xe9b   :  { %13463 = vmatpush1.bf16.msra.mxu1 %v16632_v20  ;;  %v16377_v20 = vld [vmem:[%s24160_s11 + $0xf78] sm:$0xff] }
 0xe9c   :  { %13464 = vmatprep.subr.bf16.mxu1 %v16641_v40  ;;  %v16560_v40 = vcombine.low %v16365_v43, %v16369_v50  ;;  %v16568_v60 = vcombine.low %v16373_v41, %v16377_v20  ;;  %v13510_v43 = vrot.slane %v24030_v32, %v24177_v13  ;;  %v18499_v13 = vld [vmem:[%s24162_s13 + $0x148] sm:$0xff]  }
 0xe9d   :  { %13420 = vmatpush1.bf16.msra.mxu0 %v16496_v9  ;;  %v16569_v9 = vcombine.high %v16373_v41, %v16377_v20 }
 0xe9e   :  { %13421 = vmatprep.subr.bf16.mxu0 %v16505_v44  ;;  %v18478_v44 = vld [vmem:[%s24162_s13 + $0x30] sm:$0xff]  }
 0xe9f   :  { %13465 = vmatpush1.bf16.msra.mxu1 %v16640_v54  ;;  %v18479_v54 = vld [vmem:[%s24162_s13 + $0x78] sm:$0xff]  }
 0xea0   :  { %13466 = vmatprep.subr.bf16.mxu1 %v16649_v46  ;;  %v16389_v46 = vld [vmem:[%s24160_s11 + $0xfd8] sm:$0xff] }
 0xea1   :  { %13422 = vmatpush1.bf16.msra.mxu0 %v16504_v47  ;;  %v16393_v47 = vld [vmem:[%s24160_s11 + $0xff8] sm:$0xff] }
 0xea2   :  { %13423 = vmatprep.subr.bf16.mxu0 %v16513_v5  ;;  %v18480_v5 = vld [vmem:[%s24162_s13 + $0x38] sm:$0xff]   ;;  %v16585_v8 = vcombine.high %v16389_v46, %v16393_v47  ;;  %v16584_v24 = vcombine.low %v16389_v46, %v16393_v47  ;;  %v18507_v46 = vld [vmem:[%s24162_s13 + $0x168] sm:$0xff]  }
 0xea3   :  { %13467 = vmatpush1.bf16.msra.mxu1 %v16648_v27  ;;  %v16576_v27 = vcombine.low %v16381_v25, %v16385_v59  ;;  %v18503_v25 = vld [vmem:[%s24162_s13 + $0x158] sm:$0xff]  }
 0xea4   :  { %17000 = vmatprep.subr.bf16.mxu1 %v18465_v30  ;;  %v18481_v30 = vld [vmem:[%s24162_s13 + $0xc0] sm:$0xff]   ;;  %v18504_v59 = vld [vmem:[%s24162_s13 + $0x118] sm:$0xff]  }
 0xea5   :  { %13424 = vmatpush1.bf16.msra.mxu0 %v16512_v12  ;;  %v18482_v12 = vld [vmem:[%s24162_s13 + $0x80] sm:$0xff]  }
 0xea6   :  { %13485 = vmatmul.mubr.bf16.vlgmr.msra.gmra.mrb[56].mxu1 %v23507_v49  ;;  %13425 = vmatprep.subr.bf16.mxu0 %v16521_v6  ;;  %v18469_v49 = vld [vmem:[%s24162_s13 + $0x50] sm:$0xff]   ;;  %v18483_v6 = vld [vmem:[%s24162_s13 + $0xc8] sm:$0xff]  }
 0xea7   :  { %17001 = vmatpush3.bf16.msra.mxu1 %v18466_v18  ;;  %v18485_v18 = vld [vmem:[%s24162_s13 + $0xd0] sm:$0xff]  }
 0xea8   :  { %17002 = vmatprep.subr.bf16.mxu1 %v18467_v55  ;;  %v18486_v55 = vld [vmem:[%s24162_s13 + $0x90] sm:$0xff]  }
 0xea9   :  { %13426 = vmatpush1.bf16.msra.mxu0 %v16520_v62  ;;  %v18488_v62 = vld [vmem:[%s24162_s13 + $0x98] sm:$0xff]  }
 0xeaa   :  { %13427 = vmatprep.subr.bf16.mxu0 %v16529_v26  ;;  %v18489_v26 = vld [vmem:[%s24162_s13 + $0xe0] sm:$0xff]  }
 0xeab   :  { %17003 = vmatpush3.bf16.msra.mxu1 %v18468_v35  ;;  %v18492_v35 = vld [vmem:[%s24162_s13 + $0xa8] sm:$0xff]  }
 0xeac   :  { %17004 = vmatprep.subr.bf16.mxu1 %v18469_v49  ;;  %v18493_v49 = vld [vmem:[%s24162_s13 + $0xf0] sm:$0xff]  }
 0xead   :  { %13428 = vmatpush1.bf16.msra.mxu0 %v16528_v36  ;;  %v18494_v36 = vld [vmem:[%s24162_s13 + $0xb0] sm:$0xff]  }
 0xeae   :  { %13429 = vmatprep.subr.bf16.mxu0 %v16537_v14  ;;  %v18495_v14 = vld [vmem:[%s24162_s13 + $0xf8] sm:$0xff]  }
 0xeaf   :  { %17005 = vmatpush3.bf16.msra.mxu1 %v18470_v42 }
 0xeb0   :  { %17006 = vmatprep.subr.bf16.mxu1 %v18471_v21 }
 0xeb1   :  { %13430 = vmatpush1.bf16.msra.mxu0 %v16536_v52 }
 0xeb2   :  { %13431 = vmatprep.subr.bf16.mxu0 %v16545_v3  ;;  %v18513_v3 = vld [vmem:[%s24162_s13 + $0x1c0] sm:$0xff]  }
 0xeb3   :  { %17007 = vmatpush3.bf16.msra.mxu1 %v18472_v48 }
 0xeb4   :  { %17008 = vmatprep.subr.bf16.mxu1 %v18473_v15  ;;  %v13506_v15 = vrot.slane %v24030_v32, %v19352_v33  ;;  %v18498_v33 = vld [vmem:[%s24162_s13 + $0x100] sm:$0xff]  }
 0xeb5   :  { %13432 = vmatpush1.bf16.msra.mxu0 %v16544_v17 }
 0xeb6   :  { %13433 = vmatprep.subr.bf16.mxu0 %v16553_v11 }
 0xeb7   :  { %17009 = vmatpush3.bf16.msra.mxu1 %v18474_v16 }
 0xeb8   :  { %17010 = vmatprep.subr.bf16.mxu1 %v18475_v53 }
 0xeb9   :  { %13434 = vmatpush1.bf16.msra.mxu0 %v16552_v1 }
 0xeba   :  { %13435 = vmatprep.subr.bf16.mxu0 %v16561_v51 }
 0xebb   :  { %17011 = vmatpush3.bf16.msra.mxu1 %v18476_v38 }
 0xebc   :  { %17012 = vmatprep.subr.bf16.mxu1 %v18477_v2 }
 0xebd   :  { %13436 = vmatpush1.bf16.msra.mxu0 %v16560_v40 }
 0xebe   :  { %13437 = vmatprep.subr.bf16.mxu0 %v16569_v9  ;;  %v18502_v9 = vld [vmem:[%s24162_s13 + $0x110] sm:$0xff]  }
 0xebf   :  { %17013 = vmatpush3.bf16.msra.mxu1 %v18478_v44  ;;  %v18505_v44 = vld [vmem:[%s24162_s13 + $0x160] sm:$0xff]  }
 0xec0   :  { %17014 = vmatprep.subr.bf16.mxu1 %v18479_v54 }
 0xec1   :  { %13438 = vmatpush1.bf16.msra.mxu0 %v16568_v60  ;;  %v18506_v60 = vld [vmem:[%s24162_s13 + $0x120] sm:$0xff]  }
 0xec2   :  { %13439 = vmatprep.subr.bf16.mxu0 %v16577_v7 }
 0xec3   :  { %17015 = vmatpush3.bf16.msra.mxu1 %v18480_v5 }
 0xec4   :  { %17044 = vmatprep.subr.bf16.mxu1 %v18497_v22 }
 0xec5   :  { %13440 = vmatpush1.bf16.msra.mxu0 %v16576_v27  ;;  %v18508_v27 = vld [vmem:[%s24162_s13 + $0x128] sm:$0xff]  }
 0xec6   :  { %13441 = vmatprep.subr.bf16.mxu0 %v16585_v8  ;;  %v18509_v8 = vld [vmem:[%s24162_s13 + $0x170] sm:$0xff]  }
 0xec9   :  { %13442 = vmatpush1.bf16.msra.mxu0 %v16584_v24  ;;  %v18510_v24 = vld [vmem:[%s24162_s13 + $0x130] sm:$0xff]  }
 0xeca   :  { %17022 = vmatprep.subr.bf16.mxu0 %v18481_v30  ;;  %v18511_v30 = vld [vmem:[%s24162_s13 + $0x178] sm:$0xff]  }
 0xecc   :  { %13444 = vmatmul.mubr.bf16.vlgmr.msra.gmra.mrb[4].mxu0 %v23484_v58  ;;  %v18487_v58 = vld [vmem:[%s24162_s13 + $0xd8] sm:$0xff]  }
 0xecd   :  { %17023 = vmatpush3.bf16.msra.mxu0 %v18482_v12  ;;  %v18512_v12 = vld [vmem:[%s24162_s13 + $0x138] sm:$0xff]  }
 0xece   :  { %17024 = vmatprep.subr.bf16.mxu0 %v18483_v6 }
 0xed1   :  { %17025 = vmatpush3.bf16.msra.mxu0 %v18484_v45  ;;  %v13514_v45 = vrot.slane %v24030_v32, %v19355_v34  ;;  %v18514_v34 = vld [vmem:[%s24162_s13 + $0x180] sm:$0xff]  }
 0xed2   :  { %17026 = vmatprep.subr.bf16.mxu0 %v18485_v18 }
 0xed5   :  { %17027 = vmatpush3.bf16.msra.mxu0 %v18486_v55 }
 0xed6   :  { %17028 = vmatprep.subr.bf16.mxu0 %v18487_v58  ;;  %v13518_v58 = vrot.slane %v24030_v32, %v24178_v56  ;;  %v18515_v56 = vld [vmem:[%s24162_s13 + $0x1c8] sm:$0xff]  }
 0xed9   :  { %17029 = vmatpush3.bf16.msra.mxu0 %v18488_v62 }
 0xeda   :  { %17030 = vmatprep.subr.bf16.mxu0 %v18489_v26 }
 0xedd   :  { %17031 = vmatpush3.bf16.msra.mxu0 %v18490_v29 }
 0xede   :  { %17032 = vmatprep.subr.bf16.mxu0 %v18491_v4 }
 0xee1   :  { %17033 = vmatpush3.bf16.msra.mxu0 %v18492_v35 }
 0xee2   :  { %17034 = vmatprep.subr.bf16.mxu0 %v18493_v49 }
 0xee5   :  { %17035 = vmatpush3.bf16.msra.mxu0 %v18494_v36 }
 0xee6   :  { %17036 = vmatprep.subr.bf16.mxu0 %v18495_v14 }
 0xee9   :  { %17037 = vmatpush3.bf16.msra.mxu0 %v18496_v10 }
 0xeea   :  { %17066 = vmatprep.subr.bf16.mxu0 %v18513_v3  ;;  %v18521_v3 = vld [vmem:[%s24162_s13 + $0x1e0] sm:$0xff]  }
 0xef9   :  { %v13199_v39 = vpop.f32.mrb[44].mxu1 }
 0xefa   :  { %v13201_v42 = vpop.f32.mrb[45].mxu1 }
 0xefb   :  { %v13203_v21 = vpop.f32.mrb[46].mxu1 }
 0xefc   :  { %v13204_v52 = vpop.f32.mrb[47].mxu1  ;;  %v18519_v21 = vld [vmem:[%s24162_s13 + $0x1d8] sm:$0xff]  }
 0xefd   :  { %v18520_v52 = vld [vmem:[%s24162_s13 + $0x198] sm:$0xff]  }
 0xeff   :  { %v13240_v28 = vpop.f32.mrb[248].mxu0 }
 0xf00   :  { %v13241_v48 = vadd.f32 %v13240_v28, %v13199_v39  ;;  %v13242_v17 = vpop.f32.mrb[249].mxu0 }
 0xf01   :  { %v13243_v11 = vadd.f32 %v13242_v17, %v13201_v42  ;;  %v13244_v50 = vpop.f32.mrb[250].mxu0  ;;  %v18518_v42 = vld [vmem:[%s24162_s13 + $0x190] sm:$0xff]   ;;  %v18523_v17 = vld [vmem:[%s24162_s13 + $0x1e8] sm:$0xff]  }
 0xf02   :  { %v13493_v16 = vadd.f32 %v13241_v48, %v23424_v31  ;;  %v13245_v53 = vpop.f32.mrb[251].mxu0  ;;  %v18500_v31 = vld [vmem:[%s24162_s13 + $0x108] sm:$0xff]   ;;  %v18522_v48 = vld [vmem:[%s24162_s13 + $0x1a0] sm:$0xff]  }
 0xf03   :  { %v13494_v1 = vadd.f32 %v13243_v11, %v23432_v37  ;;  %v18501_v37 = vld [vmem:[%s24162_s13 + $0x150] sm:$0xff]   ;;  %v24179_v50 = vld [vmem:[#allocation17_spill] sm:$0xff] }
 0xf04   :  { %v13543_v51 = vadd.f32 %v13506_v15, %v13493_v16  ;;  %v13521_v16 = vsub.s32 4, %v24179_v50  ;;  %v13525_v53 = vsub.s32 5, %v24179_v50 }
 0xf05   :  { %v13544_v41 = vadd.f32 %v13510_v43, %v13494_v1  ;;  %v18524_v1 = vld [vmem:[%s24162_s13 + $0x1a8] sm:$0xff]  }
 0xf06   :  { %v13551_v20 = vmax.f32 %v13543_v51, 0.0  ;;  %v18525_v51 = vld [vmem:[%s24162_s13 + $0x1f0] sm:$0xff]  }
 0xf07   :  { %v13552_v38 = vmax.f32 %v13544_v41, 0.0 }
 0xf08   :  { %v13559_v40 = vpack.c.bf16 %v13551_v20, %v13551_v20 }
 0xf09   :  { %v13560_v2 = vpack.c.bf16 %v13552_v38, %v13552_v38  ;;  %v13522_v38 = vrot.slane %v24030_v32, %v13521_v16 }
 0xf0b   :  { %14118 = vmatprep.mubr.bf16.mxu1 %v13560_v2 }
 0xf0c   :  { %14119 = vmatmul.mubr.bf16.vlgmr.msra.gmra.mrb[68].mxu1 %v13559_v40  ;;  %v13526_v40 = vrot.slane %v24030_v32, %v13525_v53 }
 0xf0d   :  { %17045 = vmatpush3.bf16.msra.mxu1 %v18498_v33 }
 0xf0e   :  { %17046 = vmatprep.subr.bf16.mxu1 %v18499_v13 }
 0xf11   :  { %17047 = vmatpush3.bf16.msra.mxu1 %v18500_v31  ;;  %v18526_v31 = vld [vmem:[%s24162_s13 + $0x1b0] sm:$0xff]  }
 0xf12   :  { %17048 = vmatprep.subr.bf16.mxu1 %v18501_v37 }
 0xf15   :  { %17049 = vmatpush3.bf16.msra.mxu1 %v18502_v9 }
 0xf16   :  { %17050 = vmatprep.subr.bf16.mxu1 %v18503_v25  ;;  %v18527_v25 = vld [vmem:[%s24162_s13 + $0x1f8] sm:$0xff]  }
 0xf19   :  { %v13322_v54 = vpop.f32.mrb[48].mxu1  ;;  %17051 = vmatpush3.bf16.msra.mxu1 %v18504_v59 }
 0xf1a   :  { %v13324_v7 = vpop.f32.mrb[49].mxu1  ;;  %17052 = vmatprep.subr.bf16.mxu1 %v18505_v44 }
 0xf1b   :  { %v13326_v47 = vpop.f32.mrb[50].mxu1 }
 0xf1c   :  { %v13327_v5 = vpop.f32.mrb[51].mxu1 }
 0xf1d   :  { %17053 = vmatpush3.bf16.msra.mxu1 %v18506_v60  ;;  %v18528_v60 = vld [vmem:[%s24162_s13 + $0x1b8] sm:$0xff]  }
 0xf1e   :  { %17054 = vmatprep.subr.bf16.mxu1 %v18507_v46 }
 0xf21   :  { %17055 = vmatpush3.bf16.msra.mxu1 %v18508_v27 }
 0xf22   :  { %17056 = vmatprep.subr.bf16.mxu1 %v18509_v8 }
 0xf25   :  { %17057 = vmatpush3.bf16.msra.mxu1 %v18510_v24 }
 0xf26   :  { %17058 = vmatprep.subr.bf16.mxu1 %v18511_v30  ;;  %v13533_v30 = vsub.s32 7, %v24179_v50 }
 0xf29   :  { %17059 = vmatpush3.bf16.msra.mxu1 %v18512_v12 }
 0xf3f   :  { %v13281_v6 = vpop.f32.mrb[252].mxu0 }
 0xf40   :  { %v13323_v22 = vadd.f32 %v13322_v54, %v13281_v6  ;;  %v13283_v18 = vpop.f32.mrb[253].mxu0 }
 0xf41   :  { %v13325_v55 = vadd.f32 %v13324_v7, %v13283_v18  ;;  %v13285_v62 = vpop.f32.mrb[254].mxu0 }
 0xf42   :  { %v13495_v26 = vadd.f32 %v13323_v22, %v23462_v0  ;;  %v13286_v29 = vpop.f32.mrb[255].mxu0  ;;  %v18516_v0 = vld [vmem:[%s24162_s13 + $0x188] sm:$0xff]  }
 0xf43   :  { %v13496_v4 = vadd.f32 %v13325_v55, %v23464_v63  ;;  %v18517_v63 = vld [vmem:[%s24162_s13 + $0x1d0] sm:$0xff]   ;;  %v13534_v55 = vrot.slane %v24030_v32, %v13533_v30 }
 0xf44   :  { %v13545_v35 = vadd.f32 %v13514_v45, %v13495_v26 }
 0xf45   :  { %v13546_v49 = vadd.f32 %v13518_v58, %v13496_v4 }
 0xf46   :  { %v13553_v36 = vmax.f32 %v13545_v35, 0.0 }
 0xf47   :  { %v13554_v14 = vmax.f32 %v13546_v49, 0.0 }
 0xf48   :  { %v13561_v39 = vpack.c.bf16 %v13553_v36, %v13553_v36 }
 0xf49   :  { %v13562_v10 = vpack.c.bf16 %v13554_v14, %v13554_v14 }
 0xf4b   :  { %14158 = vmatprep.mubr.bf16.mxu0 %v13562_v10 }
 0xf4c   :  { %14159 = vmatmul.mubr.bf16.vlgmr.msra.gmra.mrb[8].mxu0 %v13561_v39 }
 0xf4d   :  { %17067 = vmatpush3.bf16.msra.mxu0 %v18514_v34 }
 0xf4e   :  { %17068 = vmatprep.subr.bf16.mxu0 %v18515_v56 }
 0xf51   :  { %17069 = vmatpush3.bf16.msra.mxu0 %v18516_v0 }
 0xf52   :  { %17070 = vmatprep.subr.bf16.mxu0 %v18517_v63 }
 0xf55   :  { %17071 = vmatpush3.bf16.msra.mxu0 %v18518_v42 }
 0xf56   :  { %17072 = vmatprep.subr.bf16.mxu0 %v18519_v21 }
 0xf59   :  { %v13363_v28 = vpop.f32.mrb[52].mxu1  ;;  %17073 = vmatpush3.bf16.msra.mxu0 %v18520_v52 }
 0xf5a   :  { %v13365_v15 = vpop.f32.mrb[53].mxu1  ;;  %17074 = vmatprep.subr.bf16.mxu0 %v18521_v3 }
 0xf5b   :  { %v13367_v11 = vpop.f32.mrb[54].mxu1 }
 0xf5c   :  { %v13368_v43 = vpop.f32.mrb[55].mxu1 }
 0xf5d   :  { %17075 = vmatpush3.bf16.msra.mxu0 %v18522_v48 }
 0xf5e   :  { %17076 = vmatprep.subr.bf16.mxu0 %v18523_v17 }
 0xf5f   :  { %v13404_v41 = vpop.f32.mrb[0].mxu0 }
 0xf60   :  { %v13405_v20 = vadd.f32 %v13404_v41, %v13363_v28  ;;  %v13406_v2 = vpop.f32.mrb[1].mxu0 }
 0xf61   :  { %v13407_v33 = vadd.f32 %v13406_v2, %v13365_v15  ;;  %v13408_v13 = vpop.f32.mrb[2].mxu0  ;;  %17077 = vmatpush3.bf16.msra.mxu0 %v18524_v1 }
 0xf62   :  { %v13497_v37 = vadd.f32 %v13405_v20, %v23468_v23  ;;  %v13409_v9 = vpop.f32.mrb[3].mxu0  ;;  %17078 = vmatprep.subr.bf16.mxu0 %v18525_v51 }
 0xf63   :  { %v13498_v59 = vadd.f32 %v13407_v33, %v23470_v61  ;;  %v13529_v61 = vsub.s32 6, %v24179_v50 }
 0xf64   :  { %v13547_v44 = vadd.f32 %v13522_v38, %v13497_v37 }
 0xf65   :  { %v13548_v54 = vadd.f32 %v13526_v40, %v13498_v59  ;;  %17079 = vmatpush3.bf16.msra.mxu0 %v18526_v31  ;;  %v13530_v22 = vrot.slane %v24030_v32, %v13529_v61  ;;  %v16650_v32 = vld [vmem:[#allocation12] ss:$0 sm:$0xff] }
 0xf66   :  { %v13555_v7 = vmax.f32 %v13547_v44, 0.0  ;;  %17080 = vmatprep.subr.bf16.mxu0 %v18527_v25 }
 0xf67   :  { %v13556_v46 = vmax.f32 %v13548_v54, 0.0 }
 0xf68   :  { %v13563_v23 = vpack.c.bf16 %v13555_v7, %v13555_v7 }
 0xf69   :  { %v13564_v47 = vpack.c.bf16 %v13556_v46, %v13556_v46  ;;  %17081 = vmatpush3.bf16.msra.mxu0 %v18528_v60 }
 0xf6b   :  { %14198 = vmatprep.mubr.bf16.mxu1 %v13564_v47 }
 0xf6c   :  { %14199 = vmatmul.mubr.bf16.vlgmr.msra.gmra.mrb[72].mxu1 %v13563_v23 }
 0xf79   :  { %v13486_v5 = vpop.f32.mrb[56].mxu1 }
 0xf7a   :  { %v13488_v27 = vpop.f32.mrb[57].mxu1 }
 0xf7b   :  { %v13490_v8 = vpop.f32.mrb[58].mxu1 }
 0xf7c   :  { %v13491_v24 = vpop.f32.mrb[59].mxu1 }
 0xf9f   :  { %v13445_v12 = vpop.f32.mrb[4].mxu0 }
 0xfa0   :  { %v13487_v6 = vadd.f32 %v13486_v5, %v13445_v12  ;;  %v13447_v45 = vpop.f32.mrb[5].mxu0 }
 0xfa1   :  { %v13489_v18 = vadd.f32 %v13488_v27, %v13447_v45  ;;  %v13449_v58 = vpop.f32.mrb[6].mxu0 }
 0xfa2   :  { %v13499_v62 = vadd.f32 %v13487_v6, %v23589_v19  ;;  %v13450_v26 = vpop.f32.mrb[7].mxu0 }
 0xfa3   :  { %v13500_v29 = vadd.f32 %v13489_v18, %v23592_v57 }
 0xfa4   :  { %v13549_v4 = vadd.f32 %v13530_v22, %v13499_v62 }
 0xfa5   :  { %v13550_v35 = vadd.f32 %v13534_v55, %v13500_v29 }
 0xfa6   :  { %v13557_v49 = vmax.f32 %v13549_v4, 0.0 }
 0xfa7   :  { %v13558_v36 = vmax.f32 %v13550_v35, 0.0 }
 0xfa8   :  { %v13565_v10 = vpack.c.bf16 %v13557_v49, %v13557_v49 }
 0xfa9   :  { %v13566_v14 = vpack.c.bf16 %v13558_v36, %v13558_v36 }
 0xfab   :  { %14238 = vmatprep.mubr.bf16.mxu0 %v13566_v14 }
 0xfac   :  { %14239 = vmatmul.mubr.bf16.vlgmr.msra.gmra.mrb[12].mxu0 %v13565_v10 }
 0xfdf   :  { %v17016_v34 = vpop.f32.mrb[68].mxu1 }
 0xfe0   :  { %v17017_v39 = vpop.f32.mrb[69].mxu1 }
 0xfe1   :  { %v17018_v56 = vadd.f32 %v17017_v39, %v17016_v34  ;;  %v17019_v0 = vpop.f32.mrb[70].mxu1 }
 0xfe2   :  { %v17020_v63 = vpop.f32.mrb[71].mxu1 }
 0xfe3   :  { %v14121_v19 = vadd.f32 %v17018_v56, %v16650_v32 }
0x101f   :  { %v17038_v42 = vpop.f32.mrb[8].mxu0 }
0x1020   :  { %v17039_v21 = vpop.f32.mrb[9].mxu0 }
0x1021   :  { %v17040_v52 = vadd.f32 %v17039_v21, %v17038_v42  ;;  %v17041_v3 = vpop.f32.mrb[10].mxu0 }
0x1022   :  { %v17042_v57 = vpop.f32.mrb[11].mxu0 }
0x1023   :  { %v14161_v28 = vadd.f32 %v17040_v52, %v14121_v19 }
0x103f   :  { %v17060_v48 = vpop.f32.mrb[72].mxu1 }
0x1040   :  { %v17061_v15 = vpop.f32.mrb[73].mxu1 }
0x1041   :  { %v17062_v17 = vadd.f32 %v17061_v15, %v17060_v48  ;;  %v17063_v11 = vpop.f32.mrb[74].mxu1 }
0x1042   :  { %v17064_v43 = vpop.f32.mrb[75].mxu1 }
0x1043   :  { %v14201_v50 = vadd.f32 %v17062_v17, %v14161_v28 }
0x107f   :  { %v17082_v16 = vpop.f32.mrb[12].mxu0 }
0x1080   :  { %v17083_v53 = vpop.f32.mrb[13].mxu0 }
0x1081   :  { %v17084_v1 = vadd.f32 %v17083_v53, %v17082_v16  ;;  %v17085_v51 = vpop.f32.mrb[14].mxu0 }
0x1082   :  { %v17086_v41 = vpop.f32.mrb[15].mxu0 }
0x1083   :  { %v14241_v20 = vadd.f32 %v17084_v1, %v14201_v50 }
0x1085   :  { %14246 = vst [vmem:[%s24164_s15] sm:$0xff] %v14241_v20 }
0x1086   :  { %14251 = vsyncpa [#allocation3], 1 }
0x1087   :  { %14252 = vsyncpa [#allocation5], 1 }
0x1088   :  { %14253 = vsyncpa [#allocation8], 1 }
0x1089   :  { %14254 = vsyncpa [#allocation11], 1 }

</bundles_post_ra>
